<compile_context>
chip_gen: v5e
topology: v5e:2x2
jax: 0.10.0
libtpu: 0.0.40
codegen_flags: <defaults>
</compile_context>

<pallas_src>
import functools

import jax
import jax.numpy as jnp
from jax.experimental import pallas as pl
from jax.experimental.pallas import tpu as pltpu

LANE = 128                      # lane-dense output padding
COMPUTE_DTYPE = jnp.bfloat16    # operand dtype; accumulation is always f32


# ----------------------------------------------------------------------------
# Tiling helpers
# ----------------------------------------------------------------------------
def _choose_tm(m, target=512, minimum=128):
    """Row-tile size: full dim if small, else an exact multiple-of-8 divisor
    near `target` (>=128 to keep the MXU fed on v5e), else edge-masked cdiv."""
    if m <= target:
        return m                               # single block == full dim (legal)
    for tm in range(target, minimum - 1, -8):  # multiples of 8, descending
        if m % tm == 0:
            return tm
    return target                              # cdiv grid with edge masking


def _vmem_limit(byte_counts, floor=8 << 20, cap=48 << 20):
    """Derive a per-call VMEM budget from tile sizes (2x for double buffering,
    2x headroom), capped well under v7x's 64 MiB physical VMEM."""
    est = 2 * sum(int(b) for b in byte_counts)
    return int(min(max(2 * est, floor), cap))


# ----------------------------------------------------------------------------
# Pallas kernels
# ----------------------------------------------------------------------------
def _matmul_bias_act_kernel(x_ref, w_ref, b_ref, o_ref, *, apply_relu):
    acc = jnp.dot(x_ref[...], w_ref[...], preferred_element_type=jnp.float32)
    acc = acc + b_ref[...]                      # (1, N) f32, broadcasts over rows
    if apply_relu:
        acc = jnp.maximum(acc, 0.0)
    o_ref[...] = acc.astype(o_ref.dtype)


def _fc_fused_kernel(x_ref, w1_ref, b1_ref, w2_ref, b2_ref, o_ref):
    # fc1 (+ReLU) and fc2 fused: the hidden activation stays on-chip.
    h = jnp.dot(x_ref[...], w1_ref[...], preferred_element_type=jnp.float32)
    h = jnp.maximum(h + b1_ref[...], 0.0)
    h = h.astype(w2_ref.dtype)
    o = jnp.dot(h, w2_ref[...], preferred_element_type=jnp.float32)
    o_ref[...] = (o + b2_ref[...]).astype(o_ref.dtype)


# ----------------------------------------------------------------------------
# pallas_call wrappers
# ----------------------------------------------------------------------------
def linear_relu_pallas(x, w, b_row, *, relu, out_dtype):
    """y = relu?(x @ w + b).  x:(M,K) bf16, w:(K,N) bf16, b_row:(1,N) f32."""
    m, k = x.shape
    k2, n = w.shape
    assert k == k2 and b_row.shape == (1, n), (x.shape, w.shape, b_row.shape)
    tm = _choose_tm(m)
    limit = _vmem_limit([
        tm * k * x.dtype.itemsize,                     # x row tile
        tm * n * jnp.dtype(out_dtype).itemsize,        # out row tile
        k * n * w.dtype.itemsize,                      # resident weight
        n * 4,                                         # resident bias
    ])
    return pl.pallas_call(
        functools.partial(_matmul_bias_act_kernel, apply_relu=relu),
        out_shape=jax.ShapeDtypeStruct((m, n), out_dtype),
        grid=(pl.cdiv(m, tm),),
        in_specs=[
            pl.BlockSpec((tm, k), lambda i: (i, 0)),   # pipelined row tiles
            pl.BlockSpec((k, n), lambda i: (0, 0)),    # resident weight
            pl.BlockSpec((1, n), lambda i: (0, 0)),    # resident bias
        ],
        out_specs=pl.BlockSpec((tm, n), lambda i: (i, 0)),
        compiler_params=pltpu.CompilerParams(
            dimension_semantics=("parallel",),
            vmem_limit_bytes=limit),
    )(x, w, b_row)


def fc_fused_pallas(x, w1, b1_row, w2, b2_row):
    """out = (relu(x @ w1 + b1)) @ w2 + b2, one pallas_call, f32 output."""
    m, k = x.shape
    k1, h = w1.shape
    h2, n = w2.shape
    assert k == k1 and h == h2
    tm = _choose_tm(m)
    limit = _vmem_limit([
        tm * k * x.dtype.itemsize,
        tm * n * 4,
        k * h * w1.dtype.itemsize,
        h * n * w2.dtype.itemsize,
        (h + n) * 4,
    ])
    return pl.pallas_call(
        _fc_fused_kernel,
        out_shape=jax.ShapeDtypeStruct((m, n), jnp.float32),
        grid=(pl.cdiv(m, tm),),
        in_specs=[
            pl.BlockSpec((tm, k), lambda i: (i, 0)),
            pl.BlockSpec((k, h), lambda i: (0, 0)),
            pl.BlockSpec((1, h), lambda i: (0, 0)),
            pl.BlockSpec((h, n), lambda i: (0, 0)),
            pl.BlockSpec((1, n), lambda i: (0, 0)),
        ],
        out_specs=pl.BlockSpec((tm, n), lambda i: (i, 0)),
        compiler_params=pltpu.CompilerParams(
            dimension_semantics=("parallel",),
            vmem_limit_bytes=limit),
    )(x, w1, b1_row, w2, b2_row)


# ----------------------------------------------------------------------------
# Conv2d (VALID, stride s) via im2col + fused Pallas matmul
# ----------------------------------------------------------------------------
def _im2col(x_nhwc, kh, kw, stride):
    b, hgt, wid, c = x_nhwc.shape
    oh = (hgt - kh) // stride + 1
    ow = (wid - kw) // stride + 1
    cols = []
    for i in range(kh):
        for j in range(kw):
            cols.append(
                x_nhwc[:, i:i + stride * oh:stride, j:j + stride * ow:stride, :])
    patches = jnp.stack(cols, axis=3)               # (B, oh, ow, kh*kw, C)
    return patches.reshape(b * oh * ow, kh * kw * c), oh, ow


def conv2d_relu_pallas(x_nhwc, w_mat, b_row, kh, kw, stride):
    # TODO(synk): move patch extraction in-kernel (strided VMEM reads) once
    # Mosaic strided-slice lowering is validated; kept in XLA for robustness.
    b = x_nhwc.shape[0]
    patches, oh, ow = _im2col(x_nhwc, kh, kw, stride)
    y = linear_relu_pallas(patches, w_mat, b_row, relu=True,
                           out_dtype=x_nhwc.dtype)
    return y.reshape(b, oh, ow, w_mat.shape[1])


# ----------------------------------------------------------------------------
# Full CNNDQN forward (uses pre-laid-out params from prepare_params)
# ----------------------------------------------------------------------------
def cnn_dqn_forward(prep, x_nchw, *, num_actions):
    x = jnp.transpose(x_nchw, (0, 2, 3, 1)).astype(COMPUTE_DTYPE)   # NHWC bf16
    x = conv2d_relu_pallas(x, prep["w1"], prep["b1"], 8, 8, 4)      # (B,20,20,128)
    x = conv2d_relu_pallas(x, prep["w2"], prep["b2"], 4, 4, 2)      # (B, 9, 9,128)
    x = conv2d_relu_pallas(x, prep["w3"], prep["b3"], 3, 3, 1)      # (B, 7, 7,128)
    b = x.shape[0]
    # Drop the zero-padded channels; NHWC flatten order matches the
    # pre-permuted fc1 weight (no activation transpose needed).
    x = x[..., :64].reshape(b, -1)                                  # (B, 3136)
    out = fc_fused_pallas(x, prep["fc1_w"], prep["fc1_b"],
                          prep["fc2_w"], prep["fc2_b"])             # (B, 128) f32
    return out[:, :num_actions]


# ----------------------------------------------------------------------------
# One-time parameter layout prep: permute, zero-pad to lane-dense, cast bf16
# ----------------------------------------------------------------------------
def prepare_params(params, *, lane=LANE, dtype=COMPUTE_DTYPE):
    def conv_w(w_oihw, c_in_padded):
        o, i, kh, kw = w_oihw.shape
        w = jnp.transpose(w_oihw, (2, 3, 1, 0))                 # (kh, kw, I, O)
        if c_in_padded > i:                                     # zero rows for
            w = jnp.pad(w, ((0, 0), (0, 0), (0, c_in_padded - i), (0, 0)))
        w = w.reshape(kh * kw * c_in_padded, o)                 # patch-major rows
        w = jnp.pad(w, ((0, 0), (0, lane - o)))                 # lane-dense cols
        return w.astype(dtype)

    def conv_b(bias):
        return (jnp.pad(bias, (0, lane - bias.shape[0]))
                   .astype(jnp.float32).reshape(1, lane))

    # fc1 rows permuted from NCHW-flatten (PyTorch) to NHWC-flatten order.
    fc1 = params["fc1_w"].reshape(512, 64, 7, 7)
    fc1 = jnp.transpose(fc1, (2, 3, 1, 0)).reshape(7 * 7 * 64, 512)

    a = params["fc2_w"].shape[0]
    fc2 = jnp.pad(params["fc2_w"].T, ((0, 0), (0, lane - a)))

    return dict(
        w1=conv_w(params["w1"], 4),
        b1=conv_b(params["b1"]),
        w2=conv_w(params["w2"], lane),
        b2=conv_b(params["b2"]),
        w3=conv_w(params["w3"], lane),
        b3=conv_b(params["b3"]),
        fc1_w=fc1.astype(dtype),
        fc1_b=params["fc1_b"].astype(jnp.float32).reshape(1, 512),
        fc2_w=fc2.astype(dtype),
        fc2_b=(jnp.pad(params["fc2_b"], (0, lane - a))
                  .astype(jnp.float32).reshape(1, lane)),
    )


# ----------------------------------------------------------------------------
# Deterministic parameter init (PyTorch default-style uniform(-1/sqrt(fan_in)))
# ----------------------------------------------------------------------------
def init_params(key, num_actions):
    ks = jax.random.split(key, 10)

    def u(k, shape, fan_in):
        bound = 1.0 / (fan_in ** 0.5)
        return jax.random.uniform(k, shape, jnp.float32, -bound, bound)

    return dict(
        w1=u(ks[0], (32, 4, 8, 8), 4 * 8 * 8),
        b1=u(ks[1], (32,), 4 * 8 * 8),
        w2=u(ks[2], (64, 32, 4, 4), 32 * 4 * 4),
        b2=u(ks[3], (64,), 32 * 4 * 4),
        w3=u(ks[4], (64, 64, 3, 3), 64 * 3 * 3),
        b3=u(ks[5], (64,), 64 * 3 * 3),
        fc1_w=u(ks[6], (512, 64 * 7 * 7), 64 * 7 * 7),
        fc1_b=u(ks[7], (512,), 64 * 7 * 7),
        fc2_w=u(ks[8], (num_actions, 512), 512),
        fc2_b=u(ks[9], (num_actions,), 512),
    )


# ----------------------------------------------------------------------------
# Pure-JAX references (mirror the PyTorch module) for correctness checks
# ----------------------------------------------------------------------------
def reference_forward_f32(params, x_nchw):
    def conv(x, w, b, s):
        y = jax.lax.conv_general_dilated(
            x, w, (s, s), "VALID", dimension_numbers=("NCHW", "OIHW", "NCHW"))
        return jax.nn.relu(y + b[None, :, None, None])

    x = conv(x_nchw, params["w1"], params["b1"], 4)
    x = conv(x, params["w2"], params["b2"], 2)
    x = conv(x, params["w3"], params["b3"], 1)
    x = x.reshape(x.shape[0], -1)
    x = jax.nn.relu(x @ params["fc1_w"].T + params["fc1_b"])
    return x @ params["fc2_w"].T + params["fc2_b"]


def reference_forward_bf16(params, x_nchw):
    """Numerics-matched reference: bf16 operands, f32 accumulation, bf16
    inter-layer activations — same as the Pallas path, using stock XLA ops."""
    bf = jnp.bfloat16

    def conv(x, w, b, s):
        y = jax.lax.conv_general_dilated(
            x.astype(bf), w.astype(bf), (s, s), "VALID",
            dimension_numbers=("NCHW", "OIHW", "NCHW"),
            preferred_element_type=jnp.float32)
        return jax.nn.relu(y + b[None, :, None, None]).astype(bf)

    x = conv(x_nchw, params["w1"], params["b1"], 4)
    x = conv(x, params["w2"], params["b2"], 2)
    x = conv(x, params["w3"], params["b3"], 1)
    x = x.reshape(x.shape[0], -1)
    h = jnp.dot(x, params["fc1_w"].T.astype(bf),
                preferred_element_type=jnp.float32)
    h = jax.nn.relu(h + params["fc1_b"]).astype(bf)
    out = jnp.dot(h, params["fc2_w"].T.astype(bf),
                  preferred_element_type=jnp.float32)
    return out + params["fc2_b"]


if __name__ == "__main__":
    num_actions = 6
    key = jax.random.PRNGKey(0)
    k_param, k_x = jax.random.split(key)

    params = init_params(k_param, num_actions)
    prep = prepare_params(params)
    # CNNDQN's fc layer hard-codes 64*7*7, which implies 84x84 inputs.
    x = jax.random.uniform(k_x, (2, 4, 84, 84), jnp.float32)

    fwd = jax.jit(cnn_dqn_forward, static_argnames=("num_actions",))
    out = jax.block_until_ready(fwd(prep, x, num_actions=num_actions))
    assert out.shape == (2, num_actions), out.shape

    ref_bf16 = jax.block_until_ready(reference_forward_bf16(params, x))
    ref_f32 = jax.block_until_ready(reference_forward_f32(params, x))
    # Tight check against the numerics-matched (bf16 operand / f32 accum)
    # reference; looser check against the pure-f32 PyTorch-equivalent path
    # (difference there is bf16 input/weight quantization, not kernel bugs).
    assert jnp.allclose(out, ref_bf16, rtol=1e-2, atol=1e-2), \
        float(jnp.max(jnp.abs(out - ref_bf16)))
    assert jnp.allclose(out, ref_f32, rtol=5e-2, atol=5e-2), \
        float(jnp.max(jnp.abs(out - ref_f32)))

    print("KERNEL_OK")
</pallas_src>

<mosaic_0001>
module attributes {stable_mosaic.version = 11 : i64} {
  func.func @_matmul_bias_act_kernel(%arg0: i32, %arg1: memref<400x256xbf16, #tpu.memory_space<vmem>>, %arg2: memref<256x128xbf16, #tpu.memory_space<vmem>>, %arg3: memref<1x128xf32, #tpu.memory_space<vmem>>, %arg4: memref<400x128xbf16, #tpu.memory_space<vmem>>) attributes {dimension_semantics = [#tpu.dimension_semantics<parallel>], iteration_bounds = array<i64: 2>, scalar_prefetch = 0 : i64, scratch_operands = 0 : i64, tpu.core_type = #tpu.core_type<tc>, window_params = [{transform_indices = @transform_0, window_bounds = array<i64: 400, 256>}, {pipeline_mode = #tpu.pipeline_mode<synchronous>, transform_indices = @transform_1, window_bounds = array<i64: 256, 128>}, {pipeline_mode = #tpu.pipeline_mode<synchronous>, transform_indices = @transform_2, window_bounds = array<i64: 1, 128>}, {transform_indices = @transform_3, window_bounds = array<i64: 400, 128>}]} {
    %c0 = arith.constant 0 : index
    %c0_0 = arith.constant 0 : index
    %0 = vector.load %arg1[%c0, %c0_0] : memref<400x256xbf16, #tpu.memory_space<vmem>>, vector<400x256xbf16>
    %c0_1 = arith.constant 0 : index
    %c0_2 = arith.constant 0 : index
    %1 = vector.load %arg2[%c0_1, %c0_2] : memref<256x128xbf16, #tpu.memory_space<vmem>>, vector<256x128xbf16>
    %cst = arith.constant dense<0.000000e+00> : vector<400x128xf32>
    %2 = tpu.matmul %0, %1, %cst {dimension_numbers = #tpu.dot_dimension_numbers<[1], [0], [0], [1], [0, 0, 1, 1], [], []>} : vector<400x256xbf16>, vector<256x128xbf16>, vector<400x128xf32> -> vector<400x128xf32>
    %c0_3 = arith.constant 0 : index
    %c0_4 = arith.constant 0 : index
    %3 = vector.load %arg3[%c0_3, %c0_4] : memref<1x128xf32, #tpu.memory_space<vmem>>, vector<1x128xf32>
    %4 = vector.broadcast %3 : vector<1x128xf32> to vector<400x128xf32>
    %5 = arith.addf %2, %4 : vector<400x128xf32>
    %cst_5 = arith.constant 0.000000e+00 : f32
    %6 = vector.broadcast %cst_5 : f32 to vector<400x128xf32>
    %7 = arith.maximumf %5, %6 : vector<400x128xf32>
    %8 = arith.truncf %7 : vector<400x128xf32> to vector<400x128xbf16>
    %c0_6 = arith.constant 0 : index
    %c0_7 = arith.constant 0 : index
    %9 = vector.load %arg4[%c0_6, %c0_7] : memref<400x128xbf16, #tpu.memory_space<vmem>>, vector<400x128xbf16>
    tpu.vector_store %arg4[%c0_6, %c0_7], %8 {strides = array<i32>} : memref<400x128xbf16, #tpu.memory_space<vmem>>, vector<400x128xbf16>,
    return
  }
  func.func @transform_0(%arg0: i32) -> (i32, i32) {
    %c0_i32 = arith.constant 0 : i32
    %c0_i32_0 = arith.constant 0 : i32
    return %arg0, %c0_i32 : i32, i32
  }
  func.func @transform_1(%arg0: i32) -> (i32, i32) {
    %c0_i32 = arith.constant 0 : i32
    %c0_i32_0 = arith.constant 0 : i32
    %c0_i32_1 = arith.constant 0 : i32
    return %c0_i32, %c0_i32_0 : i32, i32
  }
  func.func @transform_2(%arg0: i32) -> (i32, i32) {
    %c0_i32 = arith.constant 0 : i32
    %c0_i32_0 = arith.constant 0 : i32
    %c0_i32_1 = arith.constant 0 : i32
    return %c0_i32, %c0_i32_0 : i32, i32
  }
  func.func @transform_3(%arg0: i32) -> (i32, i32) {
    %c0_i32 = arith.constant 0 : i32
    %c0_i32_0 = arith.constant 0 : i32
    return %arg0, %c0_i32 : i32, i32
  }
}

module attributes {stable_mosaic.version = 11 : i64} {
  func.func @_matmul_bias_act_kernel(%arg0: i32, %arg1: memref<162x2048xbf16, #tpu.memory_space<vmem>>, %arg2: memref<2048x128xbf16, #tpu.memory_space<vmem>>, %arg3: memref<1x128xf32, #tpu.memory_space<vmem>>, %arg4: memref<162x128xbf16, #tpu.memory_space<vmem>>) attributes {dimension_semantics = [#tpu.dimension_semantics<parallel>], iteration_bounds = array<i64: 1>, scalar_prefetch = 0 : i64, scratch_operands = 0 : i64, tpu.core_type = #tpu.core_type<tc>, window_params = [{transform_indices = @transform_0, window_bounds = array<i64: 162, 2048>}, {pipeline_mode = #tpu.pipeline_mode<synchronous>, transform_indices = @transform_1, window_bounds = array<i64: 2048, 128>}, {pipeline_mode = #tpu.pipeline_mode<synchronous>, transform_indices = @transform_2, window_bounds = array<i64: 1, 128>}, {transform_indices = @transform_3, window_bounds = array<i64: 162, 128>}]} {
    %c0 = arith.constant 0 : index
    %c0_0 = arith.constant 0 : index
    %0 = vector.load %arg1[%c0, %c0_0] : memref<162x2048xbf16, #tpu.memory_space<vmem>>, vector<162x2048xbf16>
    %c0_1 = arith.constant 0 : index
    %c0_2 = arith.constant 0 : index
    %1 = vector.load %arg2[%c0_1, %c0_2] : memref<2048x128xbf16, #tpu.memory_space<vmem>>, vector<2048x128xbf16>
    %cst = arith.constant dense<0.000000e+00> : vector<162x128xf32>
    %2 = tpu.matmul %0, %1, %cst {dimension_numbers = #tpu.dot_dimension_numbers<[1], [0], [0], [1], [0, 0, 1, 1], [], []>} : vector<162x2048xbf16>, vector<2048x128xbf16>, vector<162x128xf32> -> vector<162x128xf32>
    %c0_3 = arith.constant 0 : index
    %c0_4 = arith.constant 0 : index
    %3 = vector.load %arg3[%c0_3, %c0_4] : memref<1x128xf32, #tpu.memory_space<vmem>>, vector<1x128xf32>
    %4 = vector.broadcast %3 : vector<1x128xf32> to vector<162x128xf32>
    %5 = arith.addf %2, %4 : vector<162x128xf32>
    %cst_5 = arith.constant 0.000000e+00 : f32
    %6 = vector.broadcast %cst_5 : f32 to vector<162x128xf32>
    %7 = arith.maximumf %5, %6 : vector<162x128xf32>
    %8 = arith.truncf %7 : vector<162x128xf32> to vector<162x128xbf16>
    %c0_6 = arith.constant 0 : index
    %c0_7 = arith.constant 0 : index
    %9 = vector.load %arg4[%c0_6, %c0_7] : memref<162x128xbf16, #tpu.memory_space<vmem>>, vector<162x128xbf16>
    tpu.vector_store %arg4[%c0_6, %c0_7], %8 {strides = array<i32>} : memref<162x128xbf16, #tpu.memory_space<vmem>>, vector<162x128xbf16>,
    return
  }
  func.func @transform_0(%arg0: i32) -> (i32, i32) {
    %c0_i32 = arith.constant 0 : i32
    %c0_i32_0 = arith.constant 0 : i32
    return %arg0, %c0_i32 : i32, i32
  }
  func.func @transform_1(%arg0: i32) -> (i32, i32) {
    %c0_i32 = arith.constant 0 : i32
    %c0_i32_0 = arith.constant 0 : i32
    %c0_i32_1 = arith.constant 0 : i32
    return %c0_i32, %c0_i32_0 : i32, i32
  }
  func.func @transform_2(%arg0: i32) -> (i32, i32) {
    %c0_i32 = arith.constant 0 : i32
    %c0_i32_0 = arith.constant 0 : i32
    %c0_i32_1 = arith.constant 0 : i32
    return %c0_i32, %c0_i32_0 : i32, i32
  }
  func.func @transform_3(%arg0: i32) -> (i32, i32) {
    %c0_i32 = arith.constant 0 : i32
    %c0_i32_0 = arith.constant 0 : i32
    return %arg0, %c0_i32 : i32, i32
  }
}

module attributes {stable_mosaic.version = 11 : i64} {
  func.func @_matmul_bias_act_kernel(%arg0: i32, %arg1: memref<98x1152xbf16, #tpu.memory_space<vmem>>, %arg2: memref<1152x128xbf16, #tpu.memory_space<vmem>>, %arg3: memref<1x128xf32, #tpu.memory_space<vmem>>, %arg4: memref<98x128xbf16, #tpu.memory_space<vmem>>) attributes {dimension_semantics = [#tpu.dimension_semantics<parallel>], iteration_bounds = array<i64: 1>, scalar_prefetch = 0 : i64, scratch_operands = 0 : i64, tpu.core_type = #tpu.core_type<tc>, window_params = [{transform_indices = @transform_0, window_bounds = array<i64: 98, 1152>}, {pipeline_mode = #tpu.pipeline_mode<synchronous>, transform_indices = @transform_1, window_bounds = array<i64: 1152, 128>}, {pipeline_mode = #tpu.pipeline_mode<synchronous>, transform_indices = @transform_2, window_bounds = array<i64: 1, 128>}, {transform_indices = @transform_3, window_bounds = array<i64: 98, 128>}]} {
    %c0 = arith.constant 0 : index
    %c0_0 = arith.constant 0 : index
    %0 = vector.load %arg1[%c0, %c0_0] : memref<98x1152xbf16, #tpu.memory_space<vmem>>, vector<98x1152xbf16>
    %c0_1 = arith.constant 0 : index
    %c0_2 = arith.constant 0 : index
    %1 = vector.load %arg2[%c0_1, %c0_2] : memref<1152x128xbf16, #tpu.memory_space<vmem>>, vector<1152x128xbf16>
    %cst = arith.constant dense<0.000000e+00> : vector<98x128xf32>
    %2 = tpu.matmul %0, %1, %cst {dimension_numbers = #tpu.dot_dimension_numbers<[1], [0], [0], [1], [0, 0, 1, 1], [], []>} : vector<98x1152xbf16>, vector<1152x128xbf16>, vector<98x128xf32> -> vector<98x128xf32>
    %c0_3 = arith.constant 0 : index
    %c0_4 = arith.constant 0 : index
    %3 = vector.load %arg3[%c0_3, %c0_4] : memref<1x128xf32, #tpu.memory_space<vmem>>, vector<1x128xf32>
    %4 = vector.broadcast %3 : vector<1x128xf32> to vector<98x128xf32>
    %5 = arith.addf %2, %4 : vector<98x128xf32>
    %cst_5 = arith.constant 0.000000e+00 : f32
    %6 = vector.broadcast %cst_5 : f32 to vector<98x128xf32>
    %7 = arith.maximumf %5, %6 : vector<98x128xf32>
    %8 = arith.truncf %7 : vector<98x128xf32> to vector<98x128xbf16>
    %c0_6 = arith.constant 0 : index
    %c0_7 = arith.constant 0 : index
    %9 = vector.load %arg4[%c0_6, %c0_7] : memref<98x128xbf16, #tpu.memory_space<vmem>>, vector<98x128xbf16>
    tpu.vector_store %arg4[%c0_6, %c0_7], %8 {strides = array<i32>} : memref<98x128xbf16, #tpu.memory_space<vmem>>, vector<98x128xbf16>,
    return
  }
  func.func @transform_0(%arg0: i32) -> (i32, i32) {
    %c0_i32 = arith.constant 0 : i32
    %c0_i32_0 = arith.constant 0 : i32
    return %arg0, %c0_i32 : i32, i32
  }
  func.func @transform_1(%arg0: i32) -> (i32, i32) {
    %c0_i32 = arith.constant 0 : i32
    %c0_i32_0 = arith.constant 0 : i32
    %c0_i32_1 = arith.constant 0 : i32
    return %c0_i32, %c0_i32_0 : i32, i32
  }
  func.func @transform_2(%arg0: i32) -> (i32, i32) {
    %c0_i32 = arith.constant 0 : i32
    %c0_i32_0 = arith.constant 0 : i32
    %c0_i32_1 = arith.constant 0 : i32
    return %c0_i32, %c0_i32_0 : i32, i32
  }
  func.func @transform_3(%arg0: i32) -> (i32, i32) {
    %c0_i32 = arith.constant 0 : i32
    %c0_i32_0 = arith.constant 0 : i32
    return %arg0, %c0_i32 : i32, i32
  }
}

module attributes {stable_mosaic.version = 11 : i64} {
  func.func @_fc_fused_kernel(%arg0: i32, %arg1: memref<2x3136xbf16, #tpu.memory_space<vmem>>, %arg2: memref<3136x512xbf16, #tpu.memory_space<vmem>>, %arg3: memref<1x512xf32, #tpu.memory_space<vmem>>, %arg4: memref<512x128xbf16, #tpu.memory_space<vmem>>, %arg5: memref<1x128xf32, #tpu.memory_space<vmem>>, %arg6: memref<2x128xf32, #tpu.memory_space<vmem>>) attributes {dimension_semantics = [#tpu.dimension_semantics<parallel>], iteration_bounds = array<i64: 1>, scalar_prefetch = 0 : i64, scratch_operands = 0 : i64, tpu.core_type = #tpu.core_type<tc>, window_params = [{transform_indices = @transform_0, window_bounds = array<i64: 2, 3136>}, {pipeline_mode = #tpu.pipeline_mode<synchronous>, transform_indices = @transform_1, window_bounds = array<i64: 3136, 512>}, {pipeline_mode = #tpu.pipeline_mode<synchronous>, transform_indices = @transform_2, window_bounds = array<i64: 1, 512>}, {pipeline_mode = #tpu.pipeline_mode<synchronous>, transform_indices = @transform_3, window_bounds = array<i64: 512, 128>}, {pipeline_mode = #tpu.pipeline_mode<synchronous>, transform_indices = @transform_4, window_bounds = array<i64: 1, 128>}, {transform_indices = @transform_5, window_bounds = array<i64: 2, 128>}]} {
    %c0 = arith.constant 0 : index
    %c0_0 = arith.constant 0 : index
    %0 = vector.load %arg1[%c0, %c0_0] : memref<2x3136xbf16, #tpu.memory_space<vmem>>, vector<2x3136xbf16>
    %c0_1 = arith.constant 0 : index
    %c0_2 = arith.constant 0 : index
    %1 = vector.load %arg2[%c0_1, %c0_2] : memref<3136x512xbf16, #tpu.memory_space<vmem>>, vector<3136x512xbf16>
    %cst = arith.constant dense<0.000000e+00> : vector<2x512xf32>
    %2 = tpu.matmul %0, %1, %cst {dimension_numbers = #tpu.dot_dimension_numbers<[1], [0], [0], [1], [0, 0, 1, 1], [], []>} : vector<2x3136xbf16>, vector<3136x512xbf16>, vector<2x512xf32> -> vector<2x512xf32>
    %c0_3 = arith.constant 0 : index
    %c0_4 = arith.constant 0 : index
    %3 = vector.load %arg3[%c0_3, %c0_4] : memref<1x512xf32, #tpu.memory_space<vmem>>, vector<1x512xf32>
    %4 = vector.broadcast %3 : vector<1x512xf32> to vector<2x512xf32>
    %5 = arith.addf %2, %4 : vector<2x512xf32>
    %cst_5 = arith.constant 0.000000e+00 : f32
    %6 = vector.broadcast %cst_5 : f32 to vector<2x512xf32>
    %7 = arith.maximumf %5, %6 : vector<2x512xf32>
    %8 = arith.truncf %7 : vector<2x512xf32> to vector<2x512xbf16>
    %c0_6 = arith.constant 0 : index
    %c0_7 = arith.constant 0 : index
    %9 = vector.load %arg4[%c0_6, %c0_7] : memref<512x128xbf16, #tpu.memory_space<vmem>>, vector<512x128xbf16>
    %cst_8 = arith.constant dense<0.000000e+00> : vector<2x128xf32>
    %10 = tpu.matmul %8, %9, %cst_8 {dimension_numbers = #tpu.dot_dimension_numbers<[1], [0], [0], [1], [0, 0, 1, 1], [], []>} : vector<2x512xbf16>, vector<512x128xbf16>, vector<2x128xf32> -> vector<2x128xf32>
    %c0_9 = arith.constant 0 : index
    %c0_10 = arith.constant 0 : index
    %11 = vector.load %arg5[%c0_9, %c0_10] : memref<1x128xf32, #tpu.memory_space<vmem>>, vector<1x128xf32>
    %12 = vector.broadcast %11 : vector<1x128xf32> to vector<2x128xf32>
    %13 = arith.addf %10, %12 : vector<2x128xf32>
    %c0_11 = arith.constant 0 : index
    %c0_12 = arith.constant 0 : index
    %14 = vector.load %arg6[%c0_11, %c0_12] : memref<2x128xf32, #tpu.memory_space<vmem>>, vector<2x128xf32>
    tpu.vector_store %arg6[%c0_11, %c0_12], %13 {strides = array<i32>} : memref<2x128xf32, #tpu.memory_space<vmem>>, vector<2x128xf32>,
    return
  }
  func.func @transform_0(%arg0: i32) -> (i32, i32) {
    %c0_i32 = arith.constant 0 : i32
    %c0_i32_0 = arith.constant 0 : i32
    return %arg0, %c0_i32 : i32, i32
  }
  func.func @transform_1(%arg0: i32) -> (i32, i32) {
    %c0_i32 = arith.constant 0 : i32
    %c0_i32_0 = arith.constant 0 : i32
    %c0_i32_1 = arith.constant 0 : i32
    return %c0_i32, %c0_i32_0 : i32, i32
  }
  func.func @transform_2(%arg0: i32) -> (i32, i32) {
    %c0_i32 = arith.constant 0 : i32
    %c0_i32_0 = arith.constant 0 : i32
    %c0_i32_1 = arith.constant 0 : i32
    return %c0_i32, %c0_i32_0 : i32, i32
  }
  func.func @transform_3(%arg0: i32) -> (i32, i32) {
    %c0_i32 = arith.constant 0 : i32
    %c0_i32_0 = arith.constant 0 : i32
    %c0_i32_1 = arith.constant 0 : i32
    return %c0_i32, %c0_i32_0 : i32, i32
  }
  func.func @transform_4(%arg0: i32) -> (i32, i32) {
    %c0_i32 = arith.constant 0 : i32
    %c0_i32_0 = arith.constant 0 : i32
    %c0_i32_1 = arith.constant 0 : i32
    return %c0_i32, %c0_i32_0 : i32, i32
  }
  func.func @transform_5(%arg0: i32) -> (i32, i32) {
    %c0_i32 = arith.constant 0 : i32
    %c0_i32_0 = arith.constant 0 : i32
    return %arg0, %c0_i32 : i32, i32
  }
}

</mosaic_0001>

<bundles_post_ra>
// kernel: cnn_dqn_forward.4
= control target key start
LH: loop header
LB: loop body
LE: loop exit
PB: predicated region body
PF: predicated region fallthrough
CT: control target
= control target key end

     0   :  { %s1626_s12 = smov 0   ;;  %s1885_s0 = inlined_call_operand.vmem [shape: bf16[800,256], index: 0, kind: input, shape index: {}]   ;;  %s1886_s1 = inlined_call_operand.vmem [shape: bf16[256,128], index: 1, kind: input, shape index: {}]   ;;  %s1887_s2 = inlined_call_operand.vmem [shape: f32[1,128], index: 2, kind: input, shape index: {}]   ;;  %s1888_s3 = inlined_call_operand.vmem [shape: bf16[800,128], index: 3, kind: output, shape index: {}]  }
   0x1 LB: > { %s1083_s13 = sadd.s32 4294967295, %s1604_s12   ;;  %p1087_p0 = scmp.ge.s32.totalorder %s1604_s12, 1  ;;  %s1604_s12 = sphi %s1626_s12, %s13_s12  }
   0x2   : > { %p139_p1 = scmp.lt.s32.totalorder %s1604_s12, 3 }
   0x4   : > { %p140_p2 = pnand %p1087_p0, %p139_p1 }
   0x5   : > { %s164_s26 = smul.u32 (!%p140_p2), 50, %s1083_s13 }
   0x6   : > { %143 = sbr.rel (%p140_p2) target bundleno = 384 (0x180), region = 32 }
   0x7   : > { %p165_p3 = scmp.lt.s32.totalorder (!%p140_p2), %s164_s26, 99 }
   0xb   : > { %v1415_v0 = vld [vmem:[%s1886_s1 + $0x38] sm:$0xff]  ;;  %v1414_v2 = vld [vmem:[%s1886_s1 + $0x30] sm:$0xff]  ;;  %v1413_v4 = vld [vmem:[%s1886_s1 + $0x28] sm:$0xff]  ;;  %s1890_s26 = smov (!%p165_p3, %s164_s26), 99 }
   0xc   : > { %v1423_v1 = vld [vmem:[%s1886_s1 + $0x78] sm:$0xff]  ;;  %609 = vmatpush.bf16.msra.mxu0 %v1415_v0  ;;  %1573 = vmatpush.bf16.msra.mxu2 %v1415_v0  ;;  %v1422_v3 = vld [vmem:[%s1886_s1 + $0x70] sm:$0xff]  ;;  %v1421_v5 = vld [vmem:[%s1886_s1 + $0x68] sm:$0xff]  ;;  %s1357_s13 = sshll.u32 %s1890_s26, 3  ;;  %s1090_s28 = sshll.u32 %s1890_s26, 2 }
   0xd   : > { %743 = vmatpush.bf16.msra.mxu1 %v1423_v1  ;;  %1581 = vmatpush.bf16.msra.mxu3 %v1423_v1  ;;  %v1412_v6 = vld [vmem:[%s1886_s1 + $0x20] sm:$0xff]  ;;  %v1411_v8 = vld [vmem:[%s1886_s1 + $0x18] sm:$0xff]  ;;  %v1410_v10 = vld [vmem:[%s1886_s1 + $0x10] sm:$0xff]  ;;  %s1679_s18 = scalar_lea.vmem %s1885_s0, %s1357_s13  ;;  %s1783_s4 = scalar_lea.vmem %s1888_s3, %s1090_s28 }
   0xe   : > { %v1420_v7 = vld [vmem:[%s1886_s1 + $0x60] sm:$0xff]  ;;  %v1419_v9 = vld [vmem:[%s1886_s1 + $0x58] sm:$0xff]  ;;  %v1418_v11 = vld [vmem:[%s1886_s1 + $0x50] sm:$0xff] }
   0xf   : > { %v1409_v12 = vld [vmem:[%s1886_s1 + $0x8] sm:$0xff]  ;;  %v1408_v14 = vld [vmem:[%s1886_s1] sm:$0xff]  ;;  %v1384_v22 = vld [vmem:[%s1679_s18 + $0xd4] sm:$0xf] }
  0x10   : > { %610 = vmatpush.bf16.msra.mxu0 %v1414_v2  ;;  %1574 = vmatpush.bf16.msra.mxu2 %v1414_v2  ;;  %v1417_v13 = vld [vmem:[%s1886_s1 + $0x48] sm:$0xff]  ;;  %v1416_v15 = vld [vmem:[%s1886_s1 + $0x40] sm:$0xff]  ;;  %v1199_v23 = vld [vmem:[%s1679_s18 + $0xd8] sm:$0xf0] }
  0x11   : > { %744 = vmatpush.bf16.msra.mxu1 %v1422_v3  ;;  %1582 = vmatpush.bf16.msra.mxu3 %v1422_v3  ;;  %v1093_v16 = vld [vmem:[%s1679_s18] sm:$0xf]  ;;  %v1359_v17 = vld [vmem:[%s1679_s18 + $0x4] sm:$0xf0]  ;;  %v1358_v20 = vld [vmem:[%s1679_s18 + $0x4] sm:$0xf]  ;;  %v1202_v27 = vor.u32 %v1384_v22, %v1199_v23 }
  0x12   : > { %v1189_v18 = vld [vmem:[%s1679_s18 + $0xc0] sm:$0xf]  ;;  %v1383_v19 = vld [vmem:[%s1679_s18 + $0xc4] sm:$0xf0]  ;;  %v1095_v21 = vld [vmem:[%s1679_s18 + $0x8] sm:$0xf0]  ;;  %v1094_v24 = vor.u32 %v1359_v17, %v1093_v16 }
  0x13   : > { %v1190_v25 = vor.u32 %v1383_v19, %v1189_v18  ;;  %v1098_v26 = vor.u32 %v1358_v20, %v1095_v21  ;;  %v1101_v28 = vld [vmem:[%s1679_s18 + $0x10] sm:$0xf]  ;;  %v1361_v29 = vld [vmem:[%s1679_s18 + $0x14] sm:$0xf0]  ;;  %v1360_v32 = vld [vmem:[%s1679_s18 + $0x14] sm:$0xf] }
  0x14   : > { %611 = vmatpush.bf16.msra.mxu0 %v1413_v4  ;;  %1575 = vmatpush.bf16.msra.mxu2 %v1413_v4  ;;  %v1197_v30 = vld [vmem:[%s1679_s18 + $0xd0] sm:$0xf]  ;;  %v1385_v31 = vld [vmem:[%s1679_s18 + $0xd4] sm:$0xf0]  ;;  %v1103_v33 = vld [vmem:[%s1679_s18 + $0x18] sm:$0xf0]  ;;  %v1102_v36 = vor.u32 %v1361_v29, %v1101_v28 }
  0x15   : > { %745 = vmatpush.bf16.msra.mxu1 %v1421_v5  ;;  %1583 = vmatpush.bf16.msra.mxu3 %v1421_v5  ;;  %v1386_v34 = vld [vmem:[%s1679_s18 + $0xe4] sm:$0xf]  ;;  %v1207_v35 = vld [vmem:[%s1679_s18 + $0xe8] sm:$0xf0]  ;;  %v1198_v37 = vor.u32 %v1385_v31, %v1197_v30  ;;  %v1106_v38 = vor.u32 %v1360_v32, %v1103_v33  ;;  %v1109_v40 = vld [vmem:[%s1679_s18 + $0x20] sm:$0xf] }
  0x16   : > { %v1210_v39 = vor.u32 %v1386_v34, %v1207_v35  ;;  %v1363_v41 = vld [vmem:[%s1679_s18 + $0x24] sm:$0xf0]  ;;  %v1205_v42 = vld [vmem:[%s1679_s18 + $0xe0] sm:$0xf]  ;;  %v1362_v44 = vld [vmem:[%s1679_s18 + $0x24] sm:$0xf] }
  0x17   : > { %v1387_v43 = vld [vmem:[%s1679_s18 + $0xe4] sm:$0xf0]  ;;  %v1111_v45 = vld [vmem:[%s1679_s18 + $0x28] sm:$0xf0]  ;;  %v1388_v46 = vld [vmem:[%s1679_s18 + $0xf4] sm:$0xf]  ;;  %v1110_v48 = vor.u32 %v1363_v41, %v1109_v40 }
  0x18   : > { %612 = vmatpush.bf16.msra.mxu0 %v1412_v6  ;;  %1576 = vmatpush.bf16.msra.mxu2 %v1412_v6  ;;  %v1215_v47 = vld [vmem:[%s1679_s18 + $0xf8] sm:$0xf0]  ;;  %v1206_v49 = vor.u32 %v1387_v43, %v1205_v42  ;;  %v1114_v50 = vor.u32 %v1362_v44, %v1111_v45  ;;  %v1117_v52 = vld [vmem:[%s1679_s18 + $0x30] sm:$0xf]  ;;  %v1365_v53 = vld [vmem:[%s1679_s18 + $0x34] sm:$0xf0] }
  0x19   : > { %746 = vmatpush.bf16.msra.mxu1 %v1420_v7  ;;  %1584 = vmatpush.bf16.msra.mxu3 %v1420_v7  ;;  %v1218_v51 = vor.u32 %v1388_v46, %v1215_v47  ;;  %v1213_v54 = vld [vmem:[%s1679_s18 + $0xf0] sm:$0xf]  ;;  %v1389_v55 = vld [vmem:[%s1679_s18 + $0xf4] sm:$0xf0]  ;;  %v1364_v56 = vld [vmem:[%s1679_s18 + $0x34] sm:$0xf]  ;;  %v1118_v60 = vor.u32 %v1365_v53, %v1117_v52 }
  0x1a   : > { %v1119_v57 = vld [vmem:[%s1679_s18 + $0x38] sm:$0xf0]  ;;  %v1390_v58 = vld [vmem:[%s1679_s18 + $0x104] sm:$0xf]  ;;  %v1223_v59 = vld [vmem:[%s1679_s18 + $0x108] sm:$0xf0]  ;;  %v1214_v61 = vor.u32 %v1389_v55, %v1213_v54 }
  0x1b   : > { %v1122_v62 = vor.u32 %v1364_v56, %v1119_v57  ;;  %v1226_v63 = vor.u32 %v1390_v58, %v1223_v59  ;;  %v1125_v0 = vld [vmem:[%s1679_s18 + $0x40] sm:$0xf]  ;;  %v1367_v1 = vld [vmem:[%s1679_s18 + $0x44] sm:$0xf0]  ;;  %v1366_v4 = vld [vmem:[%s1679_s18 + $0x44] sm:$0xf] }
  0x1c   : > { %613 = vmatpush.bf16.msra.mxu0 %v1411_v8  ;;  %1577 = vmatpush.bf16.msra.mxu2 %v1411_v8  ;;  %v1221_v2 = vld [vmem:[%s1679_s18 + $0x100] sm:$0xf]  ;;  %v1391_v3 = vld [vmem:[%s1679_s18 + $0x104] sm:$0xf0]  ;;  %v1127_v5 = vld [vmem:[%s1679_s18 + $0x48] sm:$0xf0]  ;;  %v1126_v8 = vor.u32 %v1367_v1, %v1125_v0 }
  0x1d   : > { %747 = vmatpush.bf16.msra.mxu1 %v1419_v9  ;;  %1585 = vmatpush.bf16.msra.mxu3 %v1419_v9  ;;  %v1392_v6 = vld [vmem:[%s1679_s18 + $0x114] sm:$0xf]  ;;  %v1231_v7 = vld [vmem:[%s1679_s18 + $0x118] sm:$0xf0]  ;;  %v1222_v9 = vor.u32 %v1391_v3, %v1221_v2  ;;  %v1394_v18 = vld [vmem:[%s1679_s18 + $0x124] sm:$0xf] }
  0x1e   : > { %v1368_v16 = vld [vmem:[%s1679_s18 + $0x54] sm:$0xf]  ;;  %v1135_v17 = vld [vmem:[%s1679_s18 + $0x58] sm:$0xf0]  ;;  %v1239_v19 = vld [vmem:[%s1679_s18 + $0x128] sm:$0xf0] }
  0x1f   : > { %v1138_v22 = vor.u32 %v1368_v16, %v1135_v17  ;;  %v1242_v23 = vor.u32 %v1394_v18, %v1239_v19  ;;  %v1370_v28 = vld [vmem:[%s1679_s18 + $0x64] sm:$0xf]  ;;  %v1143_v29 = vld [vmem:[%s1679_s18 + $0x68] sm:$0xf0]  ;;  %v1396_v30 = vld [vmem:[%s1679_s18 + $0x134] sm:$0xf] }
  0x20   : > { %614 = vmatpush.bf16.msra.mxu0 %v1410_v10  ;;  %1578 = vmatpush.bf16.msra.mxu2 %v1410_v10  ;;  %v1130_v10 = vor.u32 %v1366_v4, %v1127_v5  ;;  %v1247_v31 = vld [vmem:[%s1679_s18 + $0x138] sm:$0xf0]  ;;  %v1146_v34 = vor.u32 %v1370_v28, %v1143_v29  ;;  %v1372_v40 = vld [vmem:[%s1679_s18 + $0x74] sm:$0xf]  ;;  %v1398_v42 = vld [vmem:[%s1679_s18 + $0x144] sm:$0xf] }
  0x21   : > { %748 = vmatpush.bf16.msra.mxu1 %v1418_v11  ;;  %1586 = vmatpush.bf16.msra.mxu3 %v1418_v11  ;;  %v1234_v11 = vor.u32 %v1392_v6, %v1231_v7  ;;  %v1250_v35 = vor.u32 %v1396_v30, %v1247_v31  ;;  %v1151_v41 = vld [vmem:[%s1679_s18 + $0x78] sm:$0xf0]  ;;  %v1255_v43 = vld [vmem:[%s1679_s18 + $0x148] sm:$0xf0]  ;;  %v1374_v52 = vld [vmem:[%s1679_s18 + $0x84] sm:$0xf] }
  0x22   : > { %v1154_v46 = vor.u32 %v1372_v40, %v1151_v41  ;;  %v1258_v47 = vor.u32 %v1398_v42, %v1255_v43  ;;  %v1159_v53 = vld [vmem:[%s1679_s18 + $0x88] sm:$0xf0]  ;;  %v1400_v54 = vld [vmem:[%s1679_s18 + $0x154] sm:$0xf]  ;;  %v1263_v55 = vld [vmem:[%s1679_s18 + $0x158] sm:$0xf0] }
  0x23   : > { %v1162_v59 = vor.u32 %v1374_v52, %v1159_v53  ;;  %v1165_v7 = vld [vmem:[%s1679_s18 + $0x90] sm:$0xf]  ;;  %v1271_v16 = vld [vmem:[%s1679_s18 + $0x168] sm:$0xf0]  ;;  %v1404_v43 = vld [vmem:[%s1679_s18 + $0x174] sm:$0xf] }
  0x24   : > { %615 = vmatpush.bf16.msra.mxu0 %v1409_v12  ;;  %1579 = vmatpush.bf16.msra.mxu2 %v1409_v12  ;;  %v1133_v12 = vld [vmem:[%s1679_s18 + $0x50] sm:$0xf]  ;;  %v1175_v40 = vld [vmem:[%s1679_s18 + $0xa8] sm:$0xf0] }
  0x25   : > { %749 = vmatpush.bf16.msra.mxu1 %v1417_v13  ;;  %1587 = vmatpush.bf16.msra.mxu3 %v1417_v13  ;;  %v1369_v13 = vld [vmem:[%s1679_s18 + $0x54] sm:$0xf0] }
  0x26   : > { %v1134_v20 = vor.u32 %v1369_v13, %v1133_v12  ;;  %v1167_v12 = vld [vmem:[%s1679_s18 + $0x98] sm:$0xf0] }
  0x28   : > { %616 = vmatpush.bf16.msra.mxu0 %v1408_v14  ;;  %1580 = vmatpush.bf16.msra.mxu2 %v1408_v14  ;;  %v1229_v14 = vld [vmem:[%s1679_s18 + $0x110] sm:$0xf] }
  0x29   : > { %750 = vmatpush.bf16.msra.mxu1 %v1416_v15  ;;  %1588 = vmatpush.bf16.msra.mxu3 %v1416_v15  ;;  %v1393_v15 = vld [vmem:[%s1679_s18 + $0x114] sm:$0xf0] }
  0x2a   : > { %v1230_v21 = vor.u32 %v1393_v15, %v1229_v14  ;;  %v1402_v15 = vld [vmem:[%s1679_s18 + $0x164] sm:$0xf] }
  0x2b   : > { %617 = vmatmul.bf16.vlgmr.msra.gmra.mxu0 %v1094_v24  ;;  %677 = vmatmul.bf16.vlgmr.msra.gmra.mxu2 %v1190_v25  ;;  %v1141_v24 = vld [vmem:[%s1679_s18 + $0x60] sm:$0xf]  ;;  %v1371_v25 = vld [vmem:[%s1679_s18 + $0x64] sm:$0xf0] }
  0x2c   : > { %751 = vmatmul.bf16.vlgmr.msra.gmra.mxu1 %v1098_v26  ;;  %816 = vmatmul.bf16.vlgmr.msra.gmra.mxu3 %v1202_v27  ;;  %v1237_v26 = vld [vmem:[%s1679_s18 + $0x120] sm:$0xf]  ;;  %v1395_v27 = vld [vmem:[%s1679_s18 + $0x124] sm:$0xf0]  ;;  %v1142_v32 = vor.u32 %v1371_v25, %v1141_v24  ;;  %v1274_v24 = vor.u32 %v1402_v15, %v1271_v16  ;;  %v1406_v15 = vld [vmem:[%s1679_s18 + $0x184] sm:$0xf] }
  0x2d   : > { %v1238_v33 = vor.u32 %v1395_v27, %v1237_v26  ;;  %v1287_v16 = vld [vmem:[%s1679_s18 + $0x188] sm:$0xf0] }
  0x3b   : > { %622 = vmatmul.bf16.gmra.mxu0 %v1102_v36  ;;  %682 = vmatmul.bf16.gmra.mxu2 %v1198_v37  ;;  %v1149_v36 = vld [vmem:[%s1679_s18 + $0x70] sm:$0xf]  ;;  %v1373_v37 = vld [vmem:[%s1679_s18 + $0x74] sm:$0xf0] }
  0x3c   : > { %756 = vmatmul.bf16.gmra.mxu1 %v1106_v38  ;;  %821 = vmatmul.bf16.gmra.mxu3 %v1210_v39  ;;  %v1245_v38 = vld [vmem:[%s1679_s18 + $0x130] sm:$0xf]  ;;  %v1397_v39 = vld [vmem:[%s1679_s18 + $0x134] sm:$0xf0]  ;;  %v1150_v44 = vor.u32 %v1373_v37, %v1149_v36  ;;  %v1379_v36 = vld [vmem:[%s1679_s18 + $0xa4] sm:$0xf0] }
  0x3d   : > { %v1246_v45 = vor.u32 %v1397_v39, %v1245_v38  ;;  %v1269_v37 = vld [vmem:[%s1679_s18 + $0x160] sm:$0xf]  ;;  %v1403_v38 = vld [vmem:[%s1679_s18 + $0x164] sm:$0xf0]  ;;  %v1378_v39 = vld [vmem:[%s1679_s18 + $0xa4] sm:$0xf] }
  0x3e   : > { %v1178_v53 = vor.u32 %v1378_v39, %v1175_v40 }
  0x4b   : > { %627 = vmatmul.bf16.gmra.mxu0 %v1110_v48  ;;  %687 = vmatmul.bf16.gmra.mxu2 %v1206_v49  ;;  %v1157_v48 = vld [vmem:[%s1679_s18 + $0x80] sm:$0xf]  ;;  %v1375_v49 = vld [vmem:[%s1679_s18 + $0x84] sm:$0xf0] }
  0x4c   : > { %761 = vmatmul.bf16.gmra.mxu1 %v1114_v50  ;;  %826 = vmatmul.bf16.gmra.mxu3 %v1218_v51  ;;  %v1253_v50 = vld [vmem:[%s1679_s18 + $0x140] sm:$0xf]  ;;  %v1399_v51 = vld [vmem:[%s1679_s18 + $0x144] sm:$0xf0]  ;;  %v1158_v56 = vor.u32 %v1375_v49, %v1157_v48 }
  0x4d   : > { %v1254_v57 = vor.u32 %v1399_v51, %v1253_v50  ;;  %v1270_v50 = vor.u32 %v1403_v38, %v1269_v37 }
  0x5b   : > { %632 = vmatmul.bf16.gmra.mxu0 %v1118_v60  ;;  %692 = vmatmul.bf16.gmra.mxu2 %v1214_v61  ;;  %v1266_v60 = vor.u32 %v1400_v54, %v1263_v55  ;;  %v1765_v61 = vld [vmem:[%s1887_s2] ss:$0 sm:$0xff] }
  0x5c   : > { %766 = vmatmul.bf16.gmra.mxu1 %v1122_v62  ;;  %831 = vmatmul.bf16.gmra.mxu3 %v1226_v63 }
  0x6b   : > { %637 = vmatmul.bf16.gmra.mxu0 %v1126_v8  ;;  %697 = vmatmul.bf16.gmra.mxu2 %v1222_v9  ;;  %v1377_v8 = vld [vmem:[%s1679_s18 + $0x94] sm:$0xf0]  ;;  %v1261_v9 = vld [vmem:[%s1679_s18 + $0x150] sm:$0xf] }
  0x6c   : > { %771 = vmatmul.bf16.gmra.mxu1 %v1130_v10  ;;  %836 = vmatmul.bf16.gmra.mxu3 %v1234_v11  ;;  %v1401_v10 = vld [vmem:[%s1679_s18 + $0x154] sm:$0xf0]  ;;  %v1376_v11 = vld [vmem:[%s1679_s18 + $0x94] sm:$0xf]  ;;  %v1166_v19 = vor.u32 %v1377_v8, %v1165_v7  ;;  %v1181_v7 = vld [vmem:[%s1679_s18 + $0xb0] sm:$0xf] }
  0x6d   : > { %v1381_v8 = vld [vmem:[%s1679_s18 + $0xb4] sm:$0xf0] }
  0x7b   : > { %642 = vmatmul.bf16.gmra.mxu0 %v1134_v20  ;;  %702 = vmatmul.bf16.gmra.mxu2 %v1230_v21  ;;  %v1262_v20 = vor.u32 %v1401_v10, %v1261_v9  ;;  %v1277_v9 = vld [vmem:[%s1679_s18 + $0x170] sm:$0xf]  ;;  %v1405_v10 = vld [vmem:[%s1679_s18 + $0x174] sm:$0xf0] }
  0x7c   : > { %776 = vmatmul.bf16.gmra.mxu1 %v1138_v22  ;;  %841 = vmatmul.bf16.gmra.mxu3 %v1242_v23  ;;  %v1170_v23 = vor.u32 %v1376_v11, %v1167_v12  ;;  %v1380_v11 = vld [vmem:[%s1679_s18 + $0xb4] sm:$0xf]  ;;  %v1183_v12 = vld [vmem:[%s1679_s18 + $0xb8] sm:$0xf0] }
  0x8b   : > { %647 = vmatmul.bf16.gmra.mxu0 %v1142_v32  ;;  %707 = vmatmul.bf16.gmra.mxu2 %v1238_v33 }
  0x8c   : > { %781 = vmatmul.bf16.gmra.mxu1 %v1146_v34  ;;  %846 = vmatmul.bf16.gmra.mxu3 %v1250_v35  ;;  %v1173_v35 = vld [vmem:[%s1679_s18 + $0xa0] sm:$0xf] }
  0x9b   : > { %652 = vmatmul.bf16.gmra.mxu0 %v1150_v44  ;;  %712 = vmatmul.bf16.gmra.mxu2 %v1246_v45  ;;  %v1279_v44 = vld [vmem:[%s1679_s18 + $0x178] sm:$0xf0] }
  0x9c   : > { %786 = vmatmul.bf16.gmra.mxu1 %v1154_v46  ;;  %851 = vmatmul.bf16.gmra.mxu3 %v1258_v47  ;;  %v1174_v46 = vor.u32 %v1379_v36, %v1173_v35  ;;  %v1282_v54 = vor.u32 %v1404_v43, %v1279_v44  ;;  %v1407_v43 = vld [vmem:[%s1679_s18 + $0x184] sm:$0xf0] }
  0xa8   : > { %v618_v58 = vpop.f32.mrf.mxu0 }
  0xa9   : > { %v752_v62 = vpop.f32.mrf.mxu1  ;;  %v619_v63 = vadd.f32 %v1765_v61, %v618_v58 }
  0xab   : > { %657 = vmatmul.bf16.gmra.mxu0 %v1158_v56  ;;  %717 = vmatmul.bf16.gmra.mxu2 %v1254_v57  ;;  %v753_v3 = vadd.f32 %v752_v62, %v619_v63 }
  0xac   : > { %791 = vmatmul.bf16.gmra.mxu1 %v1162_v59  ;;  %856 = vmatmul.bf16.gmra.mxu3 %v1266_v60 }
  0xad   : > { %v877_v13 = vmax.f32 %v753_v3, 0.0 }
  0xae   : > { %v1768_v0 = vpop.f32.mrf.mxu2 }
  0xaf   : > { %v817_v1 = vpop.f32.mrf.mxu3 }
  0xb0   : > { %v620_v2 = vpop.f32.mrf.mxu0 }
  0xb1   : > { %v621_v4 = vadd.f32 %v1765_v61, %v620_v2  ;;  %v754_v5 = vpop.f32.mrf.mxu1 }
  0xb3   : > { %v755_v6 = vadd.f32 %v754_v5, %v621_v4 }
  0xb5   : > { %v878_v14 = vmax.f32 %v755_v6, 0.0 }
  0xb6   : > { %v1785_v17 = vpop.f32.mrf.mxu2 }
  0xb7   : > { %v1427_v18 = vpack.c.bf16 %v878_v14, %v877_v13  ;;  %v819_v21 = vpop.f32.mrf.mxu3 }
  0xb8   : > { %v623_v22 = vpop.f32.mrf.mxu0 }
  0xb9   : > { %1428 = vst [vmem:[%s1783_s4] sm:$0xff] %v1427_v18   ;;  %v757_v25 = vpop.f32.mrf.mxu1  ;;  %v624_v26 = vadd.f32 %v1765_v61, %v623_v22 }
  0xbb   : > { %662 = vmatmul.bf16.gmra.mxu0 %v1166_v19  ;;  %722 = vmatmul.bf16.gmra.mxu2 %v1262_v20  ;;  %v758_v30 = vadd.f32 %v757_v25, %v624_v26  ;;  %v1182_v19 = vor.u32 %v1381_v8, %v1181_v7  ;;  %v1186_v26 = vor.u32 %v1380_v11, %v1183_v12 }
  0xbc   : > { %796 = vmatmul.bf16.gmra.mxu1 %v1170_v23  ;;  %861 = vmatmul.bf16.gmra.mxu3 %v1274_v24  ;;  %v1278_v23 = vor.u32 %v1405_v10, %v1277_v9 }
  0xbd   : > { %v879_v41 = vmax.f32 %v758_v30, 0.0 }
  0xbe   : > { %v683_v27 = vpop.f32.mrf.mxu2 }
  0xbf   : > { %v822_v28 = vpop.f32.mrf.mxu3  ;;  %v684_v33 = vadd.f32 %v1765_v61, %v683_v27  ;;  %v1290_v27 = vor.u32 %v1406_v15, %v1287_v16 }
  0xc0   : > { %v625_v29 = vpop.f32.mrf.mxu0 }
  0xc1   : > { %v626_v31 = vadd.f32 %v1765_v61, %v625_v29  ;;  %v759_v32 = vpop.f32.mrf.mxu1  ;;  %v818_v47 = vadd.f32 %v817_v1, %v684_v33 }
  0xc3   : > { %v760_v34 = vadd.f32 %v759_v32, %v626_v31  ;;  %v903_v57 = vmax.f32 %v818_v47, 0.0  ;;  %v1191_v47 = vld [vmem:[%s1679_s18 + $0xc8] sm:$0xf0] }
  0xc5   : > { %v880_v42 = vmax.f32 %v760_v34, 0.0 }
  0xc6   : > { %v685_v45 = vpop.f32.mrf.mxu2 }
  0xc7   : > { %v1432_v48 = vpack.c.bf16 %v880_v42, %v879_v41  ;;  %v686_v49 = vadd.f32 %v1765_v61, %v685_v45  ;;  %v824_v51 = vpop.f32.mrf.mxu3  ;;  %v1285_v42 = vld [vmem:[%s1679_s18 + $0x180] sm:$0xf] }
  0xc8   : > { %v628_v52 = vpop.f32.mrf.mxu0 }
  0xc9   : > { %1549 = vst [vmem:[%s1783_s4 + $0x8] sm:$0xff] %v1432_v48   ;;  %v820_v55 = vadd.f32 %v819_v21, %v686_v49  ;;  %v762_v56 = vpop.f32.mrf.mxu1  ;;  %v629_v60 = vadd.f32 %v1765_v61, %v628_v52  ;;  %v1286_v52 = vor.u32 %v1407_v43, %v1285_v42 }
  0xcb   : > { %v904_v58 = vmax.f32 %v820_v55, 0.0  ;;  %667 = vmatmul.bf16.gmra.mxu0 %v1174_v46  ;;  %727 = vmatmul.bf16.gmra.mxu2 %v1270_v50  ;;  %v763_v2 = vadd.f32 %v762_v56, %v629_v60  ;;  %v1382_v46 = vld [vmem:[%s1679_s18 + $0xc4] sm:$0xf] }
  0xcc   : > { %801 = vmatmul.bf16.gmra.mxu1 %v1178_v53  ;;  %866 = vmatmul.bf16.gmra.mxu3 %v1282_v54  ;;  %v1194_v55 = vor.u32 %v1382_v46, %v1191_v47 }
  0xcd   : > { %v1492_v59 = vpack.c.bf16 %v904_v58, %v903_v57  ;;  %v881_v13 = vmax.f32 %v763_v2, 0.0 }
  0xce   : > { %v688_v62 = vpop.f32.mrf.mxu2 }
  0xcf   : > { %1561 = vst [vmem:[%s1783_s4 + $0x68] sm:$0xff] %v1492_v59   ;;  %v827_v63 = vpop.f32.mrf.mxu3  ;;  %v689_v5 = vadd.f32 %v1765_v61, %v688_v62 }
  0xd0   : > { %v630_v1 = vpop.f32.mrf.mxu0 }
  0xd1   : > { %v631_v3 = vadd.f32 %v1765_v61, %v630_v1  ;;  %v764_v4 = vpop.f32.mrf.mxu1  ;;  %v823_v20 = vadd.f32 %v822_v28, %v689_v5 }
  0xd3   : > { %v765_v6 = vadd.f32 %v764_v4, %v631_v3  ;;  %v905_v31 = vmax.f32 %v823_v20, 0.0 }
  0xd5   : > { %v882_v14 = vmax.f32 %v765_v6, 0.0 }
  0xd6   : > { %v690_v18 = vpop.f32.mrf.mxu2 }
  0xd7   : > { %v1437_v21 = vpack.c.bf16 %v882_v14, %v881_v13  ;;  %v691_v22 = vadd.f32 %v1765_v61, %v690_v18  ;;  %v829_v24 = vpop.f32.mrf.mxu3 }
  0xd8   : > { %v633_v25 = vpop.f32.mrf.mxu0 }
  0xd9   : > { %1550 = vst [vmem:[%s1783_s4 + $0x10] sm:$0xff] %v1437_v21   ;;  %v825_v29 = vadd.f32 %v824_v51, %v691_v22  ;;  %v767_v30 = vpop.f32.mrf.mxu1  ;;  %v634_v33 = vadd.f32 %v1765_v61, %v633_v25 }
  0xdb   : > { %v906_v32 = vmax.f32 %v825_v29, 0.0  ;;  %672 = vmatmul.bf16.gmra.mxu0 %v1182_v19  ;;  %732 = vmatmul.bf16.gmra.mxu2 %v1278_v23  ;;  %v768_v37 = vadd.f32 %v767_v30, %v634_v33 }
  0xdc   : > { %806 = vmatmul.bf16.gmra.mxu1 %v1186_v26  ;;  %871 = vmatmul.bf16.gmra.mxu3 %v1290_v27 }
  0xdd   : > { %v1497_v28 = vpack.c.bf16 %v906_v32, %v905_v31  ;;  %v883_v44 = vmax.f32 %v768_v37, 0.0 }
  0xde   : > { %v693_v34 = vpop.f32.mrf.mxu2 }
  0xdf   : > { %1562 = vst [vmem:[%s1783_s4 + $0x70] sm:$0xff] %v1497_v28   ;;  %v832_v35 = vpop.f32.mrf.mxu3  ;;  %v694_v40 = vadd.f32 %v1765_v61, %v693_v34 }
  0xe0   : > { %v635_v36 = vpop.f32.mrf.mxu0 }
  0xe1   : > { %v636_v38 = vadd.f32 %v1765_v61, %v635_v36  ;;  %v769_v39 = vpop.f32.mrf.mxu1  ;;  %v828_v49 = vadd.f32 %v827_v63, %v694_v40 }
  0xe3   : > { %v770_v41 = vadd.f32 %v769_v39, %v636_v38  ;;  %v907_v58 = vmax.f32 %v828_v49, 0.0 }
  0xe5   : > { %v884_v45 = vmax.f32 %v770_v41, 0.0 }
  0xe6   : > { %v695_v48 = vpop.f32.mrf.mxu2 }
  0xe7   : > { %v1442_v50 = vpack.c.bf16 %v884_v45, %v883_v44  ;;  %v696_v51 = vadd.f32 %v1765_v61, %v695_v48  ;;  %v834_v53 = vpop.f32.mrf.mxu3 }
  0xe8   : > { %v638_v54 = vpop.f32.mrf.mxu0 }
  0xe9   : > { %1551 = vst [vmem:[%s1783_s4 + $0x18] sm:$0xff] %v1442_v50   ;;  %v830_v56 = vadd.f32 %v829_v24, %v696_v51  ;;  %v772_v57 = vpop.f32.mrf.mxu1  ;;  %v639_v62 = vadd.f32 %v1765_v61, %v638_v54 }
  0xeb   : > { %v908_v59 = vmax.f32 %v830_v56, 0.0  ;;  %737 = vmatmul.bf16.gmra.mxu2 %v1286_v52  ;;  %v773_v3 = vadd.f32 %v772_v57, %v639_v62 }
  0xec   : > { %811 = vmatmul.bf16.gmra.mxu1 %v1194_v55 }
  0xed   : > { %v1502_v60 = vpack.c.bf16 %v908_v59, %v907_v58  ;;  %v885_v8 = vmax.f32 %v773_v3, 0.0 }
  0xee   : > { %v698_v1 = vpop.f32.mrf.mxu2 }
  0xef   : > { %1563 = vst [vmem:[%s1783_s4 + $0x78] sm:$0xff] %v1502_v60   ;;  %v837_v63 = vpop.f32.mrf.mxu3  ;;  %v699_v6 = vadd.f32 %v1765_v61, %v698_v1 }
  0xf0   : > { %v640_v2 = vpop.f32.mrf.mxu0 }
  0xf1   : > { %v641_v4 = vadd.f32 %v1765_v61, %v640_v2  ;;  %v774_v5 = vpop.f32.mrf.mxu1  ;;  %v833_v11 = vadd.f32 %v832_v35, %v699_v6 }
  0xf3   : > { %v775_v7 = vadd.f32 %v774_v5, %v641_v4  ;;  %v909_v19 = vmax.f32 %v833_v11, 0.0 }
  0xf5   : > { %v886_v9 = vmax.f32 %v775_v7, 0.0 }
  0xf6   : > { %v700_v10 = vpop.f32.mrf.mxu2 }
  0xf7   : > { %v1447_v12 = vpack.c.bf16 %v886_v9, %v885_v8  ;;  %v701_v13 = vadd.f32 %v1765_v61, %v700_v10  ;;  %v839_v14 = vpop.f32.mrf.mxu3 }
  0xf8   : > { %v643_v15 = vpop.f32.mrf.mxu0 }
  0xf9   : > { %1552 = vst [vmem:[%s1783_s4 + $0x20] sm:$0xff] %v1447_v12   ;;  %v835_v16 = vadd.f32 %v834_v53, %v701_v13  ;;  %v777_v18 = vpop.f32.mrf.mxu1  ;;  %v644_v22 = vadd.f32 %v1765_v61, %v643_v15 }
  0xfb   : > { %v910_v20 = vmax.f32 %v835_v16, 0.0  ;;  %v778_v26 = vadd.f32 %v777_v18, %v644_v22 }
  0xfd   : > { %v1507_v21 = vpack.c.bf16 %v910_v20, %v909_v19  ;;  %v887_v32 = vmax.f32 %v778_v26, 0.0 }
  0xfe   : > { %v703_v23 = vpop.f32.mrf.mxu2 }
  0xff   : > { %1564 = vst [vmem:[%s1783_s4 + $0x80] sm:$0xff] %v1507_v21   ;;  %v842_v24 = vpop.f32.mrf.mxu3  ;;  %v704_v30 = vadd.f32 %v1765_v61, %v703_v23 }
 0x100   : > { %v645_v25 = vpop.f32.mrf.mxu0 }
 0x101   : > { %v646_v27 = vadd.f32 %v1765_v61, %v645_v25  ;;  %v779_v29 = vpop.f32.mrf.mxu1  ;;  %v838_v34 = vadd.f32 %v837_v63, %v704_v30 }
 0x103   : > { %v780_v31 = vadd.f32 %v779_v29, %v646_v27  ;;  %v911_v41 = vmax.f32 %v838_v34, 0.0 }
 0x105   : > { %v888_v28 = vmax.f32 %v780_v31, 0.0 }
 0x106   : > { %v705_v33 = vpop.f32.mrf.mxu2 }
 0x107   : > { %v1452_v35 = vpack.c.bf16 %v888_v28, %v887_v32  ;;  %v706_v36 = vadd.f32 %v1765_v61, %v705_v33  ;;  %v844_v37 = vpop.f32.mrf.mxu3 }
 0x108   : > { %v648_v38 = vpop.f32.mrf.mxu0 }
 0x109   : > { %1553 = vst [vmem:[%s1783_s4 + $0x28] sm:$0xff] %v1452_v35   ;;  %v840_v39 = vadd.f32 %v839_v14, %v706_v36  ;;  %v782_v40 = vpop.f32.mrf.mxu1  ;;  %v649_v44 = vadd.f32 %v1765_v61, %v648_v38 }
 0x10b   : > { %v912_v42 = vmax.f32 %v840_v39, 0.0  ;;  %v783_v48 = vadd.f32 %v782_v40, %v649_v44 }
 0x10d   : > { %v1512_v43 = vpack.c.bf16 %v912_v42, %v911_v41  ;;  %v889_v53 = vmax.f32 %v783_v48, 0.0 }
 0x10e   : > { %v708_v45 = vpop.f32.mrf.mxu2 }
 0x10f   : > { %1565 = vst [vmem:[%s1783_s4 + $0x88] sm:$0xff] %v1512_v43   ;;  %v847_v46 = vpop.f32.mrf.mxu3  ;;  %v709_v51 = vadd.f32 %v1765_v61, %v708_v45 }
 0x110   : > { %v650_v47 = vpop.f32.mrf.mxu0 }
 0x111   : > { %v651_v49 = vadd.f32 %v1765_v61, %v650_v47  ;;  %v784_v50 = vpop.f32.mrf.mxu1  ;;  %v843_v56 = vadd.f32 %v842_v24, %v709_v51 }
 0x113   : > { %v785_v52 = vadd.f32 %v784_v50, %v651_v49  ;;  %v913_v63 = vmax.f32 %v843_v56, 0.0 }
 0x115   : > { %v890_v54 = vmax.f32 %v785_v52, 0.0 }
 0x116   : > { %v710_v55 = vpop.f32.mrf.mxu2 }
 0x117   : > { %v1457_v57 = vpack.c.bf16 %v890_v54, %v889_v53  ;;  %v711_v58 = vadd.f32 %v1765_v61, %v710_v55  ;;  %v849_v59 = vpop.f32.mrf.mxu3 }
 0x118   : > { %v653_v60 = vpop.f32.mrf.mxu0 }
 0x119   : > { %1554 = vst [vmem:[%s1783_s4 + $0x30] sm:$0xff] %v1457_v57   ;;  %v845_v62 = vadd.f32 %v844_v37, %v711_v58  ;;  %v787_v1 = vpop.f32.mrf.mxu1  ;;  %v654_v4 = vadd.f32 %v1765_v61, %v653_v60 }
 0x11b   : > { %v914_v2 = vmax.f32 %v845_v62, 0.0  ;;  %v788_v8 = vadd.f32 %v787_v1, %v654_v4 }
 0x11d   : > { %v1517_v3 = vpack.c.bf16 %v914_v2, %v913_v63  ;;  %v891_v13 = vmax.f32 %v788_v8, 0.0 }
 0x11e   : > { %v713_v5 = vpop.f32.mrf.mxu2 }
 0x11f   : > { %1566 = vst [vmem:[%s1783_s4 + $0x90] sm:$0xff] %v1517_v3   ;;  %v852_v6 = vpop.f32.mrf.mxu3  ;;  %v714_v11 = vadd.f32 %v1765_v61, %v713_v5 }
 0x120   : > { %v655_v7 = vpop.f32.mrf.mxu0 }
 0x121   : > { %v656_v9 = vadd.f32 %v1765_v61, %v655_v7  ;;  %v789_v10 = vpop.f32.mrf.mxu1  ;;  %v848_v16 = vadd.f32 %v847_v46, %v714_v11 }
 0x123   : > { %v790_v12 = vadd.f32 %v789_v10, %v656_v9  ;;  %v915_v24 = vmax.f32 %v848_v16, 0.0 }
 0x125   : > { %v892_v14 = vmax.f32 %v790_v12, 0.0 }
 0x126   : > { %v715_v15 = vpop.f32.mrf.mxu2 }
 0x127   : > { %v1462_v18 = vpack.c.bf16 %v892_v14, %v891_v13  ;;  %v716_v19 = vadd.f32 %v1765_v61, %v715_v15  ;;  %v854_v21 = vpop.f32.mrf.mxu3 }
 0x128   : > { %v658_v20 = vpop.f32.mrf.mxu0 }
 0x129   : > { %1555 = vst [vmem:[%s1783_s4 + $0x38] sm:$0xff] %v1462_v18   ;;  %v850_v22 = vadd.f32 %v849_v59, %v716_v19  ;;  %v792_v23 = vpop.f32.mrf.mxu1  ;;  %v659_v27 = vadd.f32 %v1765_v61, %v658_v20 }
 0x12b   : > { %v916_v25 = vmax.f32 %v850_v22, 0.0  ;;  %v793_v31 = vadd.f32 %v792_v23, %v659_v27 }
 0x12d   : > { %v1522_v26 = vpack.c.bf16 %v916_v25, %v915_v24  ;;  %v893_v36 = vmax.f32 %v793_v31, 0.0 }
 0x12e   : > { %v718_v29 = vpop.f32.mrf.mxu2 }
 0x12f   : > { %1567 = vst [vmem:[%s1783_s4 + $0x98] sm:$0xff] %v1522_v26   ;;  %v857_v33 = vpop.f32.mrf.mxu3  ;;  %v719_v34 = vadd.f32 %v1765_v61, %v718_v29 }
 0x130   : > { %v660_v30 = vpop.f32.mrf.mxu0 }
 0x131   : > { %v661_v32 = vadd.f32 %v1765_v61, %v660_v30  ;;  %v794_v28 = vpop.f32.mrf.mxu1  ;;  %v853_v39 = vadd.f32 %v852_v6, %v719_v34 }
 0x133   : > { %v795_v35 = vadd.f32 %v794_v28, %v661_v32  ;;  %v917_v45 = vmax.f32 %v853_v39, 0.0 }
 0x135   : > { %v894_v37 = vmax.f32 %v795_v35, 0.0 }
 0x136   : > { %v720_v38 = vpop.f32.mrf.mxu2 }
 0x137   : > { %v1467_v40 = vpack.c.bf16 %v894_v37, %v893_v36  ;;  %v721_v41 = vadd.f32 %v1765_v61, %v720_v38  ;;  %v859_v47 = vpop.f32.mrf.mxu3 }
 0x138   : > { %v663_v42 = vpop.f32.mrf.mxu0 }
 0x139   : > { %1556 = vst [vmem:[%s1783_s4 + $0x40] sm:$0xff] %v1467_v40   ;;  %v855_v43 = vadd.f32 %v854_v21, %v721_v41  ;;  %v797_v44 = vpop.f32.mrf.mxu1  ;;  %v664_v49 = vadd.f32 %v1765_v61, %v663_v42 }
 0x13b   : > { %v918_v46 = vmax.f32 %v855_v43, 0.0  ;;  %v798_v52 = vadd.f32 %v797_v44, %v664_v49 }
 0x13d   : > { %v1527_v48 = vpack.c.bf16 %v918_v46, %v917_v45  ;;  %v895_v57 = vmax.f32 %v798_v52, 0.0 }
 0x13e   : > { %v723_v50 = vpop.f32.mrf.mxu2 }
 0x13f   : > { %1568 = vst [vmem:[%s1783_s4 + $0xa0] sm:$0xff] %v1527_v48   ;;  %v724_v55 = vadd.f32 %v1765_v61, %v723_v50  ;;  %v862_v60 = vpop.f32.mrf.mxu3 }
 0x140   : > { %v665_v51 = vpop.f32.mrf.mxu0 }
 0x141   : > { %v666_v53 = vadd.f32 %v1765_v61, %v665_v51  ;;  %v799_v54 = vpop.f32.mrf.mxu1  ;;  %v858_v62 = vadd.f32 %v857_v33, %v724_v55  ;;  %v679_v51 = vadd.f32 %v1765_v61, %v1768_v0 }
 0x143   : > { %v800_v56 = vadd.f32 %v799_v54, %v666_v53  ;;  %v919_v5 = vmax.f32 %v858_v62, 0.0  ;;  %v681_v54 = vadd.f32 %v1765_v61, %v1785_v17 }
 0x145   : > { %v896_v58 = vmax.f32 %v800_v56, 0.0 }
 0x146   : > { %v725_v59 = vpop.f32.mrf.mxu2 }
 0x147   : > { %v1472_v1 = vpack.c.bf16 %v896_v58, %v895_v57  ;;  %v726_v63 = vadd.f32 %v1765_v61, %v725_v59  ;;  %v864_v11 = vpop.f32.mrf.mxu3 }
 0x148   : > { %v668_v2 = vpop.f32.mrf.mxu0 }
 0x149   : > { %1557 = vst [vmem:[%s1783_s4 + $0x48] sm:$0xff] %v1472_v1   ;;  %v860_v3 = vadd.f32 %v859_v47, %v726_v63  ;;  %v802_v4 = vpop.f32.mrf.mxu1  ;;  %v669_v8 = vadd.f32 %v1765_v61, %v668_v2 }
 0x14b   : > { %v920_v6 = vmax.f32 %v860_v3, 0.0  ;;  %v803_v12 = vadd.f32 %v802_v4, %v669_v8 }
 0x14d   : > { %v1532_v7 = vpack.c.bf16 %v920_v6, %v919_v5  ;;  %v897_v18 = vmax.f32 %v803_v12, 0.0 }
 0x14e   : > { %v728_v9 = vpop.f32.mrf.mxu2 }
 0x14f   : > { %1569 = vst [vmem:[%s1783_s4 + $0xa8] sm:$0xff] %v1532_v7   ;;  %v729_v15 = vadd.f32 %v1765_v61, %v728_v9  ;;  %v867_v27 = vpop.f32.mrf.mxu3 }
 0x150   : > { %v670_v10 = vpop.f32.mrf.mxu0 }
 0x151   : > { %v671_v13 = vadd.f32 %v1765_v61, %v670_v10  ;;  %v804_v14 = vpop.f32.mrf.mxu1  ;;  %v863_v21 = vadd.f32 %v862_v60, %v729_v15 }
 0x153   : > { %v805_v16 = vadd.f32 %v804_v14, %v671_v13  ;;  %v921_v29 = vmax.f32 %v863_v21, 0.0 }
 0x155   : > { %v898_v19 = vmax.f32 %v805_v16, 0.0 }
 0x156   : > { %v730_v20 = vpop.f32.mrf.mxu2 }
 0x157   : > { %v1477_v22 = vpack.c.bf16 %v898_v19, %v897_v18  ;;  %v731_v23 = vadd.f32 %v1765_v61, %v730_v20  ;;  %v869_v39 = vpop.f32.mrf.mxu3 }
 0x158   : > { %v673_v24 = vpop.f32.mrf.mxu0 }
 0x159   : > { %1558 = vst [vmem:[%s1783_s4 + $0x50] sm:$0xff] %v1477_v22   ;;  %v865_v25 = vadd.f32 %v864_v11, %v731_v23  ;;  %v807_v26 = vpop.f32.mrf.mxu1  ;;  %v674_v32 = vadd.f32 %v1765_v61, %v673_v24 }
 0x15b   : > { %v922_v30 = vmax.f32 %v865_v25, 0.0  ;;  %v808_v34 = vadd.f32 %v807_v26, %v674_v32 }
 0x15d   : > { %v1537_v31 = vpack.c.bf16 %v922_v30, %v921_v29  ;;  %v899_v40 = vmax.f32 %v808_v34, 0.0 }
 0x15e   : > { %v733_v28 = vpop.f32.mrf.mxu2 }
 0x15f   : > { %1570 = vst [vmem:[%s1783_s4 + $0xb0] sm:$0xff] %v1537_v31   ;;  %v734_v37 = vadd.f32 %v1765_v61, %v733_v28  ;;  %v872_v52 = vpop.f32.mrf.mxu3 }
 0x160   : > { %v675_v33 = vpop.f32.mrf.mxu0 }
 0x161   : > { %v676_v35 = vadd.f32 %v1765_v61, %v675_v33  ;;  %v809_v36 = vpop.f32.mrf.mxu1  ;;  %v868_v43 = vadd.f32 %v867_v27, %v734_v37 }
 0x163   : > { %v810_v38 = vadd.f32 %v809_v36, %v676_v35  ;;  %v923_v48 = vmax.f32 %v868_v43, 0.0 }
 0x165   : > { %v900_v41 = vmax.f32 %v810_v38, 0.0 }
 0x166   : > { %v735_v42 = vpop.f32.mrf.mxu2 }
 0x167   : > { %v1482_v44 = vpack.c.bf16 %v900_v41, %v899_v40  ;;  %v736_v45 = vadd.f32 %v1765_v61, %v735_v42  ;;  %v874_v0 = vpop.f32.mrf.mxu3 }
 0x169   : > { %1559 = vst [vmem:[%s1783_s4 + $0x58] sm:$0xff] %v1482_v44   ;;  %v870_v46 = vadd.f32 %v869_v39, %v736_v45  ;;  %v812_v47 = vpop.f32.mrf.mxu1 }
 0x16a   : > { %v813_v55 = vadd.f32 %v812_v47, %v679_v51 }
 0x16b   : > { %v924_v49 = vmax.f32 %v870_v46, 0.0 }
 0x16c   : > { %v901_v59 = vmax.f32 %v813_v55, 0.0 }
 0x16d   : > { %v1542_v50 = vpack.c.bf16 %v924_v49, %v923_v48 }
 0x16e   : > { %v738_v53 = vpop.f32.mrf.mxu2 }
 0x16f   : > { %1571 = vst [vmem:[%s1783_s4 + $0xb8] sm:$0xff] %v1542_v50   ;;  %v739_v58 = vadd.f32 %v1765_v61, %v738_v53 }
 0x171   : > { %v814_v56 = vpop.f32.mrf.mxu1  ;;  %v873_v63 = vadd.f32 %v872_v52, %v739_v58 }
 0x172   : > { %v815_v57 = vadd.f32 %v814_v56, %v681_v54 }
 0x173   : > { %v925_v4 = vmax.f32 %v873_v63, 0.0 }
 0x174   : > { %v902_v60 = vmax.f32 %v815_v57, 0.0 }
 0x176   : > { %v1487_v62 = vpack.c.bf16 %v902_v60, %v901_v59  ;;  %v740_v1 = vpop.f32.mrf.mxu2 }
 0x177   : > { %v741_v2 = vadd.f32 %v1765_v61, %v740_v1 }
 0x178   : > { %1560 = vst [vmem:[%s1783_s4 + $0x60] sm:$0xff] %v1487_v62  }
 0x179   : > { %v875_v3 = vadd.f32 %v874_v0, %v741_v2 }
 0x17b   : > { %v926_v5 = vmax.f32 %v875_v3, 0.0 }
 0x17d   : > { %v1547_v6 = vpack.c.bf16 %v926_v5, %v925_v4 }
 0x17f   : > { %1572 = vst [vmem:[%s1783_s4 + $0xc0] sm:$0xff] %v1547_v6  }
 0x180 PF: > { %s13_s12 = sadd.s32 1, %s1604_s12  }
 0x181   : > { %p10_p4 = scmp.ge.s32.totalorder %s13_s12, 4  }
 0x183   :  { %12 = sbr.rel (!%p10_p4) target bundleno = 1 (0x1), region = 62 }

// kernel: cnn_dqn_forward.5
= control target key start
LH: loop header
LB: loop body
LE: loop exit
PB: predicated region body
PF: predicated region fallthrough
CT: control target
= control target key end

     0   :  { %s6277_s1 = inlined_call_operand.vmem [shape: bf16[2048,128], index: 1, kind: input, shape index: {}]   ;;  %s6278_s2 = inlined_call_operand.vmem [shape: f32[1,128], index: 2, kind: input, shape index: {}]   ;;  %s6279_s0 = inlined_call_operand.vmem [shape: bf16[162,2048], index: 0, kind: input, shape index: {}]   ;;  %s6280_s3 = inlined_call_operand.vmem [shape: bf16[162,128], index: 3, kind: output, shape index: {}]  }
   0x1   :  { %v4460_v0 = vld [vmem:[%s6277_s1 + $0x38] sm:$0xff]  ;;  %v4459_v4 = vld [vmem:[%s6277_s1 + $0x30] sm:$0xff]  ;;  %v4458_v8 = vld [vmem:[%s6277_s1 + $0x28] sm:$0xff] }
   0x2   :  { %v4468_v1 = vld [vmem:[%s6277_s1 + $0x78] sm:$0xff]  ;;  %2066 = vmatpush.bf16.msra.mxu0 %v4460_v0  ;;  %v4467_v5 = vld [vmem:[%s6277_s1 + $0x70] sm:$0xff]  ;;  %v4466_v9 = vld [vmem:[%s6277_s1 + $0x68] sm:$0xff] }
   0x3   :  { %v4476_v2 = vld [vmem:[%s6277_s1 + $0xb8] sm:$0xff]  ;;  %2129 = vmatpush.bf16.msra.mxu1 %v4468_v1  ;;  %v4475_v6 = vld [vmem:[%s6277_s1 + $0xb0] sm:$0xff]  ;;  %v4474_v10 = vld [vmem:[%s6277_s1 + $0xa8] sm:$0xff] }
   0x4   :  { %v4484_v3 = vld [vmem:[%s6277_s1 + $0xf8] sm:$0xff]  ;;  %2192 = vmatpush.bf16.msra.mxu2 %v4476_v2  ;;  %v4483_v7 = vld [vmem:[%s6277_s1 + $0xf0] sm:$0xff]  ;;  %v4482_v11 = vld [vmem:[%s6277_s1 + $0xe8] sm:$0xff] }
   0x5   :  { %2255 = vmatpush.bf16.msra.mxu3 %v4484_v3  ;;  %v4457_v12 = vld [vmem:[%s6277_s1 + $0x20] sm:$0xff]  ;;  %v4456_v16 = vld [vmem:[%s6277_s1 + $0x18] sm:$0xff]  ;;  %v4455_v20 = vld [vmem:[%s6277_s1 + $0x10] sm:$0xff] }
   0x6   :  { %2067 = vmatpush.bf16.msra.mxu0 %v4459_v4  ;;  %v4465_v13 = vld [vmem:[%s6277_s1 + $0x60] sm:$0xff]  ;;  %v4464_v17 = vld [vmem:[%s6277_s1 + $0x58] sm:$0xff]  ;;  %v4463_v21 = vld [vmem:[%s6277_s1 + $0x50] sm:$0xff] }
   0x7   :  { %2130 = vmatpush.bf16.msra.mxu1 %v4467_v5  ;;  %v4473_v14 = vld [vmem:[%s6277_s1 + $0xa0] sm:$0xff]  ;;  %v4472_v18 = vld [vmem:[%s6277_s1 + $0x98] sm:$0xff]  ;;  %v4471_v22 = vld [vmem:[%s6277_s1 + $0x90] sm:$0xff] }
   0x8   :  { %2193 = vmatpush.bf16.msra.mxu2 %v4475_v6  ;;  %v4481_v15 = vld [vmem:[%s6277_s1 + $0xe0] sm:$0xff]  ;;  %v4480_v19 = vld [vmem:[%s6277_s1 + $0xd8] sm:$0xff]  ;;  %v4479_v23 = vld [vmem:[%s6277_s1 + $0xd0] sm:$0xff] }
   0x9   :  { %2256 = vmatpush.bf16.msra.mxu3 %v4483_v7  ;;  %v4454_v24 = vld [vmem:[%s6277_s1 + $0x8] sm:$0xff]  ;;  %v4453_v28 = vld [vmem:[%s6277_s1] sm:$0xff]  ;;  %v4508_v40 = vld [vmem:[%s6277_s1 + $0x1b8] sm:$0xff] }
   0xa   :  { %2068 = vmatpush.bf16.msra.mxu0 %v4458_v8  ;;  %v4462_v25 = vld [vmem:[%s6277_s1 + $0x48] sm:$0xff]  ;;  %v4461_v29 = vld [vmem:[%s6277_s1 + $0x40] sm:$0xff]  ;;  %v4516_v41 = vld [vmem:[%s6277_s1 + $0x1f8] sm:$0xff] }
   0xb   :  { %2131 = vmatpush.bf16.msra.mxu1 %v4466_v9  ;;  %v4470_v26 = vld [vmem:[%s6277_s1 + $0x88] sm:$0xff]  ;;  %v4469_v30 = vld [vmem:[%s6277_s1 + $0x80] sm:$0xff]  ;;  %v4492_v46 = vld [vmem:[%s6277_s1 + $0x138] sm:$0xff] }
   0xc   :  { %2194 = vmatpush.bf16.msra.mxu2 %v4474_v10  ;;  %v4478_v27 = vld [vmem:[%s6277_s1 + $0xc8] sm:$0xff]  ;;  %v4477_v31 = vld [vmem:[%s6277_s1 + $0xc0] sm:$0xff]  ;;  %v4500_v47 = vld [vmem:[%s6277_s1 + $0x178] sm:$0xff] }
   0xd   :  { %2257 = vmatpush.bf16.msra.mxu3 %v4482_v11  ;;  %v3143_v32 = vld [vmem:[%s6279_s0] sm:$0xf]  ;;  %v4293_v34 = vld [vmem:[%s6279_s0 + $0x4] sm:$0xf]  ;;  %v3151_v36 = vld [vmem:[%s6279_s0 + $0x8] sm:$0xf] }
   0xe   :  { %2069 = vmatpush.bf16.msra.mxu0 %v4457_v12  ;;  %v4301_v33 = vld [vmem:[%s6279_s0 + $0x3c] sm:$0xf0]  ;;  %v3145_v35 = vld [vmem:[%s6279_s0 + $0x40] sm:$0xf0]  ;;  %v4302_v37 = vld [vmem:[%s6279_s0 + $0x44] sm:$0xf0] }
   0xf   :  { %2132 = vmatpush.bf16.msra.mxu1 %v4465_v13  ;;  %v4294_v38 = vld [vmem:[%s6279_s0 + $0xc] sm:$0xf]  ;;  %v3144_v42 = vor.u32 %v4301_v33, %v3143_v32  ;;  %v3148_v43 = vor.u32 %v4293_v34, %v3145_v35  ;;  %v3152_v44 = vor.u32 %v4302_v37, %v3151_v36  ;;  %v4507_v48 = vld [vmem:[%s6277_s1 + $0x1b0] sm:$0xff]  ;;  %v3207_v55 = vld [vmem:[%s6279_s0 + $0x80] sm:$0xf] }
  0x10   :  { %2195 = vmatpush.bf16.msra.mxu2 %v4473_v14  ;;  %v3153_v39 = vld [vmem:[%s6279_s0 + $0x48] sm:$0xf0]  ;;  %v4515_v49 = vld [vmem:[%s6277_s1 + $0x1f0] sm:$0xff]  ;;  %v4317_v56 = vld [vmem:[%s6279_s0 + $0xbc] sm:$0xf0] }
  0x11   :  { %2258 = vmatpush.bf16.msra.mxu3 %v4481_v15  ;;  %v3156_v45 = vor.u32 %v4294_v38, %v3153_v39  ;;  %v4491_v50 = vld [vmem:[%s6277_s1 + $0x130] sm:$0xff]  ;;  %v4506_v52 = vld [vmem:[%s6277_s1 + $0x1a8] sm:$0xff]  ;;  %v4309_v57 = vld [vmem:[%s6279_s0 + $0x84] sm:$0xf]  ;;  %v3208_v63 = vor.u32 %v4317_v56, %v3207_v55 }
  0x12   :  { %2070 = vmatpush.bf16.msra.mxu0 %v4456_v16  ;;  %v4499_v51 = vld [vmem:[%s6277_s1 + $0x170] sm:$0xff]  ;;  %v4514_v53 = vld [vmem:[%s6277_s1 + $0x1e8] sm:$0xff]  ;;  %v3209_v58 = vld [vmem:[%s6279_s0 + $0xc0] sm:$0xf0] }
  0x13   :  { %2133 = vmatpush.bf16.msra.mxu1 %v4464_v17  ;;  %v4490_v54 = vld [vmem:[%s6277_s1 + $0x128] sm:$0xff]  ;;  %v3212_v0 = vor.u32 %v4309_v57, %v3209_v58  ;;  %v3271_v4 = vld [vmem:[%s6279_s0 + $0x100] sm:$0xf]  ;;  %v4325_v6 = vld [vmem:[%s6279_s0 + $0x104] sm:$0xf] }
  0x14   :  { %2196 = vmatpush.bf16.msra.mxu2 %v4472_v18  ;;  %v3215_v59 = vld [vmem:[%s6279_s0 + $0x88] sm:$0xf]  ;;  %v4310_v61 = vld [vmem:[%s6279_s0 + $0x8c] sm:$0xf]  ;;  %v4333_v5 = vld [vmem:[%s6279_s0 + $0x13c] sm:$0xf0] }
  0x15   :  { %2259 = vmatpush.bf16.msra.mxu3 %v4480_v19  ;;  %v4318_v60 = vld [vmem:[%s6279_s0 + $0xc4] sm:$0xf0]  ;;  %v3217_v62 = vld [vmem:[%s6279_s0 + $0xc8] sm:$0xf0]  ;;  %v3273_v7 = vld [vmem:[%s6279_s0 + $0x140] sm:$0xf0]  ;;  %v3272_v12 = vor.u32 %v4333_v5, %v3271_v4 }
  0x16   :  { %2071 = vmatpush.bf16.msra.mxu0 %v4455_v20  ;;  %v3216_v1 = vor.u32 %v4318_v60, %v3215_v59  ;;  %v3220_v2 = vor.u32 %v4310_v61, %v3217_v62  ;;  %v4498_v3 = vld [vmem:[%s6277_s1 + $0x168] sm:$0xff]  ;;  %v3276_v13 = vor.u32 %v4325_v6, %v3273_v7  ;;  %v4505_v16 = vld [vmem:[%s6277_s1 + $0x1a0] sm:$0xff]  ;;  %v4504_v32 = vld [vmem:[%s6277_s1 + $0x198] sm:$0xff] }
  0x17   :  { %2134 = vmatpush.bf16.msra.mxu1 %v4463_v21  ;;  %v3279_v8 = vld [vmem:[%s6279_s0 + $0x108] sm:$0xf]  ;;  %v4326_v10 = vld [vmem:[%s6279_s0 + $0x10c] sm:$0xf]  ;;  %v4513_v17 = vld [vmem:[%s6277_s1 + $0x1e0] sm:$0xff] }
  0x18   :  { %2197 = vmatpush.bf16.msra.mxu2 %v4471_v22  ;;  %v4334_v9 = vld [vmem:[%s6279_s0 + $0x144] sm:$0xf0]  ;;  %v3281_v11 = vld [vmem:[%s6279_s0 + $0x148] sm:$0xf0]  ;;  %v4489_v18 = vld [vmem:[%s6277_s1 + $0x120] sm:$0xff] }
  0x19   :  { %2260 = vmatpush.bf16.msra.mxu3 %v4479_v23  ;;  %v3280_v14 = vor.u32 %v4334_v9, %v3279_v8  ;;  %v3284_v15 = vor.u32 %v4326_v10, %v3281_v11  ;;  %v4497_v19 = vld [vmem:[%s6277_s1 + $0x160] sm:$0xff]  ;;  %v4512_v33 = vld [vmem:[%s6277_s1 + $0x1d8] sm:$0xff]  ;;  %v4382_v55 = vld [vmem:[%s6279_s0 + $0x2c4] sm:$0xf0] }
  0x1a   :  { %2072 = vmatpush.bf16.msra.mxu0 %v4454_v24  ;;  %v3335_v20 = vld [vmem:[%s6279_s0 + $0x180] sm:$0xf]  ;;  %v4341_v22 = vld [vmem:[%s6279_s0 + $0x184] sm:$0xf]  ;;  %v3343_v24 = vld [vmem:[%s6279_s0 + $0x188] sm:$0xf] }
  0x1b   :  { %2135 = vmatpush.bf16.msra.mxu1 %v4462_v25  ;;  %v4349_v21 = vld [vmem:[%s6279_s0 + $0x1bc] sm:$0xf0]  ;;  %v3337_v23 = vld [vmem:[%s6279_s0 + $0x1c0] sm:$0xf0]  ;;  %v4350_v25 = vld [vmem:[%s6279_s0 + $0x1c4] sm:$0xf0] }
  0x1c   :  { %2198 = vmatpush.bf16.msra.mxu2 %v4470_v26  ;;  %v4342_v26 = vld [vmem:[%s6279_s0 + $0x18c] sm:$0xf]  ;;  %v4488_v34 = vld [vmem:[%s6277_s1 + $0x118] sm:$0xff]  ;;  %v3399_v36 = vld [vmem:[%s6279_s0 + $0x200] sm:$0xf] }
  0x1d   :  { %2261 = vmatpush.bf16.msra.mxu3 %v4478_v27  ;;  %v3345_v27 = vld [vmem:[%s6279_s0 + $0x1c8] sm:$0xf0]  ;;  %v4496_v35 = vld [vmem:[%s6277_s1 + $0x158] sm:$0xff]  ;;  %v4365_v37 = vld [vmem:[%s6279_s0 + $0x23c] sm:$0xf0] }
  0x1e   :  { %2073 = vmatpush.bf16.msra.mxu0 %v4453_v28  ;;  %v3336_v28 = vor.u32 %v4349_v21, %v3335_v20  ;;  %v4357_v38 = vld [vmem:[%s6279_s0 + $0x204] sm:$0xf]  ;;  %v4374_v56 = vld [vmem:[%s6279_s0 + $0x28c] sm:$0xf]  ;;  %v4487_v62 = vld [vmem:[%s6277_s1 + $0x110] sm:$0xff] }
  0x1f   :  { %2136 = vmatpush.bf16.msra.mxu1 %v4461_v29  ;;  %v3340_v29 = vor.u32 %v4341_v22, %v3337_v23  ;;  %v3401_v39 = vld [vmem:[%s6279_s0 + $0x240] sm:$0xf0]  ;;  %v3473_v57 = vld [vmem:[%s6279_s0 + $0x2c8] sm:$0xf0]  ;;  %v3535_v4 = vld [vmem:[%s6279_s0 + $0x308] sm:$0xf] }
  0x20   :  { %2199 = vmatpush.bf16.msra.mxu2 %v4469_v30  ;;  %v3344_v30 = vor.u32 %v4350_v25, %v3343_v24  ;;  %v3476_v61 = vor.u32 %v4374_v56, %v3473_v57  ;;  %v4398_v5 = vld [vmem:[%s6279_s0 + $0x344] sm:$0xf0]  ;;  %v4390_v6 = vld [vmem:[%s6279_s0 + $0x30c] sm:$0xf]  ;;  %v3719_v57 = vld [vmem:[%s6279_s0 + $0x480] sm:$0xf] }
  0x21   :  { %2262 = vmatpush.bf16.msra.mxu3 %v4477_v31  ;;  %2074 = vmatmul.bf16.vlgmr.msra.gmra.mxu0 %v3144_v42  ;;  %v3348_v31 = vor.u32 %v4342_v26, %v3345_v27  ;;  %v4358_v42 = vld [vmem:[%s6279_s0 + $0x20c] sm:$0xf]  ;;  %v3536_v10 = vor.u32 %v4398_v5, %v3535_v4  ;;  %v3599_v20 = vld [vmem:[%s6279_s0 + $0x388] sm:$0xf] }
  0x22   :  { %2137 = vmatmul.bf16.vlgmr.msra.gmra.mxu1 %v3148_v43  ;;  %2318 = vmatpush.bf16.msrb.mxu0 %v4492_v46  ;;  %v3409_v43 = vld [vmem:[%s6279_s0 + $0x248] sm:$0xf0]  ;;  %v4414_v21 = vld [vmem:[%s6279_s0 + $0x3c4] sm:$0xf0] }
  0x23   :  { %2200 = vmatmul.bf16.vlgmr.msra.gmra.mxu2 %v3152_v44  ;;  %2381 = vmatpush.bf16.msrb.mxu1 %v4500_v47  ;;  %v3400_v44 = vor.u32 %v4365_v37, %v3399_v36  ;;  %v3412_v47 = vor.u32 %v4358_v42, %v3409_v43  ;;  %v3537_v7 = vld [vmem:[%s6279_s0 + $0x348] sm:$0xf0]  ;;  %v3600_v26 = vor.u32 %v4414_v21, %v3599_v20  ;;  %v174_v21 = vld [vmem:[%s6279_s0 + $0x500] sm:$0x11] }
  0x24   :  { %2444 = vmatpush.bf16.msrb.mxu2 %v4508_v40  ;;  %2263 = vmatmul.bf16.vlgmr.msra.gmra.mxu3 %v3156_v45  ;;  %v3407_v40 = vld [vmem:[%s6279_s0 + $0x208] sm:$0xf]  ;;  %v3404_v45 = vor.u32 %v4357_v38, %v3401_v39  ;;  %v3540_v11 = vor.u32 %v4390_v6, %v3537_v7  ;;  %v4406_v22 = vld [vmem:[%s6279_s0 + $0x38c] sm:$0xf] }
  0x25   :  { %2507 = vmatpush.bf16.msrb.mxu3 %v4516_v41  ;;  %v4366_v41 = vld [vmem:[%s6279_s0 + $0x244] sm:$0xf0]  ;;  %v3601_v23 = vld [vmem:[%s6279_s0 + $0x3c8] sm:$0xf0] }
  0x26   :  { %2319 = vmatpush.bf16.msrb.mxu0 %v4491_v50  ;;  %v3408_v46 = vor.u32 %v4366_v41, %v3407_v40  ;;  %v3463_v50 = vld [vmem:[%s6279_s0 + $0x280] sm:$0xf]  ;;  %v3604_v27 = vor.u32 %v4406_v22, %v3601_v23  ;;  %v4422_v36 = vld [vmem:[%s6279_s0 + $0x40c] sm:$0xf] }
  0x27   :  { %2382 = vmatpush.bf16.msrb.mxu1 %v4499_v51  ;;  %v4381_v51 = vld [vmem:[%s6279_s0 + $0x2bc] sm:$0xf0]  ;;  %v3665_v37 = vld [vmem:[%s6279_s0 + $0x448] sm:$0xf0] }
  0x28   :  { %2445 = vmatpush.bf16.msrb.mxu2 %v4507_v48  ;;  %v4503_v48 = vld [vmem:[%s6277_s1 + $0x190] sm:$0xff]  ;;  %v3464_v58 = vor.u32 %v4381_v51, %v3463_v50  ;;  %v3668_v43 = vor.u32 %v4422_v36, %v3665_v37  ;;  %v175_v23 = vld [vmem:[%s6279_s0 + $0x508] sm:$0x11] }
  0x29   :  { %2508 = vmatpush.bf16.msrb.mxu3 %v4515_v49  ;;  %v4511_v49 = vld [vmem:[%s6277_s1 + $0x1d0] sm:$0xff] }
  0x2a   :  { %2320 = vmatpush.bf16.msrb.mxu0 %v4490_v54  ;;  %v3471_v54 = vld [vmem:[%s6279_s0 + $0x288] sm:$0xf] }
  0x2b   :  { %2383 = vmatpush.bf16.msrb.mxu1 %v4498_v3  ;;  %v3472_v60 = vor.u32 %v4382_v55, %v3471_v54  ;;  %v3529_v3 = vld [vmem:[%s6279_s0 + $0x340] sm:$0xf0] }
  0x2c   :  { %2446 = vmatpush.bf16.msrb.mxu2 %v4506_v52  ;;  %v4373_v52 = vld [vmem:[%s6279_s0 + $0x284] sm:$0xf] }
  0x2d   :  { %2509 = vmatpush.bf16.msrb.mxu3 %v4514_v53  ;;  %v3465_v53 = vld [vmem:[%s6279_s0 + $0x2c0] sm:$0xf0] }
  0x2e   :  { %2321 = vmatpush.bf16.msrb.mxu0 %v4489_v18  ;;  %v3468_v59 = vor.u32 %v4373_v52, %v3465_v53  ;;  %v4405_v18 = vld [vmem:[%s6279_s0 + $0x384] sm:$0xf] }
  0x2f   :  { %2384 = vmatpush.bf16.msrb.mxu1 %v4497_v19  ;;  %v3593_v19 = vld [vmem:[%s6279_s0 + $0x3c0] sm:$0xf0] }
  0x30   :  { %2447 = vmatpush.bf16.msrb.mxu2 %v4505_v16  ;;  %v4486_v16 = vld [vmem:[%s6277_s1 + $0x108] sm:$0xff]  ;;  %v3596_v25 = vor.u32 %v4405_v18, %v3593_v19 }
  0x31   :  { %2079 = vmatmul.bf16.gmra.mxu0 %v3208_v63  ;;  %2510 = vmatpush.bf16.msrb.mxu3 %v4513_v17  ;;  %v4495_v63 = vld [vmem:[%s6277_s1 + $0x150] sm:$0xff]  ;;  %v4494_v17 = vld [vmem:[%s6277_s1 + $0x148] sm:$0xff] }
  0x32   :  { %2142 = vmatmul.bf16.gmra.mxu1 %v3212_v0  ;;  %2322 = vmatpush.bf16.msrb.mxu0 %v4488_v34  ;;  %v3527_v0 = vld [vmem:[%s6279_s0 + $0x300] sm:$0xf]  ;;  %v3663_v34 = vld [vmem:[%s6279_s0 + $0x408] sm:$0xf] }
  0x33   :  { %2205 = vmatmul.bf16.gmra.mxu2 %v3216_v1  ;;  %2385 = vmatpush.bf16.msrb.mxu1 %v4496_v35  ;;  %v4397_v1 = vld [vmem:[%s6279_s0 + $0x33c] sm:$0xf0]  ;;  %v4430_v35 = vld [vmem:[%s6279_s0 + $0x444] sm:$0xf0] }
  0x34   :  { %2268 = vmatmul.bf16.gmra.mxu3 %v3220_v2  ;;  %2448 = vmatpush.bf16.msrb.mxu2 %v4504_v32  ;;  %v4389_v2 = vld [vmem:[%s6279_s0 + $0x304] sm:$0xf]  ;;  %v3528_v8 = vor.u32 %v4397_v1, %v3527_v0  ;;  %v3664_v42 = vor.u32 %v4430_v35, %v3663_v34  ;;  %v3729_v0 = vld [vmem:[%s6279_s0 + $0x4c8] sm:$0xf0] }
  0x35   :  { %2511 = vmatpush.bf16.msrb.mxu3 %v4512_v33  ;;  %v3532_v9 = vor.u32 %v4389_v2, %v3529_v3  ;;  %v4421_v32 = vld [vmem:[%s6279_s0 + $0x404] sm:$0xf] }
  0x36   :  { %2323 = vmatpush.bf16.msrb.mxu0 %v4487_v62  ;;  %v3657_v33 = vld [vmem:[%s6279_s0 + $0x440] sm:$0xf0]  ;;  %v4446_v62 = vld [vmem:[%s6279_s0 + $0x4c4] sm:$0xf0] }
  0x37   :  { %2386 = vmatpush.bf16.msrb.mxu1 %v4495_v63  ;;  %v3660_v39 = vor.u32 %v4421_v32, %v3657_v33  ;;  %v4438_v63 = vld [vmem:[%s6279_s0 + $0x48c] sm:$0xf] }
  0x38   :  { %2449 = vmatpush.bf16.msrb.mxu2 %v4503_v48  ;;  %v4493_v48 = vld [vmem:[%s6277_s1 + $0x140] sm:$0xff] }
  0x39   :  { %2512 = vmatpush.bf16.msrb.mxu3 %v4511_v49 }
  0x3a   :  { %2324 = vmatpush.bf16.msrb.mxu0 %v4486_v16 }
  0x3b   :  { %2387 = vmatpush.bf16.msrb.mxu1 %v4494_v17 }
  0x3f   :  { %2388 = vmatpush.bf16.msrb.mxu1 %v4493_v48 }
  0x41   :  { %2084 = vmatmul.bf16.gmra.mxu0 %v3272_v12  ;;  %v3591_v12 = vld [vmem:[%s6279_s0 + $0x380] sm:$0xf] }
  0x42   :  { %2147 = vmatmul.bf16.gmra.mxu1 %v3276_v13  ;;  %v4413_v13 = vld [vmem:[%s6279_s0 + $0x3bc] sm:$0xf0] }
  0x43   :  { %2210 = vmatmul.bf16.gmra.mxu2 %v3280_v14  ;;  %v4502_v14 = vld [vmem:[%s6277_s1 + $0x188] sm:$0xff]  ;;  %v3592_v24 = vor.u32 %v4413_v13, %v3591_v12  ;;  %v4540_v13 = vld [vmem:[%s6277_s1 + $0x2b8] sm:$0xff] }
  0x44   :  { %2273 = vmatmul.bf16.gmra.mxu3 %v3284_v15  ;;  %v4510_v15 = vld [vmem:[%s6277_s1 + $0x1c8] sm:$0xff]  ;;  %2450 = vmatpush.bf16.msrb.mxu2 %v4502_v14  ;;  %v4548_v14 = vld [vmem:[%s6277_s1 + $0x2f8] sm:$0xff] }
  0x45   :  { %2513 = vmatpush.bf16.msrb.mxu3 %v4510_v15  ;;  %v4524_v15 = vld [vmem:[%s6277_s1 + $0x238] sm:$0xff] }
  0x51   :  { %2089 = vmatmul.bf16.gmra.mxu0 %v3336_v28  ;;  %v5036_v28 = vld [vmem:[%s6278_s2] ss:$0 sm:$0xff] }
  0x52   :  { %2152 = vmatmul.bf16.gmra.mxu1 %v3340_v29  ;;  %v3655_v29 = vld [vmem:[%s6279_s0 + $0x400] sm:$0xf] }
  0x53   :  { %2215 = vmatmul.bf16.gmra.mxu2 %v3344_v30  ;;  %v4429_v30 = vld [vmem:[%s6279_s0 + $0x43c] sm:$0xf0] }
  0x54   :  { %2278 = vmatmul.bf16.gmra.mxu3 %v3348_v31  ;;  %v4501_v31 = vld [vmem:[%s6277_s1 + $0x180] sm:$0xff]  ;;  %v3656_v38 = vor.u32 %v4429_v30, %v3655_v29  ;;  %v931_v29 = vunpack.c.h.b16 %v174_v21  ;;  %v932_v30 = vunpack.c.l.b16 %v175_v23 }
  0x55   :  { %2451 = vmatpush.bf16.msrb.mxu2 %v4501_v31  ;;  %v933_v31 = vunpack.c.h.b16 %v175_v23  ;;  %v4319_v23 = vld [vmem:[%s6279_s0 + $0xcc] sm:$0xf0] }
  0x56   :  { %v1107_v35 = vpack.c.b16 %v931_v29, %v931_v29  ;;  %v4320_v29 = vld [vmem:[%s6279_s0 + $0xd4] sm:$0xf0] }
  0x59   :  { %2696 = vmatpush.bf16.msra.mxu2 %v4540_v13 }
  0x61   :  { %2094 = vmatmul.bf16.gmra.mxu0 %v3400_v44 }
  0x62   :  { %2157 = vmatmul.bf16.gmra.mxu1 %v3404_v45  ;;  %v4509_v45 = vld [vmem:[%s6277_s1 + $0x1c0] sm:$0xff] }
  0x63   :  { %2220 = vmatmul.bf16.gmra.mxu2 %v3408_v46  ;;  %v4485_v46 = vld [vmem:[%s6277_s1 + $0x100] sm:$0xff]  ;;  %2514 = vmatpush.bf16.msrb.mxu3 %v4509_v45 }
  0x64   :  { %2283 = vmatmul.bf16.gmra.mxu3 %v3412_v47  ;;  %2325 = vmatpush.bf16.msrb.mxu0 %v4485_v46 }
  0x67   :  { %2759 = vmatpush.bf16.msra.mxu3 %v4548_v14 }
  0x68   :  { %2570 = vmatpush.bf16.msra.mxu0 %v4524_v15 }
  0x71   :  { %2099 = vmatmul.bf16.gmra.mxu0 %v3464_v58  ;;  %v4445_v58 = vld [vmem:[%s6279_s0 + $0x4bc] sm:$0xf0] }
  0x72   :  { %2162 = vmatmul.bf16.gmra.mxu1 %v3468_v59  ;;  %v4437_v59 = vld [vmem:[%s6279_s0 + $0x484] sm:$0xf]  ;;  %v3720_v3 = vor.u32 %v4445_v58, %v3719_v57  ;;  %v4547_v57 = vld [vmem:[%s6277_s1 + $0x2f0] sm:$0xff] }
  0x73   :  { %2225 = vmatmul.bf16.gmra.mxu2 %v3472_v60  ;;  %v3721_v60 = vld [vmem:[%s6279_s0 + $0x4c0] sm:$0xf0]  ;;  %v4523_v58 = vld [vmem:[%s6277_s1 + $0x230] sm:$0xff]  ;;  %2760 = vmatpush.bf16.msra.mxu3 %v4547_v57 }
  0x74   :  { %2288 = vmatmul.bf16.gmra.mxu3 %v3476_v61  ;;  %v3727_v61 = vld [vmem:[%s6279_s0 + $0x488] sm:$0xf]  ;;  %v3724_v4 = vor.u32 %v4437_v59, %v3721_v60  ;;  %v3161_v59 = vld [vmem:[%s6279_s0 + $0x50] sm:$0xf0]  ;;  %v3167_v60 = vld [vmem:[%s6279_s0 + $0x18] sm:$0xf]  ;;  %2571 = vmatpush.bf16.msra.mxu0 %v4523_v58 }
  0x81   :  { %2104 = vmatmul.bf16.gmra.mxu0 %v3528_v8  ;;  %v3728_v8 = vor.u32 %v4446_v62, %v3727_v61  ;;  %v4531_v61 = vld [vmem:[%s6277_s1 + $0x270] sm:$0xff]  ;;  %v4304_v62 = vld [vmem:[%s6279_s0 + $0x54] sm:$0xf0] }
  0x82   :  { %2167 = vmatmul.bf16.gmra.mxu1 %v3532_v9  ;;  %v3732_v9 = vor.u32 %v4438_v63, %v3729_v0  ;;  %v4296_v63 = vld [vmem:[%s6279_s0 + $0x1c] sm:$0xf] }
  0x83   :  { %2230 = vmatmul.bf16.gmra.mxu2 %v3536_v10  ;;  %v3169_v0 = vld [vmem:[%s6279_s0 + $0x58] sm:$0xf0] }
  0x84   :  { %2293 = vmatmul.bf16.gmra.mxu3 %v3540_v11 }
  0x91   :  { %2109 = vmatmul.bf16.gmra.mxu0 %v3592_v24 }
  0x92   :  { %2172 = vmatmul.bf16.gmra.mxu1 %v3596_v25  ;;  %v4532_v25 = vld [vmem:[%s6277_s1 + $0x278] sm:$0xff] }
  0x93   :  { %2235 = vmatmul.bf16.gmra.mxu2 %v3600_v26  ;;  %2633 = vmatpush.bf16.msra.mxu1 %v4532_v25  ;;  %v4311_v25 = vld [vmem:[%s6279_s0 + $0x94] sm:$0xf] }
  0x94   :  { %2298 = vmatmul.bf16.gmra.mxu3 %v3604_v27  ;;  %v930_v27 = vunpack.c.l.b16 %v174_v21 }
  0x96   :  { %v1106_v34 = vpack.c.b16 %v930_v27, %v930_v27  ;;  %v3231_v27 = vld [vmem:[%s6279_s0 + $0x98] sm:$0xf] }
  0x97   :  { %2634 = vmatpush.bf16.msra.mxu1 %v4531_v61  ;;  %v4327_v61 = vld [vmem:[%s6279_s0 + $0x114] sm:$0xf] }
  0x9e   :  { %v2075_v40 = vpop.f32.mrf.mxu0 }
  0x9f   :  { %v2138_v41 = vpop.f32.mrf.mxu1  ;;  %v2076_v44 = vadd.f32 %v5036_v28, %v2075_v40  ;;  %v1109_v40 = vpack.c.b16 %v933_v31, %v933_v31  ;;  %v3233_v31 = vld [vmem:[%s6279_s0 + $0xd8] sm:$0xf0] }
  0xa1   :  { %v2139_v47 = vadd.f32 %v2138_v41, %v2076_v44  ;;  %2114 = vmatmul.bf16.gmra.mxu0 %v3656_v38 }
  0xa2   :  { %2177 = vmatmul.bf16.gmra.mxu1 %v3660_v39  ;;  %v1108_v39 = vpack.c.b16 %v932_v30, %v932_v30  ;;  %v4312_v30 = vld [vmem:[%s6279_s0 + $0x9c] sm:$0xf] }
  0xa3   :  { %2240 = vmatmul.bf16.gmra.mxu2 %v3664_v42 }
  0xa4   :  { %2303 = vmatmul.bf16.gmra.mxu3 %v3668_v43 }
  0xa6   :  { %v2201_v49 = vpop.f32.mrf.mxu2  ;;  %v2077_v52 = vpop.f32.mrf.mxu0 }
  0xa7   :  { %v2264_v50 = vpop.f32.mrf.mxu3  ;;  %v2202_v51 = vadd.f32 %v2201_v49, %v2139_v47  ;;  %v2140_v53 = vpop.f32.mrf.mxu1  ;;  %v2078_v54 = vadd.f32 %v5036_v28, %v2077_v52  ;;  %v4303_v52 = vld [vmem:[%s6279_s0 + $0x4c] sm:$0xf0] }
  0xa9   :  { %v5076_v55 = vadd.f32 %v2264_v50, %v2202_v51  ;;  %v2141_v56 = vadd.f32 %v2140_v53, %v2078_v54  ;;  %v3159_v51 = vld [vmem:[%s6279_s0 + $0x10] sm:$0xf]  ;;  %v4295_v53 = vld [vmem:[%s6279_s0 + $0x14] sm:$0xf] }
  0xae   :  { %v2203_v1 = vpop.f32.mrf.mxu2  ;;  %v2080_v6 = vpop.f32.mrf.mxu0 }
  0xaf   :  { %v2266_v2 = vpop.f32.mrf.mxu3  ;;  %v2204_v5 = vadd.f32 %v2203_v1, %v2141_v56  ;;  %v2143_v7 = vpop.f32.mrf.mxu1  ;;  %v2081_v10 = vadd.f32 %v5036_v28, %v2080_v6  ;;  %v4539_v56 = vld [vmem:[%s6277_s1 + $0x2b0] sm:$0xff] }
  0xb0   :  { %2697 = vmatpush.bf16.msra.mxu2 %v4539_v56 }
  0xb1   :  { %v5103_v11 = vadd.f32 %v2266_v2, %v2204_v5  ;;  %v2144_v12 = vadd.f32 %v2143_v7, %v2081_v10  ;;  %2119 = vmatmul.bf16.gmra.mxu0 %v3720_v3  ;;  %v3160_v3 = vor.u32 %v4303_v52, %v3159_v51 }
  0xb2   :  { %2182 = vmatmul.bf16.gmra.mxu1 %v3724_v4  ;;  %v3164_v4 = vor.u32 %v4295_v53, %v3161_v59  ;;  %v3287_v59 = vld [vmem:[%s6279_s0 + $0x110] sm:$0xf] }
  0xb3   :  { %2245 = vmatmul.bf16.gmra.mxu2 %v3728_v8  ;;  %v3168_v8 = vor.u32 %v4304_v62, %v3167_v60  ;;  %v4335_v60 = vld [vmem:[%s6279_s0 + $0x14c] sm:$0xf0]  ;;  %v3289_v62 = vld [vmem:[%s6279_s0 + $0x150] sm:$0xf0] }
  0xb4   :  { %2308 = vmatmul.bf16.gmra.mxu3 %v3732_v9  ;;  %v3172_v9 = vor.u32 %v4296_v63, %v3169_v0  ;;  %v3295_v63 = vld [vmem:[%s6279_s0 + $0x118] sm:$0xf] }
  0xb5   :  { %v4336_v0 = vld [vmem:[%s6279_s0 + $0x154] sm:$0xf0] }
  0xb6   :  { %v2206_v16 = vpop.f32.mrf.mxu2  ;;  %v2082_v19 = vpop.f32.mrf.mxu0 }
  0xb7   :  { %v2269_v17 = vpop.f32.mrf.mxu3  ;;  %v2207_v18 = vadd.f32 %v2206_v16, %v2144_v12  ;;  %v2145_v20 = vpop.f32.mrf.mxu1  ;;  %v2083_v22 = vadd.f32 %v5036_v28, %v2082_v19 }
  0xb9   :  { %v5121_v24 = vadd.f32 %v2269_v17, %v2207_v18  ;;  %v2146_v26 = vadd.f32 %v2145_v20, %v2083_v22  ;;  %v3223_v22 = vld [vmem:[%s6279_s0 + $0x90] sm:$0xf] }
  0xbe   :  { %v2208_v32 = vpop.f32.mrf.mxu2  ;;  %v2085_v37 = vpop.f32.mrf.mxu0 }
  0xbf   :  { %v2271_v33 = vpop.f32.mrf.mxu3  ;;  %v2209_v36 = vadd.f32 %v2208_v32, %v2146_v26  ;;  %v2148_v38 = vpop.f32.mrf.mxu1  ;;  %v2086_v41 = vadd.f32 %v5036_v28, %v2085_v37  ;;  %v3225_v26 = vld [vmem:[%s6279_s0 + $0xd0] sm:$0xf0] }
  0xc1   :  { %v5127_v42 = vadd.f32 %v2271_v33, %v2209_v36  ;;  %v2149_v43 = vadd.f32 %v2148_v38, %v2086_v41  ;;  %2124 = vmatmul.bf16.gmra.mxu0 %v1106_v34  ;;  %v3224_v34 = vor.u32 %v4319_v23, %v3223_v22 }
  0xc2   :  { %2187 = vmatmul.bf16.gmra.mxu1 %v1107_v35  ;;  %v3228_v35 = vor.u32 %v4311_v25, %v3225_v26 }
  0xc3   :  { %2250 = vmatmul.bf16.gmra.mxu2 %v1108_v39  ;;  %v3232_v39 = vor.u32 %v4320_v29, %v3231_v27  ;;  %v4545_v27 = vld [vmem:[%s6277_s1 + $0x2e0] sm:$0xff] }
  0xc4   :  { %2313 = vmatmul.bf16.gmra.mxu3 %v1109_v40  ;;  %v3236_v40 = vor.u32 %v4312_v30, %v3233_v31  ;;  %v4521_v29 = vld [vmem:[%s6277_s1 + $0x220] sm:$0xff]  ;;  %v3351_v31 = vld [vmem:[%s6279_s0 + $0x190] sm:$0xf] }
  0xc6   :  { %v2211_v44 = vpop.f32.mrf.mxu2  ;;  %v2087_v47 = vpop.f32.mrf.mxu0 }
  0xc7   :  { %v2274_v45 = vpop.f32.mrf.mxu3  ;;  %v2212_v46 = vadd.f32 %v2211_v44, %v2149_v43  ;;  %v2150_v48 = vpop.f32.mrf.mxu1  ;;  %v2088_v49 = vadd.f32 %v5036_v28, %v2087_v47  ;;  %v4538_v44 = vld [vmem:[%s6277_s1 + $0x2a8] sm:$0xff] }
  0xc8   :  { %v4522_v47 = vld [vmem:[%s6277_s1 + $0x228] sm:$0xff]  ;;  %2698 = vmatpush.bf16.msra.mxu2 %v4538_v44 }
  0xc9   :  { %v5130_v50 = vadd.f32 %v2274_v45, %v2212_v46  ;;  %v2151_v54 = vadd.f32 %v2150_v48, %v2088_v49  ;;  %v4546_v46 = vld [vmem:[%s6277_s1 + $0x2e8] sm:$0xff]  ;;  %2572 = vmatpush.bf16.msra.mxu0 %v4522_v47 }
  0xca   :  { %v4530_v48 = vld [vmem:[%s6277_s1 + $0x268] sm:$0xff]  ;;  %2761 = vmatpush.bf16.msra.mxu3 %v4546_v46 }
  0xcb   :  { %2635 = vmatpush.bf16.msra.mxu1 %v4530_v48 }
  0xcd   :  { %2573 = vmatpush.bf16.msra.mxu0 %v4521_v29 }
  0xce   :  { %v2213_v1 = vpop.f32.mrf.mxu2  ;;  %v2090_v6 = vpop.f32.mrf.mxu0  ;;  %2762 = vmatpush.bf16.msra.mxu3 %v4545_v27 }
  0xcf   :  { %v2276_v2 = vpop.f32.mrf.mxu3  ;;  %v2214_v5 = vadd.f32 %v2213_v1, %v2151_v54  ;;  %v2153_v7 = vpop.f32.mrf.mxu1  ;;  %v2091_v10 = vadd.f32 %v5036_v28, %v2090_v6  ;;  %v4328_v1 = vld [vmem:[%s6279_s0 + $0x11c] sm:$0xf]  ;;  %v3292_v6 = vor.u32 %v4327_v61, %v3289_v62 }
  0xd1   :  { %v5169_v12 = vadd.f32 %v2276_v2, %v2214_v5  ;;  %v2154_v13 = vadd.f32 %v2153_v7, %v2091_v10  ;;  %2326 = vmatmul.bf16.vlgmr.msrb.gmra.mxu0 %v3160_v3  ;;  %v3297_v2 = vld [vmem:[%s6279_s0 + $0x158] sm:$0xf0]  ;;  %v3288_v5 = vor.u32 %v4335_v60, %v3287_v59  ;;  %v3296_v10 = vor.u32 %v4336_v0, %v3295_v63  ;;  %v3415_v0 = vld [vmem:[%s6279_s0 + $0x210] sm:$0xf] }
  0xd2   :  { %2389 = vmatmul.bf16.vlgmr.msrb.gmra.mxu1 %v3164_v4 }
  0xd3   :  { %2452 = vmatmul.bf16.vlgmr.msrb.gmra.mxu2 %v3168_v8 }
  0xd4   :  { %2515 = vmatmul.bf16.vlgmr.msrb.gmra.mxu3 %v3172_v9 }
  0xd6   :  { %v2216_v14 = vpop.f32.mrf.mxu2  ;;  %v2092_v17 = vpop.f32.mrf.mxu0 }
  0xd7   :  { %v2279_v15 = vpop.f32.mrf.mxu3  ;;  %v2217_v16 = vadd.f32 %v2216_v14, %v2154_v13  ;;  %v2155_v18 = vpop.f32.mrf.mxu1  ;;  %v2093_v19 = vadd.f32 %v5036_v28, %v2092_v17  ;;  %v3300_v13 = vor.u32 %v4328_v1, %v3297_v2  ;;  %v4537_v17 = vld [vmem:[%s6277_s1 + $0x2a0] sm:$0xff]  ;;  %v4367_v1 = vld [vmem:[%s6279_s0 + $0x24c] sm:$0xf0] }
  0xd8   :  { %2699 = vmatpush.bf16.msra.mxu2 %v4537_v17  ;;  %v3416_v17 = vor.u32 %v4367_v1, %v3415_v0 }
  0xd9   :  { %v5172_v20 = vadd.f32 %v2279_v15, %v2217_v16  ;;  %v2156_v21 = vadd.f32 %v2155_v18, %v2093_v19 }
  0xde   :  { %v2218_v32 = vpop.f32.mrf.mxu2  ;;  %v2095_v37 = vpop.f32.mrf.mxu0 }
  0xdf   :  { %v2281_v33 = vpop.f32.mrf.mxu3  ;;  %v2219_v36 = vadd.f32 %v2218_v32, %v2156_v21  ;;  %v2158_v38 = vpop.f32.mrf.mxu1  ;;  %v2096_v41 = vadd.f32 %v5036_v28, %v2095_v37  ;;  %v4351_v32 = vld [vmem:[%s6279_s0 + $0x1cc] sm:$0xf0]  ;;  %v4352_v37 = vld [vmem:[%s6279_s0 + $0x1d4] sm:$0xf0] }
  0xe0   :  { %v3352_v44 = vor.u32 %v4351_v32, %v3351_v31 }
  0xe1   :  { %v5199_v43 = vadd.f32 %v2281_v33, %v2219_v36  ;;  %v2159_v45 = vadd.f32 %v2158_v38, %v2096_v41  ;;  %2331 = vmatmul.bf16.gmra.mxu0 %v3224_v34  ;;  %v4529_v33 = vld [vmem:[%s6277_s1 + $0x260] sm:$0xff]  ;;  %v4343_v34 = vld [vmem:[%s6279_s0 + $0x194] sm:$0xf]  ;;  %v3359_v36 = vld [vmem:[%s6279_s0 + $0x198] sm:$0xf] }
  0xe2   :  { %2394 = vmatmul.bf16.gmra.mxu1 %v3228_v35  ;;  %v3353_v35 = vld [vmem:[%s6279_s0 + $0x1d0] sm:$0xf0]  ;;  %v4344_v38 = vld [vmem:[%s6279_s0 + $0x19c] sm:$0xf] }
  0xe3   :  { %2457 = vmatmul.bf16.gmra.mxu2 %v3232_v39  ;;  %v3361_v39 = vld [vmem:[%s6279_s0 + $0x1d8] sm:$0xf0]  ;;  %2636 = vmatpush.bf16.msra.mxu1 %v4529_v33 }
  0xe4   :  { %2520 = vmatmul.bf16.gmra.mxu3 %v3236_v40 }
  0xe6   :  { %v2221_v49 = vpop.f32.mrf.mxu2  ;;  %v2097_v53 = vpop.f32.mrf.mxu0 }
  0xe7   :  { %v2284_v51 = vpop.f32.mrf.mxu3  ;;  %v2222_v52 = vadd.f32 %v2221_v49, %v2159_v45  ;;  %v2160_v54 = vpop.f32.mrf.mxu1  ;;  %v2098_v56 = vadd.f32 %v5036_v28, %v2097_v53  ;;  %v3356_v45 = vor.u32 %v4343_v34, %v3353_v35  ;;  %v3360_v49 = vor.u32 %v4352_v37, %v3359_v36 }
  0xe9   :  { %v5214_v57 = vadd.f32 %v2284_v51, %v2222_v52  ;;  %v2161_v58 = vadd.f32 %v2160_v54, %v2098_v56  ;;  %v3364_v51 = vor.u32 %v4344_v38, %v3361_v39 }
  0xee   :  { %v2223_v3 = vpop.f32.mrf.mxu2  ;;  %v2100_v8 = vpop.f32.mrf.mxu0 }
  0xef   :  { %v2286_v4 = vpop.f32.mrf.mxu3  ;;  %v2224_v7 = vadd.f32 %v2223_v3, %v2161_v58  ;;  %v2163_v9 = vpop.f32.mrf.mxu1  ;;  %v2101_v14 = vadd.f32 %v5036_v28, %v2100_v8  ;;  %v4536_v3 = vld [vmem:[%s6277_s1 + $0x298] sm:$0xff] }
  0xf0   :  { %v3423_v8 = vld [vmem:[%s6279_s0 + $0x218] sm:$0xf]  ;;  %2700 = vmatpush.bf16.msra.mxu2 %v4536_v3  ;;  %v4535_v3 = vld [vmem:[%s6277_s1 + $0x290] sm:$0xff] }
  0xf1   :  { %v5241_v15 = vadd.f32 %v2286_v4, %v2224_v7  ;;  %v2164_v16 = vadd.f32 %v2163_v9, %v2101_v14  ;;  %2336 = vmatmul.bf16.gmra.mxu0 %v3288_v5  ;;  %v4544_v4 = vld [vmem:[%s6277_s1 + $0x2d8] sm:$0xff]  ;;  %v3417_v7 = vld [vmem:[%s6279_s0 + $0x250] sm:$0xf0] }
  0xf2   :  { %2399 = vmatmul.bf16.gmra.mxu1 %v3292_v6  ;;  %v4520_v5 = vld [vmem:[%s6277_s1 + $0x218] sm:$0xff]  ;;  %v4359_v6 = vld [vmem:[%s6279_s0 + $0x214] sm:$0xf]  ;;  %2763 = vmatpush.bf16.msra.mxu3 %v4544_v4 }
  0xf3   :  { %2462 = vmatmul.bf16.gmra.mxu2 %v3296_v10  ;;  %v4368_v9 = vld [vmem:[%s6279_s0 + $0x254] sm:$0xf0]  ;;  %v4360_v10 = vld [vmem:[%s6279_s0 + $0x21c] sm:$0xf]  ;;  %2574 = vmatpush.bf16.msra.mxu0 %v4520_v5  ;;  %v4543_v4 = vld [vmem:[%s6277_s1 + $0x2d0] sm:$0xff] }
  0xf4   :  { %2525 = vmatmul.bf16.gmra.mxu3 %v3300_v13  ;;  %v3425_v13 = vld [vmem:[%s6279_s0 + $0x258] sm:$0xf0]  ;;  %v4519_v5 = vld [vmem:[%s6277_s1 + $0x210] sm:$0xff]  ;;  %2701 = vmatpush.bf16.msra.mxu2 %v4535_v3 }
  0xf5   :  { %v3609_v3 = vld [vmem:[%s6279_s0 + $0x3d0] sm:$0xf0] }
  0xf6   :  { %v2226_v18 = vpop.f32.mrf.mxu2  ;;  %v2102_v22 = vpop.f32.mrf.mxu0  ;;  %2764 = vmatpush.bf16.msra.mxu3 %v4543_v4  ;;  %v3615_v4 = vld [vmem:[%s6279_s0 + $0x398] sm:$0xf] }
  0xf7   :  { %v2289_v19 = vpop.f32.mrf.mxu3  ;;  %v2227_v21 = vadd.f32 %v2226_v18, %v2164_v16  ;;  %v2165_v23 = vpop.f32.mrf.mxu1  ;;  %v2103_v25 = vadd.f32 %v5036_v28, %v2102_v22  ;;  %v3420_v18 = vor.u32 %v4359_v6, %v3417_v7  ;;  %v4527_v6 = vld [vmem:[%s6277_s1 + $0x250] sm:$0xff]  ;;  %2575 = vmatpush.bf16.msra.mxu0 %v4519_v5  ;;  %v4416_v5 = vld [vmem:[%s6279_s0 + $0x3d4] sm:$0xf0] }
  0xf9   :  { %v5247_v26 = vadd.f32 %v2289_v19, %v2227_v21  ;;  %v2166_v30 = vadd.f32 %v2165_v23, %v2103_v25  ;;  %v3424_v23 = vor.u32 %v4368_v9, %v3423_v8  ;;  %v3428_v25 = vor.u32 %v4360_v10, %v3425_v13 }
  0xfe   :  { %v2228_v40 = vpop.f32.mrf.mxu2  ;;  %v2105_v47 = vpop.f32.mrf.mxu0 }
  0xff   :  { %v2291_v41 = vpop.f32.mrf.mxu3  ;;  %v2229_v46 = vadd.f32 %v2228_v40, %v2166_v30  ;;  %v2168_v48 = vpop.f32.mrf.mxu1  ;;  %v2106_v52 = vadd.f32 %v5036_v28, %v2105_v47  ;;  %v4528_v30 = vld [vmem:[%s6277_s1 + $0x258] sm:$0xff]  ;;  %v3479_v40 = vld [vmem:[%s6279_s0 + $0x290] sm:$0xf] }
 0x100   :  { %2637 = vmatpush.bf16.msra.mxu1 %v4528_v30  ;;  %v4384_v47 = vld [vmem:[%s6279_s0 + $0x2d4] sm:$0xf0]  ;;  %v3553_v30 = vld [vmem:[%s6279_s0 + $0x358] sm:$0xf0] }
 0x101   :  { %v5283_v53 = vadd.f32 %v2291_v41, %v2229_v46  ;;  %v2169_v54 = vadd.f32 %v2168_v48, %v2106_v52  ;;  %2341 = vmatmul.bf16.gmra.mxu0 %v3352_v44  ;;  %v4383_v41 = vld [vmem:[%s6279_s0 + $0x2cc] sm:$0xf0]  ;;  %v4375_v44 = vld [vmem:[%s6279_s0 + $0x294] sm:$0xf]  ;;  %v3487_v46 = vld [vmem:[%s6279_s0 + $0x298] sm:$0xf] }
 0x102   :  { %2404 = vmatmul.bf16.gmra.mxu1 %v3356_v45  ;;  %v3481_v45 = vld [vmem:[%s6279_s0 + $0x2d0] sm:$0xf0]  ;;  %v4376_v48 = vld [vmem:[%s6279_s0 + $0x29c] sm:$0xf] }
 0x103   :  { %2467 = vmatmul.bf16.gmra.mxu2 %v3360_v49  ;;  %v3489_v49 = vld [vmem:[%s6279_s0 + $0x2d8] sm:$0xf0] }
 0x104   :  { %2530 = vmatmul.bf16.gmra.mxu3 %v3364_v51  ;;  %2638 = vmatpush.bf16.msra.mxu1 %v4527_v6  ;;  %v4408_v6 = vld [vmem:[%s6279_s0 + $0x39c] sm:$0xf] }
 0x106   :  { %v2231_v56 = vpop.f32.mrf.mxu2  ;;  %v2107_v60 = vpop.f32.mrf.mxu0 }
 0x107   :  { %v2294_v58 = vpop.f32.mrf.mxu3  ;;  %v2232_v59 = vadd.f32 %v2231_v56, %v2169_v54  ;;  %v2170_v61 = vpop.f32.mrf.mxu1  ;;  %v2108_v62 = vadd.f32 %v5036_v28, %v2107_v60  ;;  %v3480_v54 = vor.u32 %v4383_v41, %v3479_v40  ;;  %v3484_v56 = vor.u32 %v4375_v44, %v3481_v45 }
 0x109   :  { %v5286_v63 = vadd.f32 %v2294_v58, %v2232_v59  ;;  %v2171_v2 = vadd.f32 %v2170_v61, %v2108_v62  ;;  %v3488_v61 = vor.u32 %v4384_v47, %v3487_v46  ;;  %v3492_v62 = vor.u32 %v4376_v48, %v3489_v49 }
 0x10e   :  { %v2233_v14 = vpop.f32.mrf.mxu2  ;;  %v2110_v21 = vpop.f32.mrf.mxu0 }
 0x10f   :  { %v2296_v16 = vpop.f32.mrf.mxu3  ;;  %v2234_v19 = vadd.f32 %v2233_v14, %v2171_v2  ;;  %v2173_v22 = vpop.f32.mrf.mxu1  ;;  %v2111_v27 = vadd.f32 %v5036_v28, %v2110_v21  ;;  %v4391_v21 = vld [vmem:[%s6279_s0 + $0x314] sm:$0xf] }
 0x111   :  { %v5322_v29 = vadd.f32 %v2296_v16, %v2234_v19  ;;  %v2174_v31 = vadd.f32 %v2173_v22, %v2111_v27  ;;  %2346 = vmatmul.bf16.gmra.mxu0 %v3416_v17  ;;  %v4399_v19 = vld [vmem:[%s6279_s0 + $0x34c] sm:$0xf0]  ;;  %v3545_v22 = vld [vmem:[%s6279_s0 + $0x350] sm:$0xf0]  ;;  %v4392_v27 = vld [vmem:[%s6279_s0 + $0x31c] sm:$0xf] }
 0x112   :  { %2409 = vmatmul.bf16.gmra.mxu1 %v3420_v18  ;;  %v3543_v18 = vld [vmem:[%s6279_s0 + $0x310] sm:$0xf]  ;;  %v3556_v40 = vor.u32 %v4392_v27, %v3553_v30 }
 0x113   :  { %2472 = vmatmul.bf16.gmra.mxu2 %v3424_v23  ;;  %v3551_v23 = vld [vmem:[%s6279_s0 + $0x318] sm:$0xf] }
 0x114   :  { %2535 = vmatmul.bf16.gmra.mxu3 %v3428_v25  ;;  %v4400_v25 = vld [vmem:[%s6279_s0 + $0x354] sm:$0xf0] }
 0x116   :  { %v2236_v32 = vpop.f32.mrf.mxu2  ;;  %v2112_v35 = vpop.f32.mrf.mxu0 }
 0x117   :  { %v2299_v33 = vpop.f32.mrf.mxu3  ;;  %v2237_v34 = vadd.f32 %v2236_v32, %v2174_v31  ;;  %v2175_v36 = vpop.f32.mrf.mxu1  ;;  %v2113_v37 = vadd.f32 %v5036_v28, %v2112_v35 }
 0x119   :  { %v5328_v38 = vadd.f32 %v2299_v33, %v2237_v34  ;;  %v2176_v39 = vadd.f32 %v2175_v36, %v2113_v37  ;;  %v3544_v33 = vor.u32 %v4399_v19, %v3543_v18  ;;  %v3548_v34 = vor.u32 %v4391_v21, %v3545_v22 }
 0x11a   :  { %v3616_v19 = vor.u32 %v4416_v5, %v3615_v4 }
 0x11e   :  { %v2238_v51 = vpop.f32.mrf.mxu2  ;;  %v2115_v59 = vpop.f32.mrf.mxu0 }
 0x11f   :  { %v2301_v52 = vpop.f32.mrf.mxu3  ;;  %v2239_v58 = vadd.f32 %v2238_v51, %v2176_v39  ;;  %v2178_v60 = vpop.f32.mrf.mxu1  ;;  %v2116_v0 = vadd.f32 %v5036_v28, %v2115_v59  ;;  %v3552_v39 = vor.u32 %v4400_v25, %v3551_v23  ;;  %v4534_v59 = vld [vmem:[%s6277_s1 + $0x288] sm:$0xff] }
 0x120   :  { %2702 = vmatpush.bf16.msra.mxu2 %v4534_v59 }
 0x121   :  { %v5355_v1 = vadd.f32 %v2301_v52, %v2239_v58  ;;  %v2179_v2 = vadd.f32 %v2178_v60, %v2116_v0  ;;  %2351 = vmatmul.bf16.gmra.mxu0 %v3480_v54  ;;  %v4415_v58 = vld [vmem:[%s6279_s0 + $0x3cc] sm:$0xf0]  ;;  %v4526_v0 = vld [vmem:[%s6277_s1 + $0x248] sm:$0xff] }
 0x122   :  { %2414 = vmatmul.bf16.gmra.mxu1 %v3484_v56  ;;  %v3607_v56 = vld [vmem:[%s6279_s0 + $0x390] sm:$0xf] }
 0x123   :  { %2477 = vmatmul.bf16.gmra.mxu2 %v3488_v61  ;;  %v4542_v61 = vld [vmem:[%s6277_s1 + $0x2c8] sm:$0xff]  ;;  %2639 = vmatpush.bf16.msra.mxu1 %v4526_v0 }
 0x124   :  { %2540 = vmatmul.bf16.gmra.mxu3 %v3492_v62  ;;  %v4518_v62 = vld [vmem:[%s6277_s1 + $0x208] sm:$0xff] }
 0x125   :  { %2765 = vmatpush.bf16.msra.mxu3 %v4542_v61  ;;  %2576 = vmatpush.bf16.msra.mxu0 %v4518_v62  ;;  %v4541_v61 = vld [vmem:[%s6277_s1 + $0x2c0] sm:$0xff] }
 0x126   :  { %v2241_v7 = vpop.f32.mrf.mxu2  ;;  %v2117_v10 = vpop.f32.mrf.mxu0  ;;  %v4517_v62 = vld [vmem:[%s6277_s1 + $0x200] sm:$0xff] }
 0x127   :  { %v2304_v8 = vpop.f32.mrf.mxu3  ;;  %v2242_v9 = vadd.f32 %v2241_v7, %v2179_v2  ;;  %v2180_v13 = vpop.f32.mrf.mxu1  ;;  %v2118_v14 = vadd.f32 %v5036_v28, %v2117_v10  ;;  %v4407_v2 = vld [vmem:[%s6279_s0 + $0x394] sm:$0xf]  ;;  %v3617_v7 = vld [vmem:[%s6279_s0 + $0x3d8] sm:$0xf0]  ;;  %v3608_v10 = vor.u32 %v4415_v58, %v3607_v56 }
 0x128   :  { %v3620_v21 = vor.u32 %v4408_v6, %v3617_v7 }
 0x129   :  { %v5370_v16 = vadd.f32 %v2304_v8, %v2242_v9  ;;  %v2181_v17 = vadd.f32 %v2180_v13, %v2118_v14  ;;  %v3612_v13 = vor.u32 %v4407_v2, %v3609_v3  ;;  %v4525_v2 = vld [vmem:[%s6277_s1 + $0x240] sm:$0xff]  ;;  %2766 = vmatpush.bf16.msra.mxu3 %v4541_v61  ;;  %2577 = vmatpush.bf16.msra.mxu0 %v4517_v62 }
 0x12a   :  { %2640 = vmatpush.bf16.msra.mxu1 %v4525_v2 }
 0x12e   :  { %v2243_v31 = vpop.f32.mrf.mxu2  ;;  %v2120_v36 = vpop.f32.mrf.mxu0 }
 0x12f   :  { %v2306_v32 = vpop.f32.mrf.mxu3  ;;  %v2244_v35 = vadd.f32 %v2243_v31, %v2181_v17  ;;  %v2183_v37 = vpop.f32.mrf.mxu1  ;;  %v2121_v41 = vadd.f32 %v5036_v28, %v2120_v36  ;;  %v4533_v36 = vld [vmem:[%s6277_s1 + $0x280] sm:$0xff] }
 0x130   :  { %2703 = vmatpush.bf16.msra.mxu2 %v4533_v36 }
 0x131   :  { %v5397_v44 = vadd.f32 %v2306_v32, %v2244_v35  ;;  %v2184_v45 = vadd.f32 %v2183_v37, %v2121_v41  ;;  %2356 = vmatmul.bf16.gmra.mxu0 %v3544_v33  ;;  %v3671_v35 = vld [vmem:[%s6279_s0 + $0x410] sm:$0xf]  ;;  %v4423_v37 = vld [vmem:[%s6279_s0 + $0x414] sm:$0xf]  ;;  %v4432_v41 = vld [vmem:[%s6279_s0 + $0x454] sm:$0xf0] }
 0x132   :  { %2419 = vmatmul.bf16.gmra.mxu1 %v3548_v34 }
 0x133   :  { %2482 = vmatmul.bf16.gmra.mxu2 %v3552_v39  ;;  %v3673_v39 = vld [vmem:[%s6279_s0 + $0x450] sm:$0xf0] }
 0x134   :  { %2545 = vmatmul.bf16.gmra.mxu3 %v3556_v40  ;;  %v3679_v40 = vld [vmem:[%s6279_s0 + $0x418] sm:$0xf] }
 0x135   :  { %v3680_v58 = vor.u32 %v4432_v41, %v3679_v40  ;;  %v4572_v40 = vld [vmem:[%s6277_s1 + $0x3b8] sm:$0xff] }
 0x136   :  { %v2246_v46 = vpop.f32.mrf.mxu2  ;;  %v2122_v49 = vpop.f32.mrf.mxu0  ;;  %v4580_v41 = vld [vmem:[%s6277_s1 + $0x3f8] sm:$0xff]  ;;  %2948 = vmatpush.bf16.msrb.mxu2 %v4572_v40  ;;  %v4306_v40 = vld [vmem:[%s6279_s0 + $0x64] sm:$0xf0] }
 0x137   :  { %v2309_v47 = vpop.f32.mrf.mxu3  ;;  %v2247_v48 = vadd.f32 %v2246_v46, %v2184_v45  ;;  %v2185_v51 = vpop.f32.mrf.mxu1  ;;  %v2123_v52 = vadd.f32 %v5036_v28, %v2122_v49  ;;  %v4424_v45 = vld [vmem:[%s6279_s0 + $0x41c] sm:$0xf]  ;;  %3011 = vmatpush.bf16.msrb.mxu3 %v4580_v41  ;;  %v4298_v41 = vld [vmem:[%s6279_s0 + $0x2c] sm:$0xf] }
 0x138   :  { %v3681_v46 = vld [vmem:[%s6279_s0 + $0x458] sm:$0xf0] }
 0x139   :  { %v5400_v54 = vadd.f32 %v2309_v47, %v2247_v48  ;;  %v2186_v60 = vadd.f32 %v2185_v51, %v2123_v52  ;;  %v3676_v51 = vor.u32 %v4423_v37, %v3673_v39  ;;  %v3684_v59 = vor.u32 %v4424_v45, %v3681_v46  ;;  %v4556_v45 = vld [vmem:[%s6277_s1 + $0x338] sm:$0xff] }
 0x13a   :  { %2822 = vmatpush.bf16.msrb.mxu0 %v4556_v45  ;;  %v3185_v45 = vld [vmem:[%s6279_s0 + $0x68] sm:$0xf0] }
 0x13e   :  { %v2248_v8 = vpop.f32.mrf.mxu2  ;;  %v2125_v17 = vpop.f32.mrf.mxu0 }
 0x13f   :  { %v2311_v9 = vpop.f32.mrf.mxu3  ;;  %v2249_v14 = vadd.f32 %v2248_v8, %v2186_v60  ;;  %v2188_v18 = vpop.f32.mrf.mxu1  ;;  %v2126_v22 = vadd.f32 %v5036_v28, %v2125_v17  ;;  %v4431_v28 = vld [vmem:[%s6279_s0 + $0x44c] sm:$0xf0]  ;;  %v3737_v17 = vld [vmem:[%s6279_s0 + $0x4d0] sm:$0xf0] }
 0x140   :  { %v3672_v49 = vor.u32 %v4431_v28, %v3671_v35 }
 0x141   :  { %v5439_v23 = vadd.f32 %v2311_v9, %v2249_v14  ;;  %v2189_v25 = vadd.f32 %v2188_v18, %v2126_v22  ;;  %2361 = vmatmul.bf16.gmra.mxu0 %v3608_v10  ;;  %v3735_v10 = vld [vmem:[%s6279_s0 + $0x490] sm:$0xf]  ;;  %v4439_v14 = vld [vmem:[%s6279_s0 + $0x494] sm:$0xf]  ;;  %v4448_v18 = vld [vmem:[%s6279_s0 + $0x4d4] sm:$0xf0] }
 0x142   :  { %2424 = vmatmul.bf16.gmra.mxu1 %v3612_v13  ;;  %v4447_v13 = vld [vmem:[%s6279_s0 + $0x4cc] sm:$0xf0] }
 0x143   :  { %2487 = vmatmul.bf16.gmra.mxu2 %v3616_v19  ;;  %v4440_v19 = vld [vmem:[%s6279_s0 + $0x49c] sm:$0xf] }
 0x144   :  { %2550 = vmatmul.bf16.gmra.mxu3 %v3620_v21  ;;  %v3745_v21 = vld [vmem:[%s6279_s0 + $0x4d8] sm:$0xf0] }
 0x145   :  { %v3748_v28 = vor.u32 %v4440_v19, %v3745_v21 }
 0x146   :  { %v2251_v27 = vpop.f32.mrf.mxu2  ;;  %v2127_v32 = vpop.f32.mrf.mxu0 }
 0x147   :  { %v2314_v30 = vpop.f32.mrf.mxu3  ;;  %v2252_v31 = vadd.f32 %v2251_v27, %v2189_v25  ;;  %v2190_v33 = vpop.f32.mrf.mxu1  ;;  %v3736_v27 = vor.u32 %v4447_v13, %v3735_v10 }
 0x149   :  { %v5441_v34 = vadd.f32 %v2314_v30, %v2252_v31  ;;  %v3740_v30 = vor.u32 %v4439_v14, %v3737_v17 }
 0x14e   :  { %v2253_v47 = vpop.f32.mrf.mxu2  ;;  %v2327_v52 = vpop.f32.mrf.mxu0 }
 0x14f   :  { %v2316_v48 = vpop.f32.mrf.mxu3  ;;  %v2390_v56 = vpop.f32.mrf.mxu1  ;;  %v2328_v60 = vadd.f32 %v2327_v52, %v5076_v55 }
 0x151   :  { %v2391_v0 = vadd.f32 %v2390_v56, %v2328_v60  ;;  %2366 = vmatmul.bf16.gmra.mxu0 %v3672_v49  ;;  %v177_v56 = vld [vmem:[%s6279_s0 + $0x518] sm:$0x11] }
 0x152   :  { %2429 = vmatmul.bf16.gmra.mxu1 %v3676_v51  ;;  %v176_v51 = vld [vmem:[%s6279_s0 + $0x510] sm:$0x11]  ;;  %v937_v2 = vunpack.c.h.b16 %v177_v56 }
 0x153   :  { %2492 = vmatmul.bf16.gmra.mxu2 %v3680_v58  ;;  %v934_v61 = vunpack.c.l.b16 %v176_v51  ;;  %v935_v62 = vunpack.c.h.b16 %v176_v51 }
 0x154   :  { %2555 = vmatmul.bf16.gmra.mxu3 %v3684_v59  ;;  %v4564_v59 = vld [vmem:[%s6277_s1 + $0x378] sm:$0xff]  ;;  %v1113_v10 = vpack.c.b16 %v937_v2, %v937_v2 }
 0x155   :  { %2885 = vmatpush.bf16.msrb.mxu1 %v4564_v59  ;;  %v3188_v59 = vor.u32 %v4298_v41, %v3185_v45 }
 0x156   :  { %v2453_v55 = vpop.f32.mrf.mxu2  ;;  %v2329_v5 = vpop.f32.mrf.mxu0 }
 0x157   :  { %v2516_v3 = vpop.f32.mrf.mxu3  ;;  %v2454_v4 = vadd.f32 %v2453_v55, %v2391_v0  ;;  %v2392_v6 = vpop.f32.mrf.mxu1  ;;  %v2330_v7 = vadd.f32 %v2329_v5, %v5103_v11  ;;  %v3743_v11 = vld [vmem:[%s6279_s0 + $0x498] sm:$0xf]  ;;  %v936_v0 = vunpack.c.l.b16 %v177_v56 }
 0x158   :  { %v3744_v35 = vor.u32 %v4448_v18, %v3743_v11 }
 0x159   :  { %v5481_v8 = vadd.f32 %v2516_v3, %v2454_v4  ;;  %v2393_v9 = vadd.f32 %v2392_v6, %v2330_v7  ;;  %v1110_v4 = vpack.c.b16 %v934_v61, %v934_v61 }
 0x15e   :  { %v2455_v22 = vpop.f32.mrf.mxu2  ;;  %v2332_v32 = vpop.f32.mrf.mxu0 }
 0x15f   :  { %v2518_v25 = vpop.f32.mrf.mxu3  ;;  %v2456_v31 = vadd.f32 %v2455_v22, %v2393_v9  ;;  %v2395_v33 = vpop.f32.mrf.mxu1  ;;  %v2333_v36 = vadd.f32 %v2332_v32, %v5121_v24  ;;  %v1112_v9 = vpack.c.b16 %v936_v0, %v936_v0 }
 0x161   :  { %v5508_v37 = vadd.f32 %v2518_v25, %v2456_v31  ;;  %v2396_v39 = vadd.f32 %v2395_v33, %v2333_v36  ;;  %2371 = vmatmul.bf16.gmra.mxu0 %v3736_v27  ;;  %v4297_v31 = vld [vmem:[%s6279_s0 + $0x24] sm:$0xf]  ;;  %v4571_v33 = vld [vmem:[%s6277_s1 + $0x3b0] sm:$0xff]  ;;  %v3183_v36 = vld [vmem:[%s6279_s0 + $0x28] sm:$0xf] }
 0x162   :  { %2434 = vmatmul.bf16.gmra.mxu1 %v3740_v30  ;;  %v4305_v30 = vld [vmem:[%s6279_s0 + $0x5c] sm:$0xf0]  ;;  %2949 = vmatpush.bf16.msrb.mxu2 %v4571_v33  ;;  %v3184_v56 = vor.u32 %v4306_v40, %v3183_v36  ;;  %v4578_v36 = vld [vmem:[%s6277_s1 + $0x3e8] sm:$0xff] }
 0x163   :  { %2497 = vmatmul.bf16.gmra.mxu2 %v3744_v35  ;;  %v4555_v35 = vld [vmem:[%s6277_s1 + $0x330] sm:$0xff] }
 0x164   :  { %2560 = vmatmul.bf16.gmra.mxu3 %v3748_v28  ;;  %v3177_v28 = vld [vmem:[%s6279_s0 + $0x60] sm:$0xf0]  ;;  %2823 = vmatpush.bf16.msrb.mxu0 %v4555_v35  ;;  %v4570_v35 = vld [vmem:[%s6277_s1 + $0x3a8] sm:$0xff] }
 0x166   :  { %v2458_v24 = vpop.f32.mrf.mxu2  ;;  %v2334_v48 = vpop.f32.mrf.mxu0  ;;  %2950 = vmatpush.bf16.msrb.mxu2 %v4570_v35  ;;  %v4345_v35 = vld [vmem:[%s6279_s0 + $0x1a4] sm:$0xf] }
 0x167   :  { %v2521_v46 = vpop.f32.mrf.mxu3  ;;  %v2459_v47 = vadd.f32 %v2458_v24, %v2396_v39  ;;  %v2397_v49 = vpop.f32.mrf.mxu1  ;;  %v2335_v52 = vadd.f32 %v2334_v48, %v5127_v42  ;;  %v1111_v42 = vpack.c.b16 %v935_v62, %v935_v62  ;;  %v4563_v39 = vld [vmem:[%s6277_s1 + $0x370] sm:$0xff]  ;;  %v3180_v48 = vor.u32 %v4297_v31, %v3177_v28 }
 0x168   :  { %2886 = vmatpush.bf16.msrb.mxu1 %v4563_v39  ;;  %v4554_v39 = vld [vmem:[%s6277_s1 + $0x328] sm:$0xff] }
 0x169   :  { %v5526_v58 = vadd.f32 %v2521_v46, %v2459_v47  ;;  %v2398_v60 = vadd.f32 %v2397_v49, %v2335_v52  ;;  %2824 = vmatpush.bf16.msrb.mxu0 %v4554_v39  ;;  %v4354_v39 = vld [vmem:[%s6279_s0 + $0x1e4] sm:$0xf0] }
 0x16e   :  { %v2460_v55 = vpop.f32.mrf.mxu2  ;;  %v2337_v6 = vpop.f32.mrf.mxu0 }
 0x16f   :  { %v2523_v3 = vpop.f32.mrf.mxu3  ;;  %v2461_v5 = vadd.f32 %v2460_v55, %v2398_v60  ;;  %v2400_v7 = vpop.f32.mrf.mxu1  ;;  %v2338_v13 = vadd.f32 %v2337_v6, %v5130_v50  ;;  %v3175_v50 = vld [vmem:[%s6279_s0 + $0x20] sm:$0xf] }
 0x170   :  { %v3176_v47 = vor.u32 %v4305_v30, %v3175_v50 }
 0x171   :  { %v5532_v14 = vadd.f32 %v2523_v3, %v2461_v5  ;;  %v2401_v17 = vadd.f32 %v2400_v7, %v2338_v13  ;;  %2376 = vmatmul.bf16.gmra.mxu0 %v1110_v4  ;;  %v4321_v7 = vld [vmem:[%s6279_s0 + $0xdc] sm:$0xf0]  ;;  %v4322_v13 = vld [vmem:[%s6279_s0 + $0xe4] sm:$0xf0] }
 0x172   :  { %2439 = vmatmul.bf16.gmra.mxu1 %v1111_v42 }
 0x173   :  { %2502 = vmatmul.bf16.gmra.mxu2 %v1112_v9  ;;  %v4313_v9 = vld [vmem:[%s6279_s0 + $0xa4] sm:$0xf] }
 0x174   :  { %2565 = vmatmul.bf16.gmra.mxu3 %v1113_v10  ;;  %v3241_v10 = vld [vmem:[%s6279_s0 + $0xe0] sm:$0xf0] }
 0x176   :  { %v2463_v11 = vpop.f32.mrf.mxu2  ;;  %v2339_v21 = vpop.f32.mrf.mxu0 }
 0x177   :  { %v2526_v18 = vpop.f32.mrf.mxu3  ;;  %v2464_v19 = vadd.f32 %v2463_v11, %v2401_v17  ;;  %v2402_v22 = vpop.f32.mrf.mxu1  ;;  %v2340_v25 = vadd.f32 %v2339_v21, %v5169_v12  ;;  %v4579_v12 = vld [vmem:[%s6277_s1 + $0x3f0] sm:$0xff]  ;;  %v4314_v17 = vld [vmem:[%s6279_s0 + $0xac] sm:$0xf] }
 0x178   :  { %3012 = vmatpush.bf16.msrb.mxu3 %v4579_v12  ;;  %v3249_v11 = vld [vmem:[%s6279_s0 + $0xe8] sm:$0xf0] }
 0x179   :  { %v5535_v27 = vadd.f32 %v2526_v18, %v2464_v19  ;;  %v2403_v32 = vadd.f32 %v2402_v22, %v2340_v25  ;;  %v3244_v22 = vor.u32 %v4313_v9, %v3241_v10 }
 0x17c   :  { %3013 = vmatpush.bf16.msrb.mxu3 %v4578_v36  ;;  %v3375_v36 = vld [vmem:[%s6279_s0 + $0x1a8] sm:$0xf] }
 0x17e   :  { %v2465_v24 = vpop.f32.mrf.mxu2  ;;  %v2342_v51 = vpop.f32.mrf.mxu0 }
 0x17f   :  { %v2528_v46 = vpop.f32.mrf.mxu3  ;;  %v2466_v49 = vadd.f32 %v2465_v24, %v2403_v32  ;;  %v2405_v52 = vpop.f32.mrf.mxu1  ;;  %v2343_v60 = vadd.f32 %v2342_v51, %v5172_v20  ;;  %v3239_v20 = vld [vmem:[%s6279_s0 + $0xa0] sm:$0xf]  ;;  %v3252_v32 = vor.u32 %v4314_v17, %v3249_v11 }
 0x180   :  { %v3240_v21 = vor.u32 %v4321_v7, %v3239_v20  ;;  %v3303_v51 = vld [vmem:[%s6279_s0 + $0x120] sm:$0xf] }
 0x181   :  { %v5574_v61 = vadd.f32 %v2528_v46, %v2466_v49  ;;  %v2406_v62 = vadd.f32 %v2405_v52, %v2343_v60  ;;  %2578 = vmatmul.bf16.vlgmr.msra.gmra.mxu0 %v3176_v47  ;;  %v4337_v52 = vld [vmem:[%s6279_s0 + $0x15c] sm:$0xf0]  ;;  %v4338_v60 = vld [vmem:[%s6279_s0 + $0x164] sm:$0xf0] }
 0x182   :  { %2641 = vmatmul.bf16.vlgmr.msra.gmra.mxu1 %v3180_v48  ;;  %v4569_v17 = vld [vmem:[%s6277_s1 + $0x3a0] sm:$0xff] }
 0x183   :  { %2704 = vmatmul.bf16.vlgmr.msra.gmra.mxu2 %v3184_v56  ;;  %v4329_v56 = vld [vmem:[%s6279_s0 + $0x124] sm:$0xf] }
 0x184   :  { %2767 = vmatmul.bf16.vlgmr.msra.gmra.mxu3 %v3188_v59  ;;  %v3305_v59 = vld [vmem:[%s6279_s0 + $0x160] sm:$0xf0]  ;;  %2951 = vmatpush.bf16.msrb.mxu2 %v4569_v17  ;;  %v3439_v17 = vld [vmem:[%s6279_s0 + $0x228] sm:$0xf] }
 0x186   :  { %v2468_v0 = vpop.f32.mrf.mxu2  ;;  %v2344_v3 = vpop.f32.mrf.mxu0 }
 0x187   :  { %v2531_v2 = vpop.f32.mrf.mxu3  ;;  %v2469_v55 = vadd.f32 %v2468_v0, %v2406_v62  ;;  %v2407_v4 = vpop.f32.mrf.mxu1  ;;  %v2345_v42 = vadd.f32 %v2344_v3, %v5199_v43  ;;  %v3247_v43 = vld [vmem:[%s6279_s0 + $0xa8] sm:$0xf]  ;;  %v4330_v62 = vld [vmem:[%s6279_s0 + $0x12c] sm:$0xf]  ;;  %v3304_v3 = vor.u32 %v4337_v52, %v3303_v51  ;;  %v3376_v52 = vor.u32 %v4354_v39, %v3375_v36  ;;  %v4560_v36 = vld [vmem:[%s6277_s1 + $0x358] sm:$0xff] }
 0x188   :  { %v3248_v31 = vor.u32 %v4322_v13, %v3247_v43  ;;  %v3313_v0 = vld [vmem:[%s6279_s0 + $0x168] sm:$0xf0] }
 0x189   :  { %v5577_v5 = vadd.f32 %v2531_v2, %v2469_v55  ;;  %v2408_v6 = vadd.f32 %v2407_v4, %v2345_v42  ;;  %v3308_v4 = vor.u32 %v4329_v56, %v3305_v59  ;;  %v3316_v9 = vor.u32 %v4330_v62, %v3313_v0 }
 0x18e   :  { %v2470_v18 = vpop.f32.mrf.mxu2  ;;  %v2347_v50 = vpop.f32.mrf.mxu0 }
 0x18f   :  { %v2533_v19 = vpop.f32.mrf.mxu3  ;;  %v2471_v25 = vadd.f32 %v2470_v18, %v2408_v6  ;;  %v2410_v30 = vpop.f32.mrf.mxu1  ;;  %v2348_v33 = vadd.f32 %v2347_v50, %v5214_v57  ;;  %v4562_v57 = vld [vmem:[%s6277_s1 + $0x368] sm:$0xff]  ;;  %v4577_v50 = vld [vmem:[%s6277_s1 + $0x3e0] sm:$0xff] }
 0x190   :  { %2887 = vmatpush.bf16.msrb.mxu1 %v4562_v57  ;;  %3014 = vmatpush.bf16.msrb.mxu3 %v4577_v50  ;;  %v4346_v57 = vld [vmem:[%s6279_s0 + $0x1ac] sm:$0xf] }
 0x191   :  { %v5604_v12 = vadd.f32 %v2533_v19, %v2471_v25  ;;  %v2411_v28 = vadd.f32 %v2410_v30, %v2348_v33  ;;  %2583 = vmatmul.bf16.gmra.mxu0 %v3240_v21  ;;  %v4553_v30 = vld [vmem:[%s6277_s1 + $0x320] sm:$0xff] }
 0x192   :  { %2646 = vmatmul.bf16.gmra.mxu1 %v3244_v22  ;;  %v4353_v33 = vld [vmem:[%s6279_s0 + $0x1dc] sm:$0xf0]  ;;  %2825 = vmatpush.bf16.msrb.mxu0 %v4553_v30 }
 0x193   :  { %2709 = vmatmul.bf16.gmra.mxu2 %v3248_v31 }
 0x194   :  { %2772 = vmatmul.bf16.gmra.mxu3 %v3252_v32  ;;  %v3367_v32 = vld [vmem:[%s6279_s0 + $0x1a0] sm:$0xf] }
 0x196   :  { %v2473_v40 = vpop.f32.mrf.mxu2  ;;  %v2349_v24 = vpop.f32.mrf.mxu0 }
 0x197   :  { %v2536_v41 = vpop.f32.mrf.mxu3  ;;  %v2474_v45 = vadd.f32 %v2473_v40, %v2411_v28  ;;  %v2412_v46 = vpop.f32.mrf.mxu1  ;;  %v2350_v47 = vadd.f32 %v2349_v24, %v5241_v15  ;;  %v3311_v15 = vld [vmem:[%s6279_s0 + $0x128] sm:$0xf]  ;;  %v3369_v28 = vld [vmem:[%s6279_s0 + $0x1e0] sm:$0xf0]  ;;  %v3377_v40 = vld [vmem:[%s6279_s0 + $0x1e8] sm:$0xf0]  ;;  %v3368_v24 = vor.u32 %v4353_v33, %v3367_v32 }
 0x198   :  { %v3312_v7 = vor.u32 %v4338_v60, %v3311_v15  ;;  %v3380_v56 = vor.u32 %v4346_v57, %v3377_v40 }
 0x199   :  { %v5619_v48 = vadd.f32 %v2536_v41, %v2474_v45  ;;  %v2413_v49 = vadd.f32 %v2412_v46, %v2350_v47  ;;  %v3372_v46 = vor.u32 %v4345_v35, %v3369_v28 }
 0x19e   :  { %v2475_v2 = vpop.f32.mrf.mxu2  ;;  %v2352_v6 = vpop.f32.mrf.mxu0 }
 0x19f   :  { %v2538_v55 = vpop.f32.mrf.mxu3  ;;  %v2476_v42 = vadd.f32 %v2475_v2, %v2413_v49  ;;  %v2415_v20 = vpop.f32.mrf.mxu1  ;;  %v2353_v10 = vadd.f32 %v2352_v6, %v5247_v26  ;;  %v4369_v6 = vld [vmem:[%s6279_s0 + $0x25c] sm:$0xf0] }
 0x1a1   :  { %v5646_v43 = vadd.f32 %v2538_v55, %v2476_v42  ;;  %v2416_v13 = vadd.f32 %v2415_v20, %v2353_v10  ;;  %2588 = vmatmul.bf16.gmra.mxu0 %v3304_v3  ;;  %v4361_v10 = vld [vmem:[%s6279_s0 + $0x224] sm:$0xf] }
 0x1a2   :  { %2651 = vmatmul.bf16.gmra.mxu1 %v3308_v4 }
 0x1a3   :  { %2714 = vmatmul.bf16.gmra.mxu2 %v3312_v7  ;;  %v4568_v7 = vld [vmem:[%s6277_s1 + $0x398] sm:$0xff] }
 0x1a4   :  { %2777 = vmatmul.bf16.gmra.mxu3 %v3316_v9  ;;  %v4576_v9 = vld [vmem:[%s6277_s1 + $0x3d8] sm:$0xff]  ;;  %2952 = vmatpush.bf16.msrb.mxu2 %v4568_v7 }
 0x1a5   :  { %3015 = vmatpush.bf16.msrb.mxu3 %v4576_v9 }
 0x1a6   :  { %v2478_v11 = vpop.f32.mrf.mxu2  ;;  %v2354_v21 = vpop.f32.mrf.mxu0 }
 0x1a7   :  { %v2541_v18 = vpop.f32.mrf.mxu3  ;;  %v2479_v19 = vadd.f32 %v2478_v11, %v2416_v13  ;;  %v2417_v22 = vpop.f32.mrf.mxu1  ;;  %v2355_v25 = vadd.f32 %v2354_v21, %v5283_v53  ;;  %v4561_v53 = vld [vmem:[%s6277_s1 + $0x360] sm:$0xff]  ;;  %v4370_v11 = vld [vmem:[%s6279_s0 + $0x264] sm:$0xf0] }
 0x1a8   :  { %2888 = vmatpush.bf16.msrb.mxu1 %v4561_v53  ;;  %v3433_v13 = vld [vmem:[%s6279_s0 + $0x260] sm:$0xf0]  ;;  %v3440_v33 = vor.u32 %v4370_v11, %v3439_v17  ;;  %v4575_v17 = vld [vmem:[%s6277_s1 + $0x3d0] sm:$0xff] }
 0x1a9   :  { %v5652_v26 = vadd.f32 %v2541_v18, %v2479_v19  ;;  %v2418_v31 = vadd.f32 %v2417_v22, %v2355_v25  ;;  %v4362_v18 = vld [vmem:[%s6279_s0 + $0x22c] sm:$0xf]  ;;  %v3436_v50 = vor.u32 %v4361_v10, %v3433_v13  ;;  %v4567_v13 = vld [vmem:[%s6277_s1 + $0x390] sm:$0xff]  ;;  %3016 = vmatpush.bf16.msrb.mxu3 %v4575_v17  ;;  %v3631_v17 = vld [vmem:[%s6279_s0 + $0x3a8] sm:$0xf] }
 0x1aa   :  { %v3441_v19 = vld [vmem:[%s6279_s0 + $0x268] sm:$0xf0]  ;;  %v4551_v11 = vld [vmem:[%s6277_s1 + $0x310] sm:$0xff]  ;;  %2953 = vmatpush.bf16.msrb.mxu2 %v4567_v13  ;;  %v3625_v13 = vld [vmem:[%s6279_s0 + $0x3e0] sm:$0xf0] }
 0x1ab   :  { %v3444_v53 = vor.u32 %v4362_v18, %v3441_v19 }
 0x1ac   :  { %2889 = vmatpush.bf16.msrb.mxu1 %v4560_v36  ;;  %v4402_v36 = vld [vmem:[%s6279_s0 + $0x364] sm:$0xf0] }
 0x1ae   :  { %v2480_v41 = vpop.f32.mrf.mxu2  ;;  %v2357_v49 = vpop.f32.mrf.mxu0 }
 0x1af   :  { %v2543_v45 = vpop.f32.mrf.mxu3  ;;  %v2481_v47 = vadd.f32 %v2480_v41, %v2418_v31  ;;  %v2420_v51 = vpop.f32.mrf.mxu1  ;;  %v2358_v59 = vadd.f32 %v2357_v49, %v5286_v63  ;;  %v3431_v63 = vld [vmem:[%s6279_s0 + $0x220] sm:$0xf] }
 0x1b0   :  { %v3432_v25 = vor.u32 %v4369_v6, %v3431_v63  ;;  %v3495_v49 = vld [vmem:[%s6279_s0 + $0x2a0] sm:$0xf] }
 0x1b1   :  { %v5688_v15 = vadd.f32 %v2543_v45, %v2481_v47  ;;  %v2421_v60 = vadd.f32 %v2420_v51, %v2358_v59  ;;  %2593 = vmatmul.bf16.gmra.mxu0 %v3368_v24  ;;  %v4385_v51 = vld [vmem:[%s6279_s0 + $0x2dc] sm:$0xf0]  ;;  %v4386_v59 = vld [vmem:[%s6279_s0 + $0x2e4] sm:$0xf0] }
 0x1b2   :  { %2656 = vmatmul.bf16.gmra.mxu1 %v3372_v46 }
 0x1b3   :  { %2719 = vmatmul.bf16.gmra.mxu2 %v3376_v52  ;;  %v4377_v52 = vld [vmem:[%s6279_s0 + $0x2a4] sm:$0xf] }
 0x1b4   :  { %2782 = vmatmul.bf16.gmra.mxu3 %v3380_v56  ;;  %v3497_v56 = vld [vmem:[%s6279_s0 + $0x2e0] sm:$0xf0] }
 0x1b6   :  { %v2483_v62 = vpop.f32.mrf.mxu2  ;;  %v2359_v55 = vpop.f32.mrf.mxu0 }
 0x1b7   :  { %v2546_v0 = vpop.f32.mrf.mxu3  ;;  %v2484_v2 = vadd.f32 %v2483_v62, %v2421_v60  ;;  %v2422_v3 = vpop.f32.mrf.mxu1  ;;  %v2360_v4 = vadd.f32 %v2359_v55, %v5322_v29  ;;  %v4552_v29 = vld [vmem:[%s6277_s1 + $0x318] sm:$0xff]  ;;  %v4378_v60 = vld [vmem:[%s6279_s0 + $0x2ac] sm:$0xf]  ;;  %v3496_v55 = vor.u32 %v4385_v51, %v3495_v49 }
 0x1b8   :  { %2826 = vmatpush.bf16.msrb.mxu0 %v4552_v29  ;;  %v3505_v62 = vld [vmem:[%s6279_s0 + $0x2e8] sm:$0xf0] }
 0x1b9   :  { %v5691_v42 = vadd.f32 %v2546_v0, %v2484_v2  ;;  %v2423_v20 = vadd.f32 %v2422_v3, %v2360_v4  ;;  %v3500_v3 = vor.u32 %v4377_v52, %v3497_v56  ;;  %v3508_v7 = vor.u32 %v4378_v60, %v3505_v62 }
 0x1bc   :  { %2827 = vmatpush.bf16.msrb.mxu0 %v4551_v11  ;;  %v4418_v11 = vld [vmem:[%s6279_s0 + $0x3e4] sm:$0xf0] }
 0x1be   :  { %v2485_v21 = vpop.f32.mrf.mxu2  ;;  %v2362_v31 = vpop.f32.mrf.mxu0 }
 0x1bf   :  { %v2548_v22 = vpop.f32.mrf.mxu3  ;;  %v2486_v30 = vadd.f32 %v2485_v21, %v2423_v20  ;;  %v2425_v32 = vpop.f32.mrf.mxu1  ;;  %v2363_v35 = vadd.f32 %v2362_v31, %v5328_v38 }
 0x1c1   :  { %v5727_v28 = vadd.f32 %v2548_v22, %v2486_v30  ;;  %v2426_v39 = vadd.f32 %v2425_v32, %v2363_v35  ;;  %2598 = vmatmul.bf16.gmra.mxu0 %v3432_v25  ;;  %v3559_v32 = vld [vmem:[%s6279_s0 + $0x320] sm:$0xf]  ;;  %v3561_v35 = vld [vmem:[%s6279_s0 + $0x360] sm:$0xf0] }
 0x1c2   :  { %2661 = vmatmul.bf16.gmra.mxu1 %v3436_v50 }
 0x1c3   :  { %2724 = vmatmul.bf16.gmra.mxu2 %v3440_v33  ;;  %v4401_v33 = vld [vmem:[%s6279_s0 + $0x35c] sm:$0xf0] }
 0x1c4   :  { %2787 = vmatmul.bf16.gmra.mxu3 %v3444_v53  ;;  %v4393_v53 = vld [vmem:[%s6279_s0 + $0x324] sm:$0xf] }
 0x1c6   :  { %v2488_v57 = vpop.f32.mrf.mxu2  ;;  %v2364_v45 = vpop.f32.mrf.mxu0 }
 0x1c7   :  { %v2551_v40 = vpop.f32.mrf.mxu3  ;;  %v2489_v41 = vadd.f32 %v2488_v57, %v2426_v39  ;;  %v2427_v24 = vpop.f32.mrf.mxu1  ;;  %v2365_v46 = vadd.f32 %v2364_v45, %v5355_v1  ;;  %v3503_v1 = vld [vmem:[%s6279_s0 + $0x2a8] sm:$0xf]  ;;  %v4394_v39 = vld [vmem:[%s6279_s0 + $0x32c] sm:$0xf]  ;;  %v3560_v45 = vor.u32 %v4401_v33, %v3559_v32  ;;  %v3632_v33 = vor.u32 %v4418_v11, %v3631_v17 }
 0x1c8   :  { %v3504_v20 = vor.u32 %v4386_v59, %v3503_v1  ;;  %v3569_v57 = vld [vmem:[%s6279_s0 + $0x368] sm:$0xf0] }
 0x1c9   :  { %v5733_v38 = vadd.f32 %v2551_v40, %v2489_v41  ;;  %v2428_v47 = vadd.f32 %v2427_v24, %v2365_v46  ;;  %v3564_v24 = vor.u32 %v4393_v53, %v3561_v35  ;;  %v3572_v52 = vor.u32 %v4394_v39, %v3569_v57 }
 0x1ce   :  { %v2490_v0 = vpop.f32.mrf.mxu2  ;;  %v2367_v63 = vpop.f32.mrf.mxu0 }
 0x1cf   :  { %v2553_v2 = vpop.f32.mrf.mxu3  ;;  %v2491_v4 = vadd.f32 %v2490_v0, %v2428_v47  ;;  %v2430_v6 = vpop.f32.mrf.mxu1  ;;  %v2368_v9 = vadd.f32 %v2367_v63, %v5370_v16  ;;  %v4559_v16 = vld [vmem:[%s6277_s1 + $0x350] sm:$0xff]  ;;  %v4417_v63 = vld [vmem:[%s6279_s0 + $0x3dc] sm:$0xf0] }
 0x1d0   :  { %2890 = vmatpush.bf16.msrb.mxu1 %v4559_v16  ;;  %v4410_v16 = vld [vmem:[%s6279_s0 + $0x3ac] sm:$0xf] }
 0x1d1   :  { %v5760_v29 = vadd.f32 %v2553_v2, %v2491_v4  ;;  %v2431_v10 = vadd.f32 %v2430_v6, %v2368_v9  ;;  %2603 = vmatmul.bf16.gmra.mxu0 %v3496_v55  ;;  %v4566_v6 = vld [vmem:[%s6277_s1 + $0x388] sm:$0xff] }
 0x1d2   :  { %2666 = vmatmul.bf16.gmra.mxu1 %v3500_v3  ;;  %v4558_v9 = vld [vmem:[%s6277_s1 + $0x348] sm:$0xff]  ;;  %2954 = vmatpush.bf16.msrb.mxu2 %v4566_v6 }
 0x1d3   :  { %2729 = vmatmul.bf16.gmra.mxu2 %v3504_v20 }
 0x1d4   :  { %2792 = vmatmul.bf16.gmra.mxu3 %v3508_v7  ;;  %v4574_v7 = vld [vmem:[%s6277_s1 + $0x3c8] sm:$0xff]  ;;  %2891 = vmatpush.bf16.msrb.mxu1 %v4558_v9 }
 0x1d5   :  { %3017 = vmatpush.bf16.msrb.mxu3 %v4574_v7  ;;  %v4573_v7 = vld [vmem:[%s6277_s1 + $0x3c0] sm:$0xff] }
 0x1d6   :  { %v2493_v18 = vpop.f32.mrf.mxu2  ;;  %v2369_v22 = vpop.f32.mrf.mxu0 }
 0x1d7   :  { %v2556_v19 = vpop.f32.mrf.mxu3  ;;  %v2494_v21 = vadd.f32 %v2493_v18, %v2431_v10  ;;  %v2432_v25 = vpop.f32.mrf.mxu1  ;;  %v2370_v50 = vadd.f32 %v2369_v22, %v5397_v44  ;;  %v3567_v44 = vld [vmem:[%s6279_s0 + $0x328] sm:$0xf]  ;;  %v4409_v10 = vld [vmem:[%s6279_s0 + $0x3a4] sm:$0xf]  ;;  %v3633_v18 = vld [vmem:[%s6279_s0 + $0x3e8] sm:$0xf0] }
 0x1d8   :  { %v3568_v51 = vor.u32 %v4402_v36, %v3567_v44  ;;  %v3636_v53 = vor.u32 %v4410_v16, %v3633_v18 }
 0x1d9   :  { %v5775_v30 = vadd.f32 %v2556_v19, %v2494_v21  ;;  %v2433_v31 = vadd.f32 %v2432_v25, %v2370_v50  ;;  %v3628_v25 = vor.u32 %v4409_v10, %v3625_v13  ;;  %v4557_v10 = vld [vmem:[%s6277_s1 + $0x340] sm:$0xff]  ;;  %3018 = vmatpush.bf16.msrb.mxu3 %v4573_v7 }
 0x1da   :  { %2892 = vmatpush.bf16.msrb.mxu1 %v4557_v10 }
 0x1de   :  { %v2495_v40 = vpop.f32.mrf.mxu2  ;;  %v2372_v47 = vpop.f32.mrf.mxu0 }
 0x1df   :  { %v2558_v41 = vpop.f32.mrf.mxu3  ;;  %v2496_v46 = vadd.f32 %v2495_v40, %v2433_v31  ;;  %v2435_v49 = vpop.f32.mrf.mxu1  ;;  %v2373_v56 = vadd.f32 %v2372_v47, %v5400_v54  ;;  %v3623_v54 = vld [vmem:[%s6279_s0 + $0x3a0] sm:$0xf] }
 0x1e0   :  { %v3624_v22 = vor.u32 %v4417_v63, %v3623_v54  ;;  %v4565_v47 = vld [vmem:[%s6277_s1 + $0x380] sm:$0xff] }
 0x1e1   :  { %v5802_v1 = vadd.f32 %v2558_v41, %v2496_v46  ;;  %v2436_v59 = vadd.f32 %v2435_v49, %v2373_v56  ;;  %2608 = vmatmul.bf16.gmra.mxu0 %v3560_v45  ;;  %v3687_v46 = vld [vmem:[%s6279_s0 + $0x420] sm:$0xf]  ;;  %v4425_v49 = vld [vmem:[%s6279_s0 + $0x424] sm:$0xf]  ;;  %v4434_v56 = vld [vmem:[%s6279_s0 + $0x464] sm:$0xf0]  ;;  %2955 = vmatpush.bf16.msrb.mxu2 %v4565_v47 }
 0x1e2   :  { %2671 = vmatmul.bf16.gmra.mxu1 %v3564_v24 }
 0x1e3   :  { %2734 = vmatmul.bf16.gmra.mxu2 %v3568_v51  ;;  %v3689_v51 = vld [vmem:[%s6279_s0 + $0x460] sm:$0xf0] }
 0x1e4   :  { %2797 = vmatmul.bf16.gmra.mxu3 %v3572_v52  ;;  %v3695_v52 = vld [vmem:[%s6279_s0 + $0x428] sm:$0xf] }
 0x1e5   :  { %v3696_v63 = vor.u32 %v4434_v56, %v3695_v52 }
 0x1e6   :  { %v2498_v60 = vpop.f32.mrf.mxu2  ;;  %v2374_v2 = vpop.f32.mrf.mxu0 }
 0x1e7   :  { %v2561_v62 = vpop.f32.mrf.mxu3  ;;  %v2499_v0 = vadd.f32 %v2498_v60, %v2436_v59  ;;  %v2437_v55 = vpop.f32.mrf.mxu1  ;;  %v2375_v3 = vadd.f32 %v2374_v2, %v5439_v23  ;;  %v4550_v23 = vld [vmem:[%s6277_s1 + $0x308] sm:$0xff] }
 0x1e8   :  { %2828 = vmatpush.bf16.msrb.mxu0 %v4550_v23  ;;  %v4426_v59 = vld [vmem:[%s6279_s0 + $0x42c] sm:$0xf]  ;;  %v4549_v23 = vld [vmem:[%s6277_s1 + $0x300] sm:$0xff] }
 0x1e9   :  { %v5805_v4 = vadd.f32 %v2561_v62, %v2499_v0  ;;  %v2438_v20 = vadd.f32 %v2437_v55, %v2375_v3  ;;  %v3697_v60 = vld [vmem:[%s6279_s0 + $0x468] sm:$0xf0]  ;;  %v3692_v55 = vor.u32 %v4425_v49, %v3689_v51 }
 0x1ea   :  { %v3700_v6 = vor.u32 %v4426_v59, %v3697_v60 }
 0x1ec   :  { %2829 = vmatpush.bf16.msrb.mxu0 %v4549_v23 }
 0x1ee   :  { %v2500_v19 = vpop.f32.mrf.mxu2  ;;  %v2377_v31 = vpop.f32.mrf.mxu0 }
 0x1ef   :  { %v2563_v21 = vpop.f32.mrf.mxu3  ;;  %v2501_v50 = vadd.f32 %v2500_v19, %v2438_v20  ;;  %v2440_v32 = vpop.f32.mrf.mxu1  ;;  %v2378_v35 = vadd.f32 %v2377_v31, %v5441_v34  ;;  %v4433_v34 = vld [vmem:[%s6279_s0 + $0x45c] sm:$0xf0]  ;;  %v3753_v31 = vld [vmem:[%s6279_s0 + $0x4e0] sm:$0xf0] }
 0x1f0   :  { %v3688_v2 = vor.u32 %v4433_v34, %v3687_v46 }
 0x1f1   :  { %v5844_v44 = vadd.f32 %v2563_v21, %v2501_v50  ;;  %v2441_v36 = vadd.f32 %v2440_v32, %v2378_v35  ;;  %2613 = vmatmul.bf16.gmra.mxu0 %v3624_v22  ;;  %v3751_v22 = vld [vmem:[%s6279_s0 + $0x4a0] sm:$0xf]  ;;  %v4441_v50 = vld [vmem:[%s6279_s0 + $0x4a4] sm:$0xf]  ;;  %v4450_v32 = vld [vmem:[%s6279_s0 + $0x4e4] sm:$0xf0] }
 0x1f2   :  { %2676 = vmatmul.bf16.gmra.mxu1 %v3628_v25  ;;  %v4449_v25 = vld [vmem:[%s6279_s0 + $0x4dc] sm:$0xf0] }
 0x1f3   :  { %2739 = vmatmul.bf16.gmra.mxu2 %v3632_v33  ;;  %v4442_v33 = vld [vmem:[%s6279_s0 + $0x4ac] sm:$0xf] }
 0x1f4   :  { %2802 = vmatmul.bf16.gmra.mxu3 %v3636_v53  ;;  %v3761_v53 = vld [vmem:[%s6279_s0 + $0x4e8] sm:$0xf0] }
 0x1f5   :  { %v3764_v34 = vor.u32 %v4442_v33, %v3761_v53 }
 0x1f6   :  { %v2503_v39 = vpop.f32.mrf.mxu2  ;;  %v2379_v41 = vpop.f32.mrf.mxu0 }
 0x1f7   :  { %v2566_v57 = vpop.f32.mrf.mxu3  ;;  %v2504_v40 = vadd.f32 %v2503_v39, %v2441_v36  ;;  %v2442_v45 = vpop.f32.mrf.mxu1  ;;  %v3752_v39 = vor.u32 %v4449_v25, %v3751_v22 }
 0x1f9   :  { %v5846_v24 = vadd.f32 %v2566_v57, %v2504_v40  ;;  %v3756_v57 = vor.u32 %v4441_v50, %v3753_v31 }
 0x1fe   :  { %v2505_v62 = vpop.f32.mrf.mxu2  ;;  %v2579_v3 = vpop.f32.mrf.mxu0 }
 0x1ff   :  { %v2568_v0 = vpop.f32.mrf.mxu3  ;;  %v2642_v54 = vpop.f32.mrf.mxu1  ;;  %v2580_v20 = vadd.f32 %v2579_v3, %v5481_v8 }
 0x200   :  { %v178_v0 = vld [vmem:[%s6279_s0 + $0x520] sm:$0x11] }
 0x201   :  { %v2643_v9 = vadd.f32 %v2642_v54, %v2580_v20  ;;  %2618 = vmatmul.bf16.gmra.mxu0 %v3688_v2  ;;  %v938_v54 = vunpack.c.l.b16 %v178_v0 }
 0x202   :  { %2681 = vmatmul.bf16.gmra.mxu1 %v3692_v55 }
 0x203   :  { %2744 = vmatmul.bf16.gmra.mxu2 %v3696_v63  ;;  %v939_v63 = vunpack.c.h.b16 %v178_v0 }
 0x204   :  { %2807 = vmatmul.bf16.gmra.mxu3 %v3700_v6 }
 0x205   :  { %v1115_v10 = vpack.c.b16 %v939_v63, %v939_v63 }
 0x206   :  { %v2705_v8 = vpop.f32.mrf.mxu2  ;;  %v2581_v11 = vpop.f32.mrf.mxu0 }
 0x207   :  { %v2768_v13 = vpop.f32.mrf.mxu3  ;;  %v2706_v17 = vadd.f32 %v2705_v8, %v2643_v9  ;;  %v2644_v16 = vpop.f32.mrf.mxu1  ;;  %v2582_v18 = vadd.f32 %v2581_v11, %v5508_v37  ;;  %v3759_v37 = vld [vmem:[%s6279_s0 + $0x4a8] sm:$0xf]  ;;  %v1114_v9 = vpack.c.b16 %v938_v54, %v938_v54 }
 0x208   :  { %v3760_v46 = vor.u32 %v4450_v32, %v3759_v37 }
 0x209   :  { %v5886_v19 = vadd.f32 %v2768_v13, %v2706_v17  ;;  %v2645_v21 = vadd.f32 %v2644_v16, %v2582_v18 }
 0x20e   :  { %v2707_v35 = vpop.f32.mrf.mxu2  ;;  %v2584_v41 = vpop.f32.mrf.mxu0 }
 0x20f   :  { %v2770_v36 = vpop.f32.mrf.mxu3  ;;  %v2708_v40 = vadd.f32 %v2707_v35, %v2645_v21  ;;  %v2647_v45 = vpop.f32.mrf.mxu1  ;;  %v2585_v47 = vadd.f32 %v2584_v41, %v5526_v58  ;;  %v179_v58 = vld [vmem:[%s6279_s0 + $0x528] sm:$0x11]  ;;  %v4307_v35 = vld [vmem:[%s6279_s0 + $0x6c] sm:$0xf0]  ;;  %v3201_v41 = vld [vmem:[%s6279_s0 + $0x78] sm:$0xf0] }
 0x210   :  { %v940_v6 = vunpack.c.l.b16 %v179_v58  ;;  %v941_v20 = vunpack.c.h.b16 %v179_v58 }
 0x211   :  { %v5913_v49 = vadd.f32 %v2770_v36, %v2708_v40  ;;  %v2648_v51 = vadd.f32 %v2647_v45, %v2585_v47  ;;  %2623 = vmatmul.bf16.gmra.mxu0 %v3752_v39  ;;  %v4299_v36 = vld [vmem:[%s6279_s0 + $0x34] sm:$0xf]  ;;  %v4300_v40 = vld [vmem:[%s6279_s0 + $0x3c] sm:$0xf] }
 0x212   :  { %2686 = vmatmul.bf16.gmra.mxu1 %v3756_v57  ;;  %v1116_v11 = vpack.c.b16 %v940_v6, %v940_v6  ;;  %v3193_v39 = vld [vmem:[%s6279_s0 + $0x70] sm:$0xf0]  ;;  %v4308_v57 = vld [vmem:[%s6279_s0 + $0x74] sm:$0xf0] }
 0x213   :  { %2749 = vmatmul.bf16.gmra.mxu2 %v3760_v46  ;;  %v3196_v47 = vor.u32 %v4299_v36, %v3193_v39 }
 0x214   :  { %2812 = vmatmul.bf16.gmra.mxu3 %v3764_v34 }
 0x216   :  { %v2710_v52 = vpop.f32.mrf.mxu2  ;;  %v2586_v60 = vpop.f32.mrf.mxu0 }
 0x217   :  { %v2773_v56 = vpop.f32.mrf.mxu3  ;;  %v2711_v59 = vadd.f32 %v2710_v52, %v2648_v51  ;;  %v2649_v62 = vpop.f32.mrf.mxu1  ;;  %v2587_v2 = vadd.f32 %v2586_v60, %v5532_v14  ;;  %v1117_v14 = vpack.c.b16 %v941_v20, %v941_v20  ;;  %v3204_v60 = vor.u32 %v4300_v40, %v3201_v41 }
 0x219   :  { %v5922_v55 = vadd.f32 %v2773_v56, %v2711_v59  ;;  %v2650_v3 = vadd.f32 %v2649_v62, %v2587_v2 }
 0x21e   :  { %v2712_v7 = vpop.f32.mrf.mxu2  ;;  %v2589_v13 = vpop.f32.mrf.mxu0 }
 0x21f   :  { %v2775_v23 = vpop.f32.mrf.mxu3  ;;  %v2713_v8 = vadd.f32 %v2712_v7, %v2650_v3  ;;  %v2652_v17 = vpop.f32.mrf.mxu1  ;;  %v2590_v16 = vadd.f32 %v2589_v13, %v5535_v27  ;;  %v3191_v27 = vld [vmem:[%s6279_s0 + $0x30] sm:$0xf]  ;;  %v4324_v13 = vld [vmem:[%s6279_s0 + $0xf4] sm:$0xf0] }
 0x220   :  { %v3192_v34 = vor.u32 %v4307_v35, %v3191_v27 }
 0x221   :  { %v5925_v18 = vadd.f32 %v2775_v23, %v2713_v8  ;;  %v2653_v21 = vadd.f32 %v2652_v17, %v2590_v16  ;;  %2628 = vmatmul.bf16.gmra.mxu0 %v1114_v9  ;;  %v4323_v9 = vld [vmem:[%s6279_s0 + $0xec] sm:$0xf0]  ;;  %v3257_v8 = vld [vmem:[%s6279_s0 + $0xf0] sm:$0xf0]  ;;  %v4316_v17 = vld [vmem:[%s6279_s0 + $0xbc] sm:$0xf] }
 0x222   :  { %2691 = vmatmul.bf16.gmra.mxu1 %v1115_v10  ;;  %v4315_v10 = vld [vmem:[%s6279_s0 + $0xb4] sm:$0xf] }
 0x223   :  { %2754 = vmatmul.bf16.gmra.mxu2 %v1116_v11  ;;  %v3265_v11 = vld [vmem:[%s6279_s0 + $0xf8] sm:$0xf0] }
 0x224   :  { %2817 = vmatmul.bf16.gmra.mxu3 %v1117_v14 }
 0x226   :  { %v2715_v22 = vpop.f32.mrf.mxu2  ;;  %v2591_v31 = vpop.f32.mrf.mxu0 }
 0x227   :  { %v2778_v25 = vpop.f32.mrf.mxu3  ;;  %v2716_v50 = vadd.f32 %v2715_v22, %v2653_v21  ;;  %v2654_v37 = vpop.f32.mrf.mxu1  ;;  %v2592_v32 = vadd.f32 %v2591_v31, %v5574_v61  ;;  %v3199_v61 = vld [vmem:[%s6279_s0 + $0x38] sm:$0xf]  ;;  %v3260_v22 = vor.u32 %v4315_v10, %v3257_v8 }
 0x228   :  { %v3200_v59 = vor.u32 %v4308_v57, %v3199_v61 }
 0x229   :  { %v5928_v33 = vadd.f32 %v2778_v25, %v2716_v50  ;;  %v2655_v53 = vadd.f32 %v2654_v37, %v2592_v32  ;;  %v3268_v32 = vor.u32 %v4316_v17, %v3265_v11 }
 0x22e   :  { %v2717_v45 = vpop.f32.mrf.mxu2  ;;  %v2594_v52 = vpop.f32.mrf.mxu0 }
 0x22f   :  { %v2780_v46 = vpop.f32.mrf.mxu3  ;;  %v2718_v51 = vadd.f32 %v2717_v45, %v2655_v53  ;;  %v2657_v56 = vpop.f32.mrf.mxu1  ;;  %v2595_v62 = vadd.f32 %v2594_v52, %v5577_v5  ;;  %v3255_v5 = vld [vmem:[%s6279_s0 + $0xb0] sm:$0xf]  ;;  %v4340_v52 = vld [vmem:[%s6279_s0 + $0x174] sm:$0xf0] }
 0x230   :  { %v3256_v21 = vor.u32 %v4323_v9, %v3255_v5 }
 0x231   :  { %v5955_v0 = vadd.f32 %v2780_v46, %v2718_v51  ;;  %v2658_v2 = vadd.f32 %v2657_v56, %v2595_v62  ;;  %2830 = vmatmul.bf16.vlgmr.msrb.gmra.mxu0 %v3192_v34  ;;  %v4339_v34 = vld [vmem:[%s6279_s0 + $0x16c] sm:$0xf0]  ;;  %v3321_v51 = vld [vmem:[%s6279_s0 + $0x170] sm:$0xf0]  ;;  %v4332_v56 = vld [vmem:[%s6279_s0 + $0x13c] sm:$0xf] }
 0x232   :  { %2893 = vmatmul.bf16.vlgmr.msrb.gmra.mxu1 %v3196_v47  ;;  %v4331_v47 = vld [vmem:[%s6279_s0 + $0x134] sm:$0xf] }
 0x233   :  { %2956 = vmatmul.bf16.vlgmr.msrb.gmra.mxu2 %v3200_v59  ;;  %v3329_v59 = vld [vmem:[%s6279_s0 + $0x178] sm:$0xf0] }
 0x234   :  { %3019 = vmatmul.bf16.vlgmr.msrb.gmra.mxu3 %v3204_v60 }
 0x236   :  { %v2720_v58 = vpop.f32.mrf.mxu2  ;;  %v2596_v63 = vpop.f32.mrf.mxu0 }
 0x237   :  { %v2783_v3 = vpop.f32.mrf.mxu3  ;;  %v2721_v54 = vadd.f32 %v2720_v58, %v2658_v2  ;;  %v2659_v6 = vpop.f32.mrf.mxu1  ;;  %v2597_v20 = vadd.f32 %v2596_v63, %v5604_v12  ;;  %v3263_v12 = vld [vmem:[%s6279_s0 + $0xb8] sm:$0xf]  ;;  %v3324_v58 = vor.u32 %v4331_v47, %v3321_v51 }
 0x238   :  { %v3264_v37 = vor.u32 %v4324_v13, %v3263_v12 }
 0x239   :  { %v5958_v7 = vadd.f32 %v2783_v3, %v2721_v54  ;;  %v2660_v23 = vadd.f32 %v2659_v6, %v2597_v20  ;;  %v3332_v20 = vor.u32 %v4332_v56, %v3329_v59 }
 0x23e   :  { %v2722_v14 = vpop.f32.mrf.mxu2  ;;  %v2599_v50 = vpop.f32.mrf.mxu0 }
 0x23f   :  { %v2785_v16 = vpop.f32.mrf.mxu3  ;;  %v2723_v25 = vadd.f32 %v2722_v14, %v2660_v23  ;;  %v2662_v31 = vpop.f32.mrf.mxu1  ;;  %v2600_v53 = vadd.f32 %v2599_v50, %v5619_v48  ;;  %v3319_v48 = vld [vmem:[%s6279_s0 + $0x130] sm:$0xf]  ;;  %v4356_v50 = vld [vmem:[%s6279_s0 + $0x1f4] sm:$0xf0] }
 0x240   :  { %v3320_v2 = vor.u32 %v4339_v34, %v3319_v48 }
 0x241   :  { %v5985_v27 = vadd.f32 %v2785_v16, %v2723_v25  ;;  %v2663_v35 = vadd.f32 %v2662_v31, %v2600_v53  ;;  %2835 = vmatmul.bf16.gmra.mxu0 %v3256_v21  ;;  %v4355_v21 = vld [vmem:[%s6279_s0 + $0x1ec] sm:$0xf0]  ;;  %v3385_v25 = vld [vmem:[%s6279_s0 + $0x1f0] sm:$0xf0]  ;;  %v4348_v31 = vld [vmem:[%s6279_s0 + $0x1bc] sm:$0xf] }
 0x242   :  { %2898 = vmatmul.bf16.gmra.mxu1 %v3260_v22  ;;  %v4347_v22 = vld [vmem:[%s6279_s0 + $0x1b4] sm:$0xf] }
 0x243   :  { %2961 = vmatmul.bf16.gmra.mxu2 %v3264_v37  ;;  %v3393_v37 = vld [vmem:[%s6279_s0 + $0x1f8] sm:$0xf0] }
 0x244   :  { %3024 = vmatmul.bf16.gmra.mxu3 %v3268_v32 }
 0x246   :  { %v2725_v36 = vpop.f32.mrf.mxu2  ;;  %v2601_v57 = vpop.f32.mrf.mxu0 }
 0x247   :  { %v2788_v39 = vpop.f32.mrf.mxu3  ;;  %v2726_v61 = vadd.f32 %v2725_v36, %v2663_v35  ;;  %v2664_v40 = vpop.f32.mrf.mxu1  ;;  %v2602_v41 = vadd.f32 %v2601_v57, %v5646_v43  ;;  %v3327_v43 = vld [vmem:[%s6279_s0 + $0x138] sm:$0xf]  ;;  %v3388_v36 = vor.u32 %v4347_v22, %v3385_v25 }
 0x248   :  { %v3328_v6 = vor.u32 %v4340_v52, %v3327_v43 }
 0x249   :  { %v5988_v45 = vadd.f32 %v2788_v39, %v2726_v61  ;;  %v2665_v46 = vadd.f32 %v2664_v40, %v2602_v41  ;;  %v3396_v41 = vor.u32 %v4348_v31, %v3393_v37 }
 0x24e   :  { %v2727_v60 = vpop.f32.mrf.mxu2  ;;  %v2604_v54 = vpop.f32.mrf.mxu0 }
 0x24f   :  { %v2790_v62 = vpop.f32.mrf.mxu3  ;;  %v2728_v3 = vadd.f32 %v2727_v60, %v2665_v46  ;;  %v2667_v63 = vpop.f32.mrf.mxu1  ;;  %v2605_v23 = vadd.f32 %v2604_v54, %v5652_v26  ;;  %v3383_v26 = vld [vmem:[%s6279_s0 + $0x1b0] sm:$0xf]  ;;  %v4372_v54 = vld [vmem:[%s6279_s0 + $0x274] sm:$0xf0] }
 0x250   :  { %v3384_v35 = vor.u32 %v4355_v21, %v3383_v26 }
 0x251   :  { %v6015_v5 = vadd.f32 %v2790_v62, %v2728_v3  ;;  %v2668_v9 = vadd.f32 %v2667_v63, %v2605_v23  ;;  %2840 = vmatmul.bf16.gmra.mxu0 %v3320_v2  ;;  %v4371_v2 = vld [vmem:[%s6279_s0 + $0x26c] sm:$0xf0]  ;;  %v3449_v3 = vld [vmem:[%s6279_s0 + $0x270] sm:$0xf0]  ;;  %v4364_v63 = vld [vmem:[%s6279_s0 + $0x23c] sm:$0xf] }
 0x252   :  { %2903 = vmatmul.bf16.gmra.mxu1 %v3324_v58  ;;  %v4363_v58 = vld [vmem:[%s6279_s0 + $0x234] sm:$0xf] }
 0x253   :  { %2966 = vmatmul.bf16.gmra.mxu2 %v3328_v6  ;;  %v3457_v6 = vld [vmem:[%s6279_s0 + $0x278] sm:$0xf0] }
 0x254   :  { %3029 = vmatmul.bf16.gmra.mxu3 %v3332_v20 }
 0x256   :  { %v2730_v10 = vpop.f32.mrf.mxu2  ;;  %v2606_v13 = vpop.f32.mrf.mxu0 }
 0x257   :  { %v2793_v8 = vpop.f32.mrf.mxu3  ;;  %v2731_v12 = vadd.f32 %v2730_v10, %v2668_v9  ;;  %v2669_v17 = vpop.f32.mrf.mxu1  ;;  %v2607_v11 = vadd.f32 %v2606_v13, %v5688_v15  ;;  %v3391_v15 = vld [vmem:[%s6279_s0 + $0x1b8] sm:$0xf]  ;;  %v3452_v10 = vor.u32 %v4363_v58, %v3449_v3 }
 0x258   :  { %v3392_v40 = vor.u32 %v4356_v50, %v3391_v15 }
 0x259   :  { %v6018_v14 = vadd.f32 %v2793_v8, %v2731_v12  ;;  %v2670_v16 = vadd.f32 %v2669_v17, %v2607_v11  ;;  %v3460_v11 = vor.u32 %v4364_v63, %v3457_v6 }
 0x25e   :  { %v2732_v32 = vpop.f32.mrf.mxu2  ;;  %v2609_v61 = vpop.f32.mrf.mxu0 }
 0x25f   :  { %v2795_v53 = vpop.f32.mrf.mxu3  ;;  %v2733_v39 = vadd.f32 %v2732_v32, %v2670_v16  ;;  %v2672_v57 = vpop.f32.mrf.mxu1  ;;  %v2610_v46 = vadd.f32 %v2609_v61, %v5691_v42  ;;  %v3447_v42 = vld [vmem:[%s6279_s0 + $0x230] sm:$0xf]  ;;  %v4388_v61 = vld [vmem:[%s6279_s0 + $0x2f4] sm:$0xf0] }
 0x260   :  { %v3448_v9 = vor.u32 %v4371_v2, %v3447_v42 }
 0x261   :  { %v6045_v48 = vadd.f32 %v2795_v53, %v2733_v39  ;;  %v2673_v34 = vadd.f32 %v2672_v57, %v2610_v46  ;;  %2845 = vmatmul.bf16.gmra.mxu0 %v3384_v35  ;;  %v4387_v35 = vld [vmem:[%s6279_s0 + $0x2ec] sm:$0xf0]  ;;  %v3513_v39 = vld [vmem:[%s6279_s0 + $0x2f0] sm:$0xf0]  ;;  %v4380_v57 = vld [vmem:[%s6279_s0 + $0x2bc] sm:$0xf] }
 0x262   :  { %2908 = vmatmul.bf16.gmra.mxu1 %v3388_v36  ;;  %v4379_v36 = vld [vmem:[%s6279_s0 + $0x2b4] sm:$0xf] }
 0x263   :  { %2971 = vmatmul.bf16.gmra.mxu2 %v3392_v40  ;;  %v3521_v40 = vld [vmem:[%s6279_s0 + $0x2f8] sm:$0xf0] }
 0x264   :  { %3034 = vmatmul.bf16.gmra.mxu3 %v3396_v41 }
 0x266   :  { %v2735_v47 = vpop.f32.mrf.mxu2  ;;  %v2611_v52 = vpop.f32.mrf.mxu0 }
 0x267   :  { %v2798_v51 = vpop.f32.mrf.mxu3  ;;  %v2736_v43 = vadd.f32 %v2735_v47, %v2673_v34  ;;  %v2674_v56 = vpop.f32.mrf.mxu1  ;;  %v2612_v59 = vadd.f32 %v2611_v52, %v5727_v28  ;;  %v3455_v28 = vld [vmem:[%s6279_s0 + $0x238] sm:$0xf]  ;;  %v3516_v47 = vor.u32 %v4379_v36, %v3513_v39 }
 0x268   :  { %v3456_v17 = vor.u32 %v4372_v54, %v3455_v28 }
 0x269   :  { %v6048_v60 = vadd.f32 %v2798_v51, %v2736_v43  ;;  %v2675_v62 = vadd.f32 %v2674_v56, %v2612_v59  ;;  %v3524_v59 = vor.u32 %v4380_v57, %v3521_v40 }
 0x26e   :  { %v2737_v20 = vpop.f32.mrf.mxu2  ;;  %v2614_v12 = vpop.f32.mrf.mxu0 }
 0x26f   :  { %v2800_v23 = vpop.f32.mrf.mxu3  ;;  %v2738_v8 = vadd.f32 %v2737_v20, %v2675_v62  ;;  %v2677_v13 = vpop.f32.mrf.mxu1  ;;  %v2615_v16 = vadd.f32 %v2614_v12, %v5733_v38  ;;  %v3511_v38 = vld [vmem:[%s6279_s0 + $0x2b0] sm:$0xf]  ;;  %v4404_v12 = vld [vmem:[%s6279_s0 + $0x374] sm:$0xf0] }
 0x270   :  { %v3512_v34 = vor.u32 %v4387_v35, %v3511_v38 }
 0x271   :  { %v6075_v26 = vadd.f32 %v2800_v23, %v2738_v8  ;;  %v2678_v21 = vadd.f32 %v2677_v13, %v2615_v16  ;;  %2850 = vmatmul.bf16.gmra.mxu0 %v3448_v9  ;;  %v4403_v9 = vld [vmem:[%s6279_s0 + $0x36c] sm:$0xf0]  ;;  %v3577_v8 = vld [vmem:[%s6279_s0 + $0x370] sm:$0xf0]  ;;  %v4396_v13 = vld [vmem:[%s6279_s0 + $0x33c] sm:$0xf] }
 0x272   :  { %2913 = vmatmul.bf16.gmra.mxu1 %v3452_v10  ;;  %v4395_v10 = vld [vmem:[%s6279_s0 + $0x334] sm:$0xf] }
 0x273   :  { %2976 = vmatmul.bf16.gmra.mxu2 %v3456_v17  ;;  %v3585_v17 = vld [vmem:[%s6279_s0 + $0x378] sm:$0xf0] }
 0x274   :  { %3039 = vmatmul.bf16.gmra.mxu3 %v3460_v11 }
 0x276   :  { %v2740_v22 = vpop.f32.mrf.mxu2  ;;  %v2616_v50 = vpop.f32.mrf.mxu0 }
 0x277   :  { %v2803_v25 = vpop.f32.mrf.mxu3  ;;  %v2741_v15 = vadd.f32 %v2740_v22, %v2678_v21  ;;  %v2679_v31 = vpop.f32.mrf.mxu1  ;;  %v2617_v37 = vadd.f32 %v2616_v50, %v5760_v29  ;;  %v3519_v29 = vld [vmem:[%s6279_s0 + $0x2b8] sm:$0xf]  ;;  %v3580_v22 = vor.u32 %v4395_v10, %v3577_v8 }
 0x278   :  { %v3520_v56 = vor.u32 %v4388_v61, %v3519_v29 }
 0x279   :  { %v6078_v32 = vadd.f32 %v2803_v25, %v2741_v15  ;;  %v2680_v53 = vadd.f32 %v2679_v31, %v2617_v37  ;;  %v3588_v37 = vor.u32 %v4396_v13, %v3585_v17 }
 0x27e   :  { %v2742_v41 = vpop.f32.mrf.mxu2  ;;  %v2619_v43 = vpop.f32.mrf.mxu0 }
 0x27f   :  { %v2805_v46 = vpop.f32.mrf.mxu3  ;;  %v2743_v51 = vadd.f32 %v2742_v41, %v2680_v53  ;;  %v2682_v52 = vpop.f32.mrf.mxu1  ;;  %v2620_v62 = vadd.f32 %v2619_v43, %v5775_v30  ;;  %v3575_v30 = vld [vmem:[%s6279_s0 + $0x330] sm:$0xf]  ;;  %v4420_v43 = vld [vmem:[%s6279_s0 + $0x3f4] sm:$0xf0] }
 0x280   :  { %v3576_v21 = vor.u32 %v4403_v9, %v3575_v30 }
 0x281   :  { %v6105_v42 = vadd.f32 %v2805_v46, %v2743_v51  ;;  %v2683_v2 = vadd.f32 %v2682_v52, %v2620_v62  ;;  %2855 = vmatmul.bf16.gmra.mxu0 %v3512_v34  ;;  %v4419_v34 = vld [vmem:[%s6279_s0 + $0x3ec] sm:$0xf0]  ;;  %v3641_v51 = vld [vmem:[%s6279_s0 + $0x3f0] sm:$0xf0]  ;;  %v4412_v52 = vld [vmem:[%s6279_s0 + $0x3bc] sm:$0xf] }
 0x282   :  { %2918 = vmatmul.bf16.gmra.mxu1 %v3516_v47  ;;  %v4411_v47 = vld [vmem:[%s6279_s0 + $0x3b4] sm:$0xf] }
 0x283   :  { %2981 = vmatmul.bf16.gmra.mxu2 %v3520_v56  ;;  %v3649_v56 = vld [vmem:[%s6279_s0 + $0x3f8] sm:$0xf0] }
 0x284   :  { %3044 = vmatmul.bf16.gmra.mxu3 %v3524_v59 }
 0x286   :  { %v2745_v58 = vpop.f32.mrf.mxu2  ;;  %v2621_v54 = vpop.f32.mrf.mxu0 }
 0x287   :  { %v2808_v3 = vpop.f32.mrf.mxu3  ;;  %v2746_v28 = vadd.f32 %v2745_v58, %v2683_v2  ;;  %v2684_v63 = vpop.f32.mrf.mxu1  ;;  %v2622_v6 = vadd.f32 %v2621_v54, %v5802_v1  ;;  %v3583_v1 = vld [vmem:[%s6279_s0 + $0x338] sm:$0xf]  ;;  %v3644_v58 = vor.u32 %v4411_v47, %v3641_v51 }
 0x288   :  { %v3584_v31 = vor.u32 %v4404_v12, %v3583_v1 }
 0x289   :  { %v6108_v20 = vadd.f32 %v2808_v3, %v2746_v28  ;;  %v2685_v23 = vadd.f32 %v2684_v63, %v2622_v6  ;;  %v3652_v6 = vor.u32 %v4412_v52, %v3649_v56  ;;  %v3769_v56 = vld [vmem:[%s6279_s0 + $0x4f0] sm:$0xf0] }
 0x28e   :  { %v2747_v11 = vpop.f32.mrf.mxu2  ;;  %v2624_v15 = vpop.f32.mrf.mxu0 }
 0x28f   :  { %v2810_v16 = vpop.f32.mrf.mxu3  ;;  %v2748_v25 = vadd.f32 %v2747_v11, %v2685_v23  ;;  %v2687_v50 = vpop.f32.mrf.mxu1  ;;  %v2625_v53 = vadd.f32 %v2624_v15, %v5805_v4  ;;  %v3639_v4 = vld [vmem:[%s6279_s0 + $0x3b0] sm:$0xf]  ;;  %v4428_v15 = vld [vmem:[%s6279_s0 + $0x43c] sm:$0xf] }
 0x290   :  { %v3640_v2 = vor.u32 %v4419_v34, %v3639_v4  ;;  %v3703_v11 = vld [vmem:[%s6279_s0 + $0x430] sm:$0xf] }
 0x291   :  { %v6135_v38 = vadd.f32 %v2810_v16, %v2748_v25  ;;  %v2688_v35 = vadd.f32 %v2687_v50, %v2625_v53  ;;  %2860 = vmatmul.bf16.gmra.mxu0 %v3576_v21  ;;  %v4427_v16 = vld [vmem:[%s6279_s0 + $0x434] sm:$0xf]  ;;  %v4436_v25 = vld [vmem:[%s6279_s0 + $0x474] sm:$0xf0]  ;;  %v3713_v50 = vld [vmem:[%s6279_s0 + $0x478] sm:$0xf0] }
 0x292   :  { %2923 = vmatmul.bf16.gmra.mxu1 %v3580_v22  ;;  %v3705_v21 = vld [vmem:[%s6279_s0 + $0x470] sm:$0xf0]  ;;  %v3711_v22 = vld [vmem:[%s6279_s0 + $0x438] sm:$0xf] }
 0x293   :  { %2986 = vmatmul.bf16.gmra.mxu2 %v3584_v31 }
 0x294   :  { %3049 = vmatmul.bf16.gmra.mxu3 %v3588_v37 }
 0x296   :  { %v2750_v36 = vpop.f32.mrf.mxu2  ;;  %v2626_v61 = vpop.f32.mrf.mxu0 }
 0x297   :  { %v2813_v39 = vpop.f32.mrf.mxu3  ;;  %v2751_v29 = vadd.f32 %v2750_v36, %v2688_v35  ;;  %v2689_v57 = vpop.f32.mrf.mxu1  ;;  %v2627_v40 = vadd.f32 %v2626_v61, %v5844_v44  ;;  %v3647_v44 = vld [vmem:[%s6279_s0 + $0x3b8] sm:$0xf]  ;;  %v3708_v35 = vor.u32 %v4427_v16, %v3705_v21  ;;  %v3716_v61 = vor.u32 %v4428_v15, %v3713_v50  ;;  %v180_v50 = vld [vmem:[%s6279_s0 + $0x530] sm:$0x11] }
 0x298   :  { %v3648_v63 = vor.u32 %v4420_v43, %v3647_v44  ;;  %v3767_v44 = vld [vmem:[%s6279_s0 + $0x4b0] sm:$0xf] }
 0x299   :  { %v6138_v41 = vadd.f32 %v2813_v39, %v2751_v29  ;;  %v2690_v46 = vadd.f32 %v2689_v57, %v2627_v40  ;;  %v3712_v29 = vor.u32 %v4436_v25, %v3711_v22  ;;  %v4451_v43 = vld [vmem:[%s6279_s0 + $0x4ec] sm:$0xf0] }
 0x29e   :  { %v2752_v59 = vpop.f32.mrf.mxu2  ;;  %v2629_v28 = vpop.f32.mrf.mxu0 }
 0x29f   :  { %v2815_v62 = vpop.f32.mrf.mxu3  ;;  %v2753_v3 = vadd.f32 %v2752_v59, %v2690_v46  ;;  %v2692_v54 = vpop.f32.mrf.mxu1  ;;  %v2630_v23 = vadd.f32 %v2629_v28, %v5846_v24  ;;  %v4435_v24 = vld [vmem:[%s6279_s0 + $0x46c] sm:$0xf0]  ;;  %v4452_v59 = vld [vmem:[%s6279_s0 + $0x4f4] sm:$0xf0] }
 0x2a0   :  { %v3704_v53 = vor.u32 %v4435_v24, %v3703_v11 }
 0x2a1   :  { %v6165_v30 = vadd.f32 %v2815_v62, %v2753_v3  ;;  %v2693_v9 = vadd.f32 %v2692_v54, %v2630_v23  ;;  %2865 = vmatmul.bf16.gmra.mxu0 %v3640_v2  ;;  %v4444_v62 = vld [vmem:[%s6279_s0 + $0x4bc] sm:$0xf]  ;;  %v3768_v54 = vor.u32 %v4451_v43, %v3767_v44 }
 0x2a2   :  { %2928 = vmatmul.bf16.gmra.mxu1 %v3644_v58  ;;  %v3777_v2 = vld [vmem:[%s6279_s0 + $0x4f8] sm:$0xf0] }
 0x2a3   :  { %2991 = vmatmul.bf16.gmra.mxu2 %v3648_v63 }
 0x2a4   :  { %3054 = vmatmul.bf16.gmra.mxu3 %v3652_v6 }
 0x2a6   :  { %v2755_v10 = vpop.f32.mrf.mxu2  ;;  %v2631_v12 = vpop.f32.mrf.mxu0 }
 0x2a7   :  { %v2818_v8 = vpop.f32.mrf.mxu3  ;;  %v2756_v1 = vadd.f32 %v2755_v10, %v2693_v9  ;;  %v2694_v13 = vpop.f32.mrf.mxu1 }
 0x2a9   :  { %v6167_v17 = vadd.f32 %v2818_v8, %v2756_v1  ;;  %v3780_v1 = vor.u32 %v4444_v62, %v3777_v2 }
 0x2ae   :  { %v2757_v31 = vpop.f32.mrf.mxu2  ;;  %v2831_v36 = vpop.f32.mrf.mxu0 }
 0x2af   :  { %v2820_v37 = vpop.f32.mrf.mxu3  ;;  %v2894_v39 = vpop.f32.mrf.mxu1  ;;  %v2832_v57 = vadd.f32 %v2831_v36, %v5886_v19  ;;  %v4443_v19 = vld [vmem:[%s6279_s0 + $0x4b4] sm:$0xf]  ;;  %v181_v31 = vld [vmem:[%s6279_s0 + $0x538] sm:$0x11] }
 0x2b0   :  { %v3772_v63 = vor.u32 %v4443_v19, %v3769_v56 }
 0x2b1   :  { %2870 = vmatmul.bf16.gmra.mxu0 %v3704_v53  ;;  %v2895_v47 = vadd.f32 %v2894_v39, %v2832_v57  ;;  %v944_v39 = vunpack.c.l.b16 %v181_v31 }
 0x2b2   :  { %2933 = vmatmul.bf16.gmra.mxu1 %v3708_v35  ;;  %v943_v35 = vunpack.c.h.b16 %v180_v50 }
 0x2b3   :  { %2996 = vmatmul.bf16.gmra.mxu2 %v3712_v29  ;;  %v945_v29 = vunpack.c.h.b16 %v181_v31  ;;  %v1120_v43 = vpack.c.b16 %v944_v39, %v944_v39 }
 0x2b4   :  { %3059 = vmatmul.bf16.gmra.mxu3 %v3716_v61 }
 0x2b6   :  { %v2957_v40 = vpop.f32.mrf.mxu2  ;;  %v2833_v4 = vpop.f32.mrf.mxu0 }
 0x2b7   :  { %v3020_v46 = vpop.f32.mrf.mxu3  ;;  %v2896_v34 = vpop.f32.mrf.mxu1  ;;  %v2834_v51 = vadd.f32 %v2833_v4, %v5913_v49  ;;  %v2958_v52 = vadd.f32 %v2957_v40, %v2895_v47  ;;  %v3775_v49 = vld [vmem:[%s6279_s0 + $0x4b8] sm:$0xf]  ;;  %v1119_v4 = vpack.c.b16 %v943_v35, %v943_v35 }
 0x2b8   :  { %v3776_v8 = vor.u32 %v4452_v59, %v3775_v49 }
 0x2b9   :  { %v2897_v58 = vadd.f32 %v2896_v34, %v2834_v51  ;;  %v3021_v6 = vadd.f32 %v3020_v46, %v2958_v52  ;;  %v1121_v52 = vpack.c.b16 %v945_v29, %v945_v29 }
 0x2bb   :  { %v3074_v13 = vmax.f32 %v3021_v6, 0.0 }
 0x2be   :  { %v2959_v3 = vpop.f32.mrf.mxu2  ;;  %v2836_v9 = vpop.f32.mrf.mxu0 }
 0x2bf   :  { %v3022_v28 = vpop.f32.mrf.mxu3  ;;  %v2960_v23 = vadd.f32 %v2959_v3, %v2897_v58  ;;  %v2899_v10 = vpop.f32.mrf.mxu1  ;;  %v2837_v16 = vadd.f32 %v2836_v9, %v5922_v55  ;;  %v942_v55 = vunpack.c.l.b16 %v180_v50 }
 0x2c1   :  { %v3023_v12 = vadd.f32 %v3022_v28, %v2960_v23  ;;  %2875 = vmatmul.bf16.gmra.mxu0 %v3768_v54  ;;  %v2900_v37 = vadd.f32 %v2899_v10, %v2837_v16  ;;  %v1118_v46 = vpack.c.b16 %v942_v55, %v942_v55 }
 0x2c2   :  { %2938 = vmatmul.bf16.gmra.mxu1 %v3772_v63 }
 0x2c3   :  { %v3075_v11 = vmax.f32 %v3023_v12, 0.0  ;;  %3001 = vmatmul.bf16.gmra.mxu2 %v3776_v8 }
 0x2c4   :  { %3064 = vmatmul.bf16.gmra.mxu3 %v3780_v1 }
 0x2c5   :  { %v4584_v24 = vpack.c.bf16 %v3075_v11, %v3074_v13 }
 0x2c6   :  { %v2962_v21 = vpop.f32.mrf.mxu2  ;;  %v2838_v25 = vpop.f32.mrf.mxu0 }
 0x2c7   :  { %v3025_v22 = vpop.f32.mrf.mxu3  ;;  %4585 = vst [vmem:[%s6280_s3] sm:$0xff] %v4584_v24   ;;  %v2901_v15 = vpop.f32.mrf.mxu1  ;;  %v2839_v53 = vadd.f32 %v2838_v25, %v5925_v18  ;;  %v2963_v36 = vadd.f32 %v2962_v21, %v2900_v37 }
 0x2c9   :  { %v2902_v61 = vadd.f32 %v2901_v15, %v2839_v53  ;;  %v3026_v34 = vadd.f32 %v3025_v22, %v2963_v36 }
 0x2cb   :  { %v3076_v18 = vmax.f32 %v3026_v34, 0.0 }
 0x2ce   :  { %v2964_v57 = vpop.f32.mrf.mxu2  ;;  %v2841_v51 = vpop.f32.mrf.mxu0 }
 0x2cf   :  { %v3027_v40 = vpop.f32.mrf.mxu3  ;;  %v2965_v47 = vadd.f32 %v2964_v57, %v2902_v61  ;;  %v2904_v44 = vpop.f32.mrf.mxu1  ;;  %v2842_v59 = vadd.f32 %v2841_v51, %v5928_v33 }
 0x2d1   :  { %v3028_v19 = vadd.f32 %v3027_v40, %v2965_v47  ;;  %2880 = vmatmul.bf16.gmra.mxu0 %v1118_v46  ;;  %v2905_v28 = vadd.f32 %v2904_v44, %v2842_v59 }
 0x2d2   :  { %2943 = vmatmul.bf16.gmra.mxu1 %v1119_v4 }
 0x2d3   :  { %v3077_v56 = vmax.f32 %v3028_v19, 0.0  ;;  %3006 = vmatmul.bf16.gmra.mxu2 %v1120_v43 }
 0x2d4   :  { %3069 = vmatmul.bf16.gmra.mxu3 %v1121_v52 }
 0x2d5   :  { %v4589_v49 = vpack.c.bf16 %v3077_v56, %v3076_v18 }
 0x2d6   :  { %v2967_v62 = vpop.f32.mrf.mxu2  ;;  %v2843_v58 = vpop.f32.mrf.mxu0 }
 0x2d7   :  { %v3030_v2 = vpop.f32.mrf.mxu3  ;;  %4631 = vst [vmem:[%s6280_s3 + $0x8] sm:$0xff] %v4589_v49   ;;  %v2906_v3 = vpop.f32.mrf.mxu1  ;;  %v2844_v54 = vadd.f32 %v2843_v58, %v5955_v0  ;;  %v2968_v63 = vadd.f32 %v2967_v62, %v2905_v28 }
 0x2d9   :  { %v2907_v6 = vadd.f32 %v2906_v3, %v2844_v54  ;;  %v3031_v10 = vadd.f32 %v3030_v2, %v2968_v63 }
 0x2db   :  { %v3078_v13 = vmax.f32 %v3031_v10, 0.0 }
 0x2de   :  { %v2969_v23 = vpop.f32.mrf.mxu2  ;;  %v2846_v1 = vpop.f32.mrf.mxu0 }
 0x2df   :  { %v3032_v9 = vpop.f32.mrf.mxu3  ;;  %v2970_v8 = vadd.f32 %v2969_v23, %v2907_v6  ;;  %v2909_v12 = vpop.f32.mrf.mxu1  ;;  %v2847_v16 = vadd.f32 %v2846_v1, %v5958_v7 }
 0x2e1   :  { %v3033_v33 = vadd.f32 %v3032_v9, %v2970_v8  ;;  %v2910_v15 = vadd.f32 %v2909_v12, %v2847_v16 }
 0x2e3   :  { %v3079_v11 = vmax.f32 %v3033_v33, 0.0 }
 0x2e5   :  { %v4594_v24 = vpack.c.bf16 %v3079_v11, %v3078_v13 }
 0x2e6   :  { %v2972_v21 = vpop.f32.mrf.mxu2  ;;  %v2848_v0 = vpop.f32.mrf.mxu0 }
 0x2e7   :  { %v3035_v22 = vpop.f32.mrf.mxu3  ;;  %4632 = vst [vmem:[%s6280_s3 + $0x10] sm:$0xff] %v4594_v24   ;;  %v2911_v25 = vpop.f32.mrf.mxu1  ;;  %v2849_v50 = vadd.f32 %v2848_v0, %v5985_v27  ;;  %v2973_v31 = vadd.f32 %v2972_v21, %v2910_v15 }
 0x2e9   :  { %v2912_v37 = vadd.f32 %v2911_v25, %v2849_v50  ;;  %v3036_v35 = vadd.f32 %v3035_v22, %v2973_v31 }
 0x2eb   :  { %v3080_v61 = vmax.f32 %v3036_v35, 0.0 }
 0x2ee   :  { %v2974_v53 = vpop.f32.mrf.mxu2  ;;  %v2851_v39 = vpop.f32.mrf.mxu0 }
 0x2ef   :  { %v3037_v55 = vpop.f32.mrf.mxu3  ;;  %v2975_v36 = vadd.f32 %v2974_v53, %v2912_v37  ;;  %v2914_v29 = vpop.f32.mrf.mxu1  ;;  %v2852_v46 = vadd.f32 %v2851_v39, %v5988_v45 }
 0x2f1   :  { %v3038_v7 = vadd.f32 %v3037_v55, %v2975_v36  ;;  %v2915_v51 = vadd.f32 %v2914_v29, %v2852_v46 }
 0x2f3   :  { %v3081_v57 = vmax.f32 %v3038_v7, 0.0 }
 0x2f5   :  { %v4599_v40 = vpack.c.bf16 %v3081_v57, %v3080_v61 }
 0x2f6   :  { %v2977_v4 = vpop.f32.mrf.mxu2  ;;  %v2853_v27 = vpop.f32.mrf.mxu0 }
 0x2f7   :  { %v3040_v34 = vpop.f32.mrf.mxu3  ;;  %4633 = vst [vmem:[%s6280_s3 + $0x18] sm:$0xff] %v4599_v40   ;;  %v2916_v47 = vpop.f32.mrf.mxu1  ;;  %v2854_v44 = vadd.f32 %v2853_v27, %v6015_v5  ;;  %v2978_v43 = vadd.f32 %v2977_v4, %v2915_v51 }
 0x2f9   :  { %v2917_v52 = vadd.f32 %v2916_v47, %v2854_v44  ;;  %v3041_v56 = vadd.f32 %v3040_v34, %v2978_v43 }
 0x2fb   :  { %v3082_v2 = vmax.f32 %v3041_v56, 0.0 }
 0x2fe   :  { %v2979_v19 = vpop.f32.mrf.mxu2  ;;  %v2856_v59 = vpop.f32.mrf.mxu0 }
 0x2ff   :  { %v3042_v18 = vpop.f32.mrf.mxu3  ;;  %v2980_v49 = vadd.f32 %v2979_v19, %v2917_v52  ;;  %v2919_v62 = vpop.f32.mrf.mxu1  ;;  %v2857_v28 = vadd.f32 %v2856_v59, %v6018_v14 }
 0x301   :  { %v3043_v45 = vadd.f32 %v3042_v18, %v2980_v49  ;;  %v2920_v23 = vadd.f32 %v2919_v62, %v2857_v28 }
 0x303   :  { %v3083_v58 = vmax.f32 %v3043_v45, 0.0 }
 0x305   :  { %v4604_v3 = vpack.c.bf16 %v3083_v58, %v3082_v2 }
 0x306   :  { %v2982_v54 = vpop.f32.mrf.mxu2  ;;  %v2858_v5 = vpop.f32.mrf.mxu0 }
 0x307   :  { %v3045_v63 = vpop.f32.mrf.mxu3  ;;  %4634 = vst [vmem:[%s6280_s3 + $0x20] sm:$0xff] %v4604_v3   ;;  %v2921_v6 = vpop.f32.mrf.mxu1  ;;  %v2859_v9 = vadd.f32 %v2858_v5, %v6045_v48  ;;  %v2983_v10 = vadd.f32 %v2982_v54, %v2920_v23 }
 0x309   :  { %v2922_v8 = vadd.f32 %v2921_v6, %v2859_v9  ;;  %v3046_v33 = vadd.f32 %v3045_v63, %v2983_v10 }
 0x30b   :  { %v3084_v16 = vmax.f32 %v3046_v33, 0.0 }
 0x30e   :  { %v2984_v1 = vpop.f32.mrf.mxu2  ;;  %v2861_v11 = vpop.f32.mrf.mxu0 }
 0x30f   :  { %v3047_v12 = vpop.f32.mrf.mxu3  ;;  %v2985_v13 = vadd.f32 %v2984_v1, %v2922_v8  ;;  %v2924_v24 = vpop.f32.mrf.mxu1  ;;  %v2862_v0 = vadd.f32 %v2861_v11, %v6048_v60 }
 0x311   :  { %v3048_v14 = vadd.f32 %v3047_v12, %v2985_v13  ;;  %v2925_v31 = vadd.f32 %v2924_v24, %v2862_v0 }
 0x313   :  { %v3085_v21 = vmax.f32 %v3048_v14, 0.0 }
 0x315   :  { %v4609_v22 = vpack.c.bf16 %v3085_v21, %v3084_v16 }
 0x316   :  { %v2987_v25 = vpop.f32.mrf.mxu2  ;;  %v2863_v48 = vpop.f32.mrf.mxu0 }
 0x317   :  { %v3050_v15 = vpop.f32.mrf.mxu3  ;;  %4635 = vst [vmem:[%s6280_s3 + $0x28] sm:$0xff] %v4609_v22   ;;  %v2926_v50 = vpop.f32.mrf.mxu1  ;;  %v2864_v37 = vadd.f32 %v2863_v48, %v6075_v26  ;;  %v2988_v53 = vadd.f32 %v2987_v25, %v2925_v31 }
 0x319   :  { %v2927_v55 = vadd.f32 %v2926_v50, %v2864_v37  ;;  %v3051_v39 = vadd.f32 %v3050_v15, %v2988_v53 }
 0x31b   :  { %v3086_v57 = vmax.f32 %v3051_v39, 0.0 }
 0x31e   :  { %v2989_v35 = vpop.f32.mrf.mxu2  ;;  %v2866_v7 = vpop.f32.mrf.mxu0 }
 0x31f   :  { %v3052_v36 = vpop.f32.mrf.mxu3  ;;  %v2990_v29 = vadd.f32 %v2989_v35, %v2927_v55  ;;  %v2929_v61 = vpop.f32.mrf.mxu1  ;;  %v2867_v4 = vadd.f32 %v2866_v7, %v6078_v32 }
 0x321   :  { %v3053_v60 = vadd.f32 %v3052_v36, %v2990_v29  ;;  %v2930_v51 = vadd.f32 %v2929_v61, %v2867_v4 }
 0x323   :  { %v3087_v40 = vmax.f32 %v3053_v60, 0.0 }
 0x325   :  { %v4614_v46 = vpack.c.bf16 %v3087_v40, %v3086_v57 }
 0x326   :  { %v2992_v34 = vpop.f32.mrf.mxu2  ;;  %v2868_v26 = vpop.f32.mrf.mxu0 }
 0x327   :  { %v3055_v27 = vpop.f32.mrf.mxu3  ;;  %4636 = vst [vmem:[%s6280_s3 + $0x30] sm:$0xff] %v4614_v46   ;;  %v2931_v47 = vpop.f32.mrf.mxu1  ;;  %v2869_v44 = vadd.f32 %v2868_v26, %v6105_v42  ;;  %v2993_v43 = vadd.f32 %v2992_v34, %v2930_v51 }
 0x329   :  { %v2932_v52 = vadd.f32 %v2931_v47, %v2869_v44  ;;  %v3056_v56 = vadd.f32 %v3055_v27, %v2993_v43 }
 0x32b   :  { %v3088_v45 = vmax.f32 %v3056_v56, 0.0 }
 0x32e   :  { %v2994_v19 = vpop.f32.mrf.mxu2  ;;  %v2871_v59 = vpop.f32.mrf.mxu0 }
 0x32f   :  { %v3057_v18 = vpop.f32.mrf.mxu3  ;;  %v2995_v49 = vadd.f32 %v2994_v19, %v2932_v52  ;;  %v2934_v62 = vpop.f32.mrf.mxu1  ;;  %v2872_v3 = vadd.f32 %v2871_v59, %v6108_v20 }
 0x331   :  { %v3058_v32 = vadd.f32 %v3057_v18, %v2995_v49  ;;  %v2935_v5 = vadd.f32 %v2934_v62, %v2872_v3 }
 0x333   :  { %v3089_v2 = vmax.f32 %v3058_v32, 0.0 }
 0x335   :  { %v4619_v58 = vpack.c.bf16 %v3089_v2, %v3088_v45 }
 0x336   :  { %v2997_v28 = vpop.f32.mrf.mxu2  ;;  %v2873_v42 = vpop.f32.mrf.mxu0 }
 0x337   :  { %v3060_v54 = vpop.f32.mrf.mxu3  ;;  %4637 = vst [vmem:[%s6280_s3 + $0x38] sm:$0xff] %v4619_v58   ;;  %v2936_v63 = vpop.f32.mrf.mxu1  ;;  %v2874_v6 = vadd.f32 %v2873_v42, %v6135_v38  ;;  %v2998_v23 = vadd.f32 %v2997_v28, %v2935_v5 }
 0x339   :  { %v2937_v9 = vadd.f32 %v2936_v63, %v2874_v6  ;;  %v3061_v1 = vadd.f32 %v3060_v54, %v2998_v23 }
 0x33b   :  { %v3090_v11 = vmax.f32 %v3061_v1, 0.0 }
 0x33e   :  { %v2999_v10 = vpop.f32.mrf.mxu2  ;;  %v2876_v33 = vpop.f32.mrf.mxu0 }
 0x33f   :  { %v3062_v8 = vpop.f32.mrf.mxu3  ;;  %v3000_v12 = vadd.f32 %v2999_v10, %v2937_v9  ;;  %v2939_v13 = vpop.f32.mrf.mxu1  ;;  %v2877_v16 = vadd.f32 %v2876_v33, %v6138_v41 }
 0x341   :  { %v3063_v20 = vadd.f32 %v3062_v8, %v3000_v12  ;;  %v2940_v25 = vadd.f32 %v2939_v13, %v2877_v16 }
 0x343   :  { %v3091_v24 = vmax.f32 %v3063_v20, 0.0 }
 0x345   :  { %v4624_v14 = vpack.c.bf16 %v3091_v24, %v3090_v11 }
 0x346   :  { %v3002_v21 = vpop.f32.mrf.mxu2  ;;  %v2878_v38 = vpop.f32.mrf.mxu0 }
 0x347   :  { %v3065_v22 = vpop.f32.mrf.mxu3  ;;  %4638 = vst [vmem:[%s6280_s3 + $0x40] sm:$0xff] %v4624_v14   ;;  %v2941_v0 = vpop.f32.mrf.mxu1  ;;  %v2879_v15 = vadd.f32 %v2878_v38, %v6165_v30  ;;  %v3003_v48 = vadd.f32 %v3002_v21, %v2940_v25 }
 0x349   :  { %v2942_v50 = vadd.f32 %v2941_v0, %v2879_v15  ;;  %v3066_v53 = vadd.f32 %v3065_v22, %v3003_v48 }
 0x34b   :  { %v3092_v29 = vmax.f32 %v3066_v53, 0.0 }
 0x34e   :  { %v3004_v31 = vpop.f32.mrf.mxu2  ;;  %v2881_v35 = vpop.f32.mrf.mxu0 }
 0x34f   :  { %v3067_v37 = vpop.f32.mrf.mxu3  ;;  %v3005_v55 = vadd.f32 %v3004_v31, %v2942_v50  ;;  %v2944_v36 = vpop.f32.mrf.mxu1  ;;  %v2882_v39 = vadd.f32 %v2881_v35, %v6167_v17 }
 0x351   :  { %v3068_v41 = vadd.f32 %v3067_v37, %v3005_v55  ;;  %v2945_v60 = vadd.f32 %v2944_v36, %v2882_v39 }
 0x353   :  { %v3093_v7 = vmax.f32 %v3068_v41, 0.0 }
 0x355   :  { %v4629_v61 = vpack.c.bf16 %v3093_v7, %v3092_v29 }
 0x356   :  { %v3007_v57 = vpop.f32.mrf.mxu2  ;;  %v2883_v46 = vpop.f32.mrf.mxu0 }
 0x357   :  { %v3070_v40 = vpop.f32.mrf.mxu3  ;;  %4639 = vst [vmem:[%s6280_s3 + $0x48] sm:$0xff] %v4629_v61   ;;  %v3008_v30 = vadd.f32 %v3007_v57, %v2945_v60  ;;  %v2946_v4 = vpop.f32.mrf.mxu1 }
 0x359   :  { %v3071_v34 = vadd.f32 %v3070_v40, %v3008_v30 }
 0x35b   :  { %v3094_v27 = vmax.f32 %v3071_v34, 0.0 }
 0x35d   :  { %v3115_v26 = vpack.c.bf16 %v3094_v27, %v3094_v27 }
 0x35e   :  { %v3009_v47 = vpop.f32.mrf.mxu2 }
 0x35f   :  { %v3072_v51 = vpop.f32.mrf.mxu3  ;;  %3136 = vst [vmem:[%s6280_s3 + $0x50] sm:$0x1] %v3115_v26 }

// kernel: cnn_dqn_forward.6
= control target key start
LH: loop header
LB: loop body
LE: loop exit
PB: predicated region body
PF: predicated region fallthrough
CT: control target
= control target key end

     0   :  { %s2775_s1 = inlined_call_operand.vmem [shape: bf16[1152,128], index: 1, kind: input, shape index: {}]   ;;  %s2776_s2 = inlined_call_operand.vmem [shape: f32[1,128], index: 2, kind: input, shape index: {}]   ;;  %s2777_s0 = inlined_call_operand.vmem [shape: bf16[98,1152], index: 0, kind: input, shape index: {}]   ;;  %s2778_s3 = inlined_call_operand.vmem [shape: bf16[98,128], index: 3, kind: output, shape index: {}]  }
   0x1   :  { %v1962_v0 = vld [vmem:[%s2775_s1 + $0x38] sm:$0xff]  ;;  %v1961_v1 = vld [vmem:[%s2775_s1 + $0x30] sm:$0xff]  ;;  %v1960_v2 = vld [vmem:[%s2775_s1 + $0x28] sm:$0xff] }
   0x2   :  { %2062 = vmatpush.bf16.msra.mxu1 %v1962_v0  ;;  %2063 = vmatpush.bf16.msra.mxu2 %v1962_v0  ;;  %v1959_v3 = vld [vmem:[%s2775_s1 + $0x20] sm:$0xff]  ;;  %v1958_v4 = vld [vmem:[%s2775_s1 + $0x18] sm:$0xff]  ;;  %v1957_v5 = vld [vmem:[%s2775_s1 + $0x10] sm:$0xff] }
   0x3   :  { %2064 = vmatpush.bf16.msra.mxu3 %v1962_v0  ;;  %967 = vmatpush.bf16.msra.mxu0 %v1962_v0  ;;  %v1956_v6 = vld [vmem:[%s2775_s1 + $0x8] sm:$0xff]  ;;  %v2131_v7 = vld [vmem:[%s2777_s0 + $0x1b0] sm:$0x11]  ;;  %v1955_v8 = vld [vmem:[%s2775_s1] sm:$0xff] }
   0x4   :  { %v1471_v9 = vld [vmem:[%s2777_s0 + $0x90] sm:$0xf]  ;;  %v1923_v10 = vld [vmem:[%s2777_s0 + $0xb0] sm:$0xf0]  ;;  %v1543_v11 = vld [vmem:[%s2777_s0 + $0x120] sm:$0xf]  ;;  %v400_v15 = vunpack.c.l.b16 %v2131_v7 }
   0x5   :  { %v1941_v12 = vld [vmem:[%s2777_s0 + $0x140] sm:$0xf0]  ;;  %v1399_v13 = vld [vmem:[%s2777_s0] sm:$0xf]  ;;  %v1986_v16 = vld [vmem:[%s2775_s1 + $0xf8] sm:$0xff]  ;;  %v1472_v18 = vor.u32 %v1923_v10, %v1471_v9 }
   0x6   :  { %2065 = vmatpush.bf16.msra.mxu1 %v1961_v1  ;;  %2066 = vmatpush.bf16.msra.mxu2 %v1961_v1  ;;  %v1905_v14 = vld [vmem:[%s2777_s0 + $0x20] sm:$0xf0]  ;;  %v1978_v17 = vld [vmem:[%s2775_s1 + $0xb8] sm:$0xff]  ;;  %v1544_v19 = vor.u32 %v1941_v12, %v1543_v11  ;;  %v463_v23 = vpack.c.b16 %v400_v15, %v400_v15  ;;  %v1985_v24 = vld [vmem:[%s2775_s1 + $0xf0] sm:$0xff] }
   0x7   :  { %2067 = vmatpush.bf16.msra.mxu3 %v1961_v1  ;;  %968 = vmatpush.bf16.msra.mxu0 %v1961_v1  ;;  %v1400_v20 = vor.u32 %v1905_v14, %v1399_v13  ;;  %v1970_v21 = vld [vmem:[%s2775_s1 + $0x78] sm:$0xff]  ;;  %v1977_v25 = vld [vmem:[%s2775_s1 + $0xb0] sm:$0xff]  ;;  %v1984_v28 = vld [vmem:[%s2775_s1 + $0xe8] sm:$0xff] }
   0x8   :  { %v1994_v22 = vld [vmem:[%s2775_s1 + $0x138] sm:$0xff]  ;;  %v1969_v26 = vld [vmem:[%s2775_s1 + $0x70] sm:$0xff]  ;;  %v1976_v29 = vld [vmem:[%s2775_s1 + $0xa8] sm:$0xff] }
   0x9   :  { %v1993_v27 = vld [vmem:[%s2775_s1 + $0x130] sm:$0xff]  ;;  %v1968_v30 = vld [vmem:[%s2775_s1 + $0x68] sm:$0xff]  ;;  %v1983_v32 = vld [vmem:[%s2775_s1 + $0xe0] sm:$0xff] }
   0xa   :  { %2068 = vmatpush.bf16.msra.mxu1 %v1960_v2  ;;  %2069 = vmatpush.bf16.msra.mxu2 %v1960_v2  ;;  %v1992_v31 = vld [vmem:[%s2775_s1 + $0x128] sm:$0xff]  ;;  %v1975_v33 = vld [vmem:[%s2775_s1 + $0xa0] sm:$0xff]  ;;  %v1507_v35 = vld [vmem:[%s2777_s0 + $0xd8] sm:$0xf] }
   0xb   :  { %2070 = vmatpush.bf16.msra.mxu3 %v1960_v2  ;;  %969 = vmatpush.bf16.msra.mxu0 %v1960_v2  ;;  %v1967_v34 = vld [vmem:[%s2775_s1 + $0x60] sm:$0xff]  ;;  %v1932_v36 = vld [vmem:[%s2777_s0 + $0xf8] sm:$0xf0]  ;;  %v1579_v37 = vld [vmem:[%s2777_s0 + $0x168] sm:$0xf] }
   0xc   :  { %v1950_v38 = vld [vmem:[%s2777_s0 + $0x188] sm:$0xf0]  ;;  %v1991_v39 = vld [vmem:[%s2775_s1 + $0x120] sm:$0xff]  ;;  %v1435_v40 = vld [vmem:[%s2777_s0 + $0x48] sm:$0xf]  ;;  %v1508_v44 = vor.u32 %v1932_v36, %v1507_v35 }
   0xd   :  { %v1914_v41 = vld [vmem:[%s2777_s0 + $0x68] sm:$0xf0]  ;;  %v1982_v42 = vld [vmem:[%s2775_s1 + $0xd8] sm:$0xff]  ;;  %v1580_v45 = vor.u32 %v1950_v38, %v1579_v37  ;;  %v1981_v49 = vld [vmem:[%s2775_s1 + $0xd0] sm:$0xff] }
   0xe   :  { %2071 = vmatpush.bf16.msra.mxu1 %v1959_v3  ;;  %2072 = vmatpush.bf16.msra.mxu2 %v1959_v3  ;;  %v1974_v43 = vld [vmem:[%s2775_s1 + $0x98] sm:$0xff]  ;;  %v1436_v46 = vor.u32 %v1914_v41, %v1435_v40  ;;  %v1973_v50 = vld [vmem:[%s2775_s1 + $0x90] sm:$0xff]  ;;  %v1980_v53 = vld [vmem:[%s2775_s1 + $0xc8] sm:$0xff] }
   0xf   :  { %2073 = vmatpush.bf16.msra.mxu3 %v1959_v3  ;;  %970 = vmatpush.bf16.msra.mxu0 %v1959_v3  ;;  %v1966_v47 = vld [vmem:[%s2775_s1 + $0x58] sm:$0xff]  ;;  %v1965_v51 = vld [vmem:[%s2775_s1 + $0x50] sm:$0xff]  ;;  %v1972_v54 = vld [vmem:[%s2775_s1 + $0x88] sm:$0xff] }
  0x10   :  { %v1990_v48 = vld [vmem:[%s2775_s1 + $0x118] sm:$0xff]  ;;  %v1989_v52 = vld [vmem:[%s2775_s1 + $0x110] sm:$0xff]  ;;  %v1964_v55 = vld [vmem:[%s2775_s1 + $0x48] sm:$0xff] }
  0x11   :  { %v1979_v56 = vld [vmem:[%s2775_s1 + $0xc0] sm:$0xff]  ;;  %v1988_v57 = vld [vmem:[%s2775_s1 + $0x108] sm:$0xff]  ;;  %v1409_v61 = vld [vmem:[%s2777_s0 + $0x2c] sm:$0xf0] }
  0x12   :  { %2074 = vmatpush.bf16.msra.mxu1 %v1958_v4  ;;  %2075 = vmatpush.bf16.msra.mxu2 %v1958_v4  ;;  %v1971_v58 = vld [vmem:[%s2775_s1 + $0x80] sm:$0xff]  ;;  %v1902_v60 = vld [vmem:[%s2777_s0 + $0xc] sm:$0xf]  ;;  %v2010_v63 = vld [vmem:[%s2775_s1 + $0x1b8] sm:$0xff] }
  0x13   :  { %2076 = vmatpush.bf16.msra.mxu3 %v1958_v4  ;;  %971 = vmatpush.bf16.msra.mxu0 %v1958_v4  ;;  %v1963_v59 = vld [vmem:[%s2775_s1 + $0x40] sm:$0xff]  ;;  %v2018_v0 = vld [vmem:[%s2775_s1 + $0x1f8] sm:$0xff]  ;;  %v1401_v1 = vld [vmem:[%s2777_s0 + $0x24] sm:$0xf0]  ;;  %v1412_v4 = vor.u32 %v1902_v60, %v1409_v61 }
  0x14   :  { %v1901_v62 = vld [vmem:[%s2777_s0 + $0x4] sm:$0xf]  ;;  %v1407_v2 = vld [vmem:[%s2777_s0 + $0x8] sm:$0xf]  ;;  %v1906_v3 = vld [vmem:[%s2777_s0 + $0x28] sm:$0xf0] }
  0x15   :  { %v2002_v9 = vld [vmem:[%s2775_s1 + $0x178] sm:$0xff]  ;;  %v1404_v11 = vor.u32 %v1901_v62, %v1401_v1  ;;  %v1408_v12 = vor.u32 %v1906_v3, %v1407_v2  ;;  %v2009_v14 = vld [vmem:[%s2775_s1 + $0x1b0] sm:$0xff]  ;;  %v1999_v36 = vld [vmem:[%s2775_s1 + $0x160] sm:$0xff] }
  0x16   :  { %2077 = vmatpush.bf16.msra.mxu1 %v1957_v5  ;;  %2078 = vmatpush.bf16.msra.mxu2 %v1957_v5  ;;  %v2026_v10 = vld [vmem:[%s2775_s1 + $0x238] sm:$0xff]  ;;  %v2017_v15 = vld [vmem:[%s2775_s1 + $0x1f0] sm:$0xff]  ;;  %v2023_v37 = vld [vmem:[%s2775_s1 + $0x220] sm:$0xff] }
  0x17   :  { %2079 = vmatpush.bf16.msra.mxu3 %v1957_v5  ;;  %972 = vmatpush.bf16.msra.mxu0 %v1957_v5  ;;  %v1987_v5 = vld [vmem:[%s2775_s1 + $0x100] sm:$0xff]  ;;  %v2006_v38 = vld [vmem:[%s2775_s1 + $0x198] sm:$0xff]  ;;  %v1934_v1 = vld [vmem:[%s2777_s0 + $0x108] sm:$0xf0] }
  0x18   :  { %v1998_v40 = vld [vmem:[%s2775_s1 + $0x158] sm:$0xff]  ;;  %v1509_v60 = vld [vmem:[%s2777_s0 + $0xfc] sm:$0xf0]  ;;  %v1933_v62 = vld [vmem:[%s2777_s0 + $0x100] sm:$0xf0] }
  0x19   :  { %v1920_v41 = vld [vmem:[%s2777_s0 + $0x9c] sm:$0xf]  ;;  %v1515_v61 = vld [vmem:[%s2777_s0 + $0xe0] sm:$0xf] }
  0x1a   :  { %2080 = vmatpush.bf16.msra.mxu1 %v1956_v6  ;;  %2081 = vmatpush.bf16.msra.mxu2 %v1956_v6  ;;  %v1516_v3 = vor.u32 %v1933_v62, %v1515_v61  ;;  %v1423_v61 = vld [vmem:[%s2777_s0 + $0x18] sm:$0xf]  ;;  %v1908_v62 = vld [vmem:[%s2777_s0 + $0x38] sm:$0xf0] }
  0x1b   :  { %2082 = vmatpush.bf16.msra.mxu3 %v1956_v6  ;;  %973 = vmatpush.bf16.msra.mxu0 %v1956_v6  ;;  %v1415_v6 = vld [vmem:[%s2777_s0 + $0x10] sm:$0xf] }
  0x1e   :  { %2083 = vmatpush.bf16.msra.mxu1 %v1955_v8  ;;  %2084 = vmatpush.bf16.msra.mxu2 %v1955_v8 }
  0x1f   :  { %2085 = vmatpush.bf16.msra.mxu3 %v1955_v8  ;;  %974 = vmatpush.bf16.msra.mxu0 %v1955_v8  ;;  %v1907_v8 = vld [vmem:[%s2777_s0 + $0x30] sm:$0xf0] }
  0x20   :  { %v1416_v13 = vor.u32 %v1907_v8, %v1415_v6  ;;  %v2004_v6 = vld [vmem:[%s2775_s1 + $0x188] sm:$0xff] }
  0x21   :  { %985 = vmatmul.bf16.vlgmr.msra.gmra.mxu1 %v1472_v18  ;;  %995 = vmatmul.bf16.vlgmr.msra.gmra.mxu2 %v1544_v19  ;;  %v2008_v18 = vld [vmem:[%s2775_s1 + $0x1a8] sm:$0xff] }
  0x22   :  { %1053 = vmatpush.bf16.msrb.mxu2 %v1978_v17  ;;  %975 = vmatmul.bf16.vlgmr.msra.gmra.mxu0 %v1400_v20  ;;  %v2025_v17 = vld [vmem:[%s2775_s1 + $0x230] sm:$0xff]  ;;  %v2016_v19 = vld [vmem:[%s2775_s1 + $0x1e8] sm:$0xff] }
  0x23   :  { %1096 = vmatpush.bf16.msrb.mxu3 %v1986_v16  ;;  %1010 = vmatpush.bf16.msrb.mxu1 %v1970_v21  ;;  %v2001_v16 = vld [vmem:[%s2775_s1 + $0x170] sm:$0xff]  ;;  %v2000_v20 = vld [vmem:[%s2775_s1 + $0x168] sm:$0xff] }
  0x24   :  { %1139 = vmatpush.bf16.msrb.mxu0 %v1994_v22  ;;  %1005 = vmatmul.bf16.vlgmr.msra.gmra.mxu3 %v463_v23  ;;  %v2024_v21 = vld [vmem:[%s2775_s1 + $0x228] sm:$0xff]  ;;  %v2007_v22 = vld [vmem:[%s2775_s1 + $0x1a0] sm:$0xff] }
  0x25   :  { %v2015_v23 = vld [vmem:[%s2775_s1 + $0x1e0] sm:$0xff]  ;;  %v2012_v8 = vld [vmem:[%s2775_s1 + $0x1c8] sm:$0xff] }
  0x26   :  { %1054 = vmatpush.bf16.msrb.mxu2 %v1977_v25  ;;  %v1445_v25 = vld [vmem:[%s2777_s0 + $0x74] sm:$0xf0] }
  0x27   :  { %1097 = vmatpush.bf16.msrb.mxu3 %v1985_v24  ;;  %1011 = vmatpush.bf16.msrb.mxu1 %v1969_v26  ;;  %v1911_v24 = vld [vmem:[%s2777_s0 + $0x54] sm:$0xf]  ;;  %v1910_v26 = vld [vmem:[%s2777_s0 + $0x4c] sm:$0xf] }
  0x28   :  { %1140 = vmatpush.bf16.msrb.mxu0 %v1993_v27  ;;  %v1437_v27 = vld [vmem:[%s2777_s0 + $0x6c] sm:$0xf0] }
  0x2a   :  { %1055 = vmatpush.bf16.msrb.mxu2 %v1976_v29  ;;  %v1915_v29 = vld [vmem:[%s2777_s0 + $0x70] sm:$0xf0] }
  0x2b   :  { %1098 = vmatpush.bf16.msrb.mxu3 %v1984_v28  ;;  %1012 = vmatpush.bf16.msrb.mxu1 %v1968_v30  ;;  %v1443_v28 = vld [vmem:[%s2777_s0 + $0x50] sm:$0xf]  ;;  %v1448_v30 = vor.u32 %v1911_v24, %v1445_v25  ;;  %v2011_v24 = vld [vmem:[%s2775_s1 + $0x1c0] sm:$0xff]  ;;  %v1947_v25 = vld [vmem:[%s2777_s0 + $0x174] sm:$0xf] }
  0x2c   :  { %1141 = vmatpush.bf16.msrb.mxu0 %v1992_v31  ;;  %v1451_v31 = vld [vmem:[%s2777_s0 + $0x58] sm:$0xf] }
  0x2e   :  { %1056 = vmatpush.bf16.msrb.mxu2 %v1975_v33  ;;  %v1440_v33 = vor.u32 %v1910_v26, %v1437_v27  ;;  %v1589_v26 = vld [vmem:[%s2777_s0 + $0x194] sm:$0xf0]  ;;  %v1995_v27 = vld [vmem:[%s2775_s1 + $0x140] sm:$0xff] }
  0x2f   :  { %1099 = vmatpush.bf16.msrb.mxu3 %v1983_v32  ;;  %1013 = vmatpush.bf16.msrb.mxu1 %v1967_v34  ;;  %v1916_v32 = vld [vmem:[%s2777_s0 + $0x78] sm:$0xf0]  ;;  %v1444_v34 = vor.u32 %v1915_v29, %v1443_v28  ;;  %v1946_v28 = vld [vmem:[%s2777_s0 + $0x16c] sm:$0xf]  ;;  %v1581_v29 = vld [vmem:[%s2777_s0 + $0x18c] sm:$0xf0] }
  0x30   :  { %1142 = vmatpush.bf16.msrb.mxu0 %v1991_v39  ;;  %v1452_v35 = vor.u32 %v1916_v32, %v1451_v31  ;;  %v2014_v39 = vld [vmem:[%s2775_s1 + $0x1d8] sm:$0xff]  ;;  %v1951_v31 = vld [vmem:[%s2777_s0 + $0x190] sm:$0xf0]  ;;  %v1592_v32 = vor.u32 %v1947_v25, %v1589_v26 }
  0x31   :  { %990 = vmatmul.bf16.gmra.mxu1 %v1508_v44  ;;  %1000 = vmatmul.bf16.gmra.mxu2 %v1580_v45  ;;  %v1473_v44 = vld [vmem:[%s2777_s0 + $0xb4] sm:$0xf0] }
  0x32   :  { %1057 = vmatpush.bf16.msrb.mxu2 %v1974_v43  ;;  %980 = vmatmul.bf16.gmra.mxu0 %v1436_v46  ;;  %v1919_v43 = vld [vmem:[%s2777_s0 + $0x94] sm:$0xf]  ;;  %v1479_v45 = vld [vmem:[%s2777_s0 + $0x98] sm:$0xf]  ;;  %v1924_v46 = vld [vmem:[%s2777_s0 + $0xb8] sm:$0xf0] }
  0x33   :  { %1100 = vmatpush.bf16.msrb.mxu3 %v1982_v42  ;;  %1014 = vmatpush.bf16.msrb.mxu1 %v1966_v47  ;;  %v1481_v42 = vld [vmem:[%s2777_s0 + $0xbc] sm:$0xf0] }
  0x34   :  { %1143 = vmatpush.bf16.msrb.mxu0 %v1990_v48  ;;  %v1484_v47 = vor.u32 %v1920_v41, %v1481_v42  ;;  %v1487_v48 = vld [vmem:[%s2777_s0 + $0xa0] sm:$0xf]  ;;  %v401_v42 = vunpack.c.h.b16 %v2131_v7 }
  0x35   :  { %v2515_v41 = vld [vmem:[%s2777_s0 + $0x1c0] sm:$0x11] }
  0x36   :  { %1058 = vmatpush.bf16.msrb.mxu2 %v1973_v50  ;;  %v1476_v50 = vor.u32 %v1919_v43, %v1473_v44  ;;  %v404_v44 = vunpack.c.l.b16 %v2515_v41 }
  0x37   :  { %1101 = vmatpush.bf16.msrb.mxu3 %v1981_v49  ;;  %1015 = vmatpush.bf16.msrb.mxu1 %v1965_v51  ;;  %v1925_v49 = vld [vmem:[%s2777_s0 + $0xc0] sm:$0xf0]  ;;  %v1480_v51 = vor.u32 %v1924_v46, %v1479_v45  ;;  %v464_v46 = vpack.c.b16 %v401_v42, %v401_v42  ;;  %v1922_v42 = vld [vmem:[%s2777_s0 + $0xac] sm:$0xf] }
  0x38   :  { %1144 = vmatpush.bf16.msrb.mxu0 %v1989_v52  ;;  %v1488_v52 = vor.u32 %v1925_v49, %v1487_v48  ;;  %v467_v49 = vpack.c.b16 %v404_v44, %v404_v44  ;;  %v1921_v44 = vld [vmem:[%s2777_s0 + $0xa4] sm:$0xf] }
  0x3a   :  { %1059 = vmatpush.bf16.msrb.mxu2 %v1972_v54  ;;  %v2005_v54 = vld [vmem:[%s2775_s1 + $0x190] sm:$0xff] }
  0x3b   :  { %1102 = vmatpush.bf16.msrb.mxu3 %v1980_v53  ;;  %1016 = vmatpush.bf16.msrb.mxu1 %v1964_v55  ;;  %v2022_v53 = vld [vmem:[%s2775_s1 + $0x218] sm:$0xff]  ;;  %v2013_v55 = vld [vmem:[%s2775_s1 + $0x1d0] sm:$0xff] }
  0x3c   :  { %1145 = vmatpush.bf16.msrb.mxu0 %v1988_v57  ;;  %v1929_v57 = vld [vmem:[%s2777_s0 + $0xe4] sm:$0xf] }
  0x3e   :  { %1060 = vmatpush.bf16.msrb.mxu2 %v1971_v58  ;;  %v1517_v58 = vld [vmem:[%s2777_s0 + $0x104] sm:$0xf0] }
  0x3f   :  { %1103 = vmatpush.bf16.msrb.mxu3 %v1979_v56  ;;  %1017 = vmatpush.bf16.msrb.mxu1 %v1963_v59  ;;  %v1997_v56 = vld [vmem:[%s2775_s1 + $0x150] sm:$0xff]  ;;  %v1928_v59 = vld [vmem:[%s2777_s0 + $0xdc] sm:$0xf] }
  0x40   :  { %1146 = vmatpush.bf16.msrb.mxu0 %v1987_v5  ;;  %v1512_v2 = vor.u32 %v1928_v59, %v1509_v60  ;;  %v2021_v5 = vld [vmem:[%s2775_s1 + $0x210] sm:$0xff]  ;;  %v1417_v60 = vld [vmem:[%s2777_s0 + $0x34] sm:$0xf0] }
  0x41   :  { %1061 = vmatmul.bf16.vlgmr.msrb.gmra.mxu2 %v1408_v12  ;;  %v1937_v12 = vld [vmem:[%s2777_s0 + $0x124] sm:$0xf]  ;;  %v1903_v59 = vld [vmem:[%s2777_s0 + $0x14] sm:$0xf] }
  0x42   :  { %1225 = vmatpush.bf16.msra.mxu2 %v2010_v63  ;;  %1104 = vmatmul.bf16.vlgmr.msrb.gmra.mxu3 %v1412_v4  ;;  %v1520_v63 = vor.u32 %v1929_v57, %v1517_v58  ;;  %v1904_v57 = vld [vmem:[%s2777_s0 + $0x1c] sm:$0xf]  ;;  %v1425_v58 = vld [vmem:[%s2777_s0 + $0x3c] sm:$0xf0] }
  0x43   :  { %1268 = vmatpush.bf16.msra.mxu3 %v2018_v0  ;;  %1182 = vmatpush.bf16.msra.mxu1 %v2002_v9  ;;  %v1523_v0 = vld [vmem:[%s2777_s0 + $0xe8] sm:$0xf] }
  0x44   :  { %1311 = vmatpush.bf16.msra.mxu0 %v2026_v10  ;;  %1018 = vmatmul.bf16.vlgmr.msrb.gmra.mxu1 %v1404_v11  ;;  %v1524_v4 = vor.u32 %v1934_v1, %v1523_v0  ;;  %v1996_v9 = vld [vmem:[%s2775_s1 + $0x148] sm:$0xff]  ;;  %v1553_v11 = vld [vmem:[%s2777_s0 + $0x14c] sm:$0xf0]  ;;  %v1431_v0 = vld [vmem:[%s2777_s0 + $0x20] sm:$0xf] }
  0x45   :  { %1147 = vmatmul.bf16.vlgmr.msrb.gmra.mxu0 %v1416_v13  ;;  %v1938_v10 = vld [vmem:[%s2777_s0 + $0x12c] sm:$0xf]  ;;  %v1545_v13 = vld [vmem:[%s2777_s0 + $0x144] sm:$0xf0]  ;;  %v1909_v1 = vld [vmem:[%s2777_s0 + $0x40] sm:$0xf0] }
  0x46   :  { %1226 = vmatpush.bf16.msra.mxu2 %v2009_v14  ;;  %v1551_v14 = vld [vmem:[%s2777_s0 + $0x128] sm:$0xf] }
  0x47   :  { %1269 = vmatpush.bf16.msra.mxu3 %v2017_v15  ;;  %1183 = vmatpush.bf16.msra.mxu1 %v2001_v16  ;;  %v1942_v15 = vld [vmem:[%s2777_s0 + $0x148] sm:$0xf0]  ;;  %v1556_v16 = vor.u32 %v1938_v10, %v1553_v11 }
  0x48   :  { %1312 = vmatpush.bf16.msra.mxu0 %v2025_v17  ;;  %v1559_v17 = vld [vmem:[%s2777_s0 + $0x130] sm:$0xf] }
  0x4a   :  { %1227 = vmatpush.bf16.msra.mxu2 %v2008_v18  ;;  %v1943_v18 = vld [vmem:[%s2777_s0 + $0x150] sm:$0xf0] }
  0x4b   :  { %1270 = vmatpush.bf16.msra.mxu3 %v2016_v19  ;;  %1184 = vmatpush.bf16.msra.mxu1 %v2000_v20  ;;  %v1548_v19 = vor.u32 %v1937_v12, %v1545_v13  ;;  %v1552_v20 = vor.u32 %v1942_v15, %v1551_v14  ;;  %v1913_v15 = vld [vmem:[%s2777_s0 + $0x64] sm:$0xf] }
  0x4c   :  { %1313 = vmatpush.bf16.msra.mxu0 %v2024_v21  ;;  %v1560_v21 = vor.u32 %v1943_v18, %v1559_v17  ;;  %v1912_v17 = vld [vmem:[%s2777_s0 + $0x5c] sm:$0xf]  ;;  %v1453_v18 = vld [vmem:[%s2777_s0 + $0x7c] sm:$0xf0] }
  0x4e   :  { %1228 = vmatpush.bf16.msra.mxu2 %v2007_v22  ;;  %v2020_v22 = vld [vmem:[%s2775_s1 + $0x208] sm:$0xff] }
  0x4f   :  { %1271 = vmatpush.bf16.msra.mxu3 %v2015_v23  ;;  %1185 = vmatpush.bf16.msra.mxu1 %v1999_v36  ;;  %v2003_v23 = vld [vmem:[%s2775_s1 + $0x180] sm:$0xff] }
  0x50   :  { %1314 = vmatpush.bf16.msra.mxu0 %v2023_v37  ;;  %v2019_v37 = vld [vmem:[%s2775_s1 + $0x200] sm:$0xff] }
  0x51   :  { %1066 = vmatmul.bf16.gmra.mxu2 %v1444_v34  ;;  %v1952_v34 = vld [vmem:[%s2777_s0 + $0x198] sm:$0xf0] }
  0x52   :  { %1109 = vmatmul.bf16.gmra.mxu3 %v1448_v30  ;;  %1229 = vmatpush.bf16.msra.mxu2 %v2006_v38  ;;  %v1587_v30 = vld [vmem:[%s2777_s0 + $0x170] sm:$0xf] }
  0x53   :  { %1272 = vmatpush.bf16.msra.mxu3 %v2014_v39  ;;  %1186 = vmatpush.bf16.msra.mxu1 %v1998_v40  ;;  %v1588_v36 = vor.u32 %v1951_v31, %v1587_v30  ;;  %v75_v39 = vld [vmem:[%s2777_s0 + $0x1b8] sm:$0x11] }
  0x54   :  { %1023 = vmatmul.bf16.gmra.mxu1 %v1440_v33  ;;  %1315 = vmatpush.bf16.msra.mxu0 %v2022_v53  ;;  %v1595_v33 = vld [vmem:[%s2777_s0 + $0x178] sm:$0xf]  ;;  %v403_v40 = vunpack.c.h.b16 %v75_v39  ;;  %v402_v43 = vunpack.c.l.b16 %v75_v39 }
  0x55   :  { %1152 = vmatmul.bf16.gmra.mxu0 %v1452_v35  ;;  %v1584_v35 = vor.u32 %v1946_v28, %v1581_v29  ;;  %v1596_v38 = vor.u32 %v1952_v34, %v1595_v33 }
  0x56   :  { %1230 = vmatpush.bf16.msra.mxu2 %v2005_v54  ;;  %v466_v45 = vpack.c.b16 %v403_v40, %v403_v40 }
  0x57   :  { %1273 = vmatpush.bf16.msra.mxu3 %v2013_v55  ;;  %1187 = vmatpush.bf16.msra.mxu1 %v1997_v56 }
  0x58   :  { %1316 = vmatpush.bf16.msra.mxu0 %v2021_v5  ;;  %v1424_v5 = vor.u32 %v1908_v62, %v1423_v61 }
  0x5a   :  { %1231 = vmatpush.bf16.msra.mxu2 %v2004_v6 }
  0x5b   :  { %1274 = vmatpush.bf16.msra.mxu3 %v2012_v8  ;;  %1188 = vmatpush.bf16.msra.mxu1 %v1996_v9  ;;  %v1432_v8 = vor.u32 %v1909_v1, %v1431_v0 }
  0x5c   :  { %1317 = vmatpush.bf16.msra.mxu0 %v2020_v22  ;;  %v1467_v22 = vld [vmem:[%s2777_s0 + $0x68] sm:$0xf] }
  0x5e   :  { %1232 = vmatpush.bf16.msra.mxu2 %v2003_v23  ;;  %v1918_v23 = vld [vmem:[%s2777_s0 + $0x88] sm:$0xf0] }
  0x5f   :  { %1275 = vmatpush.bf16.msra.mxu3 %v2011_v24  ;;  %1189 = vmatpush.bf16.msra.mxu1 %v1995_v27  ;;  %v1456_v27 = vor.u32 %v1912_v17, %v1453_v18  ;;  %v1468_v30 = vor.u32 %v1918_v23, %v1467_v22  ;;  %v1931_v18 = vld [vmem:[%s2777_s0 + $0xf4] sm:$0xf]  ;;  %v1525_v22 = vld [vmem:[%s2777_s0 + $0x10c] sm:$0xf0] }
  0x60   :  { %1318 = vmatpush.bf16.msra.mxu0 %v2019_v37  ;;  %v1531_v23 = vld [vmem:[%s2777_s0 + $0xf0] sm:$0xf] }
  0x61   :  { %1071 = vmatmul.bf16.gmra.mxu2 %v1480_v51  ;;  %v2524_v51 = vld [vmem:[%s2776_s2] ss:$0 sm:$0xff] }
  0x62   :  { %1114 = vmatmul.bf16.gmra.mxu3 %v1484_v47  ;;  %v465_v47 = vpack.c.b16 %v402_v43, %v402_v43  ;;  %v1497_v43 = vld [vmem:[%s2777_s0 + $0xcc] sm:$0xf0] }
  0x64   :  { %1028 = vmatmul.bf16.gmra.mxu1 %v1476_v50 }
  0x65   :  { %1157 = vmatmul.bf16.gmra.mxu0 %v1488_v52 }
  0x71   :  { %1076 = vmatmul.bf16.gmra.mxu2 %v1516_v3 }
  0x72   :  { %1119 = vmatmul.bf16.gmra.mxu3 %v1520_v63  ;;  %v1428_v63 = vor.u32 %v1904_v57, %v1425_v58 }
  0x74   :  { %1033 = vmatmul.bf16.gmra.mxu1 %v1512_v2 }
  0x75   :  { %1162 = vmatmul.bf16.gmra.mxu0 %v1524_v4  ;;  %v1420_v4 = vor.u32 %v1903_v59, %v1417_v60 }
  0x81   :  { %1081 = vmatmul.bf16.gmra.mxu2 %v1552_v20  ;;  %v1917_v20 = vld [vmem:[%s2777_s0 + $0x80] sm:$0xf0] }
  0x82   :  { %1124 = vmatmul.bf16.gmra.mxu3 %v1556_v16  ;;  %v1461_v16 = vld [vmem:[%s2777_s0 + $0x84] sm:$0xf0] }
  0x84   :  { %1038 = vmatmul.bf16.gmra.mxu1 %v1548_v19  ;;  %v1459_v19 = vld [vmem:[%s2777_s0 + $0x60] sm:$0xf] }
  0x85   :  { %1167 = vmatmul.bf16.gmra.mxu0 %v1560_v21  ;;  %v1464_v21 = vor.u32 %v1913_v15, %v1461_v16  ;;  %v1460_v28 = vor.u32 %v1917_v20, %v1459_v19  ;;  %v1533_v19 = vld [vmem:[%s2777_s0 + $0x114] sm:$0xf0]  ;;  %v1930_v20 = vld [vmem:[%s2777_s0 + $0xec] sm:$0xf] }
  0x91   :  { %1086 = vmatmul.bf16.gmra.mxu2 %v1588_v36 }
  0x92   :  { %1129 = vmatmul.bf16.gmra.mxu3 %v1592_v32 }
  0x94   :  { %1043 = vmatmul.bf16.gmra.mxu1 %v1584_v35 }
  0x95   :  { %1172 = vmatmul.bf16.gmra.mxu0 %v1596_v38 }
  0x9e   :  { %v2519_v48 = vpop.f32.mrf.mxu1 }
  0x9f   :  { %v976_v50 = vpop.f32.mrf.mxu0 }
  0xa0   :  { %v977_v25 = vadd.f32 %v2524_v51, %v976_v50  ;;  %v1926_v50 = vld [vmem:[%s2777_s0 + $0xc8] sm:$0xf0] }
  0xa1   :  { %1091 = vmatmul.bf16.gmra.mxu2 %v465_v47  ;;  %v1489_v47 = vld [vmem:[%s2777_s0 + $0xc4] sm:$0xf0] }
  0xa2   :  { %1134 = vmatmul.bf16.gmra.mxu3 %v466_v45  ;;  %v1492_v60 = vor.u32 %v1921_v44, %v1489_v47 }
  0xa4   :  { %1048 = vmatmul.bf16.gmra.mxu1 %v464_v46  ;;  %v996_v7 = vpop.f32.mrf.mxu2 }
  0xa5   :  { %1177 = vmatmul.bf16.gmra.mxu0 %v467_v49  ;;  %v2527_v52 = vadd.f32 %v2524_v51, %v996_v7  ;;  %v1495_v49 = vld [vmem:[%s2777_s0 + $0xa8] sm:$0xf]  ;;  %v1500_v7 = vor.u32 %v1922_v42, %v1497_v43 }
  0xa6   :  { %v2529_v53 = vpop.f32.mrf.mxu1  ;;  %v1496_v61 = vor.u32 %v1926_v50, %v1495_v49  ;;  %v1940_v50 = vld [vmem:[%s2777_s0 + $0x13c] sm:$0xf] }
  0xa7   :  { %v1006_v54 = vpop.f32.mrf.mxu3  ;;  %v978_v55 = vpop.f32.mrf.mxu0  ;;  %v989_v43 = vadd.f32 %v2524_v51, %v2529_v53 }
  0xa8   :  { %v2532_v56 = vadd.f32 %v2524_v51, %v1006_v54  ;;  %v979_v35 = vadd.f32 %v2524_v51, %v978_v55  ;;  %v1503_v54 = vld [vmem:[%s2777_s0 + $0xb0] sm:$0xf]  ;;  %v1927_v55 = vld [vmem:[%s2777_s0 + $0xd0] sm:$0xf0] }
  0xac   :  { %v998_v2 = vpop.f32.mrf.mxu2 }
  0xad   :  { %v2559_v3 = vadd.f32 %v2524_v51, %v998_v2 }
  0xae   :  { %v2561_v6 = vpop.f32.mrf.mxu1 }
  0xaf   :  { %v1008_v9 = vpop.f32.mrf.mxu3  ;;  %v981_v10 = vpop.f32.mrf.mxu0 }
  0xb0   :  { %v982_v58 = vadd.f32 %v2524_v51, %v981_v10 }
  0xb1   :  { %1233 = vmatmul.bf16.vlgmr.msra.gmra.mxu2 %v1424_v5 }
  0xb2   :  { %1276 = vmatmul.bf16.vlgmr.msra.gmra.mxu3 %v1428_v63  ;;  %v1504_v63 = vor.u32 %v1927_v55, %v1503_v54  ;;  %v1939_v54 = vld [vmem:[%s2777_s0 + $0x134] sm:$0xf] }
  0xb4   :  { %1190 = vmatmul.bf16.vlgmr.msra.gmra.mxu1 %v1420_v4  ;;  %v1001_v11 = vpop.f32.mrf.mxu2 }
  0xb5   :  { %1319 = vmatmul.bf16.vlgmr.msra.gmra.mxu0 %v1432_v8  ;;  %v2564_v12 = vadd.f32 %v2524_v51, %v1001_v11 }
  0xb6   :  { %v2566_v13 = vpop.f32.mrf.mxu1 }
  0xb7   :  { %v983_v14 = vpop.f32.mrf.mxu0 }
  0xb8   :  { %v984_v9 = vadd.f32 %v2524_v51, %v983_v14 }
  0xbc   :  { %v1003_v24 = vpop.f32.mrf.mxu2 }
  0xbd   :  { %v2594_v26 = vadd.f32 %v2524_v51, %v1003_v24  ;;  %v1935_v24 = vld [vmem:[%s2777_s0 + $0x110] sm:$0xf0] }
  0xc1   :  { %v1019_v29 = vpop.f32.mrf.mxu1  ;;  %1238 = vmatmul.bf16.gmra.mxu2 %v1460_v28  ;;  %v1936_v28 = vld [vmem:[%s2777_s0 + $0x118] sm:$0xf0] }
  0xc2   :  { %v1020_v31 = vadd.f32 %v1019_v29, %v977_v25  ;;  %1281 = vmatmul.bf16.gmra.mxu3 %v1464_v21  ;;  %v1148_v32 = vpop.f32.mrf.mxu0  ;;  %v1536_v25 = vor.u32 %v1931_v18, %v1533_v19  ;;  %v994_v19 = vadd.f32 %v2524_v51, %v2566_v13  ;;  %v1597_v13 = vld [vmem:[%s2777_s0 + $0x19c] sm:$0xf0] }
  0xc4   :  { %1195 = vmatmul.bf16.gmra.mxu1 %v1456_v27  ;;  %v1062_v34 = vpop.f32.mrf.mxu2  ;;  %v1539_v27 = vld [vmem:[%s2777_s0 + $0xf8] sm:$0xf] }
  0xc5   :  { %v1105_v33 = vpop.f32.mrf.mxu3  ;;  %1324 = vmatmul.bf16.gmra.mxu0 %v1468_v30  ;;  %v1063_v36 = vadd.f32 %v1062_v34, %v1020_v31  ;;  %v987_v30 = vadd.f32 %v2524_v51, %v2519_v48 }
  0xc7   :  { %v1106_v38 = vadd.f32 %v1105_v33, %v1063_v36  ;;  %v1532_v33 = vor.u32 %v1935_v24, %v1531_v23  ;;  %v1949_v24 = vld [vmem:[%s2777_s0 + $0x184] sm:$0xf] }
  0xc9   :  { %v1021_v37 = vpop.f32.mrf.mxu1  ;;  %v2606_v45 = vadd.f32 %v1148_v32, %v1106_v38  ;;  %v1528_v32 = vor.u32 %v1930_v20, %v1525_v22 }
  0xca   :  { %v1022_v39 = vadd.f32 %v1021_v37, %v979_v35  ;;  %v1150_v40 = vpop.f32.mrf.mxu0  ;;  %v1540_v35 = vor.u32 %v1936_v28, %v1539_v27  ;;  %v1948_v27 = vld [vmem:[%s2777_s0 + $0x17c] sm:$0xf] }
  0xcc   :  { %v1064_v57 = vpop.f32.mrf.mxu2 }
  0xcd   :  { %v1107_v46 = vpop.f32.mrf.mxu3  ;;  %v1065_v59 = vadd.f32 %v1064_v57, %v1022_v39  ;;  %v1561_v57 = vld [vmem:[%s2777_s0 + $0x154] sm:$0xf0] }
  0xcf   :  { %v1108_v0 = vadd.f32 %v1107_v46, %v1065_v59  ;;  %v1944_v59 = vld [vmem:[%s2777_s0 + $0x158] sm:$0xf0] }
  0xd1   :  { %v1024_v62 = vpop.f32.mrf.mxu1  ;;  %1243 = vmatmul.bf16.gmra.mxu2 %v1496_v61  ;;  %v2624_v4 = vadd.f32 %v1150_v40, %v1108_v0  ;;  %v1575_v61 = vld [vmem:[%s2777_s0 + $0x140] sm:$0xf]  ;;  %v992_v0 = vadd.f32 %v2524_v51, %v2561_v6 }
  0xd2   :  { %v1025_v1 = vadd.f32 %v1024_v62, %v982_v58  ;;  %1286 = vmatmul.bf16.gmra.mxu3 %v1500_v7  ;;  %v1153_v2 = vpop.f32.mrf.mxu0  ;;  %v1569_v7 = vld [vmem:[%s2777_s0 + $0x15c] sm:$0xf0]  ;;  %v1567_v58 = vld [vmem:[%s2777_s0 + $0x138] sm:$0xf]  ;;  %v1945_v62 = vld [vmem:[%s2777_s0 + $0x160] sm:$0xf0] }
  0xd4   :  { %1200 = vmatmul.bf16.gmra.mxu1 %v1492_v60  ;;  %v1067_v8 = vpop.f32.mrf.mxu2  ;;  %v1572_v60 = vor.u32 %v1940_v50, %v1569_v7 }
  0xd5   :  { %v1110_v5 = vpop.f32.mrf.mxu3  ;;  %1329 = vmatmul.bf16.gmra.mxu0 %v1504_v63  ;;  %v1068_v11 = vadd.f32 %v1067_v8, %v1025_v1 }
  0xd7   :  { %v1111_v15 = vadd.f32 %v1110_v5, %v1068_v11  ;;  %v1568_v5 = vor.u32 %v1944_v59, %v1567_v58  ;;  %v78_v58 = vld [vmem:[%s2777_s0 + $0x1d0] sm:$0x1]  ;;  %v405_v59 = vunpack.c.h.b16 %v2515_v41 }
  0xd9   :  { %v1026_v10 = vpop.f32.mrf.mxu1  ;;  %v2636_v21 = vadd.f32 %v1153_v2, %v1111_v15  ;;  %v1564_v2 = vor.u32 %v1939_v54, %v1561_v57 }
  0xda   :  { %v1027_v16 = vadd.f32 %v1026_v10, %v984_v9  ;;  %v1155_v17 = vpop.f32.mrf.mxu0  ;;  %v1576_v9 = vor.u32 %v1945_v62, %v1575_v61 }
  0xdc   :  { %v1069_v29 = vpop.f32.mrf.mxu2 }
  0xdd   :  { %v1112_v14 = vpop.f32.mrf.mxu3  ;;  %v1070_v31 = vadd.f32 %v1069_v29, %v1027_v16  ;;  %v1603_v29 = vld [vmem:[%s2777_s0 + $0x180] sm:$0xf] }
  0xdf   :  { %v1113_v36 = vadd.f32 %v1112_v14, %v1070_v31 }
  0xe1   :  { %v1029_v34 = vpop.f32.mrf.mxu1  ;;  %1248 = vmatmul.bf16.gmra.mxu2 %v1532_v33  ;;  %v2655_v39 = vadd.f32 %v1155_v17, %v1113_v36  ;;  %v1954_v33 = vld [vmem:[%s2777_s0 + $0x1a8] sm:$0xf0]  ;;  %v1600_v36 = vor.u32 %v1948_v27, %v1597_v13 }
  0xe2   :  { %v1030_v37 = vadd.f32 %v1029_v34, %v987_v30  ;;  %1291 = vmatmul.bf16.gmra.mxu3 %v1536_v25  ;;  %v1158_v38 = vpop.f32.mrf.mxu0  ;;  %v1605_v25 = vld [vmem:[%s2777_s0 + $0x1a4] sm:$0xf0]  ;;  %v1953_v30 = vld [vmem:[%s2777_s0 + $0x1a0] sm:$0xf0] }
  0xe3   :  { %v1608_v31 = vor.u32 %v1949_v24, %v1605_v25 }
  0xe4   :  { %1205 = vmatmul.bf16.gmra.mxu1 %v1528_v32  ;;  %v1072_v42 = vpop.f32.mrf.mxu2  ;;  %v1611_v32 = vld [vmem:[%s2777_s0 + $0x188] sm:$0xf] }
  0xe5   :  { %v1115_v40 = vpop.f32.mrf.mxu3  ;;  %1334 = vmatmul.bf16.gmra.mxu0 %v1540_v35  ;;  %v1073_v48 = vadd.f32 %v1072_v42, %v1030_v37  ;;  %v1604_v37 = vor.u32 %v1953_v30, %v1603_v29 }
  0xe7   :  { %v1116_v46 = vadd.f32 %v1115_v40, %v1073_v48  ;;  %v1612_v40 = vor.u32 %v1954_v33, %v1611_v32 }
  0xe9   :  { %v1031_v44 = vpop.f32.mrf.mxu1  ;;  %v2668_v55 = vadd.f32 %v1158_v38, %v1116_v46 }
  0xea   :  { %v1032_v47 = vadd.f32 %v1031_v44, %v989_v43  ;;  %v1160_v49 = vpop.f32.mrf.mxu0 }
  0xec   :  { %v1074_v63 = vpop.f32.mrf.mxu2 }
  0xed   :  { %v1117_v53 = vpop.f32.mrf.mxu3  ;;  %v1075_v1 = vadd.f32 %v1074_v63, %v1032_v47  ;;  %v408_v63 = vunpack.c.l.b16 %v78_v58 }
  0xef   :  { %v1118_v11 = vadd.f32 %v1117_v53, %v1075_v1 }
  0xf1   :  { %v1034_v8 = vpop.f32.mrf.mxu1  ;;  %1253 = vmatmul.bf16.gmra.mxu2 %v1568_v5  ;;  %v2687_v16 = vadd.f32 %v1160_v49, %v1118_v11  ;;  %v77_v49 = vld [vmem:[%s2777_s0 + $0x1c8] sm:$0x11]  ;;  %v468_v5 = vpack.c.b16 %v405_v59, %v405_v59 }
  0xf2   :  { %v1035_v10 = vadd.f32 %v1034_v8, %v992_v0  ;;  %1296 = vmatmul.bf16.gmra.mxu3 %v1572_v60  ;;  %v1163_v15 = vpop.f32.mrf.mxu0  ;;  %v406_v60 = vunpack.c.l.b16 %v77_v49 }
  0xf4   :  { %1210 = vmatmul.bf16.gmra.mxu1 %v1564_v2  ;;  %v1077_v18 = vpop.f32.mrf.mxu2  ;;  %v469_v8 = vpack.c.b16 %v406_v60, %v406_v60 }
  0xf5   :  { %v1120_v17 = vpop.f32.mrf.mxu3  ;;  %1339 = vmatmul.bf16.gmra.mxu0 %v1576_v9  ;;  %v1078_v6 = vadd.f32 %v1077_v18, %v1035_v10 }
  0xf7   :  { %v1121_v14 = vadd.f32 %v1120_v17, %v1078_v6 }
  0xf9   :  { %v1036_v20 = vpop.f32.mrf.mxu1  ;;  %v2700_v28 = vadd.f32 %v1163_v15, %v1121_v14 }
  0xfa   :  { %v1037_v22 = vadd.f32 %v1036_v20, %v994_v19  ;;  %v1165_v23 = vpop.f32.mrf.mxu0 }
  0xfc   :  { %v1079_v34 = vpop.f32.mrf.mxu2 }
  0xfd   :  { %v1122_v51 = vpop.f32.mrf.mxu3  ;;  %v1080_v35 = vadd.f32 %v1079_v34, %v1037_v22 }
  0xff   :  { %v1123_v42 = vadd.f32 %v1122_v51, %v1080_v35 }
 0x101   :  { %v1039_v38 = vpop.f32.mrf.mxu1  ;;  %1258 = vmatmul.bf16.gmra.mxu2 %v1604_v37  ;;  %v2718_v44 = vadd.f32 %v1165_v23, %v1123_v42 }
 0x102   :  { %v1040_v43 = vadd.f32 %v1039_v38, %v2527_v52  ;;  %1301 = vmatmul.bf16.gmra.mxu3 %v1608_v31  ;;  %v1168_v48 = vpop.f32.mrf.mxu0  ;;  %v407_v52 = vunpack.c.h.b16 %v77_v49 }
 0x104   :  { %1215 = vmatmul.bf16.gmra.mxu1 %v1600_v36  ;;  %v1082_v47 = vpop.f32.mrf.mxu2  ;;  %v470_v0 = vpack.c.b16 %v407_v52, %v407_v52 }
 0x105   :  { %v1125_v46 = vpop.f32.mrf.mxu3  ;;  %1344 = vmatmul.bf16.gmra.mxu0 %v1612_v40  ;;  %v1083_v50 = vadd.f32 %v1082_v47, %v1040_v43 }
 0x107   :  { %v1126_v54 = vadd.f32 %v1125_v46, %v1083_v50 }
 0x109   :  { %v1041_v7 = vpop.f32.mrf.mxu1  ;;  %v2728_v61 = vadd.f32 %v1168_v48, %v1126_v54 }
 0x10a   :  { %v1042_v53 = vadd.f32 %v1041_v7, %v2559_v3  ;;  %v1170_v57 = vpop.f32.mrf.mxu0  ;;  %v471_v3 = vpack.c.b16 %v408_v63, %v408_v63 }
 0x10c   :  { %v1084_v1 = vpop.f32.mrf.mxu2 }
 0x10d   :  { %v1127_v62 = vpop.f32.mrf.mxu3  ;;  %v1085_v2 = vadd.f32 %v1084_v1, %v1042_v53 }
 0x10f   :  { %v1128_v11 = vadd.f32 %v1127_v62, %v1085_v2 }
 0x111   :  { %v1044_v9 = vpop.f32.mrf.mxu1  ;;  %1263 = vmatmul.bf16.gmra.mxu2 %v469_v8  ;;  %v2731_v41 = vadd.f32 %v1170_v57, %v1128_v11 }
 0x112   :  { %v1045_v10 = vadd.f32 %v1044_v9, %v2564_v12  ;;  %1306 = vmatmul.bf16.gmra.mxu3 %v470_v0  ;;  %v1173_v15 = vpop.f32.mrf.mxu0 }
 0x114   :  { %1220 = vmatmul.bf16.gmra.mxu1 %v468_v5  ;;  %v1087_v18 = vpop.f32.mrf.mxu2 }
 0x115   :  { %v1130_v17 = vpop.f32.mrf.mxu3  ;;  %1349 = vmatmul.bf16.gmra.mxu0 %v471_v3  ;;  %v1088_v19 = vadd.f32 %v1087_v18, %v1045_v10 }
 0x117   :  { %v1131_v20 = vadd.f32 %v1130_v17, %v1088_v19 }
 0x119   :  { %v1046_v6 = vpop.f32.mrf.mxu1  ;;  %v2734_v23 = vadd.f32 %v1173_v15, %v1131_v20 }
 0x11a   :  { %v1047_v14 = vadd.f32 %v1046_v6, %v2594_v26  ;;  %v1175_v22 = vpop.f32.mrf.mxu0 }
 0x11c   :  { %v1089_v25 = vpop.f32.mrf.mxu2 }
 0x11d   :  { %v1132_v24 = vpop.f32.mrf.mxu3  ;;  %v1090_v12 = vadd.f32 %v1089_v25, %v1047_v14 }
 0x11f   :  { %v1133_v51 = vadd.f32 %v1132_v24, %v1090_v12 }
 0x121   :  { %v1049_v27 = vpop.f32.mrf.mxu1  ;;  %v2737_v30 = vadd.f32 %v1175_v22, %v1133_v51 }
 0x122   :  { %v1050_v13 = vadd.f32 %v1049_v27, %v2532_v56  ;;  %v1178_v29 = vpop.f32.mrf.mxu0 }
 0x124   :  { %v1092_v32 = vpop.f32.mrf.mxu2 }
 0x125   :  { %v1135_v31 = vpop.f32.mrf.mxu3  ;;  %v1093_v33 = vadd.f32 %v1092_v32, %v1050_v13 }
 0x127   :  { %v1136_v35 = vadd.f32 %v1135_v31, %v1093_v33 }
 0x129   :  { %v1051_v34 = vpop.f32.mrf.mxu1  ;;  %v2739_v26 = vadd.f32 %v1178_v29, %v1136_v35 }
 0x12a   :  { %v1180_v36 = vpop.f32.mrf.mxu0 }
 0x12c   :  { %v1094_v38 = vpop.f32.mrf.mxu2 }
 0x12d   :  { %v1137_v37 = vpop.f32.mrf.mxu3 }
 0x131   :  { %v1191_v40 = vpop.f32.mrf.mxu1 }
 0x132   :  { %v1320_v42 = vpop.f32.mrf.mxu0  ;;  %v1192_v46 = vadd.f32 %v1191_v40, %v2606_v45 }
 0x134   :  { %v1234_v48 = vpop.f32.mrf.mxu2 }
 0x135   :  { %v1277_v43 = vpop.f32.mrf.mxu3  ;;  %v1235_v47 = vadd.f32 %v1234_v48, %v1192_v46 }
 0x137   :  { %v1278_v7 = vadd.f32 %v1277_v43, %v1235_v47 }
 0x139   :  { %v1193_v56 = vpop.f32.mrf.mxu1  ;;  %v1321_v58 = vadd.f32 %v1320_v42, %v1278_v7 }
 0x13a   :  { %v1322_v49 = vpop.f32.mrf.mxu0  ;;  %v1194_v54 = vadd.f32 %v1193_v56, %v2624_v4 }
 0x13b   :  { %v1354_v0 = vmax.f32 %v1321_v58, 0.0 }
 0x13c   :  { %v1236_v53 = vpop.f32.mrf.mxu2 }
 0x13d   :  { %v1279_v50 = vpop.f32.mrf.mxu3  ;;  %v1237_v57 = vadd.f32 %v1236_v53, %v1194_v54 }
 0x13f   :  { %v1280_v59 = vadd.f32 %v1279_v50, %v1237_v57 }
 0x141   :  { %v1196_v52 = vpop.f32.mrf.mxu1  ;;  %v1323_v62 = vadd.f32 %v1322_v49, %v1280_v59 }
 0x142   :  { %v1325_v60 = vpop.f32.mrf.mxu0  ;;  %v1197_v45 = vadd.f32 %v1196_v52, %v2636_v21 }
 0x143   :  { %v1355_v1 = vmax.f32 %v1323_v62, 0.0 }
 0x144   :  { %v1239_v2 = vpop.f32.mrf.mxu2 }
 0x145   :  { %v1282_v63 = vpop.f32.mrf.mxu3  ;;  %v2030_v5 = vpack.c.bf16 %v1355_v1, %v1354_v0  ;;  %v1240_v4 = vadd.f32 %v1239_v2, %v1197_v45 }
 0x147   :  { %2031 = vst [vmem:[%s2778_s3] sm:$0xff] %v2030_v5   ;;  %v1283_v11 = vadd.f32 %v1282_v63, %v1240_v4 }
 0x149   :  { %v1198_v8 = vpop.f32.mrf.mxu1  ;;  %v1326_v19 = vadd.f32 %v1325_v60, %v1283_v11 }
 0x14a   :  { %v1327_v9 = vpop.f32.mrf.mxu0  ;;  %v1199_v10 = vadd.f32 %v1198_v8, %v2655_v39 }
 0x14b   :  { %v1356_v21 = vmax.f32 %v1326_v19, 0.0 }
 0x14c   :  { %v1241_v15 = vpop.f32.mrf.mxu2 }
 0x14d   :  { %v1284_v3 = vpop.f32.mrf.mxu3  ;;  %v1242_v17 = vadd.f32 %v1241_v15, %v1199_v10 }
 0x14f   :  { %v1285_v6 = vadd.f32 %v1284_v3, %v1242_v17 }
 0x151   :  { %v1201_v18 = vpop.f32.mrf.mxu1  ;;  %v1328_v14 = vadd.f32 %v1327_v9, %v1285_v6 }
 0x152   :  { %v1330_v20 = vpop.f32.mrf.mxu0  ;;  %v1202_v27 = vadd.f32 %v1201_v18, %v2668_v55 }
 0x153   :  { %v1357_v24 = vmax.f32 %v1328_v14, 0.0 }
 0x154   :  { %v1244_v25 = vpop.f32.mrf.mxu2 }
 0x155   :  { %v1287_v22 = vpop.f32.mrf.mxu3  ;;  %v2035_v12 = vpack.c.bf16 %v1357_v24, %v1356_v21  ;;  %v1245_v39 = vadd.f32 %v1244_v25, %v1202_v27 }
 0x157   :  { %2057 = vst [vmem:[%s2778_s3 + $0x8] sm:$0xff] %v2035_v12   ;;  %v1288_v31 = vadd.f32 %v1287_v22, %v1245_v39 }
 0x159   :  { %v1203_v51 = vpop.f32.mrf.mxu1  ;;  %v1331_v36 = vadd.f32 %v1330_v20, %v1288_v31 }
 0x15a   :  { %v1332_v13 = vpop.f32.mrf.mxu0  ;;  %v1204_v32 = vadd.f32 %v1203_v51, %v2687_v16 }
 0x15b   :  { %v1358_v55 = vmax.f32 %v1331_v36, 0.0 }
 0x15c   :  { %v1246_v33 = vpop.f32.mrf.mxu2 }
 0x15d   :  { %v1289_v29 = vpop.f32.mrf.mxu3  ;;  %v1247_v34 = vadd.f32 %v1246_v33, %v1204_v32 }
 0x15f   :  { %v1290_v37 = vadd.f32 %v1289_v29, %v1247_v34 }
 0x161   :  { %v1206_v35 = vpop.f32.mrf.mxu1  ;;  %v1333_v40 = vadd.f32 %v1332_v13, %v1290_v37 }
 0x162   :  { %v1335_v38 = vpop.f32.mrf.mxu0  ;;  %v1207_v56 = vadd.f32 %v1206_v35, %v2700_v28 }
 0x163   :  { %v1359_v43 = vmax.f32 %v1333_v40, 0.0 }
 0x164   :  { %v1249_v48 = vpop.f32.mrf.mxu2 }
 0x165   :  { %v1292_v42 = vpop.f32.mrf.mxu3  ;;  %v2040_v46 = vpack.c.bf16 %v1359_v43, %v1358_v55  ;;  %v1250_v16 = vadd.f32 %v1249_v48, %v1207_v56 }
 0x167   :  { %2058 = vst [vmem:[%s2778_s3 + $0x10] sm:$0xff] %v2040_v46   ;;  %v1293_v7 = vadd.f32 %v1292_v42, %v1250_v16 }
 0x169   :  { %v1208_v47 = vpop.f32.mrf.mxu1  ;;  %v1336_v58 = vadd.f32 %v1335_v38, %v1293_v7 }
 0x16a   :  { %v1337_v49 = vpop.f32.mrf.mxu0  ;;  %v1209_v54 = vadd.f32 %v1208_v47, %v2718_v44 }
 0x16b   :  { %v1360_v28 = vmax.f32 %v1336_v58, 0.0 }
 0x16c   :  { %v1251_v53 = vpop.f32.mrf.mxu2 }
 0x16d   :  { %v1294_v50 = vpop.f32.mrf.mxu3  ;;  %v1252_v57 = vadd.f32 %v1251_v53, %v1209_v54 }
 0x16f   :  { %v1295_v59 = vadd.f32 %v1294_v50, %v1252_v57 }
 0x171   :  { %v1211_v52 = vpop.f32.mrf.mxu1  ;;  %v1338_v62 = vadd.f32 %v1337_v49, %v1295_v59 }
 0x172   :  { %v1340_v60 = vpop.f32.mrf.mxu0  ;;  %v1212_v5 = vadd.f32 %v1211_v52, %v2728_v61 }
 0x173   :  { %v1361_v0 = vmax.f32 %v1338_v62, 0.0 }
 0x174   :  { %v1254_v1 = vpop.f32.mrf.mxu2 }
 0x175   :  { %v1297_v63 = vpop.f32.mrf.mxu3  ;;  %v2045_v2 = vpack.c.bf16 %v1361_v0, %v1360_v28  ;;  %v1255_v44 = vadd.f32 %v1254_v1, %v1212_v5 }
 0x177   :  { %2059 = vst [vmem:[%s2778_s3 + $0x18] sm:$0xff] %v2045_v2   ;;  %v1298_v9 = vadd.f32 %v1297_v63, %v1255_v44 }
 0x179   :  { %v1213_v45 = vpop.f32.mrf.mxu1  ;;  %v1341_v17 = vadd.f32 %v1340_v60, %v1298_v9 }
 0x17a   :  { %v1342_v8 = vpop.f32.mrf.mxu0  ;;  %v1214_v3 = vadd.f32 %v1213_v45, %v2731_v41 }
 0x17b   :  { %v1362_v61 = vmax.f32 %v1341_v17, 0.0 }
 0x17c   :  { %v1256_v11 = vpop.f32.mrf.mxu2 }
 0x17d   :  { %v1299_v4 = vpop.f32.mrf.mxu3  ;;  %v1257_v10 = vadd.f32 %v1256_v11, %v1214_v3 }
 0x17f   :  { %v1300_v18 = vadd.f32 %v1299_v4, %v1257_v10 }
 0x181   :  { %v1216_v15 = vpop.f32.mrf.mxu1  ;;  %v1343_v6 = vadd.f32 %v1342_v8, %v1300_v18 }
 0x182   :  { %v1345_v19 = vpop.f32.mrf.mxu0  ;;  %v1217_v24 = vadd.f32 %v1216_v15, %v2734_v23 }
 0x183   :  { %v1363_v14 = vmax.f32 %v1343_v6, 0.0 }
 0x184   :  { %v1259_v22 = vpop.f32.mrf.mxu2 }
 0x185   :  { %v1302_v20 = vpop.f32.mrf.mxu3  ;;  %v2050_v21 = vpack.c.bf16 %v1363_v14, %v1362_v61  ;;  %v1260_v41 = vadd.f32 %v1259_v22, %v1217_v24 }
 0x187   :  { %2060 = vst [vmem:[%s2778_s3 + $0x20] sm:$0xff] %v2050_v21   ;;  %v1303_v51 = vadd.f32 %v1302_v20, %v1260_v41 }
 0x189   :  { %v1218_v25 = vpop.f32.mrf.mxu1  ;;  %v1346_v32 = vadd.f32 %v1345_v19, %v1303_v51 }
 0x18a   :  { %v1347_v12 = vpop.f32.mrf.mxu0  ;;  %v1219_v39 = vadd.f32 %v1218_v25, %v2737_v30 }
 0x18b   :  { %v1364_v23 = vmax.f32 %v1346_v32, 0.0 }
 0x18c   :  { %v1261_v13 = vpop.f32.mrf.mxu2 }
 0x18d   :  { %v1304_v27 = vpop.f32.mrf.mxu3  ;;  %v1262_v29 = vadd.f32 %v1261_v13, %v1219_v39 }
 0x18f   :  { %v1305_v33 = vadd.f32 %v1304_v27, %v1262_v29 }
 0x191   :  { %v1221_v31 = vpop.f32.mrf.mxu1  ;;  %v1348_v35 = vadd.f32 %v1347_v12, %v1305_v33 }
 0x192   :  { %v1350_v34 = vpop.f32.mrf.mxu0  ;;  %v1222_v38 = vadd.f32 %v1221_v31, %v2739_v26 }
 0x193   :  { %v1365_v37 = vmax.f32 %v1348_v35, 0.0 }
 0x194   :  { %v1264_v40 = vpop.f32.mrf.mxu2 }
 0x195   :  { %v1307_v36 = vpop.f32.mrf.mxu3  ;;  %v2055_v42 = vpack.c.bf16 %v1365_v37, %v1364_v23  ;;  %v1265_v55 = vadd.f32 %v1264_v40, %v1222_v38 }
 0x197   :  { %2061 = vst [vmem:[%s2778_s3 + $0x28] sm:$0xff] %v2055_v42   ;;  %v1308_v30 = vadd.f32 %v1307_v36, %v1265_v55 }
 0x199   :  { %v1223_v43 = vpop.f32.mrf.mxu1  ;;  %v1351_v46 = vadd.f32 %v1350_v34, %v1308_v30 }
 0x19a   :  { %v1352_v48 = vpop.f32.mrf.mxu0 }
 0x19b   :  { %v1366_v47 = vmax.f32 %v1351_v46, 0.0 }
 0x19c   :  { %v1266_v16 = vpop.f32.mrf.mxu2 }
 0x19d   :  { %v1309_v56 = vpop.f32.mrf.mxu3  ;;  %v1379_v49 = vpack.c.bf16 %v1366_v47, %v1366_v47 }
 0x19f   :  { %1392 = vst [vmem:[%s2778_s3 + $0x30] sm:$0x1] %v1379_v49 }

// kernel: cnn_dqn_forward.7
= control target key start
LH: loop header
LB: loop body
LE: loop exit
PB: predicated region body
PF: predicated region fallthrough
CT: control target
= control target key end

     0   :  { %s15618_s0 = inlined_call_operand.vmem [shape: bf16[2,3136], index: 0, kind: input, shape index: {}]   ;;  %s15619_s1 = inlined_call_operand.vmem [shape: bf16[3136,512], index: 1, kind: input, shape index: {}]   ;;  %s15620_s2 = inlined_call_operand.vmem [shape: f32[1,512], index: 2, kind: input, shape index: {}]   ;;  %s15621_s3 = inlined_call_operand.vmem [shape: bf16[512,128], index: 3, kind: input, shape index: {}]   ;;  %s15622_s4 = inlined_call_operand.vmem [shape: f32[1,128], index: 4, kind: input, shape index: {}]   ;;  %s15623_s5 = inlined_call_operand.hbm [shape: f32[2,128], index: 5, kind: output, shape index: {}]  }
   0x1   :  { %v6551_v0 = vld [vmem:[%s15619_s1 + $0xe0] sm:$0xf]  ;;  %v9735_v1 = vld [vmem:[%s15619_s1 + $0xec] sm:$0xf0] }
   0x2   :  { %v6679_v2 = vld [vmem:[%s15619_s1 + $0x1e0] sm:$0xf]  ;;  %v6552_v3 = vor.u32 %v9735_v1, %v6551_v0  ;;  %v9767_v4 = vld [vmem:[%s15619_s1 + $0x1ec] sm:$0xf0] }
   0x3   :  { %v6807_v5 = vld [vmem:[%s15619_s1 + $0x2e0] sm:$0xf]  ;;  %v9799_v6 = vld [vmem:[%s15619_s1 + $0x2ec] sm:$0xf0]  ;;  %v6680_v7 = vor.u32 %v9767_v4, %v6679_v2 }
   0x4   :  { %v6808_v8 = vor.u32 %v9799_v6, %v6807_v5  ;;  %v6935_v9 = vld [vmem:[%s15619_s1 + $0x3e0] sm:$0xf]  ;;  %v9831_v10 = vld [vmem:[%s15619_s1 + $0x3ec] sm:$0xf0]  ;;  %4800 = vmatpush.bf16.msra.mxu0 %v6552_v3 }
   0x5   :  { %v6535_v11 = vld [vmem:[%s15619_s1 + $0xc0] sm:$0xf]  ;;  %v6936_v12 = vor.u32 %v9831_v10, %v6935_v9  ;;  %v9731_v13 = vld [vmem:[%s15619_s1 + $0xcc] sm:$0xf0]  ;;  %4813 = vmatpush.bf16.msra.mxu1 %v6680_v7 }
   0x6   :  { %v6663_v14 = vld [vmem:[%s15619_s1 + $0x1c0] sm:$0xf]  ;;  %v9763_v15 = vld [vmem:[%s15619_s1 + $0x1cc] sm:$0xf0]  ;;  %4826 = vmatpush.bf16.msra.mxu2 %v6808_v8  ;;  %v6536_v16 = vor.u32 %v9731_v13, %v6535_v11 }
   0x7   :  { %v6664_v17 = vor.u32 %v9763_v15, %v6663_v14  ;;  %v6791_v18 = vld [vmem:[%s15619_s1 + $0x2c0] sm:$0xf]  ;;  %v9795_v19 = vld [vmem:[%s15619_s1 + $0x2cc] sm:$0xf0]  ;;  %4839 = vmatpush.bf16.msra.mxu3 %v6936_v12 }
   0x8   :  { %v6919_v20 = vld [vmem:[%s15619_s1 + $0x3c0] sm:$0xf]  ;;  %v6792_v21 = vor.u32 %v9795_v19, %v6791_v18  ;;  %v9827_v22 = vld [vmem:[%s15619_s1 + $0x3cc] sm:$0xf0]  ;;  %4801 = vmatpush.bf16.msra.mxu0 %v6536_v16 }
   0x9   :  { %v6519_v23 = vld [vmem:[%s15619_s1 + $0xa0] sm:$0xf]  ;;  %v9727_v24 = vld [vmem:[%s15619_s1 + $0xac] sm:$0xf0]  ;;  %v6920_v25 = vor.u32 %v9827_v22, %v6919_v20  ;;  %4814 = vmatpush.bf16.msra.mxu1 %v6664_v17 }
   0xa   :  { %v6647_v26 = vld [vmem:[%s15619_s1 + $0x1a0] sm:$0xf]  ;;  %v9759_v27 = vld [vmem:[%s15619_s1 + $0x1ac] sm:$0xf0]  ;;  %v6520_v29 = vor.u32 %v9727_v24, %v6519_v23  ;;  %4827 = vmatpush.bf16.msra.mxu2 %v6792_v21 }
   0xb   :  { %v6775_v28 = vld [vmem:[%s15619_s1 + $0x2a0] sm:$0xf]  ;;  %v9791_v30 = vld [vmem:[%s15619_s1 + $0x2ac] sm:$0xf0]  ;;  %v6648_v33 = vor.u32 %v9759_v27, %v6647_v26  ;;  %4840 = vmatpush.bf16.msra.mxu3 %v6920_v25 }
   0xc   :  { %v6903_v31 = vld [vmem:[%s15619_s1 + $0x3a0] sm:$0xf]  ;;  %v9823_v32 = vld [vmem:[%s15619_s1 + $0x3ac] sm:$0xf0]  ;;  %v6776_v34 = vor.u32 %v9791_v30, %v6775_v28  ;;  %4802 = vmatpush.bf16.msra.mxu0 %v6520_v29 }
   0xd   :  { %v6503_v35 = vld [vmem:[%s15619_s1 + $0x80] sm:$0xf]  ;;  %v9723_v36 = vld [vmem:[%s15619_s1 + $0x8c] sm:$0xf0]  ;;  %v6904_v38 = vor.u32 %v9823_v32, %v6903_v31  ;;  %4815 = vmatpush.bf16.msra.mxu1 %v6648_v33 }
   0xe   :  { %v6631_v37 = vld [vmem:[%s15619_s1 + $0x180] sm:$0xf]  ;;  %v9755_v39 = vld [vmem:[%s15619_s1 + $0x18c] sm:$0xf0]  ;;  %v6504_v44 = vor.u32 %v9723_v36, %v6503_v35  ;;  %4828 = vmatpush.bf16.msra.mxu2 %v6776_v34 }
   0xf   :  { %v6759_v40 = vld [vmem:[%s15619_s1 + $0x280] sm:$0xf]  ;;  %v9787_v41 = vld [vmem:[%s15619_s1 + $0x28c] sm:$0xf0]  ;;  %v6632_v45 = vor.u32 %v9755_v39, %v6631_v37  ;;  %4841 = vmatpush.bf16.msra.mxu3 %v6904_v38 }
  0x10   :  { %v6887_v42 = vld [vmem:[%s15619_s1 + $0x380] sm:$0xf]  ;;  %v9819_v43 = vld [vmem:[%s15619_s1 + $0x38c] sm:$0xf0]  ;;  %v6760_v46 = vor.u32 %v9787_v41, %v6759_v40  ;;  %4803 = vmatpush.bf16.msra.mxu0 %v6504_v44 }
  0x11   :  { %v6487_v47 = vld [vmem:[%s15619_s1 + $0x60] sm:$0xf]  ;;  %v9719_v48 = vld [vmem:[%s15619_s1 + $0x6c] sm:$0xf0]  ;;  %v6888_v50 = vor.u32 %v9819_v43, %v6887_v42  ;;  %4816 = vmatpush.bf16.msra.mxu1 %v6632_v45 }
  0x12   :  { %v6615_v49 = vld [vmem:[%s15619_s1 + $0x160] sm:$0xf]  ;;  %v9751_v51 = vld [vmem:[%s15619_s1 + $0x16c] sm:$0xf0]  ;;  %v6488_v56 = vor.u32 %v9719_v48, %v6487_v47  ;;  %4829 = vmatpush.bf16.msra.mxu2 %v6760_v46 }
  0x13   :  { %v6743_v52 = vld [vmem:[%s15619_s1 + $0x260] sm:$0xf]  ;;  %v9783_v53 = vld [vmem:[%s15619_s1 + $0x26c] sm:$0xf0]  ;;  %v6616_v57 = vor.u32 %v9751_v51, %v6615_v49  ;;  %4842 = vmatpush.bf16.msra.mxu3 %v6888_v50 }
  0x14   :  { %v6871_v54 = vld [vmem:[%s15619_s1 + $0x360] sm:$0xf]  ;;  %v9815_v55 = vld [vmem:[%s15619_s1 + $0x36c] sm:$0xf0]  ;;  %v6744_v58 = vor.u32 %v9783_v53, %v6743_v52  ;;  %4804 = vmatpush.bf16.msra.mxu0 %v6488_v56 }
  0x15   :  { %v6471_v59 = vld [vmem:[%s15619_s1 + $0x40] sm:$0xf]  ;;  %v9715_v60 = vld [vmem:[%s15619_s1 + $0x4c] sm:$0xf0]  ;;  %v6872_v62 = vor.u32 %v9815_v55, %v6871_v54  ;;  %4817 = vmatpush.bf16.msra.mxu1 %v6616_v57 }
  0x16   :  { %v6599_v61 = vld [vmem:[%s15619_s1 + $0x140] sm:$0xf]  ;;  %v9747_v63 = vld [vmem:[%s15619_s1 + $0x14c] sm:$0xf0]  ;;  %v6472_v4 = vor.u32 %v9715_v60, %v6471_v59  ;;  %4830 = vmatpush.bf16.msra.mxu2 %v6744_v58 }
  0x17   :  { %v6727_v0 = vld [vmem:[%s15619_s1 + $0x240] sm:$0xf]  ;;  %v9779_v1 = vld [vmem:[%s15619_s1 + $0x24c] sm:$0xf0]  ;;  %v6600_v5 = vor.u32 %v9747_v63, %v6599_v61  ;;  %4843 = vmatpush.bf16.msra.mxu3 %v6872_v62 }
  0x18   :  { %v6855_v2 = vld [vmem:[%s15619_s1 + $0x340] sm:$0xf]  ;;  %v9811_v3 = vld [vmem:[%s15619_s1 + $0x34c] sm:$0xf0]  ;;  %v6728_v6 = vor.u32 %v9779_v1, %v6727_v0  ;;  %4805 = vmatpush.bf16.msra.mxu0 %v6472_v4 }
  0x19   :  { %v6455_v7 = vld [vmem:[%s15619_s1 + $0x20] sm:$0xf]  ;;  %v9711_v8 = vld [vmem:[%s15619_s1 + $0x2c] sm:$0xf0]  ;;  %v6856_v10 = vor.u32 %v9811_v3, %v6855_v2  ;;  %4818 = vmatpush.bf16.msra.mxu1 %v6600_v5 }
  0x1a   :  { %v6583_v9 = vld [vmem:[%s15619_s1 + $0x120] sm:$0xf]  ;;  %v9743_v11 = vld [vmem:[%s15619_s1 + $0x12c] sm:$0xf0]  ;;  %v6456_v16 = vor.u32 %v9711_v8, %v6455_v7  ;;  %4831 = vmatpush.bf16.msra.mxu2 %v6728_v6 }
  0x1b   :  { %v6711_v12 = vld [vmem:[%s15619_s1 + $0x220] sm:$0xf]  ;;  %v9775_v13 = vld [vmem:[%s15619_s1 + $0x22c] sm:$0xf0]  ;;  %v6584_v19 = vor.u32 %v9743_v11, %v6583_v9  ;;  %4844 = vmatpush.bf16.msra.mxu3 %v6856_v10 }
  0x1c   :  { %v6839_v14 = vld [vmem:[%s15619_s1 + $0x320] sm:$0xf]  ;;  %v9807_v15 = vld [vmem:[%s15619_s1 + $0x32c] sm:$0xf0]  ;;  %v6712_v20 = vor.u32 %v9775_v13, %v6711_v12  ;;  %4806 = vmatpush.bf16.msra.mxu0 %v6456_v16 }
  0x1d   :  { %v6439_v17 = vld [vmem:[%s15619_s1] sm:$0xf]  ;;  %v9707_v18 = vld [vmem:[%s15619_s1 + $0xc] sm:$0xf0]  ;;  %v6840_v24 = vor.u32 %v9807_v15, %v6839_v14  ;;  %4819 = vmatpush.bf16.msra.mxu1 %v6584_v19 }
  0x1e   :  { %v6567_v21 = vld [vmem:[%s15619_s1 + $0x100] sm:$0xf]  ;;  %v9739_v22 = vld [vmem:[%s15619_s1 + $0x10c] sm:$0xf0]  ;;  %v6440_v31 = vor.u32 %v9707_v18, %v6439_v17  ;;  %4832 = vmatpush.bf16.msra.mxu2 %v6712_v20 }
  0x1f   :  { %v6695_v23 = vld [vmem:[%s15619_s1 + $0x200] sm:$0xf]  ;;  %v9771_v25 = vld [vmem:[%s15619_s1 + $0x20c] sm:$0xf0]  ;;  %v6568_v35 = vor.u32 %v9739_v22, %v6567_v21  ;;  %4845 = vmatpush.bf16.msra.mxu3 %v6840_v24 }
  0x20   :  { %v6823_v26 = vld [vmem:[%s15619_s1 + $0x300] sm:$0xf]  ;;  %v9803_v27 = vld [vmem:[%s15619_s1 + $0x30c] sm:$0xf0]  ;;  %v6696_v36 = vor.u32 %v9771_v25, %v6695_v23  ;;  %4807 = vmatpush.bf16.msra.mxu0 %v6440_v31 }
  0x21   :  { %v7063_v28 = vld [vmem:[%s15619_s1 + $0x4e0] sm:$0xf]  ;;  %v9863_v29 = vld [vmem:[%s15619_s1 + $0x4ec] sm:$0xf0]  ;;  %v6824_v39 = vor.u32 %v9803_v27, %v6823_v26  ;;  %4820 = vmatpush.bf16.msra.mxu1 %v6568_v35 }
  0x22   :  { %v7191_v30 = vld [vmem:[%s15619_s1 + $0x5e0] sm:$0xf]  ;;  %v9895_v32 = vld [vmem:[%s15619_s1 + $0x5ec] sm:$0xf0]  ;;  %v7064_v40 = vor.u32 %v9863_v29, %v7063_v28  ;;  %4833 = vmatpush.bf16.msra.mxu2 %v6696_v36 }
  0x23   :  { %v7319_v33 = vld [vmem:[%s15619_s1 + $0x6e0] sm:$0xf]  ;;  %v9927_v34 = vld [vmem:[%s15619_s1 + $0x6ec] sm:$0xf0]  ;;  %v7192_v41 = vor.u32 %v9895_v32, %v7191_v30  ;;  %4846 = vmatpush.bf16.msra.mxu3 %v6824_v39 }
  0x24   :  { %v7447_v37 = vld [vmem:[%s15619_s1 + $0x7e0] sm:$0xf]  ;;  %v9959_v38 = vld [vmem:[%s15619_s1 + $0x7ec] sm:$0xf0]  ;;  %v7320_v42 = vor.u32 %v9927_v34, %v7319_v33  ;;  %4852 = vmatpush.bf16.msrb.mxu0 %v7064_v40 }
  0x25   :  { %v7047_v43 = vld [vmem:[%s15619_s1 + $0x4c0] sm:$0xf]  ;;  %v9859_v44 = vld [vmem:[%s15619_s1 + $0x4cc] sm:$0xf0]  ;;  %v7448_v46 = vor.u32 %v9959_v38, %v7447_v37  ;;  %4865 = vmatpush.bf16.msrb.mxu1 %v7192_v41 }
  0x26   :  { %v7175_v45 = vld [vmem:[%s15619_s1 + $0x5c0] sm:$0xf]  ;;  %v9891_v47 = vld [vmem:[%s15619_s1 + $0x5cc] sm:$0xf0]  ;;  %v7048_v52 = vor.u32 %v9859_v44, %v7047_v43  ;;  %4878 = vmatpush.bf16.msrb.mxu2 %v7320_v42 }
  0x27   :  { %v7303_v48 = vld [vmem:[%s15619_s1 + $0x6c0] sm:$0xf]  ;;  %v9923_v49 = vld [vmem:[%s15619_s1 + $0x6cc] sm:$0xf0]  ;;  %v7176_v55 = vor.u32 %v9891_v47, %v7175_v45  ;;  %4891 = vmatpush.bf16.msrb.mxu3 %v7448_v46 }
  0x28   :  { %v7431_v50 = vld [vmem:[%s15619_s1 + $0x7c0] sm:$0xf]  ;;  %v9955_v51 = vld [vmem:[%s15619_s1 + $0x7cc] sm:$0xf0]  ;;  %v7304_v56 = vor.u32 %v9923_v49, %v7303_v48  ;;  %4853 = vmatpush.bf16.msrb.mxu0 %v7048_v52 }
  0x29   :  { %v7031_v53 = vld [vmem:[%s15619_s1 + $0x4a0] sm:$0xf]  ;;  %v9855_v54 = vld [vmem:[%s15619_s1 + $0x4ac] sm:$0xf0]  ;;  %v7432_v60 = vor.u32 %v9955_v51, %v7431_v50  ;;  %4866 = vmatpush.bf16.msrb.mxu1 %v7176_v55 }
  0x2a   :  { %v7159_v57 = vld [vmem:[%s15619_s1 + $0x5a0] sm:$0xf]  ;;  %v9887_v58 = vld [vmem:[%s15619_s1 + $0x5ac] sm:$0xf0]  ;;  %v7032_v1 = vor.u32 %v9855_v54, %v7031_v53  ;;  %4879 = vmatpush.bf16.msrb.mxu2 %v7304_v56 }
  0x2b   :  { %v22_v59 = vld [vmem:[%s15618_s0] sm:$0xff]  ;;  %v9919_v62 = vld [vmem:[%s15619_s1 + $0x6ac] sm:$0xf0]  ;;  %v7160_v2 = vor.u32 %v9887_v58, %v7159_v57  ;;  %4892 = vmatpush.bf16.msrb.mxu3 %v7432_v60 }
  0x2c   :  { %v7287_v61 = vld [vmem:[%s15619_s1 + $0x6a0] sm:$0xf]  ;;  %821 = vst [vmem:[#allocation1] ss:$9 sm:$0xff] %v22_v59  ;;  %v9951_v0 = vld [vmem:[%s15619_s1 + $0x7ac] sm:$0xf0]  ;;  %4854 = vmatpush.bf16.msrb.mxu0 %v7032_v1 }
  0x2d   :  { %v7415_v63 = vld [vmem:[%s15619_s1 + $0x7a0] sm:$0xf]  ;;  %v7288_v3 = vor.u32 %v9919_v62, %v7287_v61  ;;  %v9851_v5 = vld [vmem:[%s15619_s1 + $0x48c] sm:$0xf0]  ;;  %4867 = vmatpush.bf16.msrb.mxu1 %v7160_v2  ;;  %v23_v61 = vld [vmem:[%s15618_s0 + $0x8] sm:$0xff] }
  0x2e   :  { %v7015_v4 = vld [vmem:[%s15619_s1 + $0x480] sm:$0xf]  ;;  %v7416_v7 = vor.u32 %v9951_v0, %v7415_v63  ;;  %v9883_v8 = vld [vmem:[%s15619_s1 + $0x58c] sm:$0xf0] }
  0x2f   :  { %v7143_v6 = vld [vmem:[%s15619_s1 + $0x580] sm:$0xf]  ;;  %v9915_v10 = vld [vmem:[%s15619_s1 + $0x68c] sm:$0xf0]  ;;  %v7016_v14 = vor.u32 %v9851_v5, %v7015_v4  ;;  %4880 = vmatpush.bf16.msrb.mxu2 %v7288_v3 }
  0x30   :  { %v7271_v9 = vld [vmem:[%s15619_s1 + $0x680] sm:$0xf]  ;;  %v9947_v12 = vld [vmem:[%s15619_s1 + $0x78c] sm:$0xf0]  ;;  %v7144_v18 = vor.u32 %v9883_v8, %v7143_v6  ;;  %4893 = vmatpush.bf16.msrb.mxu3 %v7416_v7 }
  0x31   :  { %v7399_v11 = vld [vmem:[%s15619_s1 + $0x780] sm:$0xf]  ;;  %v9847_v15 = vld [vmem:[%s15619_s1 + $0x46c] sm:$0xf0]  ;;  %v7272_v19 = vor.u32 %v9915_v10, %v7271_v9  ;;  %4855 = vmatpush.bf16.msrb.mxu0 %v7016_v14 }
  0x32   :  { %v6999_v13 = vld [vmem:[%s15619_s1 + $0x460] sm:$0xf]  ;;  %v9879_v17 = vld [vmem:[%s15619_s1 + $0x56c] sm:$0xf0]  ;;  %v7400_v23 = vor.u32 %v9947_v12, %v7399_v11  ;;  %4868 = vmatpush.bf16.msrb.mxu1 %v7144_v18 }
  0x33   :  { %v7127_v16 = vld [vmem:[%s15619_s1 + $0x560] sm:$0xf]  ;;  %v10889_v20 = vld [vmem:[#allocation1 + $0x12] sm:$0xff]  ;;  %v10902_v26 = vld [vmem:[#allocation1 + $0x9] sm:$0xff]  ;;  %v7000_v29 = vor.u32 %v9847_v15, %v6999_v13  ;;  %4881 = vmatpush.bf16.msrb.mxu2 %v7272_v19 }
  0x34   :  { %v10891_v21 = vld [vmem:[#allocation1] sm:$0xff]  ;;  %v9911_v25 = vld [vmem:[%s15619_s1 + $0x66c] sm:$0xf0]  ;;  %4834 = vmatmul.bf16.vlgmr.msra.gmra.mxu2 %v10889_v20  ;;  %4821 = vmatmul.bf16.vlgmr.msra.gmra.mxu1 %v10902_v26  ;;  %v7128_v30 = vor.u32 %v9879_v17, %v7127_v16  ;;  %v10979_v60 = vld [vmem:[#allocation1 + $0x36] sm:$0xff] }
  0x35   :  { %v10893_v22 = vld [vmem:[#allocation1 + $0x1b] sm:$0xff]  ;;  %v9943_v28 = vld [vmem:[%s15619_s1 + $0x76c] sm:$0xf0]  ;;  %4808 = vmatmul.bf16.vlgmr.msra.gmra.mxu0 %v10891_v21  ;;  %4894 = vmatpush.bf16.msrb.mxu3 %v7400_v23  ;;  %v10984_v0 = vld [vmem:[#allocation1 + $0x24] sm:$0xff] }
  0x36   :  { %v7255_v24 = vld [vmem:[%s15619_s1 + $0x660] sm:$0xf]  ;;  %4847 = vmatmul.bf16.vlgmr.msra.gmra.mxu3 %v10893_v22  ;;  %v9843_v33 = vld [vmem:[%s15619_s1 + $0x44c] sm:$0xf0]  ;;  %4856 = vmatpush.bf16.msrb.mxu0 %v7000_v29 }
  0x37   :  { %v7383_v27 = vld [vmem:[%s15619_s1 + $0x760] sm:$0xf]  ;;  %v7256_v31 = vor.u32 %v9911_v25, %v7255_v24  ;;  %v9875_v36 = vld [vmem:[%s15619_s1 + $0x54c] sm:$0xf0]  ;;  %4869 = vmatpush.bf16.msrb.mxu1 %v7128_v30 }
  0x38   :  { %v6983_v32 = vld [vmem:[%s15619_s1 + $0x440] sm:$0xf]  ;;  %v7384_v35 = vor.u32 %v9943_v28, %v7383_v27  ;;  %v9907_v38 = vld [vmem:[%s15619_s1 + $0x64c] sm:$0xf0] }
  0x39   :  { %v7111_v34 = vld [vmem:[%s15619_s1 + $0x540] sm:$0xf]  ;;  %v9939_v40 = vld [vmem:[%s15619_s1 + $0x74c] sm:$0xf0]  ;;  %v6984_v41 = vor.u32 %v9843_v33, %v6983_v32  ;;  %4882 = vmatpush.bf16.msrb.mxu2 %v7256_v31 }
  0x3a   :  { %v7239_v37 = vld [vmem:[%s15619_s1 + $0x640] sm:$0xf]  ;;  %v7112_v43 = vor.u32 %v9875_v36, %v7111_v34  ;;  %v9839_v45 = vld [vmem:[%s15619_s1 + $0x42c] sm:$0xf0]  ;;  %4895 = vmatpush.bf16.msrb.mxu3 %v7384_v35 }
  0x3b   :  { %v7367_v39 = vld [vmem:[%s15619_s1 + $0x740] sm:$0xf]  ;;  %v7240_v44 = vor.u32 %v9907_v38, %v7239_v37  ;;  %v9871_v47 = vld [vmem:[%s15619_s1 + $0x52c] sm:$0xf0]  ;;  %4857 = vmatpush.bf16.msrb.mxu0 %v6984_v41 }
  0x3c   :  { %v6967_v42 = vld [vmem:[%s15619_s1 + $0x420] sm:$0xf]  ;;  %v7368_v48 = vor.u32 %v9939_v40, %v7367_v39  ;;  %v9903_v50 = vld [vmem:[%s15619_s1 + $0x62c] sm:$0xf0]  ;;  %4870 = vmatpush.bf16.msrb.mxu1 %v7112_v43 }
  0x3d   :  { %v7095_v46 = vld [vmem:[%s15619_s1 + $0x520] sm:$0xf]  ;;  %v9935_v52 = vld [vmem:[%s15619_s1 + $0x72c] sm:$0xf0]  ;;  %v6968_v55 = vor.u32 %v9839_v45, %v6967_v42  ;;  %4883 = vmatpush.bf16.msrb.mxu2 %v7240_v44 }
  0x3e   :  { %v7223_v49 = vld [vmem:[%s15619_s1 + $0x620] sm:$0xf]  ;;  %v9835_v54 = vld [vmem:[%s15619_s1 + $0x40c] sm:$0xf0]  ;;  %v7096_v62 = vor.u32 %v9871_v47, %v7095_v46  ;;  %4896 = vmatpush.bf16.msrb.mxu3 %v7368_v48 }
  0x3f   :  { %v7351_v51 = vld [vmem:[%s15619_s1 + $0x720] sm:$0xf]  ;;  %v9867_v57 = vld [vmem:[%s15619_s1 + $0x50c] sm:$0xf0]  ;;  %v7224_v63 = vor.u32 %v9903_v50, %v7223_v49  ;;  %4858 = vmatpush.bf16.msrb.mxu0 %v6968_v55 }
  0x40   :  { %v6951_v53 = vld [vmem:[%s15619_s1 + $0x400] sm:$0xf]  ;;  %v9899_v59 = vld [vmem:[%s15619_s1 + $0x60c] sm:$0xf0]  ;;  %v7352_v3 = vor.u32 %v9935_v52, %v7351_v51  ;;  %4871 = vmatpush.bf16.msrb.mxu1 %v7096_v62 }
  0x41   :  { %v7079_v56 = vld [vmem:[%s15619_s1 + $0x500] sm:$0xf]  ;;  %v10988_v2 = vld [vmem:[#allocation1 + $0x2d] sm:$0xff]  ;;  %v6952_v9 = vor.u32 %v9835_v54, %v6951_v53  ;;  %4884 = vmatpush.bf16.msrb.mxu2 %v7224_v63 }
  0x42   :  { %v7207_v58 = vld [vmem:[%s15619_s1 + $0x600] sm:$0xf]  ;;  %v9931_v5 = vld [vmem:[%s15619_s1 + $0x70c] sm:$0xf0]  ;;  %v7080_v13 = vor.u32 %v9867_v57, %v7079_v56  ;;  %4897 = vmatpush.bf16.msrb.mxu3 %v7352_v3 }
  0x43   :  { %v10986_v1 = vld [vmem:[#allocation1 + $0x3f] sm:$0xff]  ;;  %v9991_v7 = vld [vmem:[%s15619_s1 + $0x8ec] sm:$0xf0]  ;;  %v7208_v14 = vor.u32 %v9899_v59, %v7207_v58  ;;  %4859 = vmatpush.bf16.msrb.mxu0 %v6952_v9 }
  0x44   :  { %v7335_v4 = vld [vmem:[%s15619_s1 + $0x700] sm:$0xf]  ;;  %831 = vst [vmem:[#allocation1] ss:$9 sm:$0xff] %v23_v61  ;;  %v10023_v10 = vld [vmem:[%s15619_s1 + $0x9ec] sm:$0xf0]  ;;  %4872 = vmatpush.bf16.msrb.mxu1 %v7080_v13 }
  0x45   :  { %v7575_v6 = vld [vmem:[%s15619_s1 + $0x8e0] sm:$0xf]  ;;  %v10055_v12 = vld [vmem:[%s15619_s1 + $0xaec] sm:$0xf0]  ;;  %v7336_v17 = vor.u32 %v9931_v5, %v7335_v4  ;;  %4885 = vmatpush.bf16.msrb.mxu2 %v7208_v14 }
  0x46   :  { %v7703_v8 = vld [vmem:[%s15619_s1 + $0x9e0] sm:$0xf]  ;;  %v10087_v16 = vld [vmem:[%s15619_s1 + $0xbec] sm:$0xf0]  ;;  %v7576_v18 = vor.u32 %v9991_v7, %v7575_v6  ;;  %4860 = vmatmul.bf16.vlgmr.msrb.gmra.mxu0 %v10984_v0 }
  0x47   :  { %v7831_v11 = vld [vmem:[%s15619_s1 + $0xae0] sm:$0xf]  ;;  %v7704_v19 = vor.u32 %v10023_v10, %v7703_v8  ;;  %v9987_v25 = vld [vmem:[%s15619_s1 + $0x8cc] sm:$0xf0]  ;;  %4898 = vmatpush.bf16.msrb.mxu3 %v7336_v17  ;;  %4873 = vmatmul.bf16.vlgmr.msrb.gmra.mxu1 %v10988_v2 }
  0x48   :  { %v7959_v15 = vld [vmem:[%s15619_s1 + $0xbe0] sm:$0xf]  ;;  %v7832_v23 = vor.u32 %v10055_v12, %v7831_v11  ;;  %v10019_v29 = vld [vmem:[%s15619_s1 + $0x9cc] sm:$0xf0]  ;;  %4904 = vmatpush.bf16.msra.mxu0 %v7576_v18  ;;  %4886 = vmatmul.bf16.vlgmr.msrb.gmra.mxu2 %v10979_v60 }
  0x49   :  { %v7559_v24 = vld [vmem:[%s15619_s1 + $0x8c0] sm:$0xf]  ;;  %v7960_v28 = vor.u32 %v10087_v16, %v7959_v15  ;;  %v10051_v31 = vld [vmem:[%s15619_s1 + $0xacc] sm:$0xf0]  ;;  %4917 = vmatpush.bf16.msra.mxu1 %v7704_v19 }
  0x4a   :  { %v7687_v27 = vld [vmem:[%s15619_s1 + $0x9c0] sm:$0xf]  ;;  %v10083_v33 = vld [vmem:[%s15619_s1 + $0xbcc] sm:$0xf0]  ;;  %v7560_v34 = vor.u32 %v9987_v25, %v7559_v24  ;;  %4930 = vmatpush.bf16.msra.mxu2 %v7832_v23  ;;  %4899 = vmatmul.bf16.vlgmr.msrb.gmra.mxu3 %v10986_v1 }
  0x4b   :  { %v7815_v30 = vld [vmem:[%s15619_s1 + $0xac0] sm:$0xf]  ;;  %v7688_v35 = vor.u32 %v10019_v29, %v7687_v27  ;;  %v9983_v38 = vld [vmem:[%s15619_s1 + $0x8ac] sm:$0xf0]  ;;  %4943 = vmatpush.bf16.msra.mxu3 %v7960_v28 }
  0x4c   :  { %v7943_v32 = vld [vmem:[%s15619_s1 + $0xbc0] sm:$0xf]  ;;  %v7816_v36 = vor.u32 %v10051_v31, %v7815_v30  ;;  %v10015_v41 = vld [vmem:[%s15619_s1 + $0x9ac] sm:$0xf0]  ;;  %4905 = vmatpush.bf16.msra.mxu0 %v7560_v34 }
  0x4d   :  { %v7543_v37 = vld [vmem:[%s15619_s1 + $0x8a0] sm:$0xf]  ;;  %v7944_v40 = vor.u32 %v10083_v33, %v7943_v32  ;;  %v10047_v43 = vld [vmem:[%s15619_s1 + $0xaac] sm:$0xf0]  ;;  %4918 = vmatpush.bf16.msra.mxu1 %v7688_v35 }
  0x4e   :  { %v7671_v39 = vld [vmem:[%s15619_s1 + $0x9a0] sm:$0xf]  ;;  %v10079_v45 = vld [vmem:[%s15619_s1 + $0xbac] sm:$0xf0]  ;;  %v7544_v46 = vor.u32 %v9983_v38, %v7543_v37  ;;  %4931 = vmatpush.bf16.msra.mxu2 %v7816_v36 }
  0x4f   :  { %v7799_v42 = vld [vmem:[%s15619_s1 + $0xaa0] sm:$0xf]  ;;  %v7672_v47 = vor.u32 %v10015_v41, %v7671_v39  ;;  %v9979_v50 = vld [vmem:[%s15619_s1 + $0x88c] sm:$0xf0]  ;;  %4944 = vmatpush.bf16.msra.mxu3 %v7944_v40 }
  0x50   :  { %v7927_v44 = vld [vmem:[%s15619_s1 + $0xba0] sm:$0xf]  ;;  %v7800_v48 = vor.u32 %v10047_v43, %v7799_v42  ;;  %v10011_v53 = vld [vmem:[%s15619_s1 + $0x98c] sm:$0xf0]  ;;  %4906 = vmatpush.bf16.msra.mxu0 %v7544_v46 }
  0x51   :  { %v7527_v49 = vld [vmem:[%s15619_s1 + $0x880] sm:$0xf]  ;;  %v7928_v52 = vor.u32 %v10079_v45, %v7927_v44  ;;  %v10043_v55 = vld [vmem:[%s15619_s1 + $0xa8c] sm:$0xf0]  ;;  %4919 = vmatpush.bf16.msra.mxu1 %v7672_v47 }
  0x52   :  { %v7655_v51 = vld [vmem:[%s15619_s1 + $0x980] sm:$0xf]  ;;  %v10075_v57 = vld [vmem:[%s15619_s1 + $0xb8c] sm:$0xf0]  ;;  %v7528_v58 = vor.u32 %v9979_v50, %v7527_v49  ;;  %4932 = vmatpush.bf16.msra.mxu2 %v7800_v48 }
  0x53   :  { %v7783_v54 = vld [vmem:[%s15619_s1 + $0xa80] sm:$0xf]  ;;  %v7656_v59 = vor.u32 %v10011_v53, %v7655_v51  ;;  %v9975_v63 = vld [vmem:[%s15619_s1 + $0x86c] sm:$0xf0]  ;;  %4945 = vmatpush.bf16.msra.mxu3 %v7928_v52 }
  0x54   :  { %v7911_v56 = vld [vmem:[%s15619_s1 + $0xb80] sm:$0xf]  ;;  %v7784_v61 = vor.u32 %v10043_v55, %v7783_v54  ;;  %v10007_v5 = vld [vmem:[%s15619_s1 + $0x96c] sm:$0xf0]  ;;  %4907 = vmatpush.bf16.msra.mxu0 %v7528_v58 }
  0x55   :  { %v7511_v62 = vld [vmem:[%s15619_s1 + $0x860] sm:$0xf]  ;;  %v7912_v4 = vor.u32 %v10075_v57, %v7911_v56  ;;  %v10039_v7 = vld [vmem:[%s15619_s1 + $0xa6c] sm:$0xf0]  ;;  %4920 = vmatpush.bf16.msra.mxu1 %v7656_v59 }
  0x56   :  { %v7639_v3 = vld [vmem:[%s15619_s1 + $0x960] sm:$0xf]  ;;  %v10071_v9 = vld [vmem:[%s15619_s1 + $0xb6c] sm:$0xf0]  ;;  %v7512_v10 = vor.u32 %v9975_v63, %v7511_v62  ;;  %4933 = vmatpush.bf16.msra.mxu2 %v7784_v61 }
  0x57   :  { %v7767_v6 = vld [vmem:[%s15619_s1 + $0xa60] sm:$0xf]  ;;  %v7640_v11 = vor.u32 %v10007_v5, %v7639_v3  ;;  %v9971_v14 = vld [vmem:[%s15619_s1 + $0x84c] sm:$0xf0]  ;;  %4946 = vmatpush.bf16.msra.mxu3 %v7912_v4 }
  0x58   :  { %v7895_v8 = vld [vmem:[%s15619_s1 + $0xb60] sm:$0xf]  ;;  %v7768_v12 = vor.u32 %v10039_v7, %v7767_v6  ;;  %v10003_v17 = vld [vmem:[%s15619_s1 + $0x94c] sm:$0xf0]  ;;  %4908 = vmatpush.bf16.msra.mxu0 %v7512_v10 }
  0x59   :  { %v7495_v13 = vld [vmem:[%s15619_s1 + $0x840] sm:$0xf]  ;;  %v7896_v16 = vor.u32 %v10071_v9, %v7895_v8  ;;  %v10035_v19 = vld [vmem:[%s15619_s1 + $0xa4c] sm:$0xf0]  ;;  %4921 = vmatpush.bf16.msra.mxu1 %v7640_v11 }
  0x5a   :  { %v7623_v15 = vld [vmem:[%s15619_s1 + $0x940] sm:$0xf]  ;;  %v10067_v24 = vld [vmem:[%s15619_s1 + $0xb4c] sm:$0xf0]  ;;  %v7496_v25 = vor.u32 %v9971_v14, %v7495_v13  ;;  %4934 = vmatpush.bf16.msra.mxu2 %v7768_v12 }
  0x5b   :  { %v7751_v18 = vld [vmem:[%s15619_s1 + $0xa40] sm:$0xf]  ;;  %v7624_v27 = vor.u32 %v10003_v17, %v7623_v15  ;;  %v9967_v30 = vld [vmem:[%s15619_s1 + $0x82c] sm:$0xf0]  ;;  %4947 = vmatpush.bf16.msra.mxu3 %v7896_v16 }
  0x5c   :  { %v7879_v23 = vld [vmem:[%s15619_s1 + $0xb40] sm:$0xf]  ;;  %v7752_v28 = vor.u32 %v10035_v19, %v7751_v18  ;;  %v9999_v33 = vld [vmem:[%s15619_s1 + $0x92c] sm:$0xf0]  ;;  %4909 = vmatpush.bf16.msra.mxu0 %v7496_v25 }
  0x5d   :  { %v7479_v29 = vld [vmem:[%s15619_s1 + $0x820] sm:$0xf]  ;;  %v7880_v32 = vor.u32 %v10067_v24, %v7879_v23  ;;  %v10031_v35 = vld [vmem:[%s15619_s1 + $0xa2c] sm:$0xf0]  ;;  %4922 = vmatpush.bf16.msra.mxu1 %v7624_v27 }
  0x5e   :  { %v7607_v31 = vld [vmem:[%s15619_s1 + $0x920] sm:$0xf]  ;;  %v10063_v37 = vld [vmem:[%s15619_s1 + $0xb2c] sm:$0xf0]  ;;  %v7480_v38 = vor.u32 %v9967_v30, %v7479_v29  ;;  %4935 = vmatpush.bf16.msra.mxu2 %v7752_v28 }
  0x5f   :  { %v7735_v34 = vld [vmem:[%s15619_s1 + $0xa20] sm:$0xf]  ;;  %v9963_v40 = vld [vmem:[%s15619_s1 + $0x80c] sm:$0xf0]  ;;  %v7608_v41 = vor.u32 %v9999_v33, %v7607_v31  ;;  %4948 = vmatpush.bf16.msra.mxu3 %v7880_v32 }
  0x60   :  { %v7863_v36 = vld [vmem:[%s15619_s1 + $0xb20] sm:$0xf]  ;;  %v7736_v42 = vor.u32 %v10031_v35, %v7735_v34  ;;  %v9995_v44 = vld [vmem:[%s15619_s1 + $0x90c] sm:$0xf0]  ;;  %4910 = vmatpush.bf16.msra.mxu0 %v7480_v38 }
  0x61   :  { %v7463_v39 = vld [vmem:[%s15619_s1 + $0x800] sm:$0xf]  ;;  %v7864_v46 = vor.u32 %v10063_v37, %v7863_v36  ;;  %v10027_v47 = vld [vmem:[%s15619_s1 + $0xa0c] sm:$0xf0]  ;;  %4923 = vmatpush.bf16.msra.mxu1 %v7608_v41 }
  0x62   :  { %v7591_v43 = vld [vmem:[%s15619_s1 + $0x900] sm:$0xf]  ;;  %v10059_v49 = vld [vmem:[%s15619_s1 + $0xb0c] sm:$0xf0]  ;;  %v7464_v53 = vor.u32 %v9963_v40, %v7463_v39  ;;  %4936 = vmatpush.bf16.msra.mxu2 %v7736_v42 }
  0x63   :  { %v7719_v45 = vld [vmem:[%s15619_s1 + $0xa00] sm:$0xf]  ;;  %v10119_v51 = vld [vmem:[%s15619_s1 + $0xcec] sm:$0xf0]  ;;  %v7592_v57 = vor.u32 %v9995_v44, %v7591_v43  ;;  %4949 = vmatpush.bf16.msra.mxu3 %v7864_v46 }
  0x64   :  { %v7847_v48 = vld [vmem:[%s15619_s1 + $0xb00] sm:$0xf]  ;;  %v10151_v54 = vld [vmem:[%s15619_s1 + $0xdec] sm:$0xf0]  ;;  %v7720_v58 = vor.u32 %v10027_v47, %v7719_v45  ;;  %4911 = vmatpush.bf16.msra.mxu0 %v7464_v53 }
  0x65   :  { %v8087_v50 = vld [vmem:[%s15619_s1 + $0xce0] sm:$0xf]  ;;  %v10183_v56 = vld [vmem:[%s15619_s1 + $0xeec] sm:$0xf0]  ;;  %v7848_v62 = vor.u32 %v10059_v49, %v7847_v48  ;;  %4924 = vmatpush.bf16.msra.mxu1 %v7592_v57 }
  0x66   :  { %v8215_v52 = vld [vmem:[%s15619_s1 + $0xde0] sm:$0xf]  ;;  %v10215_v61 = vld [vmem:[%s15619_s1 + $0xfec] sm:$0xf0]  ;;  %v8088_v63 = vor.u32 %v10119_v51, %v8087_v50  ;;  %4937 = vmatpush.bf16.msra.mxu2 %v7720_v58 }
  0x67   :  { %v8343_v55 = vld [vmem:[%s15619_s1 + $0xee0] sm:$0xf]  ;;  %v8216_v3 = vor.u32 %v10151_v54, %v8215_v52  ;;  %v10115_v6 = vld [vmem:[%s15619_s1 + $0xccc] sm:$0xf0]  ;;  %4950 = vmatpush.bf16.msra.mxu3 %v7848_v62 }
  0x68   :  { %v8471_v59 = vld [vmem:[%s15619_s1 + $0xfe0] sm:$0xf]  ;;  %v8344_v4 = vor.u32 %v10183_v56, %v8343_v55  ;;  %v10147_v9 = vld [vmem:[%s15619_s1 + $0xdcc] sm:$0xf0]  ;;  %4956 = vmatpush.bf16.msrb.mxu0 %v8088_v63 }
  0x69   :  { %v8071_v5 = vld [vmem:[%s15619_s1 + $0xcc0] sm:$0xf]  ;;  %v8472_v8 = vor.u32 %v10215_v61, %v8471_v59  ;;  %v10179_v11 = vld [vmem:[%s15619_s1 + $0xecc] sm:$0xf0]  ;;  %4969 = vmatpush.bf16.msrb.mxu1 %v8216_v3 }
  0x6a   :  { %v8199_v7 = vld [vmem:[%s15619_s1 + $0xdc0] sm:$0xf]  ;;  %v10211_v14 = vld [vmem:[%s15619_s1 + $0xfcc] sm:$0xf0]  ;;  %v8072_v18 = vor.u32 %v10115_v6, %v8071_v5  ;;  %4982 = vmatpush.bf16.msrb.mxu2 %v8344_v4 }
  0x6b   :  { %v8327_v10 = vld [vmem:[%s15619_s1 + $0xec0] sm:$0xf]  ;;  %v11242_v15 = vld [vmem:[#allocation1 + $0x12] sm:$0xff]  ;;  %v11244_v16 = vld [vmem:[#allocation1 + $0x9] sm:$0xff]  ;;  %v8200_v19 = vor.u32 %v10147_v9, %v8199_v7  ;;  %4995 = vmatpush.bf16.msrb.mxu3 %v8472_v8 }
  0x6c   :  { %v11234_v12 = vld [vmem:[#allocation1] sm:$0xff]  ;;  %v8328_v23 = vor.u32 %v10179_v11, %v8327_v10  ;;  %v10111_v25 = vld [vmem:[%s15619_s1 + $0xcac] sm:$0xf0]  ;;  %4938 = vmatmul.bf16.vlgmr.msra.gmra.mxu2 %v11242_v15  ;;  %4925 = vmatmul.bf16.vlgmr.msra.gmra.mxu1 %v11244_v16 }
  0x6d   :  { %v8455_v13 = vld [vmem:[%s15619_s1 + $0xfc0] sm:$0xf]  ;;  %4912 = vmatmul.bf16.vlgmr.msra.gmra.mxu0 %v11234_v12  ;;  %v10143_v29 = vld [vmem:[%s15619_s1 + $0xdac] sm:$0xf0]  ;;  %4970 = vmatpush.bf16.msrb.mxu1 %v8200_v19 }
  0x6e   :  { %v11246_v17 = vld [vmem:[#allocation1 + $0x1b] sm:$0xff]  ;;  %v8456_v28 = vor.u32 %v10211_v14, %v8455_v13  ;;  %v10175_v31 = vld [vmem:[%s15619_s1 + $0xeac] sm:$0xf0]  ;;  %4957 = vmatpush.bf16.msrb.mxu0 %v8072_v18  ;;  %4983 = vmatpush.bf16.msrb.mxu2 %v8328_v23 }
  0x6f   :  { %v8055_v24 = vld [vmem:[%s15619_s1 + $0xca0] sm:$0xf]  ;;  %v10207_v33 = vld [vmem:[%s15619_s1 + $0xfac] sm:$0xf0]  ;;  %4951 = vmatmul.bf16.vlgmr.msra.gmra.mxu3 %v11246_v17 }
  0x70   :  { %v8183_v27 = vld [vmem:[%s15619_s1 + $0xda0] sm:$0xf]  ;;  %v8056_v34 = vor.u32 %v10111_v25, %v8055_v24  ;;  %v10107_v38 = vld [vmem:[%s15619_s1 + $0xc8c] sm:$0xf0]  ;;  %4996 = vmatpush.bf16.msrb.mxu3 %v8456_v28 }
  0x71   :  { %v8311_v30 = vld [vmem:[%s15619_s1 + $0xea0] sm:$0xf]  ;;  %v8184_v36 = vor.u32 %v10143_v29, %v8183_v27  ;;  %v10139_v40 = vld [vmem:[%s15619_s1 + $0xd8c] sm:$0xf0] }
  0x72   :  { %v8439_v32 = vld [vmem:[%s15619_s1 + $0xfa0] sm:$0xf]  ;;  %v8312_v37 = vor.u32 %v10175_v31, %v8311_v30  ;;  %v10171_v43 = vld [vmem:[%s15619_s1 + $0xe8c] sm:$0xf0] }
  0x73   :  { %v8039_v35 = vld [vmem:[%s15619_s1 + $0xc80] sm:$0xf]  ;;  %v8440_v41 = vor.u32 %v10207_v33, %v8439_v32  ;;  %v10203_v45 = vld [vmem:[%s15619_s1 + $0xf8c] sm:$0xf0] }
  0x74   :  { %v8167_v39 = vld [vmem:[%s15619_s1 + $0xd80] sm:$0xf] }
  0x75   :  { %v8295_v42 = vld [vmem:[%s15619_s1 + $0xe80] sm:$0xf] }
  0x76   :  { %v8423_v44 = vld [vmem:[%s15619_s1 + $0xf80] sm:$0xf] }
  0x77   :  { %10 = vsyncpa [#allocation3], 0  ;;  %4958 = vmatpush.bf16.msrb.mxu0 %v8056_v34  ;;  %v8040_v46 = vor.u32 %v10107_v38, %v8039_v35  ;;  %4971 = vmatpush.bf16.msrb.mxu1 %v8184_v36  ;;  %v8168_v47 = vor.u32 %v10139_v40, %v8167_v39  ;;  %v8296_v48 = vor.u32 %v10171_v43, %v8295_v42  ;;  %v8023_v49 = vld [vmem:[%s15619_s1 + $0xc60] sm:$0xf]  ;;  %v10103_v50 = vld [vmem:[%s15619_s1 + $0xc6c] sm:$0xf0] }
  0x78   :  { %4984 = vmatpush.bf16.msrb.mxu2 %v8312_v37  ;;  %v8151_v51 = vld [vmem:[%s15619_s1 + $0xd60] sm:$0xf]  ;;  %4997 = vmatpush.bf16.msrb.mxu3 %v8440_v41  ;;  %v8424_v52 = vor.u32 %v10203_v45, %v8423_v44  ;;  %v10135_v53 = vld [vmem:[%s15619_s1 + $0xd6c] sm:$0xf0]  ;;  %v8024_v58 = vor.u32 %v10103_v50, %v8023_v49  ;;  %vm4797_vm0 = vcmask 523264   ;;  %s10555_s30 = smov [#allocation2]  }
  0x79   :  { %v8279_v54 = vld [vmem:[%s15619_s1 + $0xe60] sm:$0xf]  ;;  %v10167_v55 = vld [vmem:[%s15619_s1 + $0xe6c] sm:$0xf0]  ;;  %v8152_v59 = vor.u32 %v10135_v53, %v8151_v51  ;;  %s6426_s6 = sshll.u32 %s10555_s30, 4  ;;  %s6428_s9 = sshll.u32 %s15623_s5, 4  ;;  %s6427_s6 = int_to_ptr.vmem [resolvable:$true] %s6426_s6  ;;  %s6429_s9 = int_to_ptr.hbm [resolvable:$true] %s6428_s9 }
  0x7a   :  { %v8407_v56 = vld [vmem:[%s15619_s1 + $0xf60] sm:$0xf]  ;;  %v10199_v57 = vld [vmem:[%s15619_s1 + $0xf6c] sm:$0xf0]  ;;  %v8280_v61 = vor.u32 %v10167_v55, %v8279_v54 }
  0x7b   :  { %4959 = vmatpush.bf16.msrb.mxu0 %v8040_v46  ;;  %4972 = vmatpush.bf16.msrb.mxu1 %v8168_v47  ;;  %v8007_v62 = vld [vmem:[%s15619_s1 + $0xc40] sm:$0xf]  ;;  %v10099_v63 = vld [vmem:[%s15619_s1 + $0xc4c] sm:$0xf0]  ;;  %v8408_v4 = vor.u32 %v10199_v57, %v8407_v56  ;;  %v11408_v46 = vld [vmem:[#allocation1 + $0x24] sm:$0xff] }
  0x7c   :  { %4985 = vmatpush.bf16.msrb.mxu2 %v8296_v48  ;;  %v8135_v3 = vld [vmem:[%s15619_s1 + $0xd40] sm:$0xf]  ;;  %4998 = vmatpush.bf16.msrb.mxu3 %v8424_v52  ;;  %v10131_v5 = vld [vmem:[%s15619_s1 + $0xd4c] sm:$0xf0]  ;;  %v8008_v10 = vor.u32 %v10099_v63, %v8007_v62  ;;  %v11410_v47 = vld [vmem:[#allocation1 + $0x36] sm:$0xff] }
  0x7d   :  { %v8263_v6 = vld [vmem:[%s15619_s1 + $0xe40] sm:$0xf]  ;;  %v10163_v7 = vld [vmem:[%s15619_s1 + $0xe4c] sm:$0xf0]  ;;  %v8136_v13 = vor.u32 %v10131_v5, %v8135_v3 }
  0x7e   :  { %v8391_v8 = vld [vmem:[%s15619_s1 + $0xf40] sm:$0xf]  ;;  %v10195_v9 = vld [vmem:[%s15619_s1 + $0xf4c] sm:$0xf0]  ;;  %v8264_v14 = vor.u32 %v10163_v7, %v8263_v6 }
  0x7f   :  { %4960 = vmatpush.bf16.msrb.mxu0 %v8024_v58  ;;  %v7991_v11 = vld [vmem:[%s15619_s1 + $0xc20] sm:$0xf]  ;;  %4973 = vmatpush.bf16.msrb.mxu1 %v8152_v59  ;;  %v10095_v18 = vld [vmem:[%s15619_s1 + $0xc2c] sm:$0xf0]  ;;  %v8392_v24 = vor.u32 %v10195_v9, %v8391_v8 }
  0x80   :  { %4986 = vmatpush.bf16.msrb.mxu2 %v8280_v61  ;;  %v8119_v19 = vld [vmem:[%s15619_s1 + $0xd20] sm:$0xf]  ;;  %v10127_v23 = vld [vmem:[%s15619_s1 + $0xd2c] sm:$0xf0]  ;;  %4999 = vmatpush.bf16.msrb.mxu3 %v8408_v4  ;;  %v7992_v32 = vor.u32 %v10095_v18, %v7991_v11 }
  0x81   :  { %v8247_v25 = vld [vmem:[%s15619_s1 + $0xe20] sm:$0xf]  ;;  %v10159_v27 = vld [vmem:[%s15619_s1 + $0xe2c] sm:$0xf0]  ;;  %v8120_v37 = vor.u32 %v10127_v23, %v8119_v19 }
  0x82   :  { %v8375_v28 = vld [vmem:[%s15619_s1 + $0xf20] sm:$0xf]  ;;  %v10191_v29 = vld [vmem:[%s15619_s1 + $0xf2c] sm:$0xf0]  ;;  %v8248_v38 = vor.u32 %v10159_v27, %v8247_v25 }
  0x83   :  { %v7975_v30 = vld [vmem:[%s15619_s1 + $0xc00] sm:$0xf]  ;;  %v10091_v31 = vld [vmem:[%s15619_s1 + $0xc0c] sm:$0xf0]  ;;  %4961 = vmatpush.bf16.msrb.mxu0 %v8008_v10  ;;  %4974 = vmatpush.bf16.msrb.mxu1 %v8136_v13  ;;  %v8376_v43 = vor.u32 %v10191_v29, %v8375_v28 }
  0x84   :  { %v8103_v33 = vld [vmem:[%s15619_s1 + $0xd00] sm:$0xf]  ;;  %v10123_v34 = vld [vmem:[%s15619_s1 + $0xd0c] sm:$0xf0]  ;;  %4987 = vmatpush.bf16.msrb.mxu2 %v8264_v14  ;;  %5000 = vmatpush.bf16.msrb.mxu3 %v8392_v24  ;;  %v7976_v51 = vor.u32 %v10091_v31, %v7975_v30 }
  0x85   :  { %v8231_v35 = vld [vmem:[%s15619_s1 + $0xe00] sm:$0xf]  ;;  %v10155_v36 = vld [vmem:[%s15619_s1 + $0xe0c] sm:$0xf0]  ;;  %v8104_v54 = vor.u32 %v10123_v34, %v8103_v33 }
  0x86   :  { %v8359_v39 = vld [vmem:[%s15619_s1 + $0xf00] sm:$0xf]  ;;  %v10187_v40 = vld [vmem:[%s15619_s1 + $0xf0c] sm:$0xf0]  ;;  %v8232_v55 = vor.u32 %v10155_v36, %v8231_v35 }
  0x87   :  { %v8599_v41 = vld [vmem:[%s15619_s1 + $0x10e0] sm:$0xf]  ;;  %v10247_v42 = vld [vmem:[%s15619_s1 + $0x10ec] sm:$0xf0]  ;;  %4962 = vmatpush.bf16.msrb.mxu0 %v7992_v32  ;;  %4975 = vmatpush.bf16.msrb.mxu1 %v8120_v37  ;;  %v8360_v58 = vor.u32 %v10187_v40, %v8359_v39 }
  0x88   :  { %v8727_v44 = vld [vmem:[%s15619_s1 + $0x11e0] sm:$0xf]  ;;  %v10279_v45 = vld [vmem:[%s15619_s1 + $0x11ec] sm:$0xf0]  ;;  %4988 = vmatpush.bf16.msrb.mxu2 %v8248_v38  ;;  %5001 = vmatpush.bf16.msrb.mxu3 %v8376_v43  ;;  %v8600_v59 = vor.u32 %v10247_v42, %v8599_v41 }
  0x89   :  { %v11412_v48 = vld [vmem:[#allocation1 + $0x2d] sm:$0xff]  ;;  %v11414_v49 = vld [vmem:[#allocation1 + $0x3f] sm:$0xff]  ;;  %v8728_v61 = vor.u32 %v10279_v45, %v8727_v44 }
  0x8a   :  { %v24_v50 = vld [vmem:[%s15618_s0 + $0x10] sm:$0xff]  ;;  %v8855_v52 = vld [vmem:[%s15619_s1 + $0x12e0] sm:$0xf] }
  0x8b   :  { %v10311_v53 = vld [vmem:[%s15619_s1 + $0x12ec] sm:$0xf0]  ;;  %841 = vst [vmem:[#allocation1] ss:$9 sm:$0xff] %v24_v50  ;;  %v8983_v56 = vld [vmem:[%s15619_s1 + $0x13e0] sm:$0xf]  ;;  %4963 = vmatpush.bf16.msrb.mxu0 %v7976_v51  ;;  %4976 = vmatpush.bf16.msrb.mxu1 %v8104_v54 }
  0x8c   :  { %v10343_v57 = vld [vmem:[%s15619_s1 + $0x13ec] sm:$0xf0]  ;;  %v8856_v62 = vor.u32 %v10311_v53, %v8855_v52  ;;  %v8583_v63 = vld [vmem:[%s15619_s1 + $0x10c0] sm:$0xf]  ;;  %4989 = vmatpush.bf16.msrb.mxu2 %v8232_v55  ;;  %5002 = vmatpush.bf16.msrb.mxu3 %v8360_v58 }
  0x8d   :  { %v10243_v3 = vld [vmem:[%s15619_s1 + $0x10cc] sm:$0xf0]  ;;  %v8711_v4 = vld [vmem:[%s15619_s1 + $0x11c0] sm:$0xf]  ;;  %v8984_v5 = vor.u32 %v10343_v57, %v8983_v56 }
  0x8e   :  { %v10275_v6 = vld [vmem:[%s15619_s1 + $0x11cc] sm:$0xf0]  ;;  %v8839_v7 = vld [vmem:[%s15619_s1 + $0x12c0] sm:$0xf]  ;;  %v8584_v11 = vor.u32 %v10243_v3, %v8583_v63  ;;  %4964 = vmatmul.bf16.vlgmr.msrb.gmra.mxu0 %v11408_v46  ;;  %4977 = vmatmul.bf16.vlgmr.msrb.gmra.mxu1 %v11412_v48 }
  0x8f   :  { %v10307_v8 = vld [vmem:[%s15619_s1 + $0x12cc] sm:$0xf0]  ;;  %v8967_v9 = vld [vmem:[%s15619_s1 + $0x13c0] sm:$0xf]  ;;  %5008 = vmatpush.bf16.msra.mxu0 %v8600_v59  ;;  %5021 = vmatpush.bf16.msra.mxu1 %v8728_v61  ;;  %v8712_v13 = vor.u32 %v10275_v6, %v8711_v4 }
  0x90   :  { %v10339_v10 = vld [vmem:[%s15619_s1 + $0x13cc] sm:$0xf0]  ;;  %5034 = vmatpush.bf16.msra.mxu2 %v8856_v62  ;;  %v8840_v14 = vor.u32 %v10307_v8, %v8839_v7  ;;  %v8567_v18 = vld [vmem:[%s15619_s1 + $0x10a0] sm:$0xf]  ;;  %5047 = vmatpush.bf16.msra.mxu3 %v8984_v5 }
  0x91   :  { %v10239_v19 = vld [vmem:[%s15619_s1 + $0x10ac] sm:$0xf0]  ;;  %v8695_v23 = vld [vmem:[%s15619_s1 + $0x11a0] sm:$0xf]  ;;  %v8968_v24 = vor.u32 %v10339_v10, %v8967_v9  ;;  %4990 = vmatmul.bf16.vlgmr.msrb.gmra.mxu2 %v11410_v47  ;;  %5003 = vmatmul.bf16.vlgmr.msrb.gmra.mxu3 %v11414_v49 }
  0x92   :  { %v10271_v25 = vld [vmem:[%s15619_s1 + $0x11ac] sm:$0xf0]  ;;  %v8823_v27 = vld [vmem:[%s15619_s1 + $0x12a0] sm:$0xf]  ;;  %v8568_v31 = vor.u32 %v10239_v19, %v8567_v18 }
  0x93   :  { %v10303_v28 = vld [vmem:[%s15619_s1 + $0x12ac] sm:$0xf0]  ;;  %v8951_v29 = vld [vmem:[%s15619_s1 + $0x13a0] sm:$0xf]  ;;  %5009 = vmatpush.bf16.msra.mxu0 %v8584_v11  ;;  %5022 = vmatpush.bf16.msra.mxu1 %v8712_v13  ;;  %v8696_v32 = vor.u32 %v10271_v25, %v8695_v23 }
  0x94   :  { %v10335_v30 = vld [vmem:[%s15619_s1 + $0x13ac] sm:$0xf0]  ;;  %5035 = vmatpush.bf16.msra.mxu2 %v8840_v14  ;;  %v8824_v33 = vor.u32 %v10303_v28, %v8823_v27  ;;  %v8551_v34 = vld [vmem:[%s15619_s1 + $0x1080] sm:$0xf]  ;;  %5048 = vmatpush.bf16.msra.mxu3 %v8968_v24 }
  0x95   :  { %v10235_v35 = vld [vmem:[%s15619_s1 + $0x108c] sm:$0xf0]  ;;  %v8679_v36 = vld [vmem:[%s15619_s1 + $0x1180] sm:$0xf]  ;;  %v8952_v37 = vor.u32 %v10335_v30, %v8951_v29 }
  0x96   :  { %v10267_v38 = vld [vmem:[%s15619_s1 + $0x118c] sm:$0xf0]  ;;  %v8807_v39 = vld [vmem:[%s15619_s1 + $0x1280] sm:$0xf]  ;;  %v8552_v43 = vor.u32 %v10235_v35, %v8551_v34 }
  0x97   :  { %v10299_v40 = vld [vmem:[%s15619_s1 + $0x128c] sm:$0xf0]  ;;  %v8935_v41 = vld [vmem:[%s15619_s1 + $0x1380] sm:$0xf]  ;;  %5010 = vmatpush.bf16.msra.mxu0 %v8568_v31  ;;  %5023 = vmatpush.bf16.msra.mxu1 %v8696_v32  ;;  %v8680_v44 = vor.u32 %v10267_v38, %v8679_v36 }
  0x98   :  { %v10331_v42 = vld [vmem:[%s15619_s1 + $0x138c] sm:$0xf0]  ;;  %5036 = vmatpush.bf16.msra.mxu2 %v8824_v33  ;;  %v8808_v45 = vor.u32 %v10299_v40, %v8807_v39  ;;  %v8535_v50 = vld [vmem:[%s15619_s1 + $0x1060] sm:$0xf]  ;;  %5049 = vmatpush.bf16.msra.mxu3 %v8952_v37 }
  0x99   :  { %v10231_v51 = vld [vmem:[%s15619_s1 + $0x106c] sm:$0xf0]  ;;  %v8663_v52 = vld [vmem:[%s15619_s1 + $0x1160] sm:$0xf]  ;;  %v8936_v53 = vor.u32 %v10331_v42, %v8935_v41 }
  0x9a   :  { %v10263_v54 = vld [vmem:[%s15619_s1 + $0x116c] sm:$0xf0]  ;;  %v8791_v55 = vld [vmem:[%s15619_s1 + $0x1260] sm:$0xf]  ;;  %v8536_v59 = vor.u32 %v10231_v51, %v8535_v50 }
  0x9b   :  { %v10295_v56 = vld [vmem:[%s15619_s1 + $0x126c] sm:$0xf0]  ;;  %v8919_v57 = vld [vmem:[%s15619_s1 + $0x1360] sm:$0xf]  ;;  %5011 = vmatpush.bf16.msra.mxu0 %v8552_v43  ;;  %5024 = vmatpush.bf16.msra.mxu1 %v8680_v44  ;;  %v8664_v61 = vor.u32 %v10263_v54, %v8663_v52 }
  0x9c   :  { %v10327_v58 = vld [vmem:[%s15619_s1 + $0x136c] sm:$0xf0]  ;;  %5037 = vmatpush.bf16.msra.mxu2 %v8808_v45  ;;  %v8792_v62 = vor.u32 %v10295_v56, %v8791_v55  ;;  %v8519_v63 = vld [vmem:[%s15619_s1 + $0x1040] sm:$0xf]  ;;  %5050 = vmatpush.bf16.msra.mxu3 %v8936_v53 }
  0x9d   :  { %v10227_v3 = vld [vmem:[%s15619_s1 + $0x104c] sm:$0xf0]  ;;  %v8647_v4 = vld [vmem:[%s15619_s1 + $0x1140] sm:$0xf]  ;;  %v8920_v5 = vor.u32 %v10327_v58, %v8919_v57 }
  0x9e   :  { %v10259_v6 = vld [vmem:[%s15619_s1 + $0x114c] sm:$0xf0]  ;;  %v8775_v7 = vld [vmem:[%s15619_s1 + $0x1240] sm:$0xf]  ;;  %v8520_v11 = vor.u32 %v10227_v3, %v8519_v63 }
  0x9f   :  { %v10291_v8 = vld [vmem:[%s15619_s1 + $0x124c] sm:$0xf0]  ;;  %v8903_v9 = vld [vmem:[%s15619_s1 + $0x1340] sm:$0xf]  ;;  %5012 = vmatpush.bf16.msra.mxu0 %v8536_v59  ;;  %5025 = vmatpush.bf16.msra.mxu1 %v8664_v61  ;;  %v8648_v13 = vor.u32 %v10259_v6, %v8647_v4 }
  0xa0   :  { %v10323_v10 = vld [vmem:[%s15619_s1 + $0x134c] sm:$0xf0]  ;;  %5038 = vmatpush.bf16.msra.mxu2 %v8792_v62  ;;  %v8776_v14 = vor.u32 %v10291_v8, %v8775_v7  ;;  %v8503_v18 = vld [vmem:[%s15619_s1 + $0x1020] sm:$0xf]  ;;  %5051 = vmatpush.bf16.msra.mxu3 %v8920_v5 }
  0xa1   :  { %v10223_v19 = vld [vmem:[%s15619_s1 + $0x102c] sm:$0xf0]  ;;  %v8631_v23 = vld [vmem:[%s15619_s1 + $0x1120] sm:$0xf]  ;;  %v8904_v24 = vor.u32 %v10323_v10, %v8903_v9 }
  0xa2   :  { %v10255_v25 = vld [vmem:[%s15619_s1 + $0x112c] sm:$0xf0]  ;;  %v8759_v27 = vld [vmem:[%s15619_s1 + $0x1220] sm:$0xf]  ;;  %v8504_v31 = vor.u32 %v10223_v19, %v8503_v18 }
  0xa3   :  { %v10287_v28 = vld [vmem:[%s15619_s1 + $0x122c] sm:$0xf0]  ;;  %v8887_v29 = vld [vmem:[%s15619_s1 + $0x1320] sm:$0xf]  ;;  %5013 = vmatpush.bf16.msra.mxu0 %v8520_v11  ;;  %5026 = vmatpush.bf16.msra.mxu1 %v8648_v13  ;;  %v8632_v34 = vor.u32 %v10255_v25, %v8631_v23 }
  0xa4   :  { %v10319_v30 = vld [vmem:[%s15619_s1 + $0x132c] sm:$0xf0]  ;;  %v8487_v32 = vld [vmem:[%s15619_s1 + $0x1000] sm:$0xf]  ;;  %5039 = vmatpush.bf16.msra.mxu2 %v8776_v14  ;;  %v8760_v35 = vor.u32 %v10287_v28, %v8759_v27  ;;  %5052 = vmatpush.bf16.msra.mxu3 %v8904_v24 }
  0xa5   :  { %v10219_v33 = vld [vmem:[%s15619_s1 + $0x100c] sm:$0xf0]  ;;  %v8615_v36 = vld [vmem:[%s15619_s1 + $0x1100] sm:$0xf]  ;;  %v8888_v39 = vor.u32 %v10319_v30, %v8887_v29 }
  0xa6   :  { %v10251_v37 = vld [vmem:[%s15619_s1 + $0x110c] sm:$0xf0]  ;;  %v8743_v38 = vld [vmem:[%s15619_s1 + $0x1200] sm:$0xf]  ;;  %v8488_v50 = vor.u32 %v10219_v33, %v8487_v32 }
  0xa7   :  { %v10283_v40 = vld [vmem:[%s15619_s1 + $0x120c] sm:$0xf0]  ;;  %v8871_v41 = vld [vmem:[%s15619_s1 + $0x1300] sm:$0xf]  ;;  %5014 = vmatpush.bf16.msra.mxu0 %v8504_v31  ;;  %5027 = vmatpush.bf16.msra.mxu1 %v8632_v34  ;;  %v8616_v54 = vor.u32 %v10251_v37, %v8615_v36 }
  0xa8   :  { %v10315_v42 = vld [vmem:[%s15619_s1 + $0x130c] sm:$0xf0]  ;;  %v9111_v43 = vld [vmem:[%s15619_s1 + $0x14e0] sm:$0xf]  ;;  %5040 = vmatpush.bf16.msra.mxu2 %v8760_v35  ;;  %v8744_v55 = vor.u32 %v10283_v40, %v8743_v38  ;;  %5053 = vmatpush.bf16.msra.mxu3 %v8888_v39 }
  0xa9   :  { %v10375_v44 = vld [vmem:[%s15619_s1 + $0x14ec] sm:$0xf0]  ;;  %v9239_v45 = vld [vmem:[%s15619_s1 + $0x15e0] sm:$0xf]  ;;  %v8872_v58 = vor.u32 %v10315_v42, %v8871_v41 }
  0xaa   :  { %v10407_v51 = vld [vmem:[%s15619_s1 + $0x15ec] sm:$0xf0]  ;;  %v9367_v52 = vld [vmem:[%s15619_s1 + $0x16e0] sm:$0xf]  ;;  %v9112_v59 = vor.u32 %v10375_v44, %v9111_v43 }
  0xab   :  { %v10439_v53 = vld [vmem:[%s15619_s1 + $0x16ec] sm:$0xf0]  ;;  %v9495_v56 = vld [vmem:[%s15619_s1 + $0x17e0] sm:$0xf]  ;;  %v9240_v61 = vor.u32 %v10407_v51, %v9239_v45  ;;  %5015 = vmatpush.bf16.msra.mxu0 %v8488_v50  ;;  %5028 = vmatpush.bf16.msra.mxu1 %v8616_v54 }
  0xac   :  { %v10471_v57 = vld [vmem:[%s15619_s1 + $0x17ec] sm:$0xf0]  ;;  %v9368_v62 = vor.u32 %v10439_v53, %v9367_v52  ;;  %v9095_v63 = vld [vmem:[%s15619_s1 + $0x14c0] sm:$0xf]  ;;  %5041 = vmatpush.bf16.msra.mxu2 %v8744_v55  ;;  %5054 = vmatpush.bf16.msra.mxu3 %v8872_v58 }
  0xad   :  { %v10371_v3 = vld [vmem:[%s15619_s1 + $0x14cc] sm:$0xf0]  ;;  %v9223_v4 = vld [vmem:[%s15619_s1 + $0x15c0] sm:$0xf]  ;;  %v9496_v5 = vor.u32 %v10471_v57, %v9495_v56 }
  0xae   :  { %v10403_v6 = vld [vmem:[%s15619_s1 + $0x15cc] sm:$0xf0]  ;;  %v9351_v7 = vld [vmem:[%s15619_s1 + $0x16c0] sm:$0xf]  ;;  %v9096_v19 = vor.u32 %v10371_v3, %v9095_v63 }
  0xaf   :  { %v10435_v8 = vld [vmem:[%s15619_s1 + $0x16cc] sm:$0xf0]  ;;  %v11645_v9 = vld [vmem:[#allocation1] sm:$0xff]  ;;  %5060 = vmatpush.bf16.msrb.mxu0 %v9112_v59  ;;  %5073 = vmatpush.bf16.msrb.mxu1 %v9240_v61  ;;  %v9224_v23 = vor.u32 %v10403_v6, %v9223_v4 }
  0xb0   :  { %v9479_v10 = vld [vmem:[%s15619_s1 + $0x17c0] sm:$0xf]  ;;  %v10467_v11 = vld [vmem:[%s15619_s1 + $0x17cc] sm:$0xf0]  ;;  %5086 = vmatpush.bf16.msrb.mxu2 %v9368_v62  ;;  %v9352_v24 = vor.u32 %v10435_v8, %v9351_v7  ;;  %5099 = vmatpush.bf16.msrb.mxu3 %v9496_v5  ;;  %v11738_v4 = vld [vmem:[#allocation1 + $0x24] sm:$0xff] }
  0xb1   :  { %v11653_v13 = vld [vmem:[#allocation1 + $0x12] sm:$0xff]  ;;  %v11655_v14 = vld [vmem:[#allocation1 + $0x9] sm:$0xff]  ;;  %v11657_v18 = vld [vmem:[#allocation1 + $0x1b] sm:$0xff]  ;;  %5016 = vmatmul.bf16.vlgmr.msra.gmra.mxu0 %v11645_v9  ;;  %v9480_v29 = vor.u32 %v10467_v11, %v9479_v10 }
  0xb2   :  { %v9079_v25 = vld [vmem:[%s15619_s1 + $0x14a0] sm:$0xf]  ;;  %v10367_v27 = vld [vmem:[%s15619_s1 + $0x14ac] sm:$0xf0]  ;;  %5042 = vmatmul.bf16.vlgmr.msra.gmra.mxu2 %v11653_v13  ;;  %5029 = vmatmul.bf16.vlgmr.msra.gmra.mxu1 %v11655_v14  ;;  %v11740_v5 = vld [vmem:[#allocation1 + $0x36] sm:$0xff] }
  0xb3   :  { %v9207_v28 = vld [vmem:[%s15619_s1 + $0x15a0] sm:$0xf]  ;;  %v10399_v30 = vld [vmem:[%s15619_s1 + $0x15ac] sm:$0xf0]  ;;  %5055 = vmatmul.bf16.vlgmr.msra.gmra.mxu3 %v11657_v18  ;;  %5061 = vmatpush.bf16.msrb.mxu0 %v9096_v19  ;;  %v9080_v35 = vor.u32 %v10367_v27, %v9079_v25  ;;  %v25_v8 = vld [vmem:[%s15618_s0 + $0x18] sm:$0x1] }
  0xb4   :  { %v9335_v31 = vld [vmem:[%s15619_s1 + $0x16a0] sm:$0xf]  ;;  %v10431_v32 = vld [vmem:[%s15619_s1 + $0x16ac] sm:$0xf0]  ;;  %5074 = vmatpush.bf16.msrb.mxu1 %v9224_v23  ;;  %5087 = vmatpush.bf16.msrb.mxu2 %v9352_v24  ;;  %v9208_v37 = vor.u32 %v10399_v30, %v9207_v28 }
  0xb5   :  { %v9463_v33 = vld [vmem:[%s15619_s1 + $0x17a0] sm:$0xf]  ;;  %v10463_v34 = vld [vmem:[%s15619_s1 + $0x17ac] sm:$0xf0]  ;;  %v9336_v38 = vor.u32 %v10431_v32, %v9335_v31  ;;  %5100 = vmatpush.bf16.msrb.mxu3 %v9480_v29 }
  0xb6   :  { %v9063_v36 = vld [vmem:[%s15619_s1 + $0x1480] sm:$0xf]  ;;  %v10363_v39 = vld [vmem:[%s15619_s1 + $0x148c] sm:$0xf0]  ;;  %v9464_v42 = vor.u32 %v10463_v34, %v9463_v33 }
  0xb7   :  { %v9191_v40 = vld [vmem:[%s15619_s1 + $0x1580] sm:$0xf]  ;;  %v10395_v41 = vld [vmem:[%s15619_s1 + $0x158c] sm:$0xf0]  ;;  %5062 = vmatpush.bf16.msrb.mxu0 %v9080_v35  ;;  %v9064_v53 = vor.u32 %v10363_v39, %v9063_v36  ;;  %v4809_v35 = vpop.f32.mrf.mxu0 }
  0xb8   :  { %v9319_v43 = vld [vmem:[%s15619_s1 + $0x1680] sm:$0xf]  ;;  %v10427_v44 = vld [vmem:[%s15619_s1 + $0x168c] sm:$0xf0]  ;;  %5075 = vmatpush.bf16.msrb.mxu1 %v9208_v37  ;;  %5088 = vmatpush.bf16.msrb.mxu2 %v9336_v38  ;;  %v9192_v57 = vor.u32 %v10395_v41, %v9191_v40 }
  0xb9   :  { %v9447_v45 = vld [vmem:[%s15619_s1 + $0x1780] sm:$0xf]  ;;  %v10459_v50 = vld [vmem:[%s15619_s1 + $0x178c] sm:$0xf0]  ;;  %v9320_v58 = vor.u32 %v10427_v44, %v9319_v43  ;;  %5101 = vmatpush.bf16.msrb.mxu3 %v9464_v42  ;;  %v4822_v42 = vpop.f32.mrf.mxu1 }
  0xba   :  { %v9047_v51 = vld [vmem:[%s15619_s1 + $0x1460] sm:$0xf]  ;;  %v10359_v52 = vld [vmem:[%s15619_s1 + $0x146c] sm:$0xf0]  ;;  %v9448_v63 = vor.u32 %v10459_v50, %v9447_v45 }
  0xbb   :  { %v9175_v54 = vld [vmem:[%s15619_s1 + $0x1560] sm:$0xf]  ;;  %v10391_v55 = vld [vmem:[%s15619_s1 + $0x156c] sm:$0xf0]  ;;  %5063 = vmatpush.bf16.msrb.mxu0 %v9064_v53  ;;  %v9048_v10 = vor.u32 %v10359_v52, %v9047_v51 }
  0xbc   :  { %v9303_v56 = vld [vmem:[%s15619_s1 + $0x1660] sm:$0xf]  ;;  %v10423_v59 = vld [vmem:[%s15619_s1 + $0x166c] sm:$0xf0]  ;;  %5076 = vmatpush.bf16.msrb.mxu1 %v9192_v57  ;;  %5089 = vmatpush.bf16.msrb.mxu2 %v9320_v58  ;;  %v9176_v19 = vor.u32 %v10391_v55, %v9175_v54 }
  0xbd   :  { %v9431_v61 = vld [vmem:[%s15619_s1 + $0x1760] sm:$0xf]  ;;  %v10455_v62 = vld [vmem:[%s15619_s1 + $0x176c] sm:$0xf0]  ;;  %v9304_v23 = vor.u32 %v10423_v59, %v9303_v56  ;;  %5102 = vmatpush.bf16.msrb.mxu3 %v9448_v63  ;;  %v4835_v63 = vpop.f32.mrf.mxu2 }
  0xbe   :  { %v810_v3 = vld [vmem:[%s15620_s2] sm:$0xf]  ;;  %v11742_v6 = vld [vmem:[#allocation1 + $0x2d] sm:$0xff]  ;;  %v9432_v28 = vor.u32 %v10455_v62, %v9431_v61 }
  0xbf   :  { %v11744_v7 = vld [vmem:[#allocation1 + $0x3f] sm:$0xff]  ;;  %v10355_v24 = vld [vmem:[%s15619_s1 + $0x144c] sm:$0xf0]  ;;  %v812_v27 = vperm.slane %v810_v3, 0  ;;  %5064 = vmatpush.bf16.msrb.mxu0 %v9048_v10 }
  0xc0   :  { %v9031_v11 = vld [vmem:[%s15619_s1 + $0x1440] sm:$0xf]  ;;  %851 = vst [vmem:[#allocation1] ss:$9 sm:$0xff] %v25_v8  ;;  %v10387_v29 = vld [vmem:[%s15619_s1 + $0x154c] sm:$0xf0]  ;;  %5077 = vmatpush.bf16.msrb.mxu1 %v9176_v19  ;;  %5090 = vmatpush.bf16.msrb.mxu2 %v9304_v23  ;;  %v4848_v23 = vpop.f32.mrf.mxu3 }
  0xc1   :  { %v9159_v25 = vld [vmem:[%s15619_s1 + $0x1540] sm:$0xf]  ;;  %v10419_v31 = vld [vmem:[%s15619_s1 + $0x164c] sm:$0xf0]  ;;  %v9032_v34 = vor.u32 %v10355_v24, %v9031_v11  ;;  %v4810_v41 = vadd.f32 %v4809_v35, %v812_v27  ;;  %5103 = vmatpush.bf16.msrb.mxu3 %v9432_v28  ;;  %v9733_v27 = vld [vmem:[%s15619_s1 + $0xe4] sm:$0xf] }
  0xc2   :  { %v9287_v30 = vld [vmem:[%s15619_s1 + $0x1640] sm:$0xf]  ;;  %v10451_v33 = vld [vmem:[%s15619_s1 + $0x174c] sm:$0xf0]  ;;  %v9160_v36 = vor.u32 %v10387_v29, %v9159_v25  ;;  %v6553_v29 = vld [vmem:[%s15619_s1 + $0xf0] sm:$0xf0] }
  0xc3   :  { %v9415_v32 = vld [vmem:[%s15619_s1 + $0x1740] sm:$0xf]  ;;  %v9288_v37 = vor.u32 %v10419_v31, %v9287_v30  ;;  %v10351_v39 = vld [vmem:[%s15619_s1 + $0x142c] sm:$0xf0]  ;;  %v4823_v53 = vadd.f32 %v4822_v42, %v4810_v41  ;;  %5065 = vmatpush.bf16.msrb.mxu0 %v9032_v34  ;;  %v9765_v30 = vld [vmem:[%s15619_s1 + $0x1e4] sm:$0xf]  ;;  %v6556_v41 = vor.u32 %v9733_v27, %v6553_v29 }
  0xc4   :  { %v9015_v38 = vld [vmem:[%s15619_s1 + $0x1420] sm:$0xf]  ;;  %v9416_v43 = vor.u32 %v10451_v33, %v9415_v32  ;;  %v10383_v44 = vld [vmem:[%s15619_s1 + $0x152c] sm:$0xf0]  ;;  %5078 = vmatpush.bf16.msrb.mxu1 %v9160_v36  ;;  %v6681_v31 = vld [vmem:[%s15619_s1 + $0x1f0] sm:$0xf0]  ;;  %v4811_v33 = vpop.f32.mrf.mxu0 }
  0xc5   :  { %v9143_v40 = vld [vmem:[%s15619_s1 + $0x1520] sm:$0xf]  ;;  %v10415_v50 = vld [vmem:[%s15619_s1 + $0x162c] sm:$0xf0]  ;;  %v9016_v54 = vor.u32 %v10351_v39, %v9015_v38  ;;  %5091 = vmatpush.bf16.msrb.mxu2 %v9288_v37  ;;  %v4836_v19 = vadd.f32 %v4835_v63, %v4823_v53  ;;  %v9797_v36 = vld [vmem:[%s15619_s1 + $0x2e4] sm:$0xf]  ;;  %v4824_v38 = vpop.f32.mrf.mxu1  ;;  %v6684_v42 = vor.u32 %v9765_v30, %v6681_v31 }
  0xc6   :  { %v9271_v45 = vld [vmem:[%s15619_s1 + $0x1620] sm:$0xf]  ;;  %v10447_v52 = vld [vmem:[%s15619_s1 + $0x172c] sm:$0xf0]  ;;  %v9144_v57 = vor.u32 %v10383_v44, %v9143_v40  ;;  %5104 = vmatpush.bf16.msrb.mxu3 %v9416_v43  ;;  %v6809_v37 = vld [vmem:[%s15619_s1 + $0x2f0] sm:$0xf0] }
  0xc7   :  { %v9399_v51 = vld [vmem:[%s15619_s1 + $0x1720] sm:$0xf]  ;;  %v10347_v56 = vld [vmem:[%s15619_s1 + $0x140c] sm:$0xf0]  ;;  %v9272_v58 = vor.u32 %v10415_v50, %v9271_v45  ;;  %5066 = vmatpush.bf16.msrb.mxu0 %v9016_v54  ;;  %v11839_v32 = vadd.f32 %v4848_v23, %v4836_v19  ;;  %v9729_v45 = vld [vmem:[%s15619_s1 + $0xc4] sm:$0xf]  ;;  %v6812_v50 = vor.u32 %v9797_v36, %v6809_v37 }
  0xc8   :  { %v8999_v55 = vld [vmem:[%s15619_s1 + $0x1400] sm:$0xf]  ;;  %v10379_v61 = vld [vmem:[%s15619_s1 + $0x150c] sm:$0xf0]  ;;  %v9400_v3 = vor.u32 %v10447_v52, %v9399_v51  ;;  %5079 = vmatpush.bf16.msrb.mxu1 %v9144_v57  ;;  %v6537_v51 = vld [vmem:[%s15619_s1 + $0xd0] sm:$0xf0] }
  0xc9   :  { %v9127_v59 = vld [vmem:[%s15619_s1 + $0x1500] sm:$0xf]  ;;  %v10411_v8 = vld [vmem:[%s15619_s1 + $0x160c] sm:$0xf0]  ;;  %v9000_v28 = vor.u32 %v10347_v56, %v8999_v55  ;;  %5092 = vmatpush.bf16.msrb.mxu2 %v9272_v58  ;;  %v9761_v52 = vld [vmem:[%s15619_s1 + $0x1c4] sm:$0xf]  ;;  %v4837_v56 = vpop.f32.mrf.mxu2  ;;  %v4850_v58 = vpop.f32.mrf.mxu3 }
  0xca   :  { %v9255_v62 = vld [vmem:[%s15619_s1 + $0x1600] sm:$0xf]  ;;  %v10443_v11 = vld [vmem:[%s15619_s1 + $0x170c] sm:$0xf0]  ;;  %v9128_v34 = vor.u32 %v10379_v61, %v9127_v59  ;;  %5105 = vmatpush.bf16.msrb.mxu3 %v9400_v3  ;;  %v6665_v53 = vld [vmem:[%s15619_s1 + $0x1d0] sm:$0xf0]  ;;  %v6540_v59 = vor.u32 %v9729_v45, %v6537_v51 }
  0xcb   :  { %v9383_v10 = vld [vmem:[%s15619_s1 + $0x1700] sm:$0xf]  ;;  %v10487_v25 = vld [vmem:[%s15619_s1 + $0x186c] sm:$0xf0]  ;;  %v9256_v35 = vor.u32 %v10411_v8, %v9255_v62  ;;  %5067 = vmatpush.bf16.msrb.mxu0 %v9000_v28  ;;  %v9793_v54 = vld [vmem:[%s15619_s1 + $0x2c4] sm:$0xf]  ;;  %v6668_v61 = vor.u32 %v9761_v52, %v6665_v53 }
  0xcc   :  { %v9559_v24 = vld [vmem:[%s15619_s1 + $0x1860] sm:$0xf]  ;;  %v9384_v39 = vor.u32 %v10443_v11, %v9383_v10  ;;  %v10483_v44 = vld [vmem:[%s15619_s1 + $0x184c] sm:$0xf0]  ;;  %5080 = vmatpush.bf16.msrb.mxu1 %v9128_v34  ;;  %v6793_v55 = vld [vmem:[%s15619_s1 + $0x2d0] sm:$0xf0] }
  0xcd   :  { %v9560_v40 = vor.u32 %v10487_v25, %v9559_v24  ;;  %v9543_v43 = vld [vmem:[%s15619_s1 + $0x1840] sm:$0xf]  ;;  %5093 = vmatpush.bf16.msrb.mxu2 %v9256_v35  ;;  %v10479_v63 = vld [vmem:[%s15619_s1 + $0x182c] sm:$0xf0]  ;;  %v9725_v3 = vld [vmem:[%s15619_s1 + $0xa4] sm:$0xf]  ;;  %v6796_v8 = vor.u32 %v9793_v54, %v6793_v55  ;;  %v4874_v52 = vpop.f32.mrf.mxu1 }
  0xce   :  { %5106 = vmatpush.bf16.msrb.mxu3 %v9384_v39  ;;  %v9544_v57 = vor.u32 %v10483_v44, %v9543_v43  ;;  %v9527_v62 = vld [vmem:[%s15619_s1 + $0x1820] sm:$0xf]  ;;  %5068 = vmatmul.bf16.vlgmr.msrb.gmra.mxu0 %v11738_v4  ;;  %v6521_v10 = vld [vmem:[%s15619_s1 + $0xb0] sm:$0xf0]  ;;  %v9757_v11 = vld [vmem:[%s15619_s1 + $0x1a4] sm:$0xf] }
  0xcf   :  { %5116 = vmatpush.bf16.msra.mxu0 %v9560_v40  ;;  %v6649_v19 = vld [vmem:[%s15619_s1 + $0x1b0] sm:$0xf0]  ;;  %5081 = vmatmul.bf16.vlgmr.msrb.gmra.mxu1 %v11742_v6  ;;  %v9789_v23 = vld [vmem:[%s15619_s1 + $0x2a4] sm:$0xf]  ;;  %v9528_v25 = vor.u32 %v10479_v63, %v9527_v62  ;;  %v9511_v27 = vld [vmem:[%s15619_s1 + $0x1800] sm:$0xf]  ;;  %v6524_v28 = vor.u32 %v9725_v3, %v6521_v10 }
  0xd0   :  { %5125 = vmatpush.bf16.msra.mxu1 %v6556_v41  ;;  %5094 = vmatmul.bf16.vlgmr.msrb.gmra.mxu2 %v11740_v5  ;;  %v6777_v24 = vld [vmem:[%s15619_s1 + $0x2b0] sm:$0xf0]  ;;  %v6652_v29 = vor.u32 %v9757_v11, %v6649_v19  ;;  %v10475_v30 = vld [vmem:[%s15619_s1 + $0x180c] sm:$0xf0]  ;;  %v9721_v31 = vld [vmem:[%s15619_s1 + $0x84] sm:$0xf] }
  0xd1   :  { %5138 = vmatpush.bf16.msra.mxu2 %v6684_v42  ;;  %5107 = vmatmul.bf16.vlgmr.msrb.gmra.mxu3 %v11744_v7  ;;  %v6505_v33 = vld [vmem:[%s15619_s1 + $0x90] sm:$0xf0]  ;;  %v6780_v34 = vor.u32 %v9789_v23, %v6777_v24  ;;  %v9753_v35 = vld [vmem:[%s15619_s1 + $0x184] sm:$0xf]  ;;  %v9512_v41 = vor.u32 %v10475_v30, %v9511_v27  ;;  %v4861_v42 = vpop.f32.mrf.mxu0  ;;  %v4887_v10 = vpop.f32.mrf.mxu2 }
  0xd2   :  { %5151 = vmatpush.bf16.msra.mxu3 %v6812_v50  ;;  %v6633_v36 = vld [vmem:[%s15619_s1 + $0x190] sm:$0xf0]  ;;  %v9785_v37 = vld [vmem:[%s15619_s1 + $0x284] sm:$0xf]  ;;  %v6508_v43 = vor.u32 %v9721_v31, %v6505_v33  ;;  %v4862_v51 = vadd.f32 %v4861_v42, %v11839_v32 }
  0xd3   :  { %5117 = vmatpush.bf16.msra.mxu0 %v9544_v57  ;;  %v6761_v38 = vld [vmem:[%s15619_s1 + $0x290] sm:$0xf0]  ;;  %v9829_v39 = vld [vmem:[%s15619_s1 + $0x3e4] sm:$0xf]  ;;  %v6636_v44 = vor.u32 %v9753_v35, %v6633_v36 }
  0xd4   :  { %5126 = vmatpush.bf16.msra.mxu1 %v6540_v59  ;;  %v6937_v40 = vld [vmem:[%s15619_s1 + $0x3f0] sm:$0xf0]  ;;  %v9717_v45 = vld [vmem:[%s15619_s1 + $0x64] sm:$0xf]  ;;  %v6764_v53 = vor.u32 %v9785_v37, %v6761_v38 }
  0xd5   :  { %5139 = vmatpush.bf16.msra.mxu2 %v6668_v61  ;;  %v6489_v50 = vld [vmem:[%s15619_s1 + $0x70] sm:$0xf0]  ;;  %v6940_v54 = vor.u32 %v9829_v39, %v6937_v40  ;;  %v9749_v55 = vld [vmem:[%s15619_s1 + $0x164] sm:$0xf]  ;;  %v4875_v61 = vadd.f32 %v4874_v52, %v4862_v51  ;;  %v4876_v40 = vpop.f32.mrf.mxu1 }
  0xd6   :  { %5152 = vmatpush.bf16.msra.mxu3 %v6796_v8  ;;  %v6617_v56 = vld [vmem:[%s15619_s1 + $0x170] sm:$0xf0]  ;;  %v9781_v57 = vld [vmem:[%s15619_s1 + $0x264] sm:$0xf]  ;;  %v6492_v62 = vor.u32 %v9717_v45, %v6489_v50 }
  0xd7   :  { %5118 = vmatpush.bf16.msra.mxu0 %v9528_v25  ;;  %v6745_v32 = vld [vmem:[%s15619_s1 + $0x270] sm:$0xf0]  ;;  %v9825_v58 = vld [vmem:[%s15619_s1 + $0x3c4] sm:$0xf]  ;;  %v6620_v63 = vor.u32 %v9749_v55, %v6617_v56  ;;  %v4888_v27 = vadd.f32 %v4887_v10, %v4875_v61 }
  0xd8   :  { %5127 = vmatpush.bf16.msra.mxu1 %v6524_v28  ;;  %v6921_v59 = vld [vmem:[%s15619_s1 + $0x3d0] sm:$0xf0]  ;;  %v9713_v3 = vld [vmem:[%s15619_s1 + $0x44] sm:$0xf]  ;;  %v6748_v11 = vor.u32 %v9781_v57, %v6745_v32  ;;  %v4900_v28 = vpop.f32.mrf.mxu3 }
  0xd9   :  { %5140 = vmatpush.bf16.msra.mxu2 %v6652_v29  ;;  %v6473_v8 = vld [vmem:[%s15619_s1 + $0x50] sm:$0xf0]  ;;  %v6924_v19 = vor.u32 %v9825_v58, %v6921_v59  ;;  %v9745_v23 = vld [vmem:[%s15619_s1 + $0x144] sm:$0xf]  ;;  %v4863_v35 = vpop.f32.mrf.mxu0  ;;  %v4889_v32 = vpop.f32.mrf.mxu2 }
  0xda   :  { %5153 = vmatpush.bf16.msra.mxu3 %v6780_v34  ;;  %v6601_v24 = vld [vmem:[%s15619_s1 + $0x150] sm:$0xf0]  ;;  %v9777_v25 = vld [vmem:[%s15619_s1 + $0x244] sm:$0xf]  ;;  %v11978_v34 = vadd.f32 %v4900_v28, %v4888_v27  ;;  %v6476_v36 = vor.u32 %v9713_v3, %v6473_v8 }
  0xdb   :  { %5119 = vmatpush.bf16.msra.mxu0 %v9512_v41  ;;  %v6729_v29 = vld [vmem:[%s15619_s1 + $0x250] sm:$0xf0]  ;;  %v9821_v30 = vld [vmem:[%s15619_s1 + $0x3a4] sm:$0xf]  ;;  %v6604_v37 = vor.u32 %v9745_v23, %v6601_v24 }
  0xdc   :  { %5128 = vmatpush.bf16.msra.mxu1 %v6508_v43  ;;  %v6905_v31 = vld [vmem:[%s15619_s1 + $0x3b0] sm:$0xf0]  ;;  %v852_v33 = vld [vmem:[#allocation1] sm:$0xff]  ;;  %v6732_v41 = vor.u32 %v9777_v25, %v6729_v29 }
  0xdd   :  { %5141 = vmatpush.bf16.msra.mxu2 %v6636_v44  ;;  %v9709_v38 = vld [vmem:[%s15619_s1 + $0x24] sm:$0xf]  ;;  %v6457_v39 = vld [vmem:[%s15619_s1 + $0x30] sm:$0xf0]  ;;  %v6908_v42 = vor.u32 %v9821_v30, %v6905_v31 }
  0xde   :  { %5154 = vmatpush.bf16.msra.mxu3 %v6764_v53  ;;  %v9741_v43 = vld [vmem:[%s15619_s1 + $0x124] sm:$0xf]  ;;  %v6585_v44 = vld [vmem:[%s15619_s1 + $0x130] sm:$0xf0]  ;;  %9573 = vmatmul.msk.bf16.vlgmr.msra.gmra.mxu0 %vm4797_vm0, %v852_v33  ;;  %v6460_v53 = vor.u32 %v9709_v38, %v6457_v39 }
  0xdf   :  { %5164 = vmatpush.bf16.msrb.mxu0 %v6940_v54  ;;  %v9773_v45 = vld [vmem:[%s15619_s1 + $0x224] sm:$0xf]  ;;  %v6713_v50 = vld [vmem:[%s15619_s1 + $0x230] sm:$0xf0]  ;;  %v6588_v54 = vor.u32 %v9741_v43, %v6585_v44 }
  0xe0   :  { %5129 = vmatpush.bf16.msra.mxu1 %v6492_v62  ;;  %v9817_v51 = vld [vmem:[%s15619_s1 + $0x384] sm:$0xf]  ;;  %v6889_v52 = vld [vmem:[%s15619_s1 + $0x390] sm:$0xf0]  ;;  %v6716_v58 = vor.u32 %v9773_v45, %v6713_v50  ;;  %v4902_v3 = vpop.f32.mrf.mxu3 }
  0xe1   :  { %5142 = vmatpush.bf16.msra.mxu2 %v6620_v63  ;;  %v9705_v55 = vld [vmem:[%s15619_s1 + $0x4] sm:$0xf]  ;;  %v6441_v56 = vld [vmem:[%s15619_s1 + $0x10] sm:$0xf0]  ;;  %v6892_v59 = vor.u32 %v9817_v51, %v6889_v52 }
  0xe2   :  { %5155 = vmatpush.bf16.msra.mxu3 %v6748_v11  ;;  %v9737_v57 = vld [vmem:[%s15619_s1 + $0x104] sm:$0xf]  ;;  %v6569_v61 = vld [vmem:[%s15619_s1 + $0x110] sm:$0xf0]  ;;  %v6444_v25 = vor.u32 %v9705_v55, %v6441_v56 }
  0xe3   :  { %5165 = vmatpush.bf16.msrb.mxu0 %v6924_v19  ;;  %v9769_v62 = vld [vmem:[%s15619_s1 + $0x204] sm:$0xf]  ;;  %v6697_v63 = vld [vmem:[%s15619_s1 + $0x210] sm:$0xf0]  ;;  %v6572_v27 = vor.u32 %v9737_v57, %v6569_v61 }
  0xe4   :  { %5130 = vmatpush.bf16.msra.mxu1 %v6476_v36  ;;  %v9813_v8 = vld [vmem:[%s15619_s1 + $0x364] sm:$0xf]  ;;  %v6873_v10 = vld [vmem:[%s15619_s1 + $0x370] sm:$0xf0]  ;;  %v6700_v30 = vor.u32 %v9769_v62, %v6697_v63 }
  0xe5   :  { %5143 = vmatpush.bf16.msra.mxu2 %v6604_v37  ;;  %v9861_v11 = vld [vmem:[%s15619_s1 + $0x4e4] sm:$0xf]  ;;  %v7065_v19 = vld [vmem:[%s15619_s1 + $0x4f0] sm:$0xf0]  ;;  %v6876_v31 = vor.u32 %v9813_v8, %v6873_v10 }
  0xe6   :  { %5156 = vmatpush.bf16.msra.mxu3 %v6732_v41  ;;  %v9893_v23 = vld [vmem:[%s15619_s1 + $0x5e4] sm:$0xf]  ;;  %v7193_v24 = vld [vmem:[%s15619_s1 + $0x5f0] sm:$0xf0]  ;;  %v7068_v33 = vor.u32 %v9861_v11, %v7065_v19 }
  0xe7   :  { %5166 = vmatpush.bf16.msrb.mxu0 %v6908_v42  ;;  %v9925_v28 = vld [vmem:[%s15619_s1 + $0x6e4] sm:$0xf]  ;;  %v7321_v29 = vld [vmem:[%s15619_s1 + $0x6f0] sm:$0xf0]  ;;  %v7196_v35 = vor.u32 %v9893_v23, %v7193_v24 }
  0xe8   :  { %5131 = vmatpush.bf16.msra.mxu1 %v6460_v53  ;;  %v9809_v36 = vld [vmem:[%s15619_s1 + $0x344] sm:$0xf]  ;;  %v6857_v37 = vld [vmem:[%s15619_s1 + $0x350] sm:$0xf0]  ;;  %v7324_v39 = vor.u32 %v9925_v28, %v7321_v29 }
  0xe9   :  { %5144 = vmatpush.bf16.msra.mxu2 %v6588_v54  ;;  %v9857_v38 = vld [vmem:[%s15619_s1 + $0x4c4] sm:$0xf]  ;;  %v7049_v40 = vld [vmem:[%s15619_s1 + $0x4d0] sm:$0xf0]  ;;  %v6860_v45 = vor.u32 %v9809_v36, %v6857_v37 }
  0xea   :  { %5157 = vmatpush.bf16.msra.mxu3 %v6716_v58  ;;  %v9889_v41 = vld [vmem:[%s15619_s1 + $0x5c4] sm:$0xf]  ;;  %v7177_v42 = vld [vmem:[%s15619_s1 + $0x5d0] sm:$0xf0]  ;;  %v7052_v50 = vor.u32 %v9857_v38, %v7049_v40 }
  0xeb   :  { %5167 = vmatpush.bf16.msrb.mxu0 %v6892_v59  ;;  %v9921_v43 = vld [vmem:[%s15619_s1 + $0x6c4] sm:$0xf]  ;;  %v7305_v44 = vld [vmem:[%s15619_s1 + $0x6d0] sm:$0xf0]  ;;  %v7180_v51 = vor.u32 %v9889_v41, %v7177_v42 }
  0xec   :  { %5132 = vmatpush.bf16.msra.mxu1 %v6444_v25  ;;  %v9805_v52 = vld [vmem:[%s15619_s1 + $0x324] sm:$0xf]  ;;  %v6841_v53 = vld [vmem:[%s15619_s1 + $0x330] sm:$0xf0]  ;;  %v7308_v55 = vor.u32 %v9921_v43, %v7305_v44 }
  0xed   :  { %5145 = vmatpush.bf16.msra.mxu2 %v6572_v27  ;;  %v9853_v54 = vld [vmem:[%s15619_s1 + $0x4a4] sm:$0xf]  ;;  %v7033_v56 = vld [vmem:[%s15619_s1 + $0x4b0] sm:$0xf0]  ;;  %v6844_v61 = vor.u32 %v9805_v52, %v6841_v53  ;;  %v4913_v27 = vpop.f32.mrf.mxu0 }
  0xee   :  { %5158 = vmatpush.bf16.msra.mxu3 %v6700_v30  ;;  %v9885_v57 = vld [vmem:[%s15619_s1 + $0x5a4] sm:$0xf]  ;;  %v7161_v32 = vld [vmem:[%s15619_s1 + $0x5b0] sm:$0xf0]  ;;  %v7036_v63 = vor.u32 %v9853_v54, %v7033_v56 }
  0xef   :  { %5168 = vmatpush.bf16.msrb.mxu0 %v6876_v31  ;;  %v9917_v58 = vld [vmem:[%s15619_s1 + $0x6a4] sm:$0xf]  ;;  %v7289_v59 = vld [vmem:[%s15619_s1 + $0x6b0] sm:$0xf0]  ;;  %5133 = vmatmul.bf16.vlgmr.msra.gmra.mxu1 %v10891_v21  ;;  %v7164_v3 = vor.u32 %v9885_v57, %v7161_v32  ;;  %v4914_v31 = vadd.f32 %v4913_v27, %v11978_v34  ;;  %v4939_v57 = vpop.f32.mrf.mxu2 }
  0xf0   :  { %5177 = vmatpush.bf16.msrb.mxu1 %v7068_v33  ;;  %5146 = vmatmul.bf16.vlgmr.msra.gmra.mxu2 %v10902_v26  ;;  %v9801_v62 = vld [vmem:[%s15619_s1 + $0x304] sm:$0xf]  ;;  %v6825_v8 = vld [vmem:[%s15619_s1 + $0x310] sm:$0xf0]  ;;  %v7292_v19 = vor.u32 %v9917_v58, %v7289_v59 }
  0xf1   :  { %5190 = vmatpush.bf16.msrb.mxu2 %v7196_v35  ;;  %5159 = vmatmul.bf16.vlgmr.msra.gmra.mxu3 %v10889_v20  ;;  %v9849_v10 = vld [vmem:[%s15619_s1 + $0x484] sm:$0xf]  ;;  %v7017_v11 = vld [vmem:[%s15619_s1 + $0x490] sm:$0xf0]  ;;  %v6828_v33 = vor.u32 %v9801_v62, %v6825_v8  ;;  %v4926_v35 = vpop.f32.mrf.mxu1 }
  0xf2   :  { %5203 = vmatpush.bf16.msrb.mxu3 %v7324_v39  ;;  %v9881_v23 = vld [vmem:[%s15619_s1 + $0x584] sm:$0xf]  ;;  %v7145_v24 = vld [vmem:[%s15619_s1 + $0x590] sm:$0xf0]  ;;  %v7020_v36 = vor.u32 %v9849_v10, %v7017_v11  ;;  %v4927_v41 = vadd.f32 %v4926_v35, %v4914_v31 }
  0xf3   :  { %5169 = vmatpush.bf16.msrb.mxu0 %v6860_v45  ;;  %v9913_v25 = vld [vmem:[%s15619_s1 + $0x684] sm:$0xf]  ;;  %v7273_v28 = vld [vmem:[%s15619_s1 + $0x690] sm:$0xf0]  ;;  %v7148_v37 = vor.u32 %v9881_v23, %v7145_v24 }
  0xf4   :  { %5178 = vmatpush.bf16.msrb.mxu1 %v7052_v50  ;;  %v9957_v29 = vld [vmem:[%s15619_s1 + $0x7e4] sm:$0xf]  ;;  %v7449_v30 = vld [vmem:[%s15619_s1 + $0x7f0] sm:$0xf0]  ;;  %v7276_v40 = vor.u32 %v9913_v25, %v7273_v28  ;;  %v4940_v62 = vadd.f32 %v4939_v57, %v4927_v41 }
  0xf5   :  { %5191 = vmatpush.bf16.msrb.mxu2 %v7180_v51  ;;  %v9845_v38 = vld [vmem:[%s15619_s1 + $0x464] sm:$0xf]  ;;  %v7001_v39 = vld [vmem:[%s15619_s1 + $0x470] sm:$0xf0]  ;;  %v7452_v42 = vor.u32 %v9957_v29, %v7449_v30  ;;  %v4915_v11 = vpop.f32.mrf.mxu0 }
  0xf6   :  { %5204 = vmatpush.bf16.msrb.mxu3 %v7308_v55  ;;  %v9877_v34 = vld [vmem:[%s15619_s1 + $0x564] sm:$0xf]  ;;  %v7129_v43 = vld [vmem:[%s15619_s1 + $0x570] sm:$0xf0]  ;;  %v7004_v52 = vor.u32 %v9845_v38, %v7001_v39 }
  0xf7   :  { %5170 = vmatpush.bf16.msrb.mxu0 %v6844_v61  ;;  %v9909_v44 = vld [vmem:[%s15619_s1 + $0x664] sm:$0xf]  ;;  %v7257_v45 = vld [vmem:[%s15619_s1 + $0x670] sm:$0xf0]  ;;  %v7132_v53 = vor.u32 %v9877_v34, %v7129_v43 }
  0xf8   :  { %5179 = vmatpush.bf16.msrb.mxu1 %v7036_v63  ;;  %v9953_v50 = vld [vmem:[%s15619_s1 + $0x7c4] sm:$0xf]  ;;  %v7433_v51 = vld [vmem:[%s15619_s1 + $0x7d0] sm:$0xf0]  ;;  %v7260_v56 = vor.u32 %v9909_v44, %v7257_v45  ;;  %v4952_v63 = vpop.f32.mrf.mxu3 }
  0xf9   :  { %5192 = vmatpush.bf16.msrb.mxu2 %v7164_v3  ;;  %v9841_v54 = vld [vmem:[%s15619_s1 + $0x444] sm:$0xf]  ;;  %v6985_v55 = vld [vmem:[%s15619_s1 + $0x450] sm:$0xf0]  ;;  %v7436_v32 = vor.u32 %v9953_v50, %v7433_v51  ;;  %v12178_v23 = vadd.f32 %v4952_v63, %v4940_v62 }
  0xfa   :  { %5205 = vmatpush.bf16.msrb.mxu3 %v7292_v19  ;;  %v9873_v58 = vld [vmem:[%s15619_s1 + $0x544] sm:$0xf]  ;;  %v7113_v59 = vld [vmem:[%s15619_s1 + $0x550] sm:$0xf0]  ;;  %v4928_v19 = vpop.f32.mrf.mxu1  ;;  %v6988_v24 = vor.u32 %v9841_v54, %v6985_v55 }
  0xfb   :  { %5171 = vmatpush.bf16.msrb.mxu0 %v6828_v33  ;;  %v9905_v61 = vld [vmem:[%s15619_s1 + $0x644] sm:$0xf]  ;;  %v7241_v3 = vld [vmem:[%s15619_s1 + $0x650] sm:$0xf0]  ;;  %v7116_v25 = vor.u32 %v9873_v58, %v7113_v59 }
  0xfc   :  { %5180 = vmatpush.bf16.msrb.mxu1 %v7020_v36  ;;  %v9949_v8 = vld [vmem:[%s15619_s1 + $0x7a4] sm:$0xf]  ;;  %v7417_v10 = vld [vmem:[%s15619_s1 + $0x7b0] sm:$0xf0]  ;;  %v7244_v29 = vor.u32 %v9905_v61, %v7241_v3 }
  0xfd   :  { %5193 = vmatpush.bf16.msrb.mxu2 %v7148_v37  ;;  %v9837_v27 = vld [vmem:[%s15619_s1 + $0x424] sm:$0xf]  ;;  %v6969_v28 = vld [vmem:[%s15619_s1 + $0x430] sm:$0xf0]  ;;  %v7420_v30 = vor.u32 %v9949_v8, %v7417_v10 }
  0xfe   :  { %5206 = vmatpush.bf16.msrb.mxu3 %v7276_v40  ;;  %5172 = vmatmul.bf16.vlgmr.msrb.gmra.mxu0 %v10893_v22  ;;  %v9869_v31 = vld [vmem:[%s15619_s1 + $0x524] sm:$0xf]  ;;  %v7097_v33 = vld [vmem:[%s15619_s1 + $0x530] sm:$0xf0]  ;;  %v6972_v39 = vor.u32 %v9837_v27, %v6969_v28 }
  0xff   :  { %5216 = vmatpush.bf16.msra.mxu0 %v7452_v42  ;;  %v9901_v35 = vld [vmem:[%s15619_s1 + $0x624] sm:$0xf]  ;;  %v7225_v36 = vld [vmem:[%s15619_s1 + $0x630] sm:$0xf0]  ;;  %v7100_v40 = vor.u32 %v9869_v31, %v7097_v33 }
 0x100   :  { %5181 = vmatpush.bf16.msrb.mxu1 %v7004_v52  ;;  %v9945_v37 = vld [vmem:[%s15619_s1 + $0x784] sm:$0xf]  ;;  %v7401_v38 = vld [vmem:[%s15619_s1 + $0x790] sm:$0xf0]  ;;  %v7228_v43 = vor.u32 %v9901_v35, %v7225_v36  ;;  %v4941_v52 = vpop.f32.mrf.mxu2 }
 0x101   :  { %5194 = vmatpush.bf16.msrb.mxu2 %v7132_v53  ;;  %v9833_v41 = vld [vmem:[%s15619_s1 + $0x404] sm:$0xf]  ;;  %v6953_v42 = vld [vmem:[%s15619_s1 + $0x410] sm:$0xf0]  ;;  %v7404_v44 = vor.u32 %v9945_v37, %v7401_v38 }
 0x102   :  { %5207 = vmatpush.bf16.msrb.mxu3 %v7260_v56  ;;  %v9865_v34 = vld [vmem:[%s15619_s1 + $0x504] sm:$0xf]  ;;  %v7081_v45 = vld [vmem:[%s15619_s1 + $0x510] sm:$0xf0]  ;;  %v4954_v56 = vpop.f32.mrf.mxu3  ;;  %v6956_v59 = vor.u32 %v9833_v41, %v6953_v42 }
 0x103   :  { %5217 = vmatpush.bf16.msra.mxu0 %v7436_v32  ;;  %v9897_v50 = vld [vmem:[%s15619_s1 + $0x604] sm:$0xf]  ;;  %v7209_v51 = vld [vmem:[%s15619_s1 + $0x610] sm:$0xf0]  ;;  %v7084_v61 = vor.u32 %v9865_v34, %v7081_v45 }
 0x104   :  { %5182 = vmatpush.bf16.msrb.mxu1 %v6988_v24  ;;  %v9941_v53 = vld [vmem:[%s15619_s1 + $0x764] sm:$0xf]  ;;  %v7385_v54 = vld [vmem:[%s15619_s1 + $0x770] sm:$0xf0]  ;;  %v7212_v3 = vor.u32 %v9897_v50, %v7209_v51 }
 0x105   :  { %5195 = vmatpush.bf16.msrb.mxu2 %v7116_v25  ;;  %v9989_v55 = vld [vmem:[%s15619_s1 + $0x8e4] sm:$0xf]  ;;  %v7577_v57 = vld [vmem:[%s15619_s1 + $0x8f0] sm:$0xf0]  ;;  %v7388_v8 = vor.u32 %v9941_v53, %v7385_v54 }
 0x106   :  { %5208 = vmatpush.bf16.msrb.mxu3 %v7244_v29  ;;  %v10021_v32 = vld [vmem:[%s15619_s1 + $0x9e4] sm:$0xf]  ;;  %v7705_v58 = vld [vmem:[%s15619_s1 + $0x9f0] sm:$0xf0]  ;;  %v7580_v10 = vor.u32 %v9989_v55, %v7577_v57 }
 0x107   :  { %5218 = vmatpush.bf16.msra.mxu0 %v7420_v30  ;;  %v10053_v62 = vld [vmem:[%s15619_s1 + $0xae4] sm:$0xf]  ;;  %v7833_v63 = vld [vmem:[%s15619_s1 + $0xaf0] sm:$0xf0]  ;;  %v7708_v11 = vor.u32 %v10021_v32, %v7705_v58 }
 0x108   :  { %5183 = vmatpush.bf16.msrb.mxu1 %v6972_v39  ;;  %v9937_v19 = vld [vmem:[%s15619_s1 + $0x744] sm:$0xf]  ;;  %v7369_v24 = vld [vmem:[%s15619_s1 + $0x750] sm:$0xf0]  ;;  %v7836_v27 = vor.u32 %v10053_v62, %v7833_v63 }
 0x109   :  { %5196 = vmatpush.bf16.msrb.mxu2 %v7100_v40  ;;  %v9985_v25 = vld [vmem:[%s15619_s1 + $0x8c4] sm:$0xf]  ;;  %v7561_v28 = vld [vmem:[%s15619_s1 + $0x8d0] sm:$0xf0]  ;;  %v7372_v35 = vor.u32 %v9937_v19, %v7369_v24 }
 0x10a   :  { %5209 = vmatpush.bf16.msrb.mxu3 %v7228_v43  ;;  %v10017_v29 = vld [vmem:[%s15619_s1 + $0x9c4] sm:$0xf]  ;;  %v7689_v30 = vld [vmem:[%s15619_s1 + $0x9d0] sm:$0xf0]  ;;  %v7564_v36 = vor.u32 %v9985_v25, %v7561_v28 }
 0x10b   :  { %5219 = vmatpush.bf16.msra.mxu0 %v7404_v44  ;;  %v10049_v31 = vld [vmem:[%s15619_s1 + $0xac4] sm:$0xf]  ;;  %v7817_v33 = vld [vmem:[%s15619_s1 + $0xad0] sm:$0xf0]  ;;  %v7692_v37 = vor.u32 %v10017_v29, %v7689_v30 }
 0x10c   :  { %5184 = vmatpush.bf16.msrb.mxu1 %v6956_v59  ;;  %v9933_v38 = vld [vmem:[%s15619_s1 + $0x724] sm:$0xf]  ;;  %v7353_v39 = vld [vmem:[%s15619_s1 + $0x730] sm:$0xf0]  ;;  %v7820_v41 = vor.u32 %v10049_v31, %v7817_v33 }
 0x10d   :  { %5197 = vmatpush.bf16.msrb.mxu2 %v7084_v61  ;;  %v9981_v40 = vld [vmem:[%s15619_s1 + $0x8a4] sm:$0xf]  ;;  %v7545_v42 = vld [vmem:[%s15619_s1 + $0x8b0] sm:$0xf0]  ;;  %v7356_v50 = vor.u32 %v9933_v38, %v7353_v39  ;;  %v4965_v61 = vpop.f32.mrf.mxu0 }
 0x10e   :  { %5210 = vmatpush.bf16.msrb.mxu3 %v7212_v3  ;;  %v10013_v34 = vld [vmem:[%s15619_s1 + $0x9a4] sm:$0xf]  ;;  %v7673_v43 = vld [vmem:[%s15619_s1 + $0x9b0] sm:$0xf0]  ;;  %v7548_v52 = vor.u32 %v9981_v40, %v7545_v42 }
 0x10f   :  { %5220 = vmatpush.bf16.msra.mxu0 %v7388_v8  ;;  %v10045_v44 = vld [vmem:[%s15619_s1 + $0xaa4] sm:$0xf]  ;;  %v7801_v45 = vld [vmem:[%s15619_s1 + $0xab0] sm:$0xf0]  ;;  %5185 = vmatmul.bf16.vlgmr.msrb.gmra.mxu1 %v10984_v0  ;;  %v7676_v53 = vor.u32 %v10013_v34, %v7673_v43  ;;  %v4966_v8 = vadd.f32 %v4965_v61, %v12178_v23 }
 0x110   :  { %5229 = vmatpush.bf16.msra.mxu1 %v7580_v10  ;;  %5198 = vmatmul.bf16.vlgmr.msrb.gmra.mxu2 %v10988_v2  ;;  %v9929_v51 = vld [vmem:[%s15619_s1 + $0x704] sm:$0xf]  ;;  %v7337_v54 = vld [vmem:[%s15619_s1 + $0x710] sm:$0xf0]  ;;  %v7804_v57 = vor.u32 %v10045_v44, %v7801_v45 }
 0x111   :  { %5242 = vmatpush.bf16.msra.mxu2 %v7708_v11  ;;  %5211 = vmatmul.bf16.vlgmr.msrb.gmra.mxu3 %v10979_v60  ;;  %v9977_v55 = vld [vmem:[%s15619_s1 + $0x884] sm:$0xf]  ;;  %v7529_v56 = vld [vmem:[%s15619_s1 + $0x890] sm:$0xf0]  ;;  %v7340_v10 = vor.u32 %v9929_v51, %v7337_v54  ;;  %v4978_v11 = vpop.f32.mrf.mxu1 }
 0x112   :  { %5255 = vmatpush.bf16.msra.mxu3 %v7836_v27  ;;  %v10009_v32 = vld [vmem:[%s15619_s1 + $0x984] sm:$0xf]  ;;  %v7657_v58 = vld [vmem:[%s15619_s1 + $0x990] sm:$0xf0]  ;;  %v7532_v19 = vor.u32 %v9977_v55, %v7529_v56  ;;  %v4979_v29 = vadd.f32 %v4978_v11, %v4966_v8 }
 0x113   :  { %5221 = vmatpush.bf16.msra.mxu0 %v7372_v35  ;;  %v10041_v59 = vld [vmem:[%s15619_s1 + $0xa84] sm:$0xf]  ;;  %v7785_v62 = vld [vmem:[%s15619_s1 + $0xa90] sm:$0xf0]  ;;  %v7660_v24 = vor.u32 %v10009_v32, %v7657_v58 }
 0x114   :  { %5230 = vmatpush.bf16.msra.mxu1 %v7564_v36  ;;  %v10085_v63 = vld [vmem:[%s15619_s1 + $0xbe4] sm:$0xf]  ;;  %v7961_v3 = vld [vmem:[%s15619_s1 + $0xbf0] sm:$0xf0]  ;;  %v7788_v28 = vor.u32 %v10041_v59, %v7785_v62  ;;  %v4991_v34 = vpop.f32.mrf.mxu2 }
 0x115   :  { %5243 = vmatpush.bf16.msra.mxu2 %v7692_v37  ;;  %v9973_v25 = vld [vmem:[%s15619_s1 + $0x864] sm:$0xf]  ;;  %v7513_v27 = vld [vmem:[%s15619_s1 + $0x870] sm:$0xf0]  ;;  %v7964_v30 = vor.u32 %v10085_v63, %v7961_v3  ;;  %v4992_v51 = vadd.f32 %v4991_v34, %v4979_v29  ;;  %v4967_v56 = vpop.f32.mrf.mxu0 }
 0x116   :  { %5256 = vmatpush.bf16.msra.mxu3 %v7820_v41  ;;  %v10005_v23 = vld [vmem:[%s15619_s1 + $0x964] sm:$0xf]  ;;  %v7641_v31 = vld [vmem:[%s15619_s1 + $0x970] sm:$0xf0]  ;;  %v7516_v38 = vor.u32 %v9973_v25, %v7513_v27 }
 0x117   :  { %5222 = vmatpush.bf16.msra.mxu0 %v7356_v50  ;;  %v10037_v33 = vld [vmem:[%s15619_s1 + $0xa64] sm:$0xf]  ;;  %v7769_v35 = vld [vmem:[%s15619_s1 + $0xa70] sm:$0xf0]  ;;  %v7644_v39 = vor.u32 %v10005_v23, %v7641_v31 }
 0x118   :  { %5231 = vmatpush.bf16.msra.mxu1 %v7548_v52  ;;  %v10081_v36 = vld [vmem:[%s15619_s1 + $0xbc4] sm:$0xf]  ;;  %v7945_v37 = vld [vmem:[%s15619_s1 + $0xbd0] sm:$0xf0]  ;;  %v7772_v42 = vor.u32 %v10037_v33, %v7769_v35  ;;  %v5004_v52 = vpop.f32.mrf.mxu3 }
 0x119   :  { %5244 = vmatpush.bf16.msra.mxu2 %v7676_v53  ;;  %v9969_v40 = vld [vmem:[%s15619_s1 + $0x844] sm:$0xf]  ;;  %v7497_v41 = vld [vmem:[%s15619_s1 + $0x850] sm:$0xf0]  ;;  %v7948_v43 = vor.u32 %v10081_v36, %v7945_v37  ;;  %v12377_v32 = vadd.f32 %v5004_v52, %v4992_v51 }
 0x11a   :  { %5257 = vmatpush.bf16.msra.mxu3 %v7804_v57  ;;  %v10001_v44 = vld [vmem:[%s15619_s1 + $0x944] sm:$0xf]  ;;  %v7625_v45 = vld [vmem:[%s15619_s1 + $0x950] sm:$0xf0]  ;;  %v4980_v57 = vpop.f32.mrf.mxu1  ;;  %v7500_v58 = vor.u32 %v9969_v40, %v7497_v41 }
 0x11b   :  { %5223 = vmatpush.bf16.msra.mxu0 %v7340_v10  ;;  %v10033_v50 = vld [vmem:[%s15619_s1 + $0xa44] sm:$0xf]  ;;  %v7753_v53 = vld [vmem:[%s15619_s1 + $0xa50] sm:$0xf0]  ;;  %v7628_v59 = vor.u32 %v10001_v44, %v7625_v45 }
 0x11c   :  { %5232 = vmatpush.bf16.msra.mxu1 %v7532_v19  ;;  %v10077_v54 = vld [vmem:[%s15619_s1 + $0xba4] sm:$0xf]  ;;  %v7929_v55 = vld [vmem:[%s15619_s1 + $0xbb0] sm:$0xf0]  ;;  %v7756_v63 = vor.u32 %v10033_v50, %v7753_v53 }
 0x11d   :  { %5245 = vmatpush.bf16.msra.mxu2 %v7660_v24  ;;  %v9965_v61 = vld [vmem:[%s15619_s1 + $0x824] sm:$0xf]  ;;  %v7481_v62 = vld [vmem:[%s15619_s1 + $0x830] sm:$0xf0]  ;;  %v7932_v3 = vor.u32 %v10077_v54, %v7929_v55 }
 0x11e   :  { %5258 = vmatpush.bf16.msra.mxu3 %v7788_v28  ;;  %5224 = vmatmul.bf16.vlgmr.msra.gmra.mxu0 %v10986_v1  ;;  %v9997_v8 = vld [vmem:[%s15619_s1 + $0x924] sm:$0xf]  ;;  %v7609_v10 = vld [vmem:[%s15619_s1 + $0x930] sm:$0xf0]  ;;  %v7484_v27 = vor.u32 %v9965_v61, %v7481_v62 }
 0x11f   :  { %5268 = vmatpush.bf16.msrb.mxu0 %v7964_v30  ;;  %v10029_v11 = vld [vmem:[%s15619_s1 + $0xa24] sm:$0xf]  ;;  %v7737_v19 = vld [vmem:[%s15619_s1 + $0xa30] sm:$0xf0]  ;;  %v7612_v28 = vor.u32 %v9997_v8, %v7609_v10 }
 0x120   :  { %5233 = vmatpush.bf16.msra.mxu1 %v7516_v38  ;;  %v10073_v24 = vld [vmem:[%s15619_s1 + $0xb84] sm:$0xf]  ;;  %v7913_v25 = vld [vmem:[%s15619_s1 + $0xb90] sm:$0xf0]  ;;  %v7740_v31 = vor.u32 %v10029_v11, %v7737_v19  ;;  %v4993_v38 = vpop.f32.mrf.mxu2 }
 0x121   :  { %5246 = vmatpush.bf16.msra.mxu2 %v7644_v39  ;;  %v9961_v29 = vld [vmem:[%s15619_s1 + $0x804] sm:$0xf]  ;;  %v7465_v30 = vld [vmem:[%s15619_s1 + $0x810] sm:$0xf0]  ;;  %v7916_v33 = vor.u32 %v10073_v24, %v7913_v25 }
 0x122   :  { %5259 = vmatpush.bf16.msra.mxu3 %v7772_v42  ;;  %v9993_v23 = vld [vmem:[%s15619_s1 + $0x904] sm:$0xf]  ;;  %v7593_v35 = vld [vmem:[%s15619_s1 + $0x910] sm:$0xf0]  ;;  %v5006_v42 = vpop.f32.mrf.mxu3  ;;  %v7468_v45 = vor.u32 %v9961_v29, %v7465_v30 }
 0x123   :  { %5269 = vmatpush.bf16.msrb.mxu0 %v7948_v43  ;;  %v10025_v36 = vld [vmem:[%s15619_s1 + $0xa04] sm:$0xf]  ;;  %v7721_v37 = vld [vmem:[%s15619_s1 + $0xa10] sm:$0xf0]  ;;  %v7596_v50 = vor.u32 %v9993_v23, %v7593_v35 }
 0x124   :  { %5234 = vmatpush.bf16.msra.mxu1 %v7500_v58  ;;  %v10069_v39 = vld [vmem:[%s15619_s1 + $0xb64] sm:$0xf]  ;;  %v7897_v40 = vld [vmem:[%s15619_s1 + $0xb70] sm:$0xf0]  ;;  %v7724_v53 = vor.u32 %v10025_v36, %v7721_v37 }
 0x125   :  { %5247 = vmatpush.bf16.msra.mxu2 %v7628_v59  ;;  %v10117_v41 = vld [vmem:[%s15619_s1 + $0xce4] sm:$0xf]  ;;  %v8089_v34 = vld [vmem:[%s15619_s1 + $0xcf0] sm:$0xf0]  ;;  %v7900_v54 = vor.u32 %v10069_v39, %v7897_v40 }
 0x126   :  { %5260 = vmatpush.bf16.msra.mxu3 %v7756_v63  ;;  %v10149_v43 = vld [vmem:[%s15619_s1 + $0xde4] sm:$0xf]  ;;  %v8217_v44 = vld [vmem:[%s15619_s1 + $0xdf0] sm:$0xf0]  ;;  %v8092_v55 = vor.u32 %v10117_v41, %v8089_v34 }
 0x127   :  { %5270 = vmatpush.bf16.msrb.mxu0 %v7932_v3  ;;  %v10181_v51 = vld [vmem:[%s15619_s1 + $0xee4] sm:$0xf]  ;;  %v8345_v52 = vld [vmem:[%s15619_s1 + $0xef0] sm:$0xf0]  ;;  %v8220_v56 = vor.u32 %v10149_v43, %v8217_v44 }
 0x128   :  { %5235 = vmatpush.bf16.msra.mxu1 %v7484_v27  ;;  %v10065_v57 = vld [vmem:[%s15619_s1 + $0xb44] sm:$0xf]  ;;  %v7881_v58 = vld [vmem:[%s15619_s1 + $0xb50] sm:$0xf0]  ;;  %v8348_v61 = vor.u32 %v10181_v51, %v8345_v52 }
 0x129   :  { %5248 = vmatpush.bf16.msra.mxu2 %v7612_v28  ;;  %v10113_v59 = vld [vmem:[%s15619_s1 + $0xcc4] sm:$0xf]  ;;  %v8073_v62 = vld [vmem:[%s15619_s1 + $0xcd0] sm:$0xf0]  ;;  %v7884_v11 = vor.u32 %v10065_v57, %v7881_v58 }
 0x12a   :  { %5261 = vmatpush.bf16.msra.mxu3 %v7740_v31  ;;  %v10145_v63 = vld [vmem:[%s15619_s1 + $0xdc4] sm:$0xf]  ;;  %v8201_v3 = vld [vmem:[%s15619_s1 + $0xdd0] sm:$0xf0]  ;;  %v8076_v19 = vor.u32 %v10113_v59, %v8073_v62 }
 0x12b   :  { %5271 = vmatpush.bf16.msrb.mxu0 %v7916_v33  ;;  %v10177_v8 = vld [vmem:[%s15619_s1 + $0xec4] sm:$0xf]  ;;  %v8329_v10 = vld [vmem:[%s15619_s1 + $0xed0] sm:$0xf0]  ;;  %v8204_v24 = vor.u32 %v10145_v63, %v8201_v3 }
 0x12c   :  { %5236 = vmatpush.bf16.msra.mxu1 %v7468_v45  ;;  %v10061_v25 = vld [vmem:[%s15619_s1 + $0xb24] sm:$0xf]  ;;  %v7865_v27 = vld [vmem:[%s15619_s1 + $0xb30] sm:$0xf0]  ;;  %v8332_v29 = vor.u32 %v10177_v8, %v8329_v10 }
 0x12d   :  { %5249 = vmatpush.bf16.msra.mxu2 %v7596_v50  ;;  %v10109_v28 = vld [vmem:[%s15619_s1 + $0xca4] sm:$0xf]  ;;  %v8057_v30 = vld [vmem:[%s15619_s1 + $0xcb0] sm:$0xf0]  ;;  %v7868_v36 = vor.u32 %v10061_v25, %v7865_v27 }
 0x12e   :  { %5262 = vmatpush.bf16.msra.mxu3 %v7724_v53  ;;  %v10141_v23 = vld [vmem:[%s15619_s1 + $0xda4] sm:$0xf]  ;;  %v8185_v31 = vld [vmem:[%s15619_s1 + $0xdb0] sm:$0xf0]  ;;  %v8060_v38 = vor.u32 %v10109_v28, %v8057_v30  ;;  %v5017_v50 = vpop.f32.mrf.mxu0 }
 0x12f   :  { %5272 = vmatpush.bf16.msrb.mxu0 %v7900_v54  ;;  %5237 = vmatmul.bf16.vlgmr.msra.gmra.mxu1 %v11234_v12  ;;  %v10173_v33 = vld [vmem:[%s15619_s1 + $0xea4] sm:$0xf]  ;;  %v8313_v35 = vld [vmem:[%s15619_s1 + $0xeb0] sm:$0xf0]  ;;  %v8188_v39 = vor.u32 %v10141_v23, %v8185_v31  ;;  %v5018_v54 = vadd.f32 %v5017_v50, %v12377_v32 }
 0x130   :  { %5281 = vmatpush.bf16.msrb.mxu1 %v8092_v55  ;;  %5250 = vmatmul.bf16.vlgmr.msra.gmra.mxu2 %v11244_v16  ;;  %v10057_v37 = vld [vmem:[%s15619_s1 + $0xb04] sm:$0xf]  ;;  %v7849_v40 = vld [vmem:[%s15619_s1 + $0xb10] sm:$0xf0]  ;;  %v8316_v34 = vor.u32 %v10173_v33, %v8313_v35 }
 0x131   :  { %5294 = vmatpush.bf16.msrb.mxu2 %v8220_v56  ;;  %5263 = vmatmul.bf16.vlgmr.msra.gmra.mxu3 %v11242_v15  ;;  %v10105_v41 = vld [vmem:[%s15619_s1 + $0xc84] sm:$0xf]  ;;  %v8041_v42 = vld [vmem:[%s15619_s1 + $0xc90] sm:$0xf0]  ;;  %v7852_v55 = vor.u32 %v10057_v37, %v7849_v40  ;;  %v5030_v56 = vpop.f32.mrf.mxu1 }
 0x132   :  { %5307 = vmatpush.bf16.msrb.mxu3 %v8348_v61  ;;  %v10137_v43 = vld [vmem:[%s15619_s1 + $0xd84] sm:$0xf]  ;;  %v8169_v44 = vld [vmem:[%s15619_s1 + $0xd90] sm:$0xf0]  ;;  %v8044_v57 = vor.u32 %v10105_v41, %v8041_v42  ;;  %v5031_v63 = vadd.f32 %v5030_v56, %v5018_v54 }
 0x133   :  { %5273 = vmatpush.bf16.msrb.mxu0 %v7884_v11  ;;  %v10169_v45 = vld [vmem:[%s15619_s1 + $0xe84] sm:$0xf]  ;;  %v8297_v51 = vld [vmem:[%s15619_s1 + $0xe90] sm:$0xf0]  ;;  %v8172_v58 = vor.u32 %v10137_v43, %v8169_v44 }
 0x134   :  { %5282 = vmatpush.bf16.msrb.mxu1 %v8076_v19  ;;  %v10213_v52 = vld [vmem:[%s15619_s1 + $0xfe4] sm:$0xf]  ;;  %v8473_v53 = vld [vmem:[%s15619_s1 + $0xff0] sm:$0xf0]  ;;  %v8300_v62 = vor.u32 %v10169_v45, %v8297_v51 }
 0x135   :  { %5295 = vmatpush.bf16.msrb.mxu2 %v8204_v24  ;;  %v10101_v59 = vld [vmem:[%s15619_s1 + $0xc64] sm:$0xf]  ;;  %v8025_v61 = vld [vmem:[%s15619_s1 + $0xc70] sm:$0xf0]  ;;  %v8476_v3 = vor.u32 %v10213_v52, %v8473_v53  ;;  %v5043_v23 = vpop.f32.mrf.mxu2 }
 0x136   :  { %5308 = vmatpush.bf16.msrb.mxu3 %v8332_v29  ;;  %v10133_v32 = vld [vmem:[%s15619_s1 + $0xd64] sm:$0xf]  ;;  %v8153_v8 = vld [vmem:[%s15619_s1 + $0xd70] sm:$0xf0]  ;;  %v8028_v25 = vor.u32 %v10101_v59, %v8025_v61  ;;  %v5044_v37 = vadd.f32 %v5043_v23, %v5031_v63  ;;  %v5019_v42 = vpop.f32.mrf.mxu0 }
 0x137   :  { %5274 = vmatpush.bf16.msrb.mxu0 %v7868_v36  ;;  %v10165_v10 = vld [vmem:[%s15619_s1 + $0xe64] sm:$0xf]  ;;  %v8281_v11 = vld [vmem:[%s15619_s1 + $0xe70] sm:$0xf0]  ;;  %v8156_v27 = vor.u32 %v10133_v32, %v8153_v8 }
 0x138   :  { %5283 = vmatpush.bf16.msrb.mxu1 %v8060_v38  ;;  %v10209_v19 = vld [vmem:[%s15619_s1 + $0xfc4] sm:$0xf]  ;;  %v8457_v24 = vld [vmem:[%s15619_s1 + $0xfd0] sm:$0xf0]  ;;  %v8284_v30 = vor.u32 %v10165_v10, %v8281_v11  ;;  %v5056_v38 = vpop.f32.mrf.mxu3 }
 0x139   :  { %5296 = vmatpush.bf16.msrb.mxu2 %v8188_v39  ;;  %v10097_v28 = vld [vmem:[%s15619_s1 + $0xc44] sm:$0xf]  ;;  %v8009_v29 = vld [vmem:[%s15619_s1 + $0xc50] sm:$0xf0]  ;;  %v8460_v31 = vor.u32 %v10209_v19, %v8457_v24  ;;  %v12576_v43 = vadd.f32 %v5056_v38, %v5044_v37 }
 0x13a   :  { %5309 = vmatpush.bf16.msrb.mxu3 %v8316_v34  ;;  %v10129_v33 = vld [vmem:[%s15619_s1 + $0xd44] sm:$0xf]  ;;  %v8137_v35 = vld [vmem:[%s15619_s1 + $0xd50] sm:$0xf0]  ;;  %v5032_v34 = vpop.f32.mrf.mxu1  ;;  %v8012_v44 = vor.u32 %v10097_v28, %v8009_v29 }
 0x13b   :  { %5275 = vmatpush.bf16.msrb.mxu0 %v7852_v55  ;;  %v10161_v36 = vld [vmem:[%s15619_s1 + $0xe44] sm:$0xf]  ;;  %v8265_v39 = vld [vmem:[%s15619_s1 + $0xe50] sm:$0xf0]  ;;  %v8140_v45 = vor.u32 %v10129_v33, %v8137_v35 }
 0x13c   :  { %5284 = vmatpush.bf16.msrb.mxu1 %v8044_v57  ;;  %v10205_v40 = vld [vmem:[%s15619_s1 + $0xfa4] sm:$0xf]  ;;  %v8441_v41 = vld [vmem:[%s15619_s1 + $0xfb0] sm:$0xf0]  ;;  %v8268_v52 = vor.u32 %v10161_v36, %v8265_v39 }
 0x13d   :  { %5297 = vmatpush.bf16.msrb.mxu2 %v8172_v58  ;;  %v10093_v50 = vld [vmem:[%s15619_s1 + $0xc24] sm:$0xf]  ;;  %v7993_v51 = vld [vmem:[%s15619_s1 + $0xc30] sm:$0xf0]  ;;  %v8444_v53 = vor.u32 %v10205_v40, %v8441_v41 }
 0x13e   :  { %5310 = vmatpush.bf16.msrb.mxu3 %v8300_v62  ;;  %5276 = vmatmul.bf16.vlgmr.msrb.gmra.mxu0 %v11246_v17  ;;  %v10125_v54 = vld [vmem:[%s15619_s1 + $0xd24] sm:$0xf]  ;;  %v8121_v55 = vld [vmem:[%s15619_s1 + $0xd30] sm:$0xf0]  ;;  %v7996_v61 = vor.u32 %v10093_v50, %v7993_v51 }
 0x13f   :  { %5320 = vmatpush.bf16.msra.mxu0 %v8476_v3  ;;  %v10157_v56 = vld [vmem:[%s15619_s1 + $0xe24] sm:$0xf]  ;;  %v8249_v57 = vld [vmem:[%s15619_s1 + $0xe30] sm:$0xf0]  ;;  %v8124_v62 = vor.u32 %v10125_v54, %v8121_v55 }
 0x140   :  { %5285 = vmatpush.bf16.msrb.mxu1 %v8028_v25  ;;  %v10201_v58 = vld [vmem:[%s15619_s1 + $0xf84] sm:$0xf]  ;;  %v8425_v59 = vld [vmem:[%s15619_s1 + $0xf90] sm:$0xf0]  ;;  %v8252_v8 = vor.u32 %v10157_v56, %v8249_v57  ;;  %v5045_v25 = vpop.f32.mrf.mxu2 }
 0x141   :  { %5298 = vmatpush.bf16.msrb.mxu2 %v8156_v27  ;;  %v10089_v63 = vld [vmem:[%s15619_s1 + $0xc04] sm:$0xf]  ;;  %v7977_v3 = vld [vmem:[%s15619_s1 + $0xc10] sm:$0xf0]  ;;  %v8428_v10 = vor.u32 %v10201_v58, %v8425_v59 }
 0x142   :  { %5311 = vmatpush.bf16.msrb.mxu3 %v8284_v30  ;;  %v10121_v32 = vld [vmem:[%s15619_s1 + $0xd04] sm:$0xf]  ;;  %v8105_v11 = vld [vmem:[%s15619_s1 + $0xd10] sm:$0xf0]  ;;  %v5058_v30 = vpop.f32.mrf.mxu3  ;;  %v7980_v35 = vor.u32 %v10089_v63, %v7977_v3 }
 0x143   :  { %5321 = vmatpush.bf16.msra.mxu0 %v8460_v31  ;;  %v10153_v19 = vld [vmem:[%s15619_s1 + $0xe04] sm:$0xf]  ;;  %v8233_v24 = vld [vmem:[%s15619_s1 + $0xe10] sm:$0xf0]  ;;  %v8108_v36 = vor.u32 %v10121_v32, %v8105_v11 }
 0x144   :  { %5286 = vmatpush.bf16.msrb.mxu1 %v8012_v44  ;;  %v10197_v27 = vld [vmem:[%s15619_s1 + $0xf64] sm:$0xf]  ;;  %v8409_v28 = vld [vmem:[%s15619_s1 + $0xf70] sm:$0xf0]  ;;  %v8236_v39 = vor.u32 %v10153_v19, %v8233_v24 }
 0x145   :  { %5299 = vmatpush.bf16.msrb.mxu2 %v8140_v45  ;;  %v10245_v29 = vld [vmem:[%s15619_s1 + $0x10e4] sm:$0xf]  ;;  %v8601_v23 = vld [vmem:[%s15619_s1 + $0x10f0] sm:$0xf0]  ;;  %v8412_v40 = vor.u32 %v10197_v27, %v8409_v28 }
 0x146   :  { %5312 = vmatpush.bf16.msrb.mxu3 %v8268_v52  ;;  %v10277_v31 = vld [vmem:[%s15619_s1 + $0x11e4] sm:$0xf]  ;;  %v8729_v33 = vld [vmem:[%s15619_s1 + $0x11f0] sm:$0xf0]  ;;  %v8604_v41 = vor.u32 %v10245_v29, %v8601_v23 }
 0x147   :  { %5322 = vmatpush.bf16.msra.mxu0 %v8444_v53  ;;  %v10309_v37 = vld [vmem:[%s15619_s1 + $0x12e4] sm:$0xf]  ;;  %v8857_v38 = vld [vmem:[%s15619_s1 + $0x12f0] sm:$0xf0]  ;;  %v8732_v42 = vor.u32 %v10277_v31, %v8729_v33 }
 0x148   :  { %5287 = vmatpush.bf16.msrb.mxu1 %v7996_v61  ;;  %v10193_v34 = vld [vmem:[%s15619_s1 + $0xf44] sm:$0xf]  ;;  %v8393_v44 = vld [vmem:[%s15619_s1 + $0xf50] sm:$0xf0]  ;;  %v8860_v50 = vor.u32 %v10309_v37, %v8857_v38 }
 0x149   :  { %5300 = vmatpush.bf16.msrb.mxu2 %v8124_v62  ;;  %v10241_v45 = vld [vmem:[%s15619_s1 + $0x10c4] sm:$0xf]  ;;  %v8585_v51 = vld [vmem:[%s15619_s1 + $0x10d0] sm:$0xf0]  ;;  %v8396_v56 = vor.u32 %v10193_v34, %v8393_v44 }
 0x14a   :  { %5313 = vmatpush.bf16.msrb.mxu3 %v8252_v8  ;;  %v10273_v52 = vld [vmem:[%s15619_s1 + $0x11c4] sm:$0xf]  ;;  %v8713_v53 = vld [vmem:[%s15619_s1 + $0x11d0] sm:$0xf0]  ;;  %v8588_v57 = vor.u32 %v10241_v45, %v8585_v51 }
 0x14b   :  { %5323 = vmatpush.bf16.msra.mxu0 %v8428_v10  ;;  %v10305_v54 = vld [vmem:[%s15619_s1 + $0x12c4] sm:$0xf]  ;;  %v8841_v55 = vld [vmem:[%s15619_s1 + $0x12d0] sm:$0xf0]  ;;  %v8716_v58 = vor.u32 %v10273_v52, %v8713_v53 }
 0x14c   :  { %5288 = vmatpush.bf16.msrb.mxu1 %v7980_v35  ;;  %v10189_v59 = vld [vmem:[%s15619_s1 + $0xf24] sm:$0xf]  ;;  %v8377_v61 = vld [vmem:[%s15619_s1 + $0xf30] sm:$0xf0]  ;;  %v8844_v63 = vor.u32 %v10305_v54, %v8841_v55 }
 0x14d   :  { %5301 = vmatpush.bf16.msrb.mxu2 %v8108_v36  ;;  %v10237_v62 = vld [vmem:[%s15619_s1 + $0x10a4] sm:$0xf]  ;;  %v8569_v3 = vld [vmem:[%s15619_s1 + $0x10b0] sm:$0xf0]  ;;  %v8380_v19 = vor.u32 %v10189_v59, %v8377_v61  ;;  %v5069_v36 = vpop.f32.mrf.mxu0 }
 0x14e   :  { %5314 = vmatpush.bf16.msrb.mxu3 %v8236_v39  ;;  %v10269_v32 = vld [vmem:[%s15619_s1 + $0x11a4] sm:$0xf]  ;;  %v8697_v8 = vld [vmem:[%s15619_s1 + $0x11b0] sm:$0xf0]  ;;  %v8572_v25 = vor.u32 %v10237_v62, %v8569_v3 }
 0x14f   :  { %5324 = vmatpush.bf16.msra.mxu0 %v8412_v40  ;;  %5289 = vmatmul.bf16.vlgmr.msrb.gmra.mxu1 %v11408_v46  ;;  %v10301_v10 = vld [vmem:[%s15619_s1 + $0x12a4] sm:$0xf]  ;;  %v8825_v11 = vld [vmem:[%s15619_s1 + $0x12b0] sm:$0xf0]  ;;  %v8700_v27 = vor.u32 %v10269_v32, %v8697_v8  ;;  %v5070_v40 = vadd.f32 %v5069_v36, %v12576_v43 }
 0x150   :  { %5333 = vmatpush.bf16.msra.mxu1 %v8604_v41  ;;  %5302 = vmatmul.bf16.vlgmr.msrb.gmra.mxu2 %v11412_v48  ;;  %v10185_v24 = vld [vmem:[%s15619_s1 + $0xf04] sm:$0xf]  ;;  %v8361_v28 = vld [vmem:[%s15619_s1 + $0xf10] sm:$0xf0]  ;;  %v8828_v23 = vor.u32 %v10301_v10, %v8825_v11 }
 0x151   :  { %5346 = vmatpush.bf16.msra.mxu2 %v8732_v42  ;;  %5315 = vmatmul.bf16.vlgmr.msrb.gmra.mxu3 %v11410_v47  ;;  %v10233_v29 = vld [vmem:[%s15619_s1 + $0x1084] sm:$0xf]  ;;  %v8553_v30 = vld [vmem:[%s15619_s1 + $0x1090] sm:$0xf0]  ;;  %v8364_v41 = vor.u32 %v10185_v24, %v8361_v28  ;;  %v5082_v42 = vpop.f32.mrf.mxu1 }
 0x152   :  { %5359 = vmatpush.bf16.msra.mxu3 %v8860_v50  ;;  %v10265_v31 = vld [vmem:[%s15619_s1 + $0x1184] sm:$0xf]  ;;  %v8681_v33 = vld [vmem:[%s15619_s1 + $0x1190] sm:$0xf0]  ;;  %v8556_v34 = vor.u32 %v10233_v29, %v8553_v30  ;;  %v5083_v52 = vadd.f32 %v5082_v42, %v5070_v40 }
 0x153   :  { %5325 = vmatpush.bf16.msra.mxu0 %v8396_v56  ;;  %v10297_v35 = vld [vmem:[%s15619_s1 + $0x1284] sm:$0xf]  ;;  %v8809_v37 = vld [vmem:[%s15619_s1 + $0x1290] sm:$0xf0]  ;;  %v8684_v44 = vor.u32 %v10265_v31, %v8681_v33  ;;  %v5095_v32 = vpop.f32.mrf.mxu2 }
 0x154   :  { %5334 = vmatpush.bf16.msra.mxu1 %v8588_v57  ;;  %v10341_v38 = vld [vmem:[%s15619_s1 + $0x13e4] sm:$0xf]  ;;  %v8985_v39 = vld [vmem:[%s15619_s1 + $0x13f0] sm:$0xf0]  ;;  %v8812_v51 = vor.u32 %v10297_v35, %v8809_v37  ;;  %v5096_v24 = vadd.f32 %v5095_v32, %v5083_v52 }
 0x155   :  { %5347 = vmatpush.bf16.msra.mxu2 %v8716_v58  ;;  %v10229_v45 = vld [vmem:[%s15619_s1 + $0x1064] sm:$0xf]  ;;  %v8537_v50 = vld [vmem:[%s15619_s1 + $0x1070] sm:$0xf0]  ;;  %v8988_v53 = vor.u32 %v10341_v38, %v8985_v39 }
 0x156   :  { %5360 = vmatpush.bf16.msra.mxu3 %v8844_v63  ;;  %v10261_v43 = vld [vmem:[%s15619_s1 + $0x1164] sm:$0xf]  ;;  %v8665_v54 = vld [vmem:[%s15619_s1 + $0x1170] sm:$0xf0]  ;;  %v8540_v59 = vor.u32 %v10229_v45, %v8537_v50 }
 0x157   :  { %5326 = vmatpush.bf16.msra.mxu0 %v8380_v19  ;;  %v10293_v55 = vld [vmem:[%s15619_s1 + $0x1264] sm:$0xf]  ;;  %v8793_v56 = vld [vmem:[%s15619_s1 + $0x1270] sm:$0xf0]  ;;  %v8668_v61 = vor.u32 %v10261_v43, %v8665_v54 }
 0x158   :  { %5335 = vmatpush.bf16.msra.mxu1 %v8572_v25  ;;  %v10337_v57 = vld [vmem:[%s15619_s1 + $0x13c4] sm:$0xf]  ;;  %v8969_v58 = vld [vmem:[%s15619_s1 + $0x13d0] sm:$0xf0]  ;;  %v8796_v3 = vor.u32 %v10293_v55, %v8793_v56  ;;  %v5071_v25 = vpop.f32.mrf.mxu0 }
 0x159   :  { %5348 = vmatpush.bf16.msra.mxu2 %v8700_v27  ;;  %v10225_v62 = vld [vmem:[%s15619_s1 + $0x1044] sm:$0xf]  ;;  %v8521_v63 = vld [vmem:[%s15619_s1 + $0x1050] sm:$0xf0]  ;;  %v8972_v8 = vor.u32 %v10337_v57, %v8969_v58  ;;  %v5108_v27 = vpop.f32.mrf.mxu3 }
 0x15a   :  { %5361 = vmatpush.bf16.msra.mxu3 %v8828_v23  ;;  %v10257_v10 = vld [vmem:[%s15619_s1 + $0x1144] sm:$0xf]  ;;  %v8649_v11 = vld [vmem:[%s15619_s1 + $0x1150] sm:$0xf0]  ;;  %v5084_v23 = vpop.f32.mrf.mxu1  ;;  %v5109_v31 = vadd.f32 %v5108_v27, %v5096_v24  ;;  %v8524_v33 = vor.u32 %v10225_v62, %v8521_v63 }
 0x15b   :  { %5327 = vmatpush.bf16.msra.mxu0 %v8364_v41  ;;  %v10289_v19 = vld [vmem:[%s15619_s1 + $0x1244] sm:$0xf]  ;;  %v8777_v28 = vld [vmem:[%s15619_s1 + $0x1250] sm:$0xf0]  ;;  %v8652_v35 = vor.u32 %v10257_v10, %v8649_v11 }
 0x15c   :  { %5336 = vmatpush.bf16.msra.mxu1 %v8556_v34  ;;  %v10333_v29 = vld [vmem:[%s15619_s1 + $0x13a4] sm:$0xf]  ;;  %v8953_v30 = vld [vmem:[%s15619_s1 + $0x13b0] sm:$0xf0]  ;;  %v8780_v38 = vor.u32 %v10289_v19, %v8777_v28 }
 0x15d   :  { %5349 = vmatpush.bf16.msra.mxu2 %v8684_v44  ;;  %v10221_v36 = vld [vmem:[%s15619_s1 + $0x1024] sm:$0xf]  ;;  %v8505_v37 = vld [vmem:[%s15619_s1 + $0x1030] sm:$0xf0]  ;;  %v8956_v39 = vor.u32 %v10333_v29, %v8953_v30 }
 0x15e   :  { %5362 = vmatpush.bf16.msra.mxu3 %v8812_v51  ;;  %5328 = vmatmul.bf16.vlgmr.msra.gmra.mxu0 %v11414_v49  ;;  %v10253_v40 = vld [vmem:[%s15619_s1 + $0x1124] sm:$0xf]  ;;  %v8633_v41 = vld [vmem:[%s15619_s1 + $0x1130] sm:$0xf0]  ;;  %v8508_v50 = vor.u32 %v10221_v36, %v8505_v37 }
 0x15f   :  { %5372 = vmatpush.bf16.msrb.mxu0 %v8988_v53  ;;  %v10285_v42 = vld [vmem:[%s15619_s1 + $0x1224] sm:$0xf]  ;;  %v8761_v34 = vld [vmem:[%s15619_s1 + $0x1230] sm:$0xf0]  ;;  %v8636_v51 = vor.u32 %v10253_v40, %v8633_v41 }
 0x160   :  { %5337 = vmatpush.bf16.msra.mxu1 %v8540_v59  ;;  %v10329_v44 = vld [vmem:[%s15619_s1 + $0x1384] sm:$0xf]  ;;  %v8937_v45 = vld [vmem:[%s15619_s1 + $0x1390] sm:$0xf0]  ;;  %v8764_v54 = vor.u32 %v10285_v42, %v8761_v34  ;;  %v5097_v59 = vpop.f32.mrf.mxu2  ;;  %v5121_v32 = vpop.f32.mrf.mxu0 }
 0x161   :  { %5350 = vmatpush.bf16.msra.mxu2 %v8668_v61  ;;  %v10217_v52 = vld [vmem:[%s15619_s1 + $0x1004] sm:$0xf]  ;;  %v8489_v53 = vld [vmem:[%s15619_s1 + $0x1010] sm:$0xf0]  ;;  %v8940_v55 = vor.u32 %v10329_v44, %v8937_v45  ;;  %v12835_v19 = vadd.f32 %v5121_v32, %v5109_v31 }
 0x162   :  { %5363 = vmatpush.bf16.msra.mxu3 %v8796_v3  ;;  %v10249_v43 = vld [vmem:[%s15619_s1 + $0x1104] sm:$0xf]  ;;  %v8617_v56 = vld [vmem:[%s15619_s1 + $0x1110] sm:$0xf0]  ;;  %v5110_v3 = vpop.f32.mrf.mxu3  ;;  %v8492_v24 = vor.u32 %v10217_v52, %v8489_v53 }
 0x163   :  { %5373 = vmatpush.bf16.msrb.mxu0 %v8972_v8  ;;  %v10281_v57 = vld [vmem:[%s15619_s1 + $0x1204] sm:$0xf]  ;;  %v8745_v58 = vld [vmem:[%s15619_s1 + $0x1210] sm:$0xf0]  ;;  %v8620_v25 = vor.u32 %v10249_v43, %v8617_v56 }
 0x164   :  { %5338 = vmatpush.bf16.msra.mxu1 %v8524_v33  ;;  %v10325_v61 = vld [vmem:[%s15619_s1 + $0x1364] sm:$0xf]  ;;  %v8921_v62 = vld [vmem:[%s15619_s1 + $0x1370] sm:$0xf0]  ;;  %v8748_v29 = vor.u32 %v10281_v57, %v8745_v58 }
 0x165   :  { %5351 = vmatpush.bf16.msra.mxu2 %v8652_v35  ;;  %v10373_v63 = vld [vmem:[%s15619_s1 + $0x14e4] sm:$0xf]  ;;  %v9113_v8 = vld [vmem:[%s15619_s1 + $0x14f0] sm:$0xf0]  ;;  %v8924_v30 = vor.u32 %v10325_v61, %v8921_v62 }
 0x166   :  { %5364 = vmatpush.bf16.msra.mxu3 %v8780_v38  ;;  %v10405_v10 = vld [vmem:[%s15619_s1 + $0x15e4] sm:$0xf]  ;;  %v9241_v11 = vld [vmem:[%s15619_s1 + $0x15f0] sm:$0xf0]  ;;  %v9116_v23 = vor.u32 %v10373_v63, %v9113_v8 }
 0x167   :  { %5374 = vmatpush.bf16.msrb.mxu0 %v8956_v39  ;;  %v10437_v27 = vld [vmem:[%s15619_s1 + $0x16e4] sm:$0xf]  ;;  %v9369_v28 = vld [vmem:[%s15619_s1 + $0x16f0] sm:$0xf0]  ;;  %v9244_v33 = vor.u32 %v10405_v10, %v9241_v11 }
 0x168   :  { %5339 = vmatpush.bf16.msra.mxu1 %v8508_v50  ;;  %v10321_v31 = vld [vmem:[%s15619_s1 + $0x1344] sm:$0xf]  ;;  %v8905_v35 = vld [vmem:[%s15619_s1 + $0x1350] sm:$0xf0]  ;;  %v9372_v37 = vor.u32 %v10437_v27, %v9369_v28  ;;  %v5123_v56 = vpop.f32.mrf.mxu0  ;;  %v10523_v27 = vld [vmem:[%s15620_s2] sm:$0xf] }
 0x169   :  { %5352 = vmatpush.bf16.msra.mxu2 %v8636_v51  ;;  %v10369_v36 = vld [vmem:[%s15619_s1 + $0x14c4] sm:$0xf]  ;;  %v9097_v38 = vld [vmem:[%s15619_s1 + $0x14d0] sm:$0xf0]  ;;  %v8908_v34 = vor.u32 %v10321_v31, %v8905_v35  ;;  %v813_v28 = vperm.slane %v10523_v27, 1 }
 0x16a   :  { %5365 = vmatpush.bf16.msra.mxu3 %v8764_v54  ;;  %v10401_v39 = vld [vmem:[%s15619_s1 + $0x15c4] sm:$0xf]  ;;  %v9225_v40 = vld [vmem:[%s15619_s1 + $0x15d0] sm:$0xf0]  ;;  %v9100_v44 = vor.u32 %v10369_v36, %v9097_v38 }
 0x16b   :  { %5375 = vmatpush.bf16.msrb.mxu0 %v8940_v55  ;;  %v10433_v41 = vld [vmem:[%s15619_s1 + $0x16c4] sm:$0xf]  ;;  %v9353_v42 = vld [vmem:[%s15619_s1 + $0x16d0] sm:$0xf0]  ;;  %v9228_v45 = vor.u32 %v10401_v39, %v9225_v40 }
 0x16c   :  { %5340 = vmatpush.bf16.msra.mxu1 %v8492_v24  ;;  %v10317_v50 = vld [vmem:[%s15619_s1 + $0x1324] sm:$0xf]  ;;  %v8889_v51 = vld [vmem:[%s15619_s1 + $0x1330] sm:$0xf0]  ;;  %v9356_v53 = vor.u32 %v10433_v41, %v9353_v42  ;;  %v5134_v31 = vpop.f32.mrf.mxu1 }
 0x16d   :  { %5353 = vmatpush.bf16.msra.mxu2 %v8620_v25  ;;  %v10365_v52 = vld [vmem:[%s15619_s1 + $0x14a4] sm:$0xf]  ;;  %v9081_v43 = vld [vmem:[%s15619_s1 + $0x14b0] sm:$0xf0]  ;;  %v8892_v59 = vor.u32 %v10317_v50, %v8889_v51 }
 0x16e   :  { %5366 = vmatpush.bf16.msra.mxu3 %v8748_v29  ;;  %v10397_v54 = vld [vmem:[%s15619_s1 + $0x15a4] sm:$0xf]  ;;  %v9209_v55 = vld [vmem:[%s15619_s1 + $0x15b0] sm:$0xf0]  ;;  %v9084_v63 = vor.u32 %v10365_v52, %v9081_v43 }
 0x16f   :  { %5376 = vmatpush.bf16.msrb.mxu0 %v8924_v30  ;;  %5341 = vmatmul.bf16.vlgmr.msra.gmra.mxu1 %v11645_v9  ;;  %v10429_v57 = vld [vmem:[%s15619_s1 + $0x16a4] sm:$0xf]  ;;  %v9337_v58 = vld [vmem:[%s15619_s1 + $0x16b0] sm:$0xf0]  ;;  %v9212_v3 = vor.u32 %v10397_v54, %v9209_v55 }
 0x170   :  { %5385 = vmatpush.bf16.msrb.mxu1 %v9116_v23  ;;  %5354 = vmatmul.bf16.vlgmr.msra.gmra.mxu2 %v11655_v14  ;;  %v10313_v61 = vld [vmem:[%s15619_s1 + $0x1304] sm:$0xf]  ;;  %v8873_v62 = vld [vmem:[%s15619_s1 + $0x1310] sm:$0xf0]  ;;  %v9340_v11 = vor.u32 %v10429_v57, %v9337_v58 }
 0x171   :  { %5398 = vmatpush.bf16.msrb.mxu2 %v9244_v33  ;;  %5367 = vmatmul.bf16.vlgmr.msra.gmra.mxu3 %v11653_v13  ;;  %v10361_v32 = vld [vmem:[%s15619_s1 + $0x1484] sm:$0xf]  ;;  %v9065_v8 = vld [vmem:[%s15619_s1 + $0x1490] sm:$0xf0]  ;;  %v8876_v33 = vor.u32 %v10313_v61, %v8873_v62 }
 0x172   :  { %5411 = vmatpush.bf16.msrb.mxu3 %v9372_v37  ;;  %v10393_v10 = vld [vmem:[%s15619_s1 + $0x1584] sm:$0xf]  ;;  %v9193_v24 = vld [vmem:[%s15619_s1 + $0x1590] sm:$0xf0]  ;;  %v9068_v35 = vor.u32 %v10361_v32, %v9065_v8 }
 0x173   :  { %5377 = vmatpush.bf16.msrb.mxu0 %v8908_v34  ;;  %v10425_v25 = vld [vmem:[%s15619_s1 + $0x1684] sm:$0xf]  ;;  %v9321_v29 = vld [vmem:[%s15619_s1 + $0x1690] sm:$0xf0]  ;;  %v9196_v36 = vor.u32 %v10393_v10, %v9193_v24  ;;  %v5147_v55 = vpop.f32.mrf.mxu2 }
 0x174   :  { %5386 = vmatpush.bf16.msrb.mxu1 %v9100_v44  ;;  %v10469_v30 = vld [vmem:[%s15619_s1 + $0x17e4] sm:$0xf]  ;;  %v9497_v23 = vld [vmem:[%s15619_s1 + $0x17f0] sm:$0xf0]  ;;  %v9324_v39 = vor.u32 %v10425_v25, %v9321_v29  ;;  %v5135_v44 = vadd.f32 %v5134_v31, %v813_v28 }
 0x175   :  { %5399 = vmatpush.bf16.msrb.mxu2 %v9228_v45  ;;  %v10357_v37 = vld [vmem:[%s15619_s1 + $0x1464] sm:$0xf]  ;;  %v9049_v38 = vld [vmem:[%s15619_s1 + $0x1470] sm:$0xf0]  ;;  %v9500_v40 = vor.u32 %v10469_v30, %v9497_v23 }
 0x176   :  { %5412 = vmatpush.bf16.msrb.mxu3 %v9356_v53  ;;  %v10389_v41 = vld [vmem:[%s15619_s1 + $0x1564] sm:$0xf]  ;;  %v9177_v42 = vld [vmem:[%s15619_s1 + $0x1570] sm:$0xf0]  ;;  %v9052_v52 = vor.u32 %v10357_v37, %v9049_v38  ;;  %v5148_v62 = vadd.f32 %v5147_v55, %v5135_v44 }
 0x177   :  { %5378 = vmatpush.bf16.msrb.mxu0 %v8892_v59  ;;  %v10421_v34 = vld [vmem:[%s15619_s1 + $0x1664] sm:$0xf]  ;;  %v9305_v45 = vld [vmem:[%s15619_s1 + $0x1670] sm:$0xf0]  ;;  %v9180_v53 = vor.u32 %v10389_v41, %v9177_v42 }
 0x178   :  { %5387 = vmatpush.bf16.msrb.mxu1 %v9084_v63  ;;  %v10465_v50 = vld [vmem:[%s15619_s1 + $0x17c4] sm:$0xf]  ;;  %v9481_v51 = vld [vmem:[%s15619_s1 + $0x17d0] sm:$0xf0]  ;;  %v9308_v56 = vor.u32 %v10421_v34, %v9305_v45  ;;  %v5160_v63 = vpop.f32.mrf.mxu3 }
 0x179   :  { %5400 = vmatpush.bf16.msrb.mxu2 %v9212_v3  ;;  %v10353_v43 = vld [vmem:[%s15619_s1 + $0x1444] sm:$0xf]  ;;  %v9033_v54 = vld [vmem:[%s15619_s1 + $0x1450] sm:$0xf0]  ;;  %v9484_v57 = vor.u32 %v10465_v50, %v9481_v51  ;;  %v5161_v10 = vadd.f32 %v5160_v63, %v5148_v62 }
 0x17a   :  { %5413 = vmatpush.bf16.msrb.mxu3 %v9340_v11  ;;  %v10385_v58 = vld [vmem:[%s15619_s1 + $0x1544] sm:$0xf]  ;;  %v9161_v59 = vld [vmem:[%s15619_s1 + $0x1550] sm:$0xf0]  ;;  %v5136_v11 = vpop.f32.mrf.mxu1  ;;  %v9036_v24 = vor.u32 %v10353_v43, %v9033_v54 }
 0x17b   :  { %5379 = vmatpush.bf16.msrb.mxu0 %v8876_v33  ;;  %v10417_v61 = vld [vmem:[%s15619_s1 + $0x1644] sm:$0xf]  ;;  %v9289_v3 = vld [vmem:[%s15619_s1 + $0x1650] sm:$0xf0]  ;;  %v9164_v25 = vor.u32 %v10385_v58, %v9161_v59  ;;  %v5173_v38 = vpop.f32.mrf.mxu0  ;;  %v5149_v45 = vpop.f32.mrf.mxu2  ;;  %v6559_v59 = vld [vmem:[%s15619_s1 + $0xe8] sm:$0xf] }
 0x17c   :  { %5388 = vmatpush.bf16.msrb.mxu1 %v9068_v35  ;;  %v10461_v32 = vld [vmem:[%s15619_s1 + $0x17a4] sm:$0xf]  ;;  %v9465_v8 = vld [vmem:[%s15619_s1 + $0x17b0] sm:$0xf0]  ;;  %v9292_v29 = vor.u32 %v10417_v61, %v9289_v3  ;;  %v13009_v44 = vadd.f32 %v5173_v38, %v5161_v10  ;;  %v9736_v61 = vld [vmem:[%s15619_s1 + $0xf4] sm:$0xf0] }
 0x17d   :  { %5401 = vmatpush.bf16.msrb.mxu2 %v9196_v36  ;;  %v10349_v27 = vld [vmem:[%s15619_s1 + $0x1424] sm:$0xf]  ;;  %v9017_v28 = vld [vmem:[%s15619_s1 + $0x1430] sm:$0xf0]  ;;  %v9468_v30 = vor.u32 %v10461_v32, %v9465_v8  ;;  %v6687_v3 = vld [vmem:[%s15619_s1 + $0x1e8] sm:$0xf] }
 0x17e   :  { %5414 = vmatpush.bf16.msrb.mxu3 %v9324_v39  ;;  %5380 = vmatmul.bf16.vlgmr.msrb.gmra.mxu0 %v11657_v18  ;;  %v10381_v23 = vld [vmem:[%s15619_s1 + $0x1524] sm:$0xf]  ;;  %v9145_v33 = vld [vmem:[%s15619_s1 + $0x1530] sm:$0xf0]  ;;  %v9020_v39 = vor.u32 %v10349_v27, %v9017_v28  ;;  %v9768_v32 = vld [vmem:[%s15619_s1 + $0x1f4] sm:$0xf0] }
 0x17f   :  { %5424 = vmatpush.bf16.msra.mxu0 %v9500_v40  ;;  %v10413_v31 = vld [vmem:[%s15619_s1 + $0x1624] sm:$0xf]  ;;  %v9273_v35 = vld [vmem:[%s15619_s1 + $0x1630] sm:$0xf0]  ;;  %v9148_v40 = vor.u32 %v10381_v23, %v9145_v33  ;;  %v6543_v23 = vld [vmem:[%s15619_s1 + $0xc8] sm:$0xf] }
 0x180   :  { %5389 = vmatpush.bf16.msrb.mxu1 %v9052_v52  ;;  %v10457_v36 = vld [vmem:[%s15619_s1 + $0x1784] sm:$0xf]  ;;  %v9449_v37 = vld [vmem:[%s15619_s1 + $0x1790] sm:$0xf0]  ;;  %v9276_v50 = vor.u32 %v10413_v31, %v9273_v35  ;;  %v5162_v54 = vpop.f32.mrf.mxu3  ;;  %v9732_v33 = vld [vmem:[%s15619_s1 + $0xd4] sm:$0xf0] }
 0x181   :  { %5402 = vmatpush.bf16.msrb.mxu2 %v9180_v53  ;;  %v10345_v41 = vld [vmem:[%s15619_s1 + $0x1404] sm:$0xf]  ;;  %v9001_v42 = vld [vmem:[%s15619_s1 + $0x1410] sm:$0xf0]  ;;  %v9452_v51 = vor.u32 %v10457_v36, %v9449_v37  ;;  %v6671_v35 = vld [vmem:[%s15619_s1 + $0x1c8] sm:$0xf] }
 0x182   :  { %5415 = vmatpush.bf16.msrb.mxu3 %v9308_v56  ;;  %v10377_v34 = vld [vmem:[%s15619_s1 + $0x1504] sm:$0xf]  ;;  %v9129_v52 = vld [vmem:[%s15619_s1 + $0x1510] sm:$0xf0]  ;;  %v9004_v62 = vor.u32 %v10345_v41, %v9001_v42  ;;  %v9764_v36 = vld [vmem:[%s15619_s1 + $0x1d4] sm:$0xf0] }
 0x183   :  { %5425 = vmatpush.bf16.msra.mxu0 %v9484_v57  ;;  %v10409_v53 = vld [vmem:[%s15619_s1 + $0x1604] sm:$0xf]  ;;  %v9257_v43 = vld [vmem:[%s15619_s1 + $0x1610] sm:$0xf0]  ;;  %v9132_v63 = vor.u32 %v10377_v34, %v9129_v52  ;;  %v5175_v31 = vpop.f32.mrf.mxu0  ;;  %v6672_v34 = vor.u32 %v9764_v36, %v6671_v35  ;;  %v6655_v52 = vld [vmem:[%s15619_s1 + $0x1a8] sm:$0xf] }
 0x184   :  { %5390 = vmatpush.bf16.msrb.mxu1 %v9036_v24  ;;  %v10453_v55 = vld [vmem:[%s15619_s1 + $0x1764] sm:$0xf]  ;;  %v9433_v56 = vld [vmem:[%s15619_s1 + $0x1770] sm:$0xf0]  ;;  %v9260_v8 = vor.u32 %v10409_v53, %v9257_v43  ;;  %v6560_v24 = vor.u32 %v9736_v61, %v6559_v59  ;;  %v9760_v53 = vld [vmem:[%s15619_s1 + $0x1b4] sm:$0xf0] }
 0x185   :  { %5403 = vmatpush.bf16.msrb.mxu2 %v9164_v25  ;;  %v10485_v57 = vld [vmem:[%s15619_s1 + $0x1864] sm:$0xf]  ;;  %v9561_v58 = vld [vmem:[%s15619_s1 + $0x1870] sm:$0xf0]  ;;  %v9436_v10 = vor.u32 %v10453_v55, %v9433_v56  ;;  %v6656_v61 = vor.u32 %v9760_v53, %v6655_v52  ;;  %v6495_v31 = vld [vmem:[%s15619_s1 + $0x68] sm:$0xf] }
 0x186   :  { %5416 = vmatpush.bf16.msrb.mxu3 %v9292_v29  ;;  %v9564_v11 = vor.u32 %v10485_v57, %v9561_v58  ;;  %v10449_v25 = vld [vmem:[%s15619_s1 + $0x1744] sm:$0xf]  ;;  %v9417_v27 = vld [vmem:[%s15619_s1 + $0x1750] sm:$0xf0]  ;;  %v6688_v29 = vor.u32 %v9768_v32, %v6687_v3  ;;  %v6639_v3 = vld [vmem:[%s15619_s1 + $0x188] sm:$0xf] }
 0x187   :  { %5426 = vmatpush.bf16.msra.mxu0 %v9468_v30  ;;  %v10481_v28 = vld [vmem:[%s15619_s1 + $0x1844] sm:$0xf]  ;;  %v9545_v30 = vld [vmem:[%s15619_s1 + $0x1850] sm:$0xf0]  ;;  %v9420_v37 = vor.u32 %v10449_v25, %v9417_v27  ;;  %v9756_v32 = vld [vmem:[%s15619_s1 + $0x194] sm:$0xf0] }
 0x188   :  { %5391 = vmatpush.bf16.msrb.mxu1 %v9020_v39  ;;  %v9548_v38 = vor.u32 %v10481_v28, %v9545_v30  ;;  %v6544_v39 = vor.u32 %v9732_v33, %v6543_v23  ;;  %v9401_v41 = vld [vmem:[%s15619_s1 + $0x1730] sm:$0xf0]  ;;  %v10477_v42 = vld [vmem:[%s15619_s1 + $0x1824] sm:$0xf]  ;;  %v9832_v25 = vld [vmem:[%s15619_s1 + $0x3f4] sm:$0xf0]  ;;  %v6640_v23 = vor.u32 %v9756_v32, %v6639_v3 }
 0x189   :  { %5404 = vmatpush.bf16.msrb.mxu2 %v9148_v40  ;;  %v10445_v40 = vld [vmem:[%s15619_s1 + $0x1724] sm:$0xf]  ;;  %v9529_v45 = vld [vmem:[%s15619_s1 + $0x1830] sm:$0xf0]  ;;  %v9720_v35 = vld [vmem:[%s15619_s1 + $0x74] sm:$0xf0] }
 0x18a   :  { %5417 = vmatpush.bf16.msrb.mxu3 %v9276_v50  ;;  %v6527_v50 = vld [vmem:[%s15619_s1 + $0xa8] sm:$0xf]  ;;  %v9404_v43 = vor.u32 %v10445_v40, %v9401_v41  ;;  %v10441_v54 = vld [vmem:[%s15619_s1 + $0x1704] sm:$0xf]  ;;  %v9532_v55 = vor.u32 %v10477_v42, %v9529_v45  ;;  %v9385_v57 = vld [vmem:[%s15619_s1 + $0x1710] sm:$0xf0]  ;;  %v6496_v42 = vor.u32 %v9720_v35, %v6495_v31 }
 0x18b   :  { %5427 = vmatpush.bf16.msra.mxu0 %v9452_v51  ;;  %v9728_v51 = vld [vmem:[%s15619_s1 + $0xb4] sm:$0xf0]  ;;  %v10473_v58 = vld [vmem:[%s15619_s1 + $0x1804] sm:$0xf]  ;;  %v9513_v59 = vld [vmem:[%s15619_s1 + $0x1810] sm:$0xf0] }
 0x18c   :  { %5392 = vmatpush.bf16.msrb.mxu1 %v9004_v62  ;;  %v6528_v56 = vor.u32 %v9728_v51, %v6527_v50  ;;  %v6511_v62 = vld [vmem:[%s15619_s1 + $0x88] sm:$0xf]  ;;  %v5186_v27 = vpop.f32.mrf.mxu1  ;;  %v9516_v28 = vor.u32 %v10473_v58, %v9513_v59  ;;  %v9828_v41 = vld [vmem:[%s15619_s1 + $0x3d4] sm:$0xf0] }
 0x18d   :  { %5405 = vmatpush.bf16.msrb.mxu2 %v9132_v63  ;;  %v9724_v63 = vld [vmem:[%s15619_s1 + $0x94] sm:$0xf0]  ;;  %v5187_v30 = vadd.f32 %v5186_v27, %v13009_v44  ;;  %v6623_v36 = vld [vmem:[%s15619_s1 + $0x168] sm:$0xf] }
 0x18e   :  { %5418 = vmatpush.bf16.msrb.mxu3 %v9260_v8  ;;  %v6815_v8 = vld [vmem:[%s15619_s1 + $0x2e8] sm:$0xf]  ;;  %v9752_v44 = vld [vmem:[%s15619_s1 + $0x174] sm:$0xf0] }
 0x18f   :  { %5428 = vmatpush.bf16.msra.mxu0 %v9436_v10  ;;  %5393 = vmatmul.bf16.vlgmr.msrb.gmra.mxu1 %v11738_v4  ;;  %v9800_v10 = vld [vmem:[%s15619_s1 + $0x2f4] sm:$0xf0]  ;;  %v6927_v40 = vld [vmem:[%s15619_s1 + $0x3c8] sm:$0xf]  ;;  %v6624_v45 = vor.u32 %v9752_v44, %v6623_v36 }
 0x190   :  { %5441 = vmatpush.bf16.msra.mxu1 %v9564_v11  ;;  %5406 = vmatmul.bf16.vlgmr.msrb.gmra.mxu2 %v11742_v6  ;;  %v9388_v11 = vor.u32 %v10441_v54, %v9385_v57  ;;  %v6816_v33 = vor.u32 %v9800_v10, %v6815_v8  ;;  %v6479_v51 = vld [vmem:[%s15619_s1 + $0x48] sm:$0xf]  ;;  %v9716_v52 = vld [vmem:[%s15619_s1 + $0x54] sm:$0xf0] }
 0x191   :  { %5450 = vmatpush.bf16.msra.mxu2 %v6560_v24  ;;  %5419 = vmatmul.bf16.vlgmr.msrb.gmra.mxu3 %v11740_v5  ;;  %v6943_v24 = vld [vmem:[%s15619_s1 + $0x3e8] sm:$0xf]  ;;  %v9792_v58 = vld [vmem:[%s15619_s1 + $0x2b4] sm:$0xf0]  ;;  %v6480_v3 = vor.u32 %v9716_v52, %v6479_v51 }
 0x192   :  { %5463 = vmatpush.bf16.msra.mxu3 %v6688_v29  ;;  %v6512_v29 = vor.u32 %v9724_v63, %v6511_v62  ;;  %v6607_v53 = vld [vmem:[%s15619_s1 + $0x148] sm:$0xf]  ;;  %v9744_v27 = vld [vmem:[%s15619_s1 + $0x134] sm:$0xf0] }
 0x193   :  { %5429 = vmatpush.bf16.msra.mxu0 %v9420_v37  ;;  %v6944_v37 = vor.u32 %v9832_v25, %v6943_v24  ;;  %v6783_v57 = vld [vmem:[%s15619_s1 + $0x2a8] sm:$0xf]  ;;  %v9820_v31 = vld [vmem:[%s15619_s1 + $0x394] sm:$0xf0] }
 0x194   :  { %5442 = vmatpush.bf16.msra.mxu1 %v9548_v38  ;;  %v6799_v38 = vld [vmem:[%s15619_s1 + $0x2c8] sm:$0xf]  ;;  %v5212_v54 = vpop.f32.mrf.mxu3  ;;  %v5188_v63 = vpop.f32.mrf.mxu1  ;;  %v6784_v8 = vor.u32 %v9792_v58, %v6783_v57  ;;  %v9784_v51 = vld [vmem:[%s15619_s1 + $0x274] sm:$0xf0] }
 0x195   :  { %5451 = vmatpush.bf16.msra.mxu2 %v6544_v39  ;;  %v9796_v39 = vld [vmem:[%s15619_s1 + $0x2d4] sm:$0xf0]  ;;  %v6911_v59 = vld [vmem:[%s15619_s1 + $0x3a8] sm:$0xf] }
 0x196   :  { %5464 = vmatpush.bf16.msra.mxu3 %v6672_v34  ;;  %v5199_v34 = vpop.f32.mrf.mxu2  ;;  %v6800_v50 = vor.u32 %v9796_v39, %v6799_v38  ;;  %v6463_v10 = vld [vmem:[%s15619_s1 + $0x28] sm:$0xf]  ;;  %v9896_v57 = vld [vmem:[%s15619_s1 + $0x5f4] sm:$0xf0] }
 0x197   :  { %5430 = vmatpush.bf16.msra.mxu0 %v9404_v43  ;;  %v5200_v43 = vadd.f32 %v5199_v34, %v5187_v30  ;;  %v6591_v24 = vld [vmem:[%s15619_s1 + $0x128] sm:$0xf]  ;;  %v10524_v30 = vld [vmem:[#allocation1] sm:$0xff] }
 0x198   :  { %5443 = vmatpush.bf16.msra.mxu1 %v9532_v55  ;;  %v6928_v55 = vor.u32 %v9828_v41, %v6927_v40  ;;  %v6592_v38 = vor.u32 %v9744_v27, %v6591_v24  ;;  %v9708_v40 = vld [vmem:[%s15619_s1 + $0x14] sm:$0xf0]  ;;  %v6575_v41 = vld [vmem:[%s15619_s1 + $0x108] sm:$0xf] }
 0x199   :  { %5452 = vmatpush.bf16.msra.mxu2 %v6528_v56  ;;  %v9748_v56 = vld [vmem:[%s15619_s1 + $0x154] sm:$0xf0]  ;;  %v5213_v62 = vadd.f32 %v5212_v54, %v5200_v43  ;;  %v6879_v52 = vld [vmem:[%s15619_s1 + $0x368] sm:$0xf] }
 0x19a   :  { %5465 = vmatpush.bf16.msra.mxu3 %v6656_v61  ;;  %v9824_v61 = vld [vmem:[%s15619_s1 + $0x3b4] sm:$0xf0]  ;;  %v6608_v32 = vor.u32 %v9748_v56, %v6607_v53  ;;  %v7071_v43 = vld [vmem:[%s15619_s1 + $0x4e8] sm:$0xf] }
 0x19b   :  { %5431 = vmatpush.bf16.msra.mxu0 %v9388_v11  ;;  %v9712_v11 = vld [vmem:[%s15619_s1 + $0x34] sm:$0xf0]  ;;  %v6912_v25 = vor.u32 %v9824_v61, %v6911_v59  ;;  %v7199_v56 = vld [vmem:[%s15619_s1 + $0x5e8] sm:$0xf] }
 0x19c   :  { %5444 = vmatpush.bf16.msra.mxu1 %v9516_v28  ;;  %v6767_v28 = vld [vmem:[%s15619_s1 + $0x288] sm:$0xf]  ;;  %v6464_v35 = vor.u32 %v9712_v11, %v6463_v10  ;;  %v5214_v34 = vpop.f32.mrf.mxu3  ;;  %v9816_v53 = vld [vmem:[%s15619_s1 + $0x374] sm:$0xf0] }
 0x19d   :  { %5453 = vmatpush.bf16.msra.mxu2 %v6512_v29  ;;  %v9788_v29 = vld [vmem:[%s15619_s1 + $0x294] sm:$0xf0]  ;;  %v6880_v61 = vor.u32 %v9816_v53, %v6879_v52  ;;  %v6735_v63 = vld [vmem:[%s15619_s1 + $0x248] sm:$0xf] }
 0x19e   :  { %5466 = vmatpush.bf16.msra.mxu3 %v6640_v23  ;;  %5432 = vmatmul.bf16.vlgmr.msra.gmra.mxu0 %v11744_v7  ;;  %v5225_v23 = vpop.f32.mrf.mxu0  ;;  %v5201_v44 = vpop.f32.mrf.mxu2  ;;  %v6768_v39 = vor.u32 %v9788_v29, %v6767_v28  ;;  %v9864_v54 = vld [vmem:[%s15619_s1 + $0x4f4] sm:$0xf0]  ;;  %v7055_v11 = vld [vmem:[%s15619_s1 + $0x4c8] sm:$0xf] }
 0x19f   :  { %5476 = vmatpush.bf16.msrb.mxu0 %v6816_v33  ;;  %9574 = vmatmul.msk.bf16.vlgmr.msra.gmra.mxu1 %vm4797_vm0, %v10524_v30  ;;  %v6895_v33 = vld [vmem:[%s15619_s1 + $0x388] sm:$0xf]  ;;  %v13206_v36 = vadd.f32 %v5225_v23, %v5213_v62  ;;  %v7072_v62 = vor.u32 %v9864_v54, %v7071_v43  ;;  %v9812_v10 = vld [vmem:[%s15619_s1 + $0x354] sm:$0xf0] }
 0x1a0   :  { %5489 = vmatpush.bf16.msrb.mxu1 %v6944_v37  ;;  %v6447_v37 = vld [vmem:[%s15619_s1 + $0x8] sm:$0xf]  ;;  %v9860_v24 = vld [vmem:[%s15619_s1 + $0x4d4] sm:$0xf0] }
 0x1a1   :  { %5454 = vmatpush.bf16.msra.mxu2 %v6496_v42  ;;  %v9740_v42 = vld [vmem:[%s15619_s1 + $0x114] sm:$0xf0]  ;;  %v7183_v27 = vld [vmem:[%s15619_s1 + $0x5c8] sm:$0xf]  ;;  %v7056_v23 = vor.u32 %v9860_v24, %v7055_v11 }
 0x1a2   :  { %5467 = vmatpush.bf16.msra.mxu3 %v6624_v45  ;;  %v6896_v45 = vor.u32 %v9820_v31, %v6895_v33  ;;  %v6576_v58 = vor.u32 %v9740_v42, %v6575_v41  ;;  %v9892_v28 = vld [vmem:[%s15619_s1 + $0x5d4] sm:$0xf0]  ;;  %v6719_v33 = vld [vmem:[%s15619_s1 + $0x228] sm:$0xf] }
 0x1a3   :  { %5477 = vmatpush.bf16.msrb.mxu0 %v6800_v50  ;;  %v6751_v50 = vld [vmem:[%s15619_s1 + $0x268] sm:$0xf]  ;;  %v9776_v31 = vld [vmem:[%s15619_s1 + $0x234] sm:$0xf0] }
 0x1a4   :  { %5490 = vmatpush.bf16.msrb.mxu1 %v6928_v55  ;;  %v6448_v55 = vor.u32 %v9708_v40, %v6447_v37  ;;  %v6752_v59 = vor.u32 %v9784_v51, %v6751_v50  ;;  %v7184_v37 = vor.u32 %v9892_v28, %v7183_v27  ;;  %v9808_v44 = vld [vmem:[%s15619_s1 + $0x334] sm:$0xf0]  ;;  %v7167_v40 = vld [vmem:[%s15619_s1 + $0x5a8] sm:$0xf]  ;;  %v6720_v42 = vor.u32 %v9776_v31, %v6719_v33 }
 0x1a5   :  { %5455 = vmatpush.bf16.msra.mxu2 %v6480_v3  ;;  %v9780_v3 = vld [vmem:[%s15619_s1 + $0x254] sm:$0xf0]  ;;  %v6703_v34 = vld [vmem:[%s15619_s1 + $0x208] sm:$0xf] }
 0x1a6   :  { %5468 = vmatpush.bf16.msra.mxu3 %v6608_v32  ;;  %v6863_v32 = vld [vmem:[%s15619_s1 + $0x348] sm:$0xf]  ;;  %v6736_v29 = vor.u32 %v9780_v3, %v6735_v63  ;;  %v9888_v41 = vld [vmem:[%s15619_s1 + $0x5b4] sm:$0xf0] }
 0x1a7   :  { %5478 = vmatpush.bf16.msrb.mxu0 %v6784_v8  ;;  %v7200_v8 = vor.u32 %v9896_v57, %v7199_v56  ;;  %v6864_v30 = vor.u32 %v9812_v10, %v6863_v32  ;;  %v9772_v51 = vld [vmem:[%s15619_s1 + $0x214] sm:$0xf0]  ;;  %v6831_v52 = vld [vmem:[%s15619_s1 + $0x308] sm:$0xf]  ;;  %v7168_v43 = vor.u32 %v9888_v41, %v7167_v40 }
 0x1a8   :  { %5491 = vmatpush.bf16.msrb.mxu1 %v6912_v25  ;;  %v5227_v25 = vpop.f32.mrf.mxu0  ;;  %v9804_v53 = vld [vmem:[%s15619_s1 + $0x314] sm:$0xf0]  ;;  %v7023_v54 = vld [vmem:[%s15619_s1 + $0x488] sm:$0xf]  ;;  %v6704_v63 = vor.u32 %v9772_v51, %v6703_v34 }
 0x1a9   :  { %5456 = vmatpush.bf16.msra.mxu2 %v6464_v35  ;;  %v6847_v35 = vld [vmem:[%s15619_s1 + $0x328] sm:$0xf]  ;;  %v9960_v32 = vld [vmem:[%s15619_s1 + $0x7f4] sm:$0xf0] }
 0x1aa   :  { %5469 = vmatpush.bf16.msra.mxu3 %v6592_v38  ;;  %v7039_v38 = vld [vmem:[%s15619_s1 + $0x4a8] sm:$0xf]  ;;  %v9848_v25 = vld [vmem:[%s15619_s1 + $0x474] sm:$0xf0] }
 0x1ab   :  { %5479 = vmatpush.bf16.msrb.mxu0 %v6768_v39  ;;  %v9856_v39 = vld [vmem:[%s15619_s1 + $0x4b4] sm:$0xf0]  ;;  %v7151_v56 = vld [vmem:[%s15619_s1 + $0x588] sm:$0xf] }
 0x1ac   :  { %5492 = vmatpush.bf16.msrb.mxu1 %v6896_v45  ;;  %v6848_v45 = vor.u32 %v9808_v44, %v6847_v35  ;;  %v7040_v50 = vor.u32 %v9856_v39, %v7039_v38  ;;  %v5238_v57 = vpop.f32.mrf.mxu1  ;;  %v7455_v3 = vld [vmem:[%s15619_s1 + $0x7e8] sm:$0xf]  ;;  %v9956_v31 = vld [vmem:[%s15619_s1 + $0x7d4] sm:$0xf0] }
 0x1ad   :  { %5457 = vmatpush.bf16.msra.mxu2 %v6448_v55  ;;  %v9852_v55 = vld [vmem:[%s15619_s1 + $0x494] sm:$0xf0]  ;;  %v7135_v27 = vld [vmem:[%s15619_s1 + $0x568] sm:$0xf]  ;;  %v7456_v28 = vor.u32 %v9960_v32, %v7455_v3 }
 0x1ae   :  { %5470 = vmatpush.bf16.msra.mxu3 %v6576_v58  ;;  %v9884_v58 = vld [vmem:[%s15619_s1 + $0x594] sm:$0xf0]  ;;  %v7024_v10 = vor.u32 %v9852_v55, %v7023_v54  ;;  %v7439_v33 = vld [vmem:[%s15619_s1 + $0x7c8] sm:$0xf] }
 0x1af   :  { %5480 = vmatpush.bf16.msrb.mxu0 %v6752_v59  ;;  %v7327_v59 = vld [vmem:[%s15619_s1 + $0x6e8] sm:$0xf]  ;;  %v7152_v11 = vor.u32 %v9884_v58, %v7151_v56  ;;  %v9844_v41 = vld [vmem:[%s15619_s1 + $0x454] sm:$0xf0] }
 0x1b0   :  { %5493 = vmatpush.bf16.msrb.mxu1 %v6880_v61  ;;  %5458 = vmatmul.bf16.vlgmr.msra.gmra.mxu2 %v10891_v21  ;;  %v9928_v61 = vld [vmem:[%s15619_s1 + $0x6f4] sm:$0xf0]  ;;  %v6991_v40 = vld [vmem:[%s15619_s1 + $0x448] sm:$0xf] }
 0x1b1   :  { %5502 = vmatpush.bf16.msrb.mxu2 %v7072_v62  ;;  %5471 = vmatmul.bf16.vlgmr.msra.gmra.mxu3 %v10902_v26  ;;  %v5239_v62 = vadd.f32 %v5238_v57, %v13206_v36  ;;  %v7328_v24 = vor.u32 %v9928_v61, %v7327_v59  ;;  %v7007_v36 = vld [vmem:[%s15619_s1 + $0x468] sm:$0xf]  ;;  %v9952_v54 = vld [vmem:[%s15619_s1 + $0x7b4] sm:$0xf0]  ;;  %v6992_v56 = vor.u32 %v9844_v41, %v6991_v40 }
 0x1b2   :  { %5515 = vmatpush.bf16.msrb.mxu3 %v7200_v8  ;;  %v6832_v8 = vor.u32 %v9804_v53, %v6831_v52  ;;  %v7008_v35 = vor.u32 %v9848_v25, %v7007_v36  ;;  %v7295_v51 = vld [vmem:[%s15619_s1 + $0x6a8] sm:$0xf]  ;;  %v9920_v52 = vld [vmem:[%s15619_s1 + $0x6b4] sm:$0xf0] }
 0x1b3   :  { %5481 = vmatpush.bf16.msrb.mxu0 %v6736_v29  ;;  %v9880_v29 = vld [vmem:[%s15619_s1 + $0x574] sm:$0xf0]  ;;  %v5251_v44 = vpop.f32.mrf.mxu2  ;;  %v7296_v58 = vor.u32 %v9920_v52, %v7295_v51  ;;  %v6975_v59 = vld [vmem:[%s15619_s1 + $0x428] sm:$0xf] }
 0x1b4   :  { %5494 = vmatpush.bf16.msrb.mxu1 %v6864_v30  ;;  %v7311_v30 = vld [vmem:[%s15619_s1 + $0x6c8] sm:$0xf]  ;;  %v5264_v39 = vpop.f32.mrf.mxu3  ;;  %v5252_v34 = vadd.f32 %v5251_v44, %v5239_v62  ;;  %v5240_v53 = vpop.f32.mrf.mxu1  ;;  %v9840_v61 = vld [vmem:[%s15619_s1 + $0x434] sm:$0xf0] }
 0x1b5   :  { %5503 = vmatpush.bf16.msrb.mxu2 %v7056_v23  ;;  %v9924_v23 = vld [vmem:[%s15619_s1 + $0x6d4] sm:$0xf0]  ;;  %v7103_v62 = vld [vmem:[%s15619_s1 + $0x528] sm:$0xf]  ;;  %v6976_v25 = vor.u32 %v9840_v61, %v6975_v59 }
 0x1b6   :  { %5516 = vmatpush.bf16.msrb.mxu3 %v7184_v37  ;;  %v7136_v37 = vor.u32 %v9880_v29, %v7135_v27  ;;  %v7312_v38 = vor.u32 %v9924_v23, %v7311_v30  ;;  %v5265_v55 = vadd.f32 %v5264_v39, %v5252_v34  ;;  %v9872_v3 = vld [vmem:[%s15619_s1 + $0x534] sm:$0xf0]  ;;  %v7279_v32 = vld [vmem:[%s15619_s1 + $0x688] sm:$0xf] }
 0x1b7   :  { %5482 = vmatpush.bf16.msrb.mxu0 %v6720_v42  ;;  %v7119_v42 = vld [vmem:[%s15619_s1 + $0x548] sm:$0xf]  ;;  %v9836_v30 = vld [vmem:[%s15619_s1 + $0x414] sm:$0xf0] }
 0x1b8   :  { %5495 = vmatpush.bf16.msrb.mxu1 %v6848_v45  ;;  %v7440_v45 = vor.u32 %v9956_v31, %v7439_v33  ;;  %v6959_v27 = vld [vmem:[%s15619_s1 + $0x408] sm:$0xf]  ;;  %v9868_v33 = vld [vmem:[%s15619_s1 + $0x514] sm:$0xf0] }
 0x1b9   :  { %5504 = vmatpush.bf16.msrb.mxu2 %v7040_v50  ;;  %v9876_v50 = vld [vmem:[%s15619_s1 + $0x554] sm:$0xf0]  ;;  %v7087_v23 = vld [vmem:[%s15619_s1 + $0x508] sm:$0xf]  ;;  %v6960_v34 = vor.u32 %v9836_v30, %v6959_v27 }
 0x1ba   :  { %5517 = vmatpush.bf16.msrb.mxu3 %v7168_v43  ;;  %v7423_v43 = vld [vmem:[%s15619_s1 + $0x7a8] sm:$0xf]  ;;  %v7120_v57 = vor.u32 %v9876_v50, %v7119_v42  ;;  %v9944_v40 = vld [vmem:[%s15619_s1 + $0x774] sm:$0xf0]  ;;  %v7088_v51 = vor.u32 %v9868_v33, %v7087_v23 }
 0x1bb   :  { %5483 = vmatpush.bf16.msrb.mxu0 %v6704_v63  ;;  %v7424_v63 = vor.u32 %v9952_v54, %v7423_v43  ;;  %v5253_v31 = vpop.f32.mrf.mxu2  ;;  %v7263_v44 = vld [vmem:[%s15619_s1 + $0x668] sm:$0xf]  ;;  %v9992_v42 = vld [vmem:[%s15619_s1 + $0x8f4] sm:$0xf0] }
 0x1bc   :  { %5496 = vmatpush.bf16.msrb.mxu1 %v6832_v8  ;;  %v9916_v8 = vld [vmem:[%s15619_s1 + $0x694] sm:$0xf0]  ;;  %v7391_v39 = vld [vmem:[%s15619_s1 + $0x768] sm:$0xf] }
 0x1bd   :  { %5505 = vmatpush.bf16.msrb.mxu2 %v7024_v10  ;;  %v5277_v10 = vpop.f32.mrf.mxu0  ;;  %v7280_v29 = vor.u32 %v9916_v8, %v7279_v32  ;;  %v7583_v41 = vld [vmem:[%s15619_s1 + $0x8e8] sm:$0xf]  ;;  %v10024_v50 = vld [vmem:[%s15619_s1 + $0x9f4] sm:$0xf0]  ;;  %v7392_v53 = vor.u32 %v9944_v40, %v7391_v39 }
 0x1be   :  { %5518 = vmatpush.bf16.msrb.mxu3 %v7152_v11  ;;  %5484 = vmatmul.bf16.vlgmr.msrb.gmra.mxu0 %v10889_v20  ;;  %v7407_v11 = vld [vmem:[%s15619_s1 + $0x788] sm:$0xf]  ;;  %v13405_v36 = vadd.f32 %v5277_v10, %v5265_v55  ;;  %v7584_v43 = vor.u32 %v9992_v42, %v7583_v41  ;;  %v9908_v55 = vld [vmem:[%s15619_s1 + $0x654] sm:$0xf0] }
 0x1bf   :  { %5528 = vmatpush.bf16.msra.mxu0 %v7328_v24  ;;  %5497 = vmatmul.bf16.vlgmr.msrb.gmra.mxu1 %v10893_v22  ;;  %v9948_v24 = vld [vmem:[%s15619_s1 + $0x794] sm:$0xf0]  ;;  %v7247_v54 = vld [vmem:[%s15619_s1 + $0x648] sm:$0xf] }
 0x1c0   :  { %5541 = vmatpush.bf16.msra.mxu1 %v7456_v28  ;;  %v7104_v28 = vor.u32 %v9872_v3, %v7103_v62  ;;  %v7567_v59 = vld [vmem:[%s15619_s1 + $0x8c8] sm:$0xf]  ;;  %v9988_v61 = vld [vmem:[%s15619_s1 + $0x8d4] sm:$0xf0]  ;;  %v7248_v32 = vor.u32 %v9908_v55, %v7247_v54 }
 0x1c1   :  { %5506 = vmatpush.bf16.msrb.mxu2 %v7008_v35  ;;  %v5266_v35 = vpop.f32.mrf.mxu3  ;;  %v10020_v3 = vld [vmem:[%s15619_s1 + $0x9d4] sm:$0xf0]  ;;  %v7568_v10 = vor.u32 %v9988_v61, %v7567_v59  ;;  %v7679_v23 = vld [vmem:[%s15619_s1 + $0x9a8] sm:$0xf] }
 0x1c2   :  { %5519 = vmatpush.bf16.msrb.mxu3 %v7136_v37  ;;  %v7408_v37 = vor.u32 %v9948_v24, %v7407_v11  ;;  %v7231_v11 = vld [vmem:[%s15619_s1 + $0x628] sm:$0xf]  ;;  %v9904_v24 = vld [vmem:[%s15619_s1 + $0x634] sm:$0xf0] }
 0x1c3   :  { %5529 = vmatpush.bf16.msra.mxu0 %v7312_v38  ;;  %v9912_v38 = vld [vmem:[%s15619_s1 + $0x674] sm:$0xf0]  ;;  %v7232_v31 = vor.u32 %v9904_v24, %v7231_v11  ;;  %v7215_v35 = vld [vmem:[%s15619_s1 + $0x608] sm:$0xf] }
 0x1c4   :  { %5542 = vmatpush.bf16.msra.mxu1 %v7440_v45  ;;  %v7711_v45 = vld [vmem:[%s15619_s1 + $0x9e8] sm:$0xf]  ;;  %v7264_v52 = vor.u32 %v9912_v38, %v7263_v44  ;;  %v9984_v30 = vld [vmem:[%s15619_s1 + $0x8b4] sm:$0xf0] }
 0x1c5   :  { %5507 = vmatpush.bf16.msrb.mxu2 %v6992_v56  ;;  %v7375_v56 = vld [vmem:[%s15619_s1 + $0x748] sm:$0xf]  ;;  %v5279_v62 = vpop.f32.mrf.mxu0  ;;  %v10016_v33 = vld [vmem:[%s15619_s1 + $0x9b4] sm:$0xf0] }
 0x1c6   :  { %5520 = vmatpush.bf16.msrb.mxu3 %v7120_v57  ;;  %v7712_v57 = vor.u32 %v10024_v50, %v7711_v45  ;;  %v9900_v38 = vld [vmem:[%s15619_s1 + $0x614] sm:$0xf0]  ;;  %v7343_v39 = vld [vmem:[%s15619_s1 + $0x708] sm:$0xf]  ;;  %v7680_v41 = vor.u32 %v10016_v33, %v7679_v23 }
 0x1c7   :  { %5530 = vmatpush.bf16.msra.mxu0 %v7296_v58  ;;  %v9940_v58 = vld [vmem:[%s15619_s1 + $0x754] sm:$0xf0]  ;;  %v7535_v42 = vld [vmem:[%s15619_s1 + $0x888] sm:$0xf]  ;;  %v7216_v54 = vor.u32 %v9900_v38, %v7215_v35 }
 0x1c8   :  { %5543 = vmatpush.bf16.msra.mxu1 %v7424_v63  ;;  %v7695_v63 = vld [vmem:[%s15619_s1 + $0x9c8] sm:$0xf]  ;;  %v7376_v8 = vor.u32 %v9940_v58, %v7375_v56  ;;  %v9932_v40 = vld [vmem:[%s15619_s1 + $0x714] sm:$0xf0] }
 0x1c9   :  { %5508 = vmatpush.bf16.msrb.mxu2 %v6976_v25  ;;  %v7359_v25 = vld [vmem:[%s15619_s1 + $0x728] sm:$0xf]  ;;  %v7696_v27 = vor.u32 %v10020_v3, %v7695_v63  ;;  %v10088_v56 = vld [vmem:[%s15619_s1 + $0xbf4] sm:$0xf0] }
 0x1ca   :  { %5521 = vmatpush.bf16.msrb.mxu3 %v7104_v28  ;;  %v9936_v28 = vld [vmem:[%s15619_s1 + $0x734] sm:$0xf0]  ;;  %v7663_v45 = vld [vmem:[%s15619_s1 + $0x988] sm:$0xf] }
 0x1cb   :  { %5531 = vmatpush.bf16.msra.mxu0 %v7280_v29  ;;  %v7551_v29 = vld [vmem:[%s15619_s1 + $0x8a8] sm:$0xf]  ;;  %v9976_v62 = vld [vmem:[%s15619_s1 + $0x874] sm:$0xf0] }
 0x1cc   :  { %5544 = vmatpush.bf16.msra.mxu1 %v7408_v37  ;;  %v7360_v37 = vor.u32 %v9936_v28, %v7359_v25  ;;  %v7552_v44 = vor.u32 %v9984_v30, %v7551_v29  ;;  %v5290_v50 = vpop.f32.mrf.mxu1  ;;  %v7967_v55 = vld [vmem:[%s15619_s1 + $0xbe8] sm:$0xf]  ;;  %v10084_v24 = vld [vmem:[%s15619_s1 + $0xbd4] sm:$0xf0] }
 0x1cd   :  { %5509 = vmatpush.bf16.msrb.mxu2 %v6960_v34  ;;  %v9980_v34 = vld [vmem:[%s15619_s1 + $0x894] sm:$0xf0]  ;;  %v7647_v63 = vld [vmem:[%s15619_s1 + $0x968] sm:$0xf]  ;;  %v7968_v3 = vor.u32 %v10088_v56, %v7967_v55 }
 0x1ce   :  { %5522 = vmatpush.bf16.msrb.mxu3 %v7088_v51  ;;  %v10012_v51 = vld [vmem:[%s15619_s1 + $0x994] sm:$0xf0]  ;;  %v7536_v58 = vor.u32 %v9980_v34, %v7535_v42  ;;  %v7951_v11 = vld [vmem:[%s15619_s1 + $0xbc8] sm:$0xf] }
 0x1cf   :  { %5532 = vmatpush.bf16.msra.mxu0 %v7264_v52  ;;  %v7839_v52 = vld [vmem:[%s15619_s1 + $0xae8] sm:$0xf]  ;;  %v7664_v59 = vor.u32 %v10012_v51, %v7663_v45  ;;  %v9972_v33 = vld [vmem:[%s15619_s1 + $0x854] sm:$0xf0] }
 0x1d0   :  { %5545 = vmatpush.bf16.msra.mxu1 %v7392_v53  ;;  %5510 = vmatmul.bf16.vlgmr.msrb.gmra.mxu2 %v10984_v0  ;;  %v10056_v53 = vld [vmem:[%s15619_s1 + $0xaf4] sm:$0xf0]  ;;  %v7503_v23 = vld [vmem:[%s15619_s1 + $0x848] sm:$0xf] }
 0x1d1   :  { %5554 = vmatpush.bf16.msra.mxu2 %v7584_v43  ;;  %5523 = vmatmul.bf16.vlgmr.msrb.gmra.mxu3 %v10988_v2  ;;  %v5291_v43 = vadd.f32 %v5290_v50, %v13405_v36  ;;  %v7840_v61 = vor.u32 %v10056_v53, %v7839_v52  ;;  %v7519_v36 = vld [vmem:[%s15619_s1 + $0x868] sm:$0xf]  ;;  %v10080_v42 = vld [vmem:[%s15619_s1 + $0xbb4] sm:$0xf0]  ;;  %v7504_v45 = vor.u32 %v9972_v33, %v7503_v23 }
 0x1d2   :  { %5567 = vmatpush.bf16.msra.mxu3 %v7712_v57  ;;  %v7344_v57 = vor.u32 %v9932_v40, %v7343_v39  ;;  %v7520_v25 = vor.u32 %v9976_v62, %v7519_v36  ;;  %v7807_v38 = vld [vmem:[%s15619_s1 + $0xaa8] sm:$0xf]  ;;  %v10048_v39 = vld [vmem:[%s15619_s1 + $0xab4] sm:$0xf0] }
 0x1d3   :  { %5533 = vmatpush.bf16.msra.mxu0 %v7248_v32  ;;  %v10008_v32 = vld [vmem:[%s15619_s1 + $0x974] sm:$0xf0]  ;;  %v5303_v28 = vpop.f32.mrf.mxu2  ;;  %v7808_v51 = vor.u32 %v10048_v39, %v7807_v38  ;;  %v7487_v52 = vld [vmem:[%s15619_s1 + $0x828] sm:$0xf] }
 0x1d4   :  { %5546 = vmatpush.bf16.msra.mxu1 %v7376_v8  ;;  %v7823_v8 = vld [vmem:[%s15619_s1 + $0xac8] sm:$0xf]  ;;  %v5316_v30 = vpop.f32.mrf.mxu3  ;;  %v5304_v35 = vadd.f32 %v5303_v28, %v5291_v43  ;;  %v5292_v40 = vpop.f32.mrf.mxu1  ;;  %v9968_v53 = vld [vmem:[%s15619_s1 + $0x834] sm:$0xf0] }
 0x1d5   :  { %5555 = vmatpush.bf16.msra.mxu2 %v7568_v10  ;;  %v10052_v10 = vld [vmem:[%s15619_s1 + $0xad4] sm:$0xf0]  ;;  %v7615_v43 = vld [vmem:[%s15619_s1 + $0x928] sm:$0xf]  ;;  %v7488_v62 = vor.u32 %v9968_v53, %v7487_v52 }
 0x1d6   :  { %5568 = vmatpush.bf16.msra.mxu3 %v7696_v27  ;;  %v7648_v27 = vor.u32 %v10008_v32, %v7647_v63  ;;  %v7824_v29 = vor.u32 %v10052_v10, %v7823_v8  ;;  %v5317_v34 = vadd.f32 %v5316_v30, %v5304_v35  ;;  %v10000_v55 = vld [vmem:[%s15619_s1 + $0x934] sm:$0xf0]  ;;  %v7791_v56 = vld [vmem:[%s15619_s1 + $0xa88] sm:$0xf] }
 0x1d7   :  { %5534 = vmatpush.bf16.msra.mxu0 %v7232_v31  ;;  %v7631_v31 = vld [vmem:[%s15619_s1 + $0x948] sm:$0xf]  ;;  %v9964_v8 = vld [vmem:[%s15619_s1 + $0x814] sm:$0xf0] }
 0x1d8   :  { %5547 = vmatpush.bf16.msra.mxu1 %v7360_v37  ;;  %v7952_v37 = vor.u32 %v10084_v24, %v7951_v11  ;;  %v7471_v63 = vld [vmem:[%s15619_s1 + $0x808] sm:$0xf]  ;;  %v9996_v11 = vld [vmem:[%s15619_s1 + $0x914] sm:$0xf0] }
 0x1d9   :  { %5556 = vmatpush.bf16.msra.mxu2 %v7552_v44  ;;  %v10004_v44 = vld [vmem:[%s15619_s1 + $0x954] sm:$0xf0]  ;;  %v7599_v10 = vld [vmem:[%s15619_s1 + $0x908] sm:$0xf]  ;;  %v7472_v35 = vor.u32 %v9964_v8, %v7471_v63 }
 0x1da   :  { %5569 = vmatpush.bf16.msra.mxu3 %v7680_v41  ;;  %v7935_v41 = vld [vmem:[%s15619_s1 + $0xba8] sm:$0xf]  ;;  %v7632_v50 = vor.u32 %v10004_v44, %v7631_v31  ;;  %v10072_v23 = vld [vmem:[%s15619_s1 + $0xb74] sm:$0xf0]  ;;  %v7600_v38 = vor.u32 %v9996_v11, %v7599_v10 }
 0x1db   :  { %5535 = vmatpush.bf16.msra.mxu0 %v7216_v54  ;;  %v7936_v54 = vor.u32 %v10080_v42, %v7935_v41  ;;  %v5305_v24 = vpop.f32.mrf.mxu2  ;;  %v7775_v28 = vld [vmem:[%s15619_s1 + $0xa68] sm:$0xf]  ;;  %v10120_v31 = vld [vmem:[%s15619_s1 + $0xcf4] sm:$0xf0] }
 0x1dc   :  { %5548 = vmatpush.bf16.msra.mxu1 %v7344_v57  ;;  %v10044_v57 = vld [vmem:[%s15619_s1 + $0xa94] sm:$0xf0]  ;;  %v7903_v30 = vld [vmem:[%s15619_s1 + $0xb68] sm:$0xf] }
 0x1dd   :  { %5557 = vmatpush.bf16.msra.mxu2 %v7536_v58  ;;  %v5329_v58 = vpop.f32.mrf.mxu0  ;;  %v7792_v32 = vor.u32 %v10044_v57, %v7791_v56  ;;  %v8095_v33 = vld [vmem:[%s15619_s1 + $0xce8] sm:$0xf]  ;;  %v10152_v44 = vld [vmem:[%s15619_s1 + $0xdf4] sm:$0xf0]  ;;  %v7904_v40 = vor.u32 %v10072_v23, %v7903_v30 }
 0x1de   :  { %5570 = vmatpush.bf16.msra.mxu3 %v7664_v59  ;;  %5536 = vmatmul.bf16.vlgmr.msra.gmra.mxu0 %v10979_v60  ;;  %v7919_v59 = vld [vmem:[%s15619_s1 + $0xb88] sm:$0xf]  ;;  %v13604_v36 = vadd.f32 %v5329_v58, %v5317_v34  ;;  %v8096_v41 = vor.u32 %v10120_v31, %v8095_v33  ;;  %v10036_v34 = vld [vmem:[%s15619_s1 + $0xa54] sm:$0xf0] }
 0x1df   :  { %5580 = vmatpush.bf16.msrb.mxu0 %v7840_v61  ;;  %5549 = vmatmul.bf16.vlgmr.msra.gmra.mxu1 %v10986_v1  ;;  %v10076_v61 = vld [vmem:[%s15619_s1 + $0xb94] sm:$0xf0]  ;;  %v7759_v42 = vld [vmem:[%s15619_s1 + $0xa48] sm:$0xf] }
 0x1e0   :  { %5593 = vmatpush.bf16.msrb.mxu1 %v7968_v3  ;;  %v7616_v3 = vor.u32 %v10000_v55, %v7615_v43  ;;  %v8079_v52 = vld [vmem:[%s15619_s1 + $0xcc8] sm:$0xf]  ;;  %v10116_v53 = vld [vmem:[%s15619_s1 + $0xcd4] sm:$0xf0]  ;;  %v7760_v56 = vor.u32 %v10036_v34, %v7759_v42 }
 0x1e1   :  { %5558 = vmatpush.bf16.msra.mxu2 %v7520_v25  ;;  %v5318_v25 = vpop.f32.mrf.mxu3  ;;  %v10148_v55 = vld [vmem:[%s15619_s1 + $0xdd4] sm:$0xf0]  ;;  %v8080_v58 = vor.u32 %v10116_v53, %v8079_v52  ;;  %v8191_v10 = vld [vmem:[%s15619_s1 + $0xda8] sm:$0xf] }
 0x1e2   :  { %5571 = vmatpush.bf16.msra.mxu3 %v7648_v27  ;;  %v7920_v27 = vor.u32 %v10076_v61, %v7919_v59  ;;  %v7743_v59 = vld [vmem:[%s15619_s1 + $0xa28] sm:$0xf]  ;;  %v10032_v61 = vld [vmem:[%s15619_s1 + $0xa34] sm:$0xf0] }
 0x1e3   :  { %5581 = vmatpush.bf16.msrb.mxu0 %v7824_v29  ;;  %v10040_v29 = vld [vmem:[%s15619_s1 + $0xa74] sm:$0xf0]  ;;  %v7744_v24 = vor.u32 %v10032_v61, %v7743_v59  ;;  %v7727_v25 = vld [vmem:[%s15619_s1 + $0xa08] sm:$0xf] }
 0x1e4   :  { %5594 = vmatpush.bf16.msrb.mxu1 %v7952_v37  ;;  %v8223_v37 = vld [vmem:[%s15619_s1 + $0xde8] sm:$0xf]  ;;  %v7776_v39 = vor.u32 %v10040_v29, %v7775_v28  ;;  %v10112_v8 = vld [vmem:[%s15619_s1 + $0xcb4] sm:$0xf0] }
 0x1e5   :  { %5559 = vmatpush.bf16.msra.mxu2 %v7504_v45  ;;  %v7887_v45 = vld [vmem:[%s15619_s1 + $0xb48] sm:$0xf]  ;;  %v5331_v43 = vpop.f32.mrf.mxu0  ;;  %v10144_v11 = vld [vmem:[%s15619_s1 + $0xdb4] sm:$0xf0] }
 0x1e6   :  { %5572 = vmatpush.bf16.msra.mxu3 %v7632_v50  ;;  %v8224_v50 = vor.u32 %v10152_v44, %v8223_v37  ;;  %v10028_v29 = vld [vmem:[%s15619_s1 + $0xa14] sm:$0xf0]  ;;  %v7855_v30 = vld [vmem:[%s15619_s1 + $0xb08] sm:$0xf]  ;;  %v8192_v33 = vor.u32 %v10144_v11, %v8191_v10 }
 0x1e7   :  { %5582 = vmatpush.bf16.msrb.mxu0 %v7808_v51  ;;  %v10068_v51 = vld [vmem:[%s15619_s1 + $0xb54] sm:$0xf0]  ;;  %v8047_v31 = vld [vmem:[%s15619_s1 + $0xc88] sm:$0xf]  ;;  %v7728_v42 = vor.u32 %v10028_v29, %v7727_v25 }
 0x1e8   :  { %5595 = vmatpush.bf16.msrb.mxu1 %v7936_v54  ;;  %v8207_v54 = vld [vmem:[%s15619_s1 + $0xdc8] sm:$0xf]  ;;  %v7888_v57 = vor.u32 %v10068_v51, %v7887_v45  ;;  %v10060_v23 = vld [vmem:[%s15619_s1 + $0xb14] sm:$0xf0] }
 0x1e9   :  { %5560 = vmatpush.bf16.msra.mxu2 %v7488_v62  ;;  %v7871_v62 = vld [vmem:[%s15619_s1 + $0xb28] sm:$0xf]  ;;  %v8208_v63 = vor.u32 %v10148_v55, %v8207_v54  ;;  %v10216_v45 = vld [vmem:[%s15619_s1 + $0xff4] sm:$0xf0] }
 0x1ea   :  { %5573 = vmatpush.bf16.msra.mxu3 %v7616_v3  ;;  %v10064_v3 = vld [vmem:[%s15619_s1 + $0xb34] sm:$0xf0]  ;;  %v8175_v37 = vld [vmem:[%s15619_s1 + $0xd88] sm:$0xf] }
 0x1eb   :  { %5583 = vmatpush.bf16.msrb.mxu0 %v7792_v32  ;;  %v8063_v32 = vld [vmem:[%s15619_s1 + $0xca8] sm:$0xf]  ;;  %v10104_v43 = vld [vmem:[%s15619_s1 + $0xc74] sm:$0xf0] }
 0x1ec   :  { %5596 = vmatpush.bf16.msrb.mxu1 %v7920_v27  ;;  %v7872_v27 = vor.u32 %v10064_v3, %v7871_v62  ;;  %v8064_v28 = vor.u32 %v10112_v8, %v8063_v32  ;;  %v5342_v44 = vpop.f32.mrf.mxu1  ;;  %v8479_v34 = vld [vmem:[%s15619_s1 + $0xfe8] sm:$0xf]  ;;  %v10212_v61 = vld [vmem:[%s15619_s1 + $0xfd4] sm:$0xf0] }
 0x1ed   :  { %5561 = vmatpush.bf16.msra.mxu2 %v7472_v35  ;;  %v10108_v35 = vld [vmem:[%s15619_s1 + $0xc94] sm:$0xf0]  ;;  %v8159_v54 = vld [vmem:[%s15619_s1 + $0xd68] sm:$0xf]  ;;  %v8480_v55 = vor.u32 %v10216_v45, %v8479_v34 }
 0x1ee   :  { %5574 = vmatpush.bf16.msra.mxu3 %v7600_v38  ;;  %v10140_v38 = vld [vmem:[%s15619_s1 + $0xd94] sm:$0xf0]  ;;  %v8048_v51 = vor.u32 %v10108_v35, %v8047_v31  ;;  %v8463_v59 = vld [vmem:[%s15619_s1 + $0xfc8] sm:$0xf] }
 0x1ef   :  { %5584 = vmatpush.bf16.msrb.mxu0 %v7776_v39  ;;  %v8351_v39 = vld [vmem:[%s15619_s1 + $0xee8] sm:$0xf]  ;;  %v8176_v52 = vor.u32 %v10140_v38, %v8175_v37  ;;  %v10100_v11 = vld [vmem:[%s15619_s1 + $0xc54] sm:$0xf0] }
 0x1f0   :  { %5597 = vmatpush.bf16.msrb.mxu1 %v7904_v40  ;;  %5562 = vmatmul.bf16.vlgmr.msra.gmra.mxu2 %v11234_v12  ;;  %v10184_v40 = vld [vmem:[%s15619_s1 + $0xef4] sm:$0xf0]  ;;  %v8015_v10 = vld [vmem:[%s15619_s1 + $0xc48] sm:$0xf] }
 0x1f1   :  { %5606 = vmatpush.bf16.msrb.mxu2 %v8096_v41  ;;  %5575 = vmatmul.bf16.vlgmr.msra.gmra.mxu3 %v11244_v16  ;;  %v5343_v41 = vadd.f32 %v5342_v44, %v13604_v36  ;;  %v8352_v53 = vor.u32 %v10184_v40, %v8351_v39  ;;  %v8031_v36 = vld [vmem:[%s15619_s1 + $0xc68] sm:$0xf]  ;;  %v10208_v31 = vld [vmem:[%s15619_s1 + $0xfb4] sm:$0xf0]  ;;  %v8016_v37 = vor.u32 %v10100_v11, %v8015_v10 }
 0x1f2   :  { %5619 = vmatpush.bf16.msrb.mxu3 %v8224_v50  ;;  %v7856_v50 = vor.u32 %v10060_v23, %v7855_v30  ;;  %v8032_v62 = vor.u32 %v10104_v43, %v8031_v36  ;;  %v8319_v29 = vld [vmem:[%s15619_s1 + $0xea8] sm:$0xf]  ;;  %v10176_v30 = vld [vmem:[%s15619_s1 + $0xeb4] sm:$0xf0] }
 0x1f3   :  { %5585 = vmatpush.bf16.msrb.mxu0 %v7760_v56  ;;  %v10136_v56 = vld [vmem:[%s15619_s1 + $0xd74] sm:$0xf0]  ;;  %v5355_v3 = vpop.f32.mrf.mxu2  ;;  %v8320_v38 = vor.u32 %v10176_v30, %v8319_v29  ;;  %v7999_v39 = vld [vmem:[%s15619_s1 + $0xc28] sm:$0xf] }
 0x1f4   :  { %5598 = vmatpush.bf16.msrb.mxu1 %v7888_v57  ;;  %v8335_v57 = vld [vmem:[%s15619_s1 + $0xec8] sm:$0xf]  ;;  %v5368_v8 = vpop.f32.mrf.mxu3  ;;  %v5356_v25 = vadd.f32 %v5355_v3, %v5343_v41  ;;  %v5344_v23 = vpop.f32.mrf.mxu1  ;;  %v10096_v40 = vld [vmem:[%s15619_s1 + $0xc34] sm:$0xf0] }
 0x1f5   :  { %5607 = vmatpush.bf16.msrb.mxu2 %v8080_v58  ;;  %v10180_v58 = vld [vmem:[%s15619_s1 + $0xed4] sm:$0xf0]  ;;  %v8127_v41 = vld [vmem:[%s15619_s1 + $0xd28] sm:$0xf]  ;;  %v8000_v43 = vor.u32 %v10096_v40, %v7999_v39 }
 0x1f6   :  { %5620 = vmatpush.bf16.msrb.mxu3 %v8208_v63  ;;  %v8160_v63 = vor.u32 %v10136_v56, %v8159_v54  ;;  %v8336_v32 = vor.u32 %v10180_v58, %v8335_v57  ;;  %v5369_v35 = vadd.f32 %v5368_v8, %v5356_v25  ;;  %v10128_v34 = vld [vmem:[%s15619_s1 + $0xd34] sm:$0xf0]  ;;  %v8303_v45 = vld [vmem:[%s15619_s1 + $0xe88] sm:$0xf] }
 0x1f7   :  { %5586 = vmatpush.bf16.msrb.mxu0 %v7744_v24  ;;  %v8143_v24 = vld [vmem:[%s15619_s1 + $0xd48] sm:$0xf]  ;;  %v10092_v57 = vld [vmem:[%s15619_s1 + $0xc14] sm:$0xf0] }
 0x1f8   :  { %5599 = vmatpush.bf16.msrb.mxu1 %v7872_v27  ;;  %v8464_v27 = vor.u32 %v10212_v61, %v8463_v59  ;;  %v7983_v54 = vld [vmem:[%s15619_s1 + $0xc08] sm:$0xf]  ;;  %v10124_v59 = vld [vmem:[%s15619_s1 + $0xd14] sm:$0xf0] }
 0x1f9   :  { %5608 = vmatpush.bf16.msrb.mxu2 %v8064_v28  ;;  %v10132_v28 = vld [vmem:[%s15619_s1 + $0xd54] sm:$0xf0]  ;;  %v8111_v58 = vld [vmem:[%s15619_s1 + $0xd08] sm:$0xf]  ;;  %v7984_v25 = vor.u32 %v10092_v57, %v7983_v54 }
 0x1fa   :  { %5621 = vmatpush.bf16.msrb.mxu3 %v8192_v33  ;;  %v8447_v33 = vld [vmem:[%s15619_s1 + $0xfa8] sm:$0xf]  ;;  %v8144_v44 = vor.u32 %v10132_v28, %v8143_v24  ;;  %v10200_v10 = vld [vmem:[%s15619_s1 + $0xf74] sm:$0xf0]  ;;  %v8112_v29 = vor.u32 %v10124_v59, %v8111_v58 }
 0x1fb   :  { %5587 = vmatpush.bf16.msrb.mxu0 %v7728_v42  ;;  %v8448_v42 = vor.u32 %v10208_v31, %v8447_v33  ;;  %v5357_v61 = vpop.f32.mrf.mxu2  ;;  %v8287_v3 = vld [vmem:[%s15619_s1 + $0xe68] sm:$0xf]  ;;  %v10248_v24 = vld [vmem:[%s15619_s1 + $0x10f4] sm:$0xf0] }
 0x1fc   :  { %5600 = vmatpush.bf16.msrb.mxu1 %v7856_v50  ;;  %v10172_v50 = vld [vmem:[%s15619_s1 + $0xe94] sm:$0xf0]  ;;  %v8415_v8 = vld [vmem:[%s15619_s1 + $0xf68] sm:$0xf] }
 0x1fd   :  { %5609 = vmatpush.bf16.msrb.mxu2 %v8048_v51  ;;  %v5381_v51 = vpop.f32.mrf.mxu0  ;;  %v8304_v56 = vor.u32 %v10172_v50, %v8303_v45  ;;  %v8607_v11 = vld [vmem:[%s15619_s1 + $0x10e8] sm:$0xf]  ;;  %v10280_v28 = vld [vmem:[%s15619_s1 + $0x11f4] sm:$0xf0]  ;;  %v8416_v23 = vor.u32 %v10200_v10, %v8415_v8 }
 0x1fe   :  { %5622 = vmatpush.bf16.msrb.mxu3 %v8176_v52  ;;  %5588 = vmatmul.bf16.vlgmr.msrb.gmra.mxu0 %v11242_v15  ;;  %v8431_v52 = vld [vmem:[%s15619_s1 + $0xf88] sm:$0xf]  ;;  %v13803_v36 = vadd.f32 %v5381_v51, %v5369_v35  ;;  %v8608_v33 = vor.u32 %v10248_v24, %v8607_v11  ;;  %v10164_v35 = vld [vmem:[%s15619_s1 + $0xe54] sm:$0xf0] }
 0x1ff   :  { %5632 = vmatpush.bf16.msra.mxu0 %v8352_v53  ;;  %5601 = vmatmul.bf16.vlgmr.msrb.gmra.mxu1 %v11246_v17  ;;  %v10204_v53 = vld [vmem:[%s15619_s1 + $0xf94] sm:$0xf0]  ;;  %v8271_v31 = vld [vmem:[%s15619_s1 + $0xe48] sm:$0xf] }
 0x200   :  { %5645 = vmatpush.bf16.msra.mxu1 %v8480_v55  ;;  %v8128_v55 = vor.u32 %v10128_v34, %v8127_v41  ;;  %v8591_v39 = vld [vmem:[%s15619_s1 + $0x10c8] sm:$0xf]  ;;  %v10244_v40 = vld [vmem:[%s15619_s1 + $0x10d4] sm:$0xf0]  ;;  %v8272_v45 = vor.u32 %v10164_v35, %v8271_v31 }
 0x201   :  { %5610 = vmatpush.bf16.msrb.mxu2 %v8032_v62  ;;  %v5370_v62 = vpop.f32.mrf.mxu3  ;;  %v10276_v34 = vld [vmem:[%s15619_s1 + $0x11d4] sm:$0xf0]  ;;  %v8592_v51 = vor.u32 %v10244_v40, %v8591_v39  ;;  %v8703_v58 = vld [vmem:[%s15619_s1 + $0x11a8] sm:$0xf] }
 0x202   :  { %5623 = vmatpush.bf16.msrb.mxu3 %v8160_v63  ;;  %v8432_v63 = vor.u32 %v10204_v53, %v8431_v52  ;;  %v8255_v52 = vld [vmem:[%s15619_s1 + $0xe28] sm:$0xf]  ;;  %v10160_v53 = vld [vmem:[%s15619_s1 + $0xe34] sm:$0xf0] }
 0x203   :  { %5633 = vmatpush.bf16.msra.mxu0 %v8336_v32  ;;  %v10168_v32 = vld [vmem:[%s15619_s1 + $0xe74] sm:$0xf0]  ;;  %v8256_v61 = vor.u32 %v10160_v53, %v8255_v52  ;;  %v8239_v62 = vld [vmem:[%s15619_s1 + $0xe08] sm:$0xf] }
 0x204   :  { %5646 = vmatpush.bf16.msra.mxu1 %v8464_v27  ;;  %v8735_v27 = vld [vmem:[%s15619_s1 + $0x11e8] sm:$0xf]  ;;  %v8288_v30 = vor.u32 %v10168_v32, %v8287_v3  ;;  %v10240_v57 = vld [vmem:[%s15619_s1 + $0x10b4] sm:$0xf0] }
 0x205   :  { %5611 = vmatpush.bf16.msrb.mxu2 %v8016_v37  ;;  %v8399_v37 = vld [vmem:[%s15619_s1 + $0xf48] sm:$0xf]  ;;  %v5383_v41 = vpop.f32.mrf.mxu0  ;;  %v10272_v59 = vld [vmem:[%s15619_s1 + $0x11b4] sm:$0xf0] }
 0x206   :  { %5624 = vmatpush.bf16.msrb.mxu3 %v8144_v44  ;;  %v8736_v44 = vor.u32 %v10280_v28, %v8735_v27  ;;  %v10156_v32 = vld [vmem:[%s15619_s1 + $0xe14] sm:$0xf0]  ;;  %v8367_v8 = vld [vmem:[%s15619_s1 + $0xf08] sm:$0xf]  ;;  %v8704_v11 = vor.u32 %v10272_v59, %v8703_v58 }
 0x207   :  { %5634 = vmatpush.bf16.msra.mxu0 %v8320_v38  ;;  %v10196_v38 = vld [vmem:[%s15619_s1 + $0xf54] sm:$0xf0]  ;;  %v8559_v24 = vld [vmem:[%s15619_s1 + $0x1088] sm:$0xf]  ;;  %v8240_v31 = vor.u32 %v10156_v32, %v8239_v62 }
 0x208   :  { %5647 = vmatpush.bf16.msra.mxu1 %v8448_v42  ;;  %v8719_v42 = vld [vmem:[%s15619_s1 + $0x11c8] sm:$0xf]  ;;  %v8400_v50 = vor.u32 %v10196_v38, %v8399_v37  ;;  %v10188_v10 = vld [vmem:[%s15619_s1 + $0xf14] sm:$0xf0] }
 0x209   :  { %5612 = vmatpush.bf16.msrb.mxu2 %v8000_v43  ;;  %v8383_v43 = vld [vmem:[%s15619_s1 + $0xf28] sm:$0xf]  ;;  %v8720_v54 = vor.u32 %v10276_v34, %v8719_v42  ;;  %v10344_v37 = vld [vmem:[%s15619_s1 + $0x13f4] sm:$0xf0] }
 0x20a   :  { %5625 = vmatpush.bf16.msrb.mxu3 %v8128_v55  ;;  %v10192_v55 = vld [vmem:[%s15619_s1 + $0xf34] sm:$0xf0]  ;;  %v8687_v27 = vld [vmem:[%s15619_s1 + $0x1188] sm:$0xf] }
 0x20b   :  { %5635 = vmatpush.bf16.msra.mxu0 %v8304_v56  ;;  %v8575_v56 = vld [vmem:[%s15619_s1 + $0x10a8] sm:$0xf]  ;;  %v10232_v41 = vld [vmem:[%s15619_s1 + $0x1074] sm:$0xf0] }
 0x20c   :  { %5648 = vmatpush.bf16.msra.mxu1 %v8432_v63  ;;  %v8384_v63 = vor.u32 %v10192_v55, %v8383_v43  ;;  %v8576_v3 = vor.u32 %v10240_v57, %v8575_v56  ;;  %v5394_v28 = vpop.f32.mrf.mxu1  ;;  %v8991_v35 = vld [vmem:[%s15619_s1 + $0x13e8] sm:$0xf]  ;;  %v10340_v53 = vld [vmem:[%s15619_s1 + $0x13d4] sm:$0xf0] }
 0x20d   :  { %5613 = vmatpush.bf16.msrb.mxu2 %v7984_v25  ;;  %v10236_v25 = vld [vmem:[%s15619_s1 + $0x1094] sm:$0xf0]  ;;  %v8671_v42 = vld [vmem:[%s15619_s1 + $0x1168] sm:$0xf]  ;;  %v8992_v34 = vor.u32 %v10344_v37, %v8991_v35 }
 0x20e   :  { %5626 = vmatpush.bf16.msrb.mxu3 %v8112_v29  ;;  %v10268_v29 = vld [vmem:[%s15619_s1 + $0x1194] sm:$0xf0]  ;;  %v8560_v38 = vor.u32 %v10236_v25, %v8559_v24  ;;  %v8975_v52 = vld [vmem:[%s15619_s1 + $0x13c8] sm:$0xf] }
 0x20f   :  { %5636 = vmatpush.bf16.msra.mxu0 %v8288_v30  ;;  %v8863_v30 = vld [vmem:[%s15619_s1 + $0x12e8] sm:$0xf]  ;;  %v8688_v39 = vor.u32 %v10268_v29, %v8687_v27  ;;  %v10228_v59 = vld [vmem:[%s15619_s1 + $0x1054] sm:$0xf0] }
 0x210   :  { %5649 = vmatpush.bf16.msra.mxu1 %v8416_v23  ;;  %5614 = vmatmul.bf16.vlgmr.msrb.gmra.mxu2 %v11408_v46  ;;  %v10312_v23 = vld [vmem:[%s15619_s1 + $0x12f4] sm:$0xf0]  ;;  %v8527_v58 = vld [vmem:[%s15619_s1 + $0x1048] sm:$0xf] }
 0x211   :  { %5658 = vmatpush.bf16.msra.mxu2 %v8608_v33  ;;  %5627 = vmatmul.bf16.vlgmr.msrb.gmra.mxu3 %v11412_v48  ;;  %v5395_v33 = vadd.f32 %v5394_v28, %v13803_v36  ;;  %v8864_v40 = vor.u32 %v10312_v23, %v8863_v30  ;;  %v8543_v36 = vld [vmem:[%s15619_s1 + $0x1068] sm:$0xf]  ;;  %v10260_v32 = vld [vmem:[%s15619_s1 + $0x1154] sm:$0xf0]  ;;  %v8528_v27 = vor.u32 %v10228_v59, %v8527_v58 }
 0x212   :  { %5671 = vmatpush.bf16.msra.mxu3 %v8736_v44  ;;  %v8368_v44 = vor.u32 %v10188_v10, %v8367_v8  ;;  %v8544_v43 = vor.u32 %v10232_v41, %v8543_v36  ;;  %v8831_v8 = vld [vmem:[%s15619_s1 + $0x12a8] sm:$0xf]  ;;  %v10304_v10 = vld [vmem:[%s15619_s1 + $0x12b4] sm:$0xf0] }
 0x213   :  { %5637 = vmatpush.bf16.msra.mxu0 %v8272_v45  ;;  %v10264_v45 = vld [vmem:[%s15619_s1 + $0x1174] sm:$0xf0]  ;;  %v5407_v55 = vpop.f32.mrf.mxu2  ;;  %v8832_v29 = vor.u32 %v10304_v10, %v8831_v8  ;;  %v8511_v30 = vld [vmem:[%s15619_s1 + $0x1028] sm:$0xf] }
 0x214   :  { %5650 = vmatpush.bf16.msra.mxu1 %v8400_v50  ;;  %v8847_v50 = vld [vmem:[%s15619_s1 + $0x12c8] sm:$0xf]  ;;  %v5420_v57 = vpop.f32.mrf.mxu3  ;;  %v5408_v62 = vadd.f32 %v5407_v55, %v5395_v33  ;;  %v10336_v24 = vld [vmem:[%s15619_s1 + $0x13b4] sm:$0xf0] }
 0x215   :  { %5659 = vmatpush.bf16.msra.mxu2 %v8592_v51  ;;  %v10308_v51 = vld [vmem:[%s15619_s1 + $0x12d4] sm:$0xf0]  ;;  %v8639_v33 = vld [vmem:[%s15619_s1 + $0x1128] sm:$0xf] }
 0x216   :  { %5672 = vmatpush.bf16.msra.mxu3 %v8720_v54  ;;  %v8672_v54 = vor.u32 %v10264_v45, %v8671_v42  ;;  %v8848_v56 = vor.u32 %v10308_v51, %v8847_v50  ;;  %v5421_v25 = vadd.f32 %v5420_v57, %v5408_v62  ;;  %v10224_v23 = vld [vmem:[%s15619_s1 + $0x1034] sm:$0xf0]  ;;  %v8815_v37 = vld [vmem:[%s15619_s1 + $0x1288] sm:$0xf] }
 0x217   :  { %5638 = vmatpush.bf16.msra.mxu0 %v8256_v61  ;;  %v8655_v61 = vld [vmem:[%s15619_s1 + $0x1148] sm:$0xf]  ;;  %v10256_v35 = vld [vmem:[%s15619_s1 + $0x1134] sm:$0xf0]  ;;  %v8512_v41 = vor.u32 %v10224_v23, %v8511_v30 }
 0x218   :  { %5651 = vmatpush.bf16.msra.mxu1 %v8384_v63  ;;  %v8976_v63 = vor.u32 %v10340_v53, %v8975_v52  ;;  %v8656_v28 = vor.u32 %v10260_v32, %v8655_v61  ;;  %v8495_v42 = vld [vmem:[%s15619_s1 + $0x1008] sm:$0xf]  ;;  %v10220_v50 = vld [vmem:[%s15619_s1 + $0x1014] sm:$0xf0] }
 0x219   :  { %5660 = vmatpush.bf16.msra.mxu2 %v8576_v3  ;;  %v5396_v3 = vpop.f32.mrf.mxu1  ;;  %v8623_v51 = vld [vmem:[%s15619_s1 + $0x1108] sm:$0xf]  ;;  %v10252_v52 = vld [vmem:[%s15619_s1 + $0x1114] sm:$0xf0] }
 0x21a   :  { %5673 = vmatpush.bf16.msra.mxu3 %v8704_v11  ;;  %v8959_v11 = vld [vmem:[%s15619_s1 + $0x13a8] sm:$0xf]  ;;  %v10328_v58 = vld [vmem:[%s15619_s1 + $0x1374] sm:$0xf0]  ;;  %v8624_v10 = vor.u32 %v10252_v52, %v8623_v51 }
 0x21b   :  { %5639 = vmatpush.bf16.msra.mxu0 %v8240_v31  ;;  %v8960_v31 = vor.u32 %v10336_v24, %v8959_v11  ;;  %v8799_v55 = vld [vmem:[%s15619_s1 + $0x1268] sm:$0xf]  ;;  %v10376_v61 = vld [vmem:[%s15619_s1 + $0x14f4] sm:$0xf0] }
 0x21c   :  { %5652 = vmatpush.bf16.msra.mxu1 %v8368_v44  ;;  %v10300_v44 = vld [vmem:[%s15619_s1 + $0x1294] sm:$0xf0]  ;;  %v5422_v53 = vpop.f32.mrf.mxu3  ;;  %v8927_v57 = vld [vmem:[%s15619_s1 + $0x1368] sm:$0xf] }
 0x21d   :  { %5661 = vmatpush.bf16.msra.mxu2 %v8560_v38  ;;  %v5433_v38 = vpop.f32.mrf.mxu0  ;;  %v8816_v45 = vor.u32 %v10300_v44, %v8815_v37  ;;  %v9119_v59 = vld [vmem:[%s15619_s1 + $0x14e8] sm:$0xf]  ;;  %v10408_v32 = vld [vmem:[%s15619_s1 + $0x15f4] sm:$0xf0]  ;;  %v8928_v24 = vor.u32 %v10328_v58, %v8927_v57 }
 0x21e   :  { %5674 = vmatpush.bf16.msra.mxu3 %v8688_v39  ;;  %5640 = vmatmul.bf16.vlgmr.msra.gmra.mxu0 %v11410_v47  ;;  %v8943_v39 = vld [vmem:[%s15619_s1 + $0x1388] sm:$0xf]  ;;  %v5434_v36 = vadd.f32 %v5433_v38, %v5421_v25  ;;  %v9120_v25 = vor.u32 %v10376_v61, %v9119_v59  ;;  %v10324_v23 = vld [vmem:[%s15619_s1 + $0x1354] sm:$0xf0] }
 0x21f   :  { %5684 = vmatpush.bf16.msrb.mxu0 %v8864_v40  ;;  %5653 = vmatmul.bf16.vlgmr.msra.gmra.mxu1 %v11414_v49  ;;  %v10332_v40 = vld [vmem:[%s15619_s1 + $0x1394] sm:$0xf0]  ;;  %v9247_v3 = vld [vmem:[%s15619_s1 + $0x15e8] sm:$0xf] }
 0x220   :  { %5697 = vmatpush.bf16.msrb.mxu1 %v8992_v34  ;;  %v8640_v34 = vor.u32 %v10256_v35, %v8639_v33  ;;  %v9248_v30 = vor.u32 %v10408_v32, %v9247_v3  ;;  %v9103_v33 = vld [vmem:[%s15619_s1 + $0x14c8] sm:$0xf]  ;;  %v10404_v44 = vld [vmem:[%s15619_s1 + $0x15d4] sm:$0xf0] }
 0x221   :  { %5662 = vmatpush.bf16.msra.mxu2 %v8544_v43  ;;  %v5409_v43 = vpop.f32.mrf.mxu2  ;;  %v5446_v62 = vpop.f32.mrf.mxu1  ;;  %v9231_v37 = vld [vmem:[%s15619_s1 + $0x15c8] sm:$0xf]  ;;  %v10368_v51 = vld [vmem:[%s15619_s1 + $0x14b4] sm:$0xf0] }
 0x222   :  { %5675 = vmatpush.bf16.msra.mxu3 %v8672_v54  ;;  %v8944_v54 = vor.u32 %v10332_v40, %v8943_v39  ;;  %v14038_v8 = vadd.f32 %v5446_v62, %v5434_v36  ;;  %v8767_v36 = vld [vmem:[%s15619_s1 + $0x1228] sm:$0xf]  ;;  %v10400_v53 = vld [vmem:[%s15619_s1 + $0x15b4] sm:$0xf0] }
 0x223   :  { %5685 = vmatpush.bf16.msrb.mxu0 %v8848_v56  ;;  %v10296_v56 = vld [vmem:[%s15619_s1 + $0x1274] sm:$0xf0]  ;;  %v9215_v52 = vld [vmem:[%s15619_s1 + $0x15a8] sm:$0xf] }
 0x224   :  { %5698 = vmatpush.bf16.msrb.mxu1 %v8976_v63  ;;  %v8496_v63 = vor.u32 %v10220_v50, %v8495_v42  ;;  %v8800_v11 = vor.u32 %v10296_v56, %v8799_v55  ;;  %v8895_v42 = vld [vmem:[%s15619_s1 + $0x1328] sm:$0xf]  ;;  %v10284_v58 = vld [vmem:[%s15619_s1 + $0x1214] sm:$0xf0]  ;;  %v9216_v62 = vor.u32 %v10400_v53, %v9215_v52 }
 0x225   :  { %5663 = vmatpush.bf16.msra.mxu2 %v8528_v27  ;;  %v8783_v27 = vld [vmem:[%s15619_s1 + $0x1248] sm:$0xf]  ;;  %v5435_v35 = vpop.f32.mrf.mxu0  ;;  %v10316_v61 = vld [vmem:[%s15619_s1 + $0x1314] sm:$0xf0] }
 0x226   :  { %5676 = vmatpush.bf16.msra.mxu3 %v8656_v28  ;;  %v10292_v28 = vld [vmem:[%s15619_s1 + $0x1254] sm:$0xf0]  ;;  %v9087_v50 = vld [vmem:[%s15619_s1 + $0x14a8] sm:$0xf] }
 0x227   :  { %5686 = vmatpush.bf16.msrb.mxu0 %v8832_v29  ;;  %v8911_v29 = vld [vmem:[%s15619_s1 + $0x1348] sm:$0xf]  ;;  %v8784_v38 = vor.u32 %v10292_v28, %v8783_v27  ;;  %v9088_v57 = vor.u32 %v10368_v51, %v9087_v50  ;;  %v10364_v3 = vld [vmem:[%s15619_s1 + $0x1494] sm:$0xf0] }
 0x228   :  { %5699 = vmatpush.bf16.msrb.mxu1 %v8960_v31  ;;  %v10372_v31 = vld [vmem:[%s15619_s1 + $0x14d4] sm:$0xf0]  ;;  %v8912_v39 = vor.u32 %v10324_v23, %v8911_v29  ;;  %v8751_v55 = vld [vmem:[%s15619_s1 + $0x1208] sm:$0xf] }
 0x229   :  { %5664 = vmatpush.bf16.msra.mxu2 %v8512_v41  ;;  %v9104_v40 = vor.u32 %v10372_v31, %v9103_v33  ;;  %v10288_v41 = vld [vmem:[%s15619_s1 + $0x1234] sm:$0xf0]  ;;  %v5448_v43 = vpop.f32.mrf.mxu1  ;;  %v8879_v59 = vld [vmem:[%s15619_s1 + $0x1308] sm:$0xf] }
 0x22a   :  { %5677 = vmatpush.bf16.msra.mxu3 %v8640_v34  ;;  %v9232_v34 = vor.u32 %v10404_v44, %v9231_v37  ;;  %v9199_v32 = vld [vmem:[%s15619_s1 + $0x1588] sm:$0xf]  ;;  %v10472_v28 = vld [vmem:[%s15619_s1 + $0x17f4] sm:$0xf0]  ;;  %v8880_v29 = vor.u32 %v10316_v61, %v8879_v59  ;;  %v10525_v44 = vld [vmem:[%s15620_s2] sm:$0xf] }
 0x22b   :  { %5687 = vmatpush.bf16.msrb.mxu0 %v8816_v45  ;;  %v10320_v45 = vld [vmem:[%s15619_s1 + $0x1334] sm:$0xf0]  ;;  %v9503_v27 = vld [vmem:[%s15619_s1 + $0x17e8] sm:$0xf] }
 0x22c   :  { %5700 = vmatpush.bf16.msrb.mxu1 %v8944_v54  ;;  %v8768_v54 = vor.u32 %v10288_v41, %v8767_v36  ;;  %v8896_v56 = vor.u32 %v10320_v45, %v8895_v42  ;;  %v9055_v23 = vld [vmem:[%s15619_s1 + $0x1468] sm:$0xf]  ;;  %v10360_v35 = vld [vmem:[%s15619_s1 + $0x1474] sm:$0xf0] }
 0x22d   :  { %5665 = vmatpush.bf16.msra.mxu2 %v8496_v63  ;;  %v9071_v63 = vld [vmem:[%s15619_s1 + $0x1488] sm:$0xf]  ;;  %v10436_v41 = vld [vmem:[%s15619_s1 + $0x16d4] sm:$0xf0]  ;;  %v9056_v45 = vor.u32 %v10360_v35, %v9055_v23 }
 0x22e   :  { %5678 = vmatpush.bf16.msra.mxu3 %v8624_v10  ;;  %v10396_v10 = vld [vmem:[%s15619_s1 + $0x1594] sm:$0xf0]  ;;  %v9183_v37 = vld [vmem:[%s15619_s1 + $0x1568] sm:$0xf] }
 0x22f   :  { %5688 = vmatpush.bf16.msrb.mxu0 %v8800_v11  ;;  %v9375_v11 = vld [vmem:[%s15619_s1 + $0x16e8] sm:$0xf]  ;;  %v9200_v33 = vor.u32 %v10396_v10, %v9199_v32  ;;  %v10356_v43 = vld [vmem:[%s15619_s1 + $0x1454] sm:$0xf0] }
 0x230   :  { %5701 = vmatpush.bf16.msrb.mxu1 %v8928_v24  ;;  %5666 = vmatmul.bf16.vlgmr.msra.gmra.mxu2 %v11645_v9  ;;  %v10440_v24 = vld [vmem:[%s15619_s1 + $0x16f4] sm:$0xf0]  ;;  %v9359_v36 = vld [vmem:[%s15619_s1 + $0x16c8] sm:$0xf] }
 0x231   :  { %5710 = vmatpush.bf16.msrb.mxu2 %v9120_v25  ;;  %5679 = vmatmul.bf16.vlgmr.msra.gmra.mxu3 %v11655_v14  ;;  %v8752_v25 = vor.u32 %v10284_v58, %v8751_v55  ;;  %v9376_v31 = vor.u32 %v10440_v24, %v9375_v11  ;;  %v9487_v42 = vld [vmem:[%s15619_s1 + $0x17c8] sm:$0xf]  ;;  %v9360_v52 = vor.u32 %v10436_v41, %v9359_v36  ;;  %v10388_v58 = vld [vmem:[%s15619_s1 + $0x1554] sm:$0xf0] }
 0x232   :  { %5723 = vmatpush.bf16.msrb.mxu3 %v9248_v30  ;;  %v9072_v30 = vor.u32 %v10364_v3, %v9071_v63  ;;  %v9039_v53 = vld [vmem:[%s15619_s1 + $0x1448] sm:$0xf]  ;;  %v10432_v61 = vld [vmem:[%s15619_s1 + $0x16b4] sm:$0xf0] }
 0x233   :  { %5689 = vmatpush.bf16.msrb.mxu0 %v8784_v38  ;;  %v814_v38 = vperm.slane %v10525_v44, 2  ;;  %v5459_v50 = vpop.f32.mrf.mxu2  ;;  %v9343_v59 = vld [vmem:[%s15619_s1 + $0x16a8] sm:$0xf]  ;;  %v10464_v63 = vld [vmem:[%s15619_s1 + $0x17b4] sm:$0xf0]  ;;  %v9040_v32 = vor.u32 %v10356_v43, %v9039_v53 }
 0x234   :  { %5702 = vmatpush.bf16.msrb.mxu1 %v8912_v39  ;;  %v9504_v39 = vor.u32 %v10472_v28, %v9503_v27  ;;  %v9344_v11 = vor.u32 %v10432_v61, %v9343_v59  ;;  %v9023_v24 = vld [vmem:[%s15619_s1 + $0x1428] sm:$0xf]  ;;  %v10428_v23 = vld [vmem:[%s15619_s1 + $0x1694] sm:$0xf0]  ;;  %v9734_v59 = vld [vmem:[%s15619_s1 + $0xec] sm:$0xf] }
 0x235   :  { %5711 = vmatpush.bf16.msrb.mxu2 %v9104_v40  ;;  %v10392_v40 = vld [vmem:[%s15619_s1 + $0x1574] sm:$0xf0]  ;;  %v5460_v55 = vadd.f32 %v5459_v50, %v814_v38  ;;  %v9151_v27 = vld [vmem:[%s15619_s1 + $0x1528] sm:$0xf]  ;;  %v6561_v61 = vld [vmem:[%s15619_s1 + $0xf8] sm:$0xf0] }
 0x236   :  { %5724 = vmatpush.bf16.msrb.mxu3 %v9232_v34  ;;  %v10468_v34 = vld [vmem:[%s15619_s1 + $0x17d4] sm:$0xf0]  ;;  %v9184_v51 = vor.u32 %v10392_v40, %v9183_v37  ;;  %v9007_v44 = vld [vmem:[%s15619_s1 + $0x1408] sm:$0xf] }
 0x237   :  { %5690 = vmatpush.bf16.msrb.mxu0 %v8768_v54  ;;  %v9167_v54 = vld [vmem:[%s15619_s1 + $0x1548] sm:$0xf]  ;;  %v10424_v53 = vld [vmem:[%s15619_s1 + $0x1674] sm:$0xf0] }
 0x238   :  { %5703 = vmatpush.bf16.msrb.mxu1 %v8896_v56  ;;  %v5472_v56 = vpop.f32.mrf.mxu3  ;;  %v9168_v10 = vor.u32 %v10388_v58, %v9167_v54  ;;  %v9439_v43 = vld [vmem:[%s15619_s1 + $0x1768] sm:$0xf] }
 0x239   :  { %5712 = vmatpush.bf16.msrb.mxu2 %v9088_v57  ;;  %v9488_v57 = vor.u32 %v10468_v34, %v9487_v42  ;;  %v5473_v3 = vadd.f32 %v5472_v56, %v5460_v55  ;;  %v10348_v42 = vld [vmem:[%s15619_s1 + $0x1414] sm:$0xf0]  ;;  %v9135_v34 = vld [vmem:[%s15619_s1 + $0x1508] sm:$0xf] }
 0x23a   :  { %5725 = vmatpush.bf16.msrb.mxu3 %v9216_v62  ;;  %v9471_v62 = vld [vmem:[%s15619_s1 + $0x17a8] sm:$0xf]  ;;  %v10456_v55 = vld [vmem:[%s15619_s1 + $0x1774] sm:$0xf0]  ;;  %v9008_v58 = vor.u32 %v10348_v42, %v9007_v44 }
 0x23b   :  { %5691 = vmatpush.bf16.msrb.mxu0 %v8752_v25  ;;  %v10352_v25 = vld [vmem:[%s15619_s1 + $0x1434] sm:$0xf0]  ;;  %v9472_v28 = vor.u32 %v10464_v63, %v9471_v62  ;;  %v5485_v35 = vpop.f32.mrf.mxu0  ;;  %v5461_v40 = vpop.f32.mrf.mxu2  ;;  %v9567_v56 = vld [vmem:[%s15619_s1 + $0x1868] sm:$0xf] }
 0x23c   :  { %5704 = vmatpush.bf16.msrb.mxu1 %v8880_v29  ;;  %v10384_v29 = vld [vmem:[%s15619_s1 + $0x1534] sm:$0xf0]  ;;  %v9024_v37 = vor.u32 %v10352_v25, %v9023_v24  ;;  %v5486_v38 = vadd.f32 %v5485_v35, %v5473_v3  ;;  %v9440_v3 = vor.u32 %v10456_v55, %v9439_v43  ;;  %v9423_v24 = vld [vmem:[%s15619_s1 + $0x1748] sm:$0xf]  ;;  %v6564_v25 = vor.u32 %v9734_v59, %v6561_v61 }
 0x23d   :  { %5713 = vmatpush.bf16.msrb.mxu2 %v9072_v30  ;;  %v9327_v30 = vld [vmem:[%s15619_s1 + $0x1688] sm:$0xf]  ;;  %v9152_v36 = vor.u32 %v10384_v29, %v9151_v27  ;;  %v10452_v27 = vld [vmem:[%s15619_s1 + $0x1754] sm:$0xf0] }
 0x23e   :  { %5726 = vmatpush.bf16.msrb.mxu3 %v9200_v33  ;;  %5692 = vmatmul.bf16.vlgmr.msrb.gmra.mxu0 %v11653_v13  ;;  %v9455_v33 = vld [vmem:[%s15619_s1 + $0x1788] sm:$0xf]  ;;  %v9328_v41 = vor.u32 %v10428_v23, %v9327_v30  ;;  %v10484_v29 = vld [vmem:[%s15619_s1 + $0x1854] sm:$0xf0]  ;;  %v9730_v23 = vld [vmem:[%s15619_s1 + $0xcc] sm:$0xf] }
 0x23f   :  { %5736 = vmatpush.bf16.msra.mxu0 %v9376_v31  ;;  %5705 = vmatmul.bf16.vlgmr.msrb.gmra.mxu1 %v11657_v18  ;;  %v10460_v31 = vld [vmem:[%s15619_s1 + $0x1794] sm:$0xf0]  ;;  %v9407_v40 = vld [vmem:[%s15619_s1 + $0x1728] sm:$0xf] }
 0x240   :  { %5749 = vmatpush.bf16.msra.mxu1 %v9504_v39  ;;  %v5498_v39 = vpop.f32.mrf.mxu1  ;;  %v5474_v50 = vpop.f32.mrf.mxu3  ;;  %v9535_v42 = vld [vmem:[%s15619_s1 + $0x1828] sm:$0xf]  ;;  %v10476_v61 = vld [vmem:[%s15619_s1 + $0x1814] sm:$0xf0] }
 0x241   :  { %5714 = vmatpush.bf16.msrb.mxu2 %v9056_v45  ;;  %v10380_v45 = vld [vmem:[%s15619_s1 + $0x1514] sm:$0xf0]  ;;  %v14224_v54 = vadd.f32 %v5498_v39, %v5486_v38  ;;  %v9279_v38 = vld [vmem:[%s15619_s1 + $0x1628] sm:$0xf]  ;;  %v6529_v50 = vld [vmem:[%s15619_s1 + $0xb8] sm:$0xf0] }
 0x242   :  { %5727 = vmatpush.bf16.msrb.mxu3 %v9184_v51  ;;  %v9456_v51 = vor.u32 %v10460_v31, %v9455_v33  ;;  %v9136_v62 = vor.u32 %v10380_v45, %v9135_v34  ;;  %v6545_v33 = vld [vmem:[%s15619_s1 + $0xd8] sm:$0xf0]  ;;  %v10416_v39 = vld [vmem:[%s15619_s1 + $0x1634] sm:$0xf0]  ;;  %v9726_v45 = vld [vmem:[%s15619_s1 + $0xac] sm:$0xf] }
 0x243   :  { %5737 = vmatpush.bf16.msra.mxu0 %v9360_v52  ;;  %v9311_v52 = vld [vmem:[%s15619_s1 + $0x1668] sm:$0xf]  ;;  %v5487_v30 = vpop.f32.mrf.mxu0  ;;  %v10480_v34 = vld [vmem:[%s15619_s1 + $0x1834] sm:$0xf0]  ;;  %v6532_v59 = vor.u32 %v9726_v45, %v6529_v50  ;;  %v9714_v50 = vld [vmem:[%s15619_s1 + $0x4c] sm:$0xf] }
 0x244   :  { %5750 = vmatpush.bf16.msra.mxu1 %v9488_v57  ;;  %v10488_v57 = vld [vmem:[%s15619_s1 + $0x1874] sm:$0xf0]  ;;  %v9312_v63 = vor.u32 %v10424_v53, %v9311_v52  ;;  %v9263_v52 = vld [vmem:[%s15619_s1 + $0x1608] sm:$0xf]  ;;  %v9536_v55 = vor.u32 %v10480_v34, %v9535_v42 }
 0x245   :  { %5715 = vmatpush.bf16.msrb.mxu2 %v9040_v32  ;;  %v9568_v32 = vor.u32 %v10488_v57, %v9567_v56  ;;  %v10412_v53 = vld [vmem:[%s15619_s1 + $0x1614] sm:$0xf0]  ;;  %v9391_v56 = vld [vmem:[%s15619_s1 + $0x1708] sm:$0xf] }
 0x246   :  { %5728 = vmatpush.bf16.msrb.mxu3 %v9168_v10  ;;  %v9295_v10 = vld [vmem:[%s15619_s1 + $0x1648] sm:$0xf]  ;;  %v10444_v57 = vld [vmem:[%s15619_s1 + $0x1714] sm:$0xf0] }
 0x247   :  { %5738 = vmatpush.bf16.msra.mxu0 %v9344_v11  ;;  %v10420_v11 = vld [vmem:[%s15619_s1 + $0x1654] sm:$0xf0] }
 0x248   :  { %5751 = vmatpush.bf16.msra.mxu1 %v9472_v28  ;;  %v9551_v28 = vld [vmem:[%s15619_s1 + $0x1848] sm:$0xf]  ;;  %v5500_v31 = vpop.f32.mrf.mxu1  ;;  %v9296_v35 = vor.u32 %v10420_v11, %v9295_v10  ;;  %v9798_v10 = vld [vmem:[%s15619_s1 + $0x2ec] sm:$0xf]  ;;  %v9264_v11 = vor.u32 %v10412_v53, %v9263_v52 }
 0x249   :  { %5716 = vmatpush.bf16.msrb.mxu2 %v9024_v37  ;;  %v9424_v37 = vor.u32 %v10452_v27, %v9423_v24  ;;  %v9552_v44 = vor.u32 %v10484_v29, %v9551_v28  ;;  %v6817_v24 = vld [vmem:[%s15619_s1 + $0x2f8] sm:$0xf0]  ;;  %v9392_v28 = vor.u32 %v10444_v57, %v9391_v56  ;;  %v9758_v56 = vld [vmem:[%s15619_s1 + $0x1ac] sm:$0xf] }
 0x24a   :  { %5729 = vmatpush.bf16.msrb.mxu3 %v9152_v36  ;;  %v6548_v36 = vor.u32 %v9730_v23, %v6545_v33  ;;  %v6945_v27 = vld [vmem:[%s15619_s1 + $0x3f8] sm:$0xf0]  ;;  %v9718_v33 = vld [vmem:[%s15619_s1 + $0x6c] sm:$0xf] }
 0x24b   :  { %5739 = vmatpush.bf16.msra.mxu0 %v9328_v41  ;;  %v10448_v41 = vld [vmem:[%s15619_s1 + $0x1734] sm:$0xf0]  ;;  %v6497_v31 = vld [vmem:[%s15619_s1 + $0x78] sm:$0xf0] }
 0x24c   :  { %5752 = vmatpush.bf16.msra.mxu1 %v9456_v51  ;;  %v9280_v51 = vor.u32 %v10416_v39, %v9279_v38  ;;  %v9408_v43 = vor.u32 %v10448_v41, %v9407_v40  ;;  %v6673_v38 = vld [vmem:[%s15619_s1 + $0x1d8] sm:$0xf0]  ;;  %v9794_v39 = vld [vmem:[%s15619_s1 + $0x2cc] sm:$0xf]  ;;  %v6500_v34 = vor.u32 %v9718_v33, %v6497_v31 }
 0x24d   :  { %5717 = vmatpush.bf16.msrb.mxu2 %v9008_v58  ;;  %v9519_v58 = vld [vmem:[%s15619_s1 + $0x1808] sm:$0xf]  ;;  %v6801_v40 = vld [vmem:[%s15619_s1 + $0x2d8] sm:$0xf0]  ;;  %v9818_v33 = vld [vmem:[%s15619_s1 + $0x38c] sm:$0xf] }
 0x24e   :  { %5730 = vmatpush.bf16.msrb.mxu3 %v9136_v62  ;;  %v9722_v62 = vld [vmem:[%s15619_s1 + $0x8c] sm:$0xf]  ;;  %v9520_v29 = vor.u32 %v10476_v61, %v9519_v58  ;;  %v6929_v41 = vld [vmem:[%s15619_s1 + $0x3d8] sm:$0xf0] }
 0x24f   :  { %5740 = vmatpush.bf16.msra.mxu0 %v9312_v63  ;;  %v6513_v63 = vld [vmem:[%s15619_s1 + $0x98] sm:$0xf0]  ;;  %v9790_v58 = vld [vmem:[%s15619_s1 + $0x2ac] sm:$0xf] }
 0x250   :  { %5753 = vmatpush.bf16.msra.mxu1 %v9440_v3  ;;  %5718 = vmatmul.bf16.vlgmr.msrb.gmra.mxu2 %v11738_v4  ;;  %v9766_v3 = vld [vmem:[%s15619_s1 + $0x1ec] sm:$0xf]  ;;  %v6516_v30 = vor.u32 %v9722_v62, %v6513_v63  ;;  %v6657_v57 = vld [vmem:[%s15619_s1 + $0x1b8] sm:$0xf0] }
 0x251   :  { %5766 = vmatpush.bf16.msra.mxu2 %v9568_v32  ;;  %5731 = vmatmul.bf16.vlgmr.msrb.gmra.mxu3 %v11742_v6  ;;  %v6689_v32 = vld [vmem:[%s15619_s1 + $0x1f8] sm:$0xf0] }
 0x252   :  { %5775 = vmatpush.bf16.msra.mxu3 %v6564_v25  ;;  %v9830_v25 = vld [vmem:[%s15619_s1 + $0x3ec] sm:$0xf]  ;;  %v6692_v23 = vor.u32 %v9766_v3, %v6689_v32  ;;  %v6913_v61 = vld [vmem:[%s15619_s1 + $0x3b8] sm:$0xf0]  ;;  %v6660_v3 = vor.u32 %v9758_v56, %v6657_v57 }
 0x253   :  { %5741 = vmatpush.bf16.msra.mxu0 %v9296_v35  ;;  %v6820_v35 = vor.u32 %v9798_v10, %v6817_v24  ;;  %v5511_v42 = vpop.f32.mrf.mxu2  ;;  %v9710_v32 = vld [vmem:[%s15619_s1 + $0x2c] sm:$0xf]  ;;  %v6465_v10 = vld [vmem:[%s15619_s1 + $0x38] sm:$0xf0] }
 0x254   :  { %5754 = vmatpush.bf16.msra.mxu1 %v9424_v37  ;;  %v6948_v37 = vor.u32 %v9830_v25, %v6945_v27  ;;  %v5512_v52 = vadd.f32 %v5511_v42, %v14224_v54  ;;  %v5524_v53 = vpop.f32.mrf.mxu3  ;;  %v6785_v54 = vld [vmem:[%s15619_s1 + $0x2b8] sm:$0xf0]  ;;  %v9754_v25 = vld [vmem:[%s15619_s1 + $0x18c] sm:$0xf] }
 0x255   :  { %5767 = vmatpush.bf16.msra.mxu2 %v9552_v44  ;;  %v9762_v44 = vld [vmem:[%s15619_s1 + $0x1cc] sm:$0xf]  ;;  %v6641_v27 = vld [vmem:[%s15619_s1 + $0x198] sm:$0xf0] }
 0x256   :  { %5776 = vmatpush.bf16.msra.mxu3 %v6548_v36  ;;  %v9826_v36 = vld [vmem:[%s15619_s1 + $0x3cc] sm:$0xf]  ;;  %v6676_v45 = vor.u32 %v9762_v44, %v6673_v38  ;;  %v5525_v62 = vadd.f32 %v5524_v53, %v5512_v52  ;;  %v6897_v31 = vld [vmem:[%s15619_s1 + $0x398] sm:$0xf0]  ;;  %v6468_v38 = vor.u32 %v9710_v32, %v6465_v10 }
 0x257   :  { %5742 = vmatpush.bf16.msra.mxu0 %v9280_v51  ;;  %v6481_v51 = vld [vmem:[%s15619_s1 + $0x58] sm:$0xf0]  ;;  %v9782_v52 = vld [vmem:[%s15619_s1 + $0x26c] sm:$0xf] }
 0x258   :  { %5755 = vmatpush.bf16.msra.mxu1 %v9408_v43  ;;  %v6804_v43 = vor.u32 %v9794_v39, %v6801_v40  ;;  %v6484_v63 = vor.u32 %v9714_v50, %v6481_v51  ;;  %v6644_v39 = vor.u32 %v9754_v25, %v6641_v27  ;;  %v9706_v40 = vld [vmem:[%s15619_s1 + $0xc] sm:$0xf]  ;;  %v6625_v51 = vld [vmem:[%s15619_s1 + $0x178] sm:$0xf0] }
 0x259   :  { %5768 = vmatpush.bf16.msra.mxu2 %v9536_v55  ;;  %v6932_v55 = vor.u32 %v9826_v36, %v6929_v41  ;;  %v6449_v36 = vld [vmem:[%s15619_s1 + $0x18] sm:$0xf0]  ;;  %v9750_v50 = vld [vmem:[%s15619_s1 + $0x16c] sm:$0xf] }
 0x25a   :  { %5777 = vmatpush.bf16.msra.mxu3 %v6532_v59  ;;  %v9822_v59 = vld [vmem:[%s15619_s1 + $0x3ac] sm:$0xf]  ;;  %v6753_v53 = vld [vmem:[%s15619_s1 + $0x278] sm:$0xf0] }
 0x25b   :  { %5743 = vmatpush.bf16.msra.mxu0 %v9264_v11  ;;  %v6788_v11 = vor.u32 %v9790_v58, %v6785_v54  ;;  %v6916_v24 = vor.u32 %v9822_v59, %v6913_v61  ;;  %v5513_v44 = vpop.f32.mrf.mxu2  ;;  %v9862_v56 = vld [vmem:[%s15619_s1 + $0x4ec] sm:$0xf]  ;;  %v7073_v57 = vld [vmem:[%s15619_s1 + $0x4f8] sm:$0xf0]  ;;  %v6452_v58 = vor.u32 %v9706_v40, %v6449_v36  ;;  %v6628_v54 = vor.u32 %v9750_v50, %v6625_v51 }
 0x25c   :  { %5756 = vmatpush.bf16.msra.mxu1 %v9392_v28  ;;  %v9786_v28 = vld [vmem:[%s15619_s1 + $0x28c] sm:$0xf]  ;;  %v5526_v41 = vpop.f32.mrf.mxu3  ;;  %v6756_v59 = vor.u32 %v9782_v52, %v6753_v53  ;;  %v7076_v32 = vor.u32 %v9862_v56, %v7073_v57  ;;  %v6737_v10 = vld [vmem:[%s15619_s1 + $0x258] sm:$0xf0] }
 0x25d   :  { %5769 = vmatpush.bf16.msra.mxu2 %v9520_v29  ;;  %v10526_v29 = vld [vmem:[#allocation1] sm:$0xff]  ;;  %v9858_v27 = vld [vmem:[%s15619_s1 + $0x4cc] sm:$0xf]  ;;  %v6849_v40 = vld [vmem:[%s15619_s1 + $0x338] sm:$0xf0] }
 0x25e   :  { %5778 = vmatpush.bf16.msra.mxu3 %v6516_v30  ;;  %5744 = vmatmul.bf16.vlgmr.msra.gmra.mxu0 %v11740_v5  ;;  %v5537_v30 = vpop.f32.mrf.mxu0  ;;  %v9854_v36 = vld [vmem:[%s15619_s1 + $0x4ac] sm:$0xf]  ;;  %v7041_v41 = vld [vmem:[%s15619_s1 + $0x4b8] sm:$0xf0] }
 0x25f   :  { %5788 = vmatpush.bf16.msrb.mxu0 %v6692_v23  ;;  %5757 = vmatmul.bf16.vlgmr.msra.gmra.mxu1 %v11744_v7  ;;  %v6769_v23 = vld [vmem:[%s15619_s1 + $0x298] sm:$0xf0]  ;;  %v9770_v53 = vld [vmem:[%s15619_s1 + $0x20c] sm:$0xf] }
 0x260   :  { %5801 = vmatpush.bf16.msrb.mxu1 %v6820_v35  ;;  %9575 = vmatmul.msk.bf16.vlgmr.msra.gmra.mxu2 %vm4797_vm0, %v10526_v29  ;;  %v5538_v35 = vadd.f32 %v5537_v30, %v5525_v62  ;;  %v6772_v42 = vor.u32 %v9786_v28, %v6769_v23  ;;  %v9746_v62 = vld [vmem:[%s15619_s1 + $0x14c] sm:$0xf]  ;;  %v7057_v28 = vld [vmem:[%s15619_s1 + $0x4d8] sm:$0xf0] }
 0x261   :  { %5814 = vmatpush.bf16.msrb.mxu2 %v6948_v37  ;;  %v5550_v37 = vpop.f32.mrf.mxu1  ;;  %v7060_v44 = vor.u32 %v9858_v27, %v7057_v28  ;;  %v6577_v50 = vld [vmem:[%s15619_s1 + $0x118] sm:$0xf0]  ;;  %v9850_v57 = vld [vmem:[%s15619_s1 + $0x48c] sm:$0xf] }
 0x262   :  { %5779 = vmatpush.bf16.msra.mxu3 %v6500_v34  ;;  %v6900_v34 = vor.u32 %v9818_v33, %v6897_v31  ;;  %v9742_v31 = vld [vmem:[%s15619_s1 + $0x12c] sm:$0xf]  ;;  %v6833_v56 = vld [vmem:[%s15619_s1 + $0x318] sm:$0xf0] }
 0x263   :  { %5789 = vmatpush.bf16.msrb.mxu0 %v6676_v45  ;;  %v14415_v45 = vadd.f32 %v5550_v37, %v5538_v35  ;;  %v6593_v35 = vld [vmem:[%s15619_s1 + $0x138] sm:$0xf0]  ;;  %v9774_v37 = vld [vmem:[%s15619_s1 + $0x22c] sm:$0xf] }
 0x264   :  { %5802 = vmatpush.bf16.msrb.mxu1 %v6804_v43  ;;  %v9814_v43 = vld [vmem:[%s15619_s1 + $0x36c] sm:$0xf]  ;;  %v7009_v28 = vld [vmem:[%s15619_s1 + $0x478] sm:$0xf0] }
 0x265   :  { %5815 = vmatpush.bf16.msrb.mxu2 %v6932_v55  ;;  %v6881_v55 = vld [vmem:[%s15619_s1 + $0x378] sm:$0xf0]  ;;  %v9846_v27 = vld [vmem:[%s15619_s1 + $0x46c] sm:$0xf] }
 0x266   :  { %5780 = vmatpush.bf16.msra.mxu3 %v6484_v63  ;;  %v6884_v61 = vor.u32 %v9814_v43, %v6881_v55  ;;  %v6609_v63 = vld [vmem:[%s15619_s1 + $0x158] sm:$0xf0]  ;;  %v5539_v25 = vpop.f32.mrf.mxu0  ;;  %v9802_v43 = vld [vmem:[%s15619_s1 + $0x30c] sm:$0xf]  ;;  %v7044_v55 = vor.u32 %v9854_v36, %v7041_v41 }
 0x267   :  { %5790 = vmatpush.bf16.msrb.mxu0 %v6660_v3  ;;  %v9778_v3 = vld [vmem:[%s15619_s1 + $0x24c] sm:$0xf]  ;;  %v6612_v30 = vor.u32 %v9746_v62, %v6609_v63  ;;  %v7329_v63 = vld [vmem:[%s15619_s1 + $0x6f8] sm:$0xf0] }
 0x268   :  { %5803 = vmatpush.bf16.msrb.mxu1 %v6788_v11  ;;  %v9810_v11 = vld [vmem:[%s15619_s1 + $0x34c] sm:$0xf]  ;;  %v6740_v23 = vor.u32 %v9778_v3, %v6737_v10 }
 0x269   :  { %5816 = vmatpush.bf16.msrb.mxu2 %v6916_v24  ;;  %v6865_v24 = vld [vmem:[%s15619_s1 + $0x358] sm:$0xf0]  ;;  %v5552_v29 = vpop.f32.mrf.mxu1  ;;  %v9958_v3 = vld [vmem:[%s15619_s1 + $0x7ec] sm:$0xf] }
 0x26a   :  { %5781 = vmatpush.bf16.msra.mxu3 %v6468_v38  ;;  %v6868_v33 = vor.u32 %v9810_v11, %v6865_v24  ;;  %v6721_v38 = vld [vmem:[%s15619_s1 + $0x238] sm:$0xf0]  ;;  %v6836_v11 = vor.u32 %v9802_v43, %v6833_v56 }
 0x26b   :  { %5791 = vmatpush.bf16.msrb.mxu0 %v6644_v39  ;;  %v9806_v39 = vld [vmem:[%s15619_s1 + $0x32c] sm:$0xf]  ;;  %v6724_v51 = vor.u32 %v9774_v37, %v6721_v38  ;;  %v7297_v43 = vld [vmem:[%s15619_s1 + $0x6b8] sm:$0xf0] }
 0x26c   :  { %5804 = vmatpush.bf16.msrb.mxu1 %v6772_v42  ;;  %v6596_v42 = vor.u32 %v9742_v31, %v6593_v35  ;;  %v6852_v52 = vor.u32 %v9806_v39, %v6849_v40  ;;  %v9922_v31 = vld [vmem:[%s15619_s1 + $0x6cc] sm:$0xf]  ;;  %v7313_v35 = vld [vmem:[%s15619_s1 + $0x6d8] sm:$0xf0]  ;;  %v7012_v39 = vor.u32 %v9846_v27, %v7009_v28 }
 0x26d   :  { %5817 = vmatpush.bf16.msrb.mxu2 %v6900_v34  ;;  %v9738_v34 = vld [vmem:[%s15619_s1 + $0x10c] sm:$0xf]  ;;  %v7425_v56 = vld [vmem:[%s15619_s1 + $0x7b8] sm:$0xf0] }
 0x26e   :  { %5782 = vmatpush.bf16.msra.mxu3 %v6452_v58  ;;  %v7025_v58 = vld [vmem:[%s15619_s1 + $0x498] sm:$0xf0]  ;;  %v6580_v62 = vor.u32 %v9738_v34, %v6577_v50  ;;  %v9954_v37 = vld [vmem:[%s15619_s1 + $0x7cc] sm:$0xf]  ;;  %v7316_v50 = vor.u32 %v9922_v31, %v7313_v35 }
 0x26f   :  { %5792 = vmatpush.bf16.msrb.mxu0 %v6628_v54  ;;  %v9894_v54 = vld [vmem:[%s15619_s1 + $0x5ec] sm:$0xf]  ;;  %v7028_v24 = vor.u32 %v9850_v57, %v7025_v58  ;;  %v6993_v34 = vld [vmem:[%s15619_s1 + $0x458] sm:$0xf0] }
 0x270   :  { %5805 = vmatpush.bf16.msrb.mxu1 %v6756_v59  ;;  %v7201_v59 = vld [vmem:[%s15619_s1 + $0x5f8] sm:$0xf0] }
 0x271   :  { %5818 = vmatpush.bf16.msrb.mxu2 %v6884_v61  ;;  %5783 = vmatmul.bf16.vlgmr.msra.gmra.mxu3 %v10891_v21  ;;  %v6705_v21 = vld [vmem:[%s15619_s1 + $0x218] sm:$0xf0]  ;;  %v9926_v61 = vld [vmem:[%s15619_s1 + $0x6ec] sm:$0xf]  ;;  %v7204_v25 = vor.u32 %v9894_v54, %v7201_v59 }
 0x272   :  { %5827 = vmatpush.bf16.msrb.mxu3 %v7076_v32  ;;  %v7457_v32 = vld [vmem:[%s15619_s1 + $0x7f8] sm:$0xf0]  ;;  %v6708_v10 = vor.u32 %v9770_v53, %v6705_v21  ;;  %v7332_v29 = vor.u32 %v9926_v61, %v7329_v63  ;;  %v9918_v53 = vld [vmem:[%s15619_s1 + $0x6ac] sm:$0xf] }
 0x273   :  { %5793 = vmatpush.bf16.msrb.mxu0 %v6612_v30  ;;  %v7460_v30 = vor.u32 %v9958_v3, %v7457_v32  ;;  %v5563_v38 = vpop.f32.mrf.mxu2  ;;  %v9838_v54 = vld [vmem:[%s15619_s1 + $0x42c] sm:$0xf]  ;;  %v6977_v59 = vld [vmem:[%s15619_s1 + $0x438] sm:$0xf0]  ;;  %v7300_v61 = vor.u32 %v9918_v53, %v7297_v43 }
 0x274   :  { %5806 = vmatpush.bf16.msrb.mxu1 %v6740_v23  ;;  %v9890_v23 = vld [vmem:[%s15619_s1 + $0x5cc] sm:$0xf]  ;;  %v5564_v40 = vadd.f32 %v5563_v38, %v14415_v45  ;;  %v5576_v41 = vpop.f32.mrf.mxu3  ;;  %v7169_v45 = vld [vmem:[%s15619_s1 + $0x5b8] sm:$0xf0]  ;;  %v6980_v27 = vor.u32 %v9838_v54, %v6977_v59 }
 0x275   :  { %5819 = vmatpush.bf16.msrb.mxu2 %v6868_v33  ;;  %v7185_v33 = vld [vmem:[%s15619_s1 + $0x5d8] sm:$0xf0]  ;;  %v9946_v32 = vld [vmem:[%s15619_s1 + $0x78c] sm:$0xf] }
 0x276   :  { %5828 = vmatpush.bf16.msrb.mxu3 %v7060_v44  ;;  %v7441_v44 = vld [vmem:[%s15619_s1 + $0x7d8] sm:$0xf0]  ;;  %v7188_v36 = vor.u32 %v9890_v23, %v7185_v33  ;;  %v5577_v21 = vadd.f32 %v5576_v41, %v5564_v40  ;;  %v9910_v38 = vld [vmem:[%s15619_s1 + $0x66c] sm:$0xf] }
 0x277   :  { %5794 = vmatpush.bf16.msrb.mxu0 %v6596_v42  ;;  %v9842_v42 = vld [vmem:[%s15619_s1 + $0x44c] sm:$0xf]  ;;  %v7281_v3 = vld [vmem:[%s15619_s1 + $0x698] sm:$0xf0] }
 0x278   :  { %5807 = vmatpush.bf16.msrb.mxu1 %v6724_v51  ;;  %v7444_v51 = vor.u32 %v9954_v37, %v7441_v44  ;;  %v6996_v57 = vor.u32 %v9842_v42, %v6993_v34  ;;  %v9878_v37 = vld [vmem:[%s15619_s1 + $0x56c] sm:$0xf]  ;;  %v7137_v44 = vld [vmem:[%s15619_s1 + $0x578] sm:$0xf0] }
 0x279   :  { %5820 = vmatpush.bf16.msrb.mxu2 %v6852_v52  ;;  %v9886_v52 = vld [vmem:[%s15619_s1 + $0x5ac] sm:$0xf]  ;;  %v7585_v42 = vld [vmem:[%s15619_s1 + $0x8f8] sm:$0xf0] }
 0x27a   :  { %5829 = vmatpush.bf16.msrb.mxu3 %v7044_v55  ;;  %v9950_v55 = vld [vmem:[%s15619_s1 + $0x7ac] sm:$0xf]  ;;  %v7172_v58 = vor.u32 %v9886_v52, %v7169_v45  ;;  %v7121_v53 = vld [vmem:[%s15619_s1 + $0x558] sm:$0xf0] }
 0x27b   :  { %5795 = vmatpush.bf16.msrb.mxu0 %v6580_v62  ;;  %v9914_v62 = vld [vmem:[%s15619_s1 + $0x68c] sm:$0xf]  ;;  %v5589_v63 = vpop.f32.mrf.mxu0  ;;  %v7569_v59 = vld [vmem:[%s15619_s1 + $0x8d8] sm:$0xf0] }
 0x27c   :  { %5808 = vmatpush.bf16.msrb.mxu1 %v6708_v10  ;;  %v7409_v10 = vld [vmem:[%s15619_s1 + $0x798] sm:$0xf0]  ;;  %v5578_v23 = vpop.f32.mrf.mxu3  ;;  %v7284_v33 = vor.u32 %v9914_v62, %v7281_v3  ;;  %v9942_v40 = vld [vmem:[%s15619_s1 + $0x76c] sm:$0xf] }
 0x27d   :  { %5821 = vmatpush.bf16.msrb.mxu2 %v6836_v11  ;;  %v5590_v11 = vadd.f32 %v5589_v63, %v5577_v21  ;;  %v7412_v31 = vor.u32 %v9946_v32, %v7409_v10  ;;  %v9990_v41 = vld [vmem:[%s15619_s1 + $0x8ec] sm:$0xf]  ;;  %v7105_v63 = vld [vmem:[%s15619_s1 + $0x538] sm:$0xf0] }
 0x27e   :  { %5830 = vmatpush.bf16.msrb.mxu3 %v7028_v24  ;;  %5796 = vmatmul.bf16.vlgmr.msrb.gmra.mxu0 %v10902_v26  ;;  %v7153_v26 = vld [vmem:[%s15619_s1 + $0x598] sm:$0xf0]  ;;  %v5602_v24 = vpop.f32.mrf.mxu1  ;;  %v9874_v45 = vld [vmem:[%s15619_s1 + $0x54c] sm:$0xf]  ;;  %v7588_v43 = vor.u32 %v9990_v41, %v7585_v42 }
 0x27f   :  { %5840 = vmatpush.bf16.msra.mxu0 %v7204_v25  ;;  %5809 = vmatmul.bf16.vlgmr.msrb.gmra.mxu1 %v10889_v20  ;;  %v9882_v20 = vld [vmem:[%s15619_s1 + $0x58c] sm:$0xf]  ;;  %v5565_v25 = vpop.f32.mrf.mxu2  ;;  %v14614_v35 = vadd.f32 %v5602_v24, %v5590_v11  ;;  %v7233_v10 = vld [vmem:[%s15619_s1 + $0x638] sm:$0xf0] }
 0x280   :  { %5853 = vmatpush.bf16.msra.mxu1 %v7332_v29  ;;  %5822 = vmatmul.bf16.vlgmr.msrb.gmra.mxu2 %v10893_v22  ;;  %v7428_v22 = vor.u32 %v9950_v55, %v7425_v56  ;;  %v7156_v28 = vor.u32 %v9882_v20, %v7153_v26  ;;  %v9834_v29 = vld [vmem:[%s15619_s1 + $0x40c] sm:$0xf]  ;;  %v7249_v55 = vld [vmem:[%s15619_s1 + $0x658] sm:$0xf0] }
 0x281   :  { %5866 = vmatpush.bf16.msra.mxu2 %v7460_v30  ;;  %v6961_v30 = vld [vmem:[%s15619_s1 + $0x418] sm:$0xf0]  ;;  %v9906_v21 = vld [vmem:[%s15619_s1 + $0x64c] sm:$0xf] }
 0x282   :  { %5831 = vmatpush.bf16.msrb.mxu3 %v7012_v39  ;;  %v7265_v39 = vld [vmem:[%s15619_s1 + $0x678] sm:$0xf0]  ;;  %v6964_v34 = vor.u32 %v9834_v29, %v6961_v30  ;;  %v9938_v56 = vld [vmem:[%s15619_s1 + $0x74c] sm:$0xf]  ;;  %v7252_v20 = vor.u32 %v9906_v21, %v7249_v55 }
 0x283   :  { %5841 = vmatpush.bf16.msra.mxu0 %v7188_v36  ;;  %v7393_v36 = vld [vmem:[%s15619_s1 + $0x778] sm:$0xf0]  ;;  %v9986_v54 = vld [vmem:[%s15619_s1 + $0x8cc] sm:$0xf] }
 0x284   :  { %5854 = vmatpush.bf16.msra.mxu1 %v7316_v50  ;;  %v7140_v50 = vor.u32 %v9878_v37, %v7137_v44  ;;  %v7396_v52 = vor.u32 %v9942_v40, %v7393_v36  ;;  %v9870_v62 = vld [vmem:[%s15619_s1 + $0x52c] sm:$0xf]  ;;  %v7572_v32 = vor.u32 %v9986_v54, %v7569_v59  ;;  %v7361_v24 = vld [vmem:[%s15619_s1 + $0x738] sm:$0xf0] }
 0x285   :  { %5867 = vmatpush.bf16.msra.mxu2 %v7444_v51  ;;  %v7268_v51 = vor.u32 %v9910_v38, %v7265_v39  ;;  %v9902_v3 = vld [vmem:[%s15619_s1 + $0x62c] sm:$0xf]  ;;  %v7089_v30 = vld [vmem:[%s15619_s1 + $0x518] sm:$0xf0] }
 0x286   :  { %5832 = vmatpush.bf16.msrb.mxu3 %v6996_v57  ;;  %v7377_v57 = vld [vmem:[%s15619_s1 + $0x758] sm:$0xf0]  ;;  %v9934_v11 = vld [vmem:[%s15619_s1 + $0x72c] sm:$0xf] }
 0x287   :  { %5842 = vmatpush.bf16.msra.mxu0 %v7172_v58  ;;  %v5591_v58 = vpop.f32.mrf.mxu0  ;;  %v7380_v26 = vor.u32 %v9938_v56, %v7377_v57  ;;  %v9982_v25 = vld [vmem:[%s15619_s1 + $0x8ac] sm:$0xf]  ;;  %v7364_v23 = vor.u32 %v9934_v11, %v7361_v24  ;;  %v7345_v38 = vld [vmem:[%s15619_s1 + $0x718] sm:$0xf0] }
 0x288   :  { %5855 = vmatpush.bf16.msra.mxu1 %v7300_v61  ;;  %v5604_v61 = vpop.f32.mrf.mxu1  ;;  %v9866_v29 = vld [vmem:[%s15619_s1 + $0x50c] sm:$0xf]  ;;  %v7537_v40 = vld [vmem:[%s15619_s1 + $0x898] sm:$0xf0] }
 0x289   :  { %5868 = vmatpush.bf16.msra.mxu2 %v7428_v22  ;;  %v7124_v22 = vor.u32 %v9874_v45, %v7121_v53  ;;  %v9930_v37 = vld [vmem:[%s15619_s1 + $0x70c] sm:$0xf]  ;;  %v7713_v41 = vld [vmem:[%s15619_s1 + $0x9f8] sm:$0xf0] }
 0x28a   :  { %5833 = vmatpush.bf16.msrb.mxu3 %v6980_v27  ;;  %v7553_v27 = vld [vmem:[%s15619_s1 + $0x8b8] sm:$0xf0]  ;;  %v9978_v39 = vld [vmem:[%s15619_s1 + $0x88c] sm:$0xf]  ;;  %v7348_v53 = vor.u32 %v9930_v37, %v7345_v38 }
 0x28b   :  { %5843 = vmatpush.bf16.msra.mxu0 %v7156_v28  ;;  %v7108_v28 = vor.u32 %v9870_v62, %v7105_v63  ;;  %v7556_v44 = vor.u32 %v9982_v25, %v7553_v27  ;;  %v10022_v36 = vld [vmem:[%s15619_s1 + $0x9ec] sm:$0xf]  ;;  %v7540_v21 = vor.u32 %v9978_v39, %v7537_v40  ;;  %v7521_v56 = vld [vmem:[%s15619_s1 + $0x878] sm:$0xf0] }
 0x28c   :  { %5856 = vmatpush.bf16.msra.mxu1 %v7284_v33  ;;  %v9898_v33 = vld [vmem:[%s15619_s1 + $0x60c] sm:$0xf]  ;;  %v7697_v59 = vld [vmem:[%s15619_s1 + $0x9d8] sm:$0xf0] }
 0x28d   :  { %5869 = vmatpush.bf16.msra.mxu2 %v7412_v31  ;;  %v7217_v31 = vld [vmem:[%s15619_s1 + $0x618] sm:$0xf0]  ;;  %v10054_v42 = vld [vmem:[%s15619_s1 + $0xaec] sm:$0xf] }
 0x28e   :  { %5834 = vmatpush.bf16.msrb.mxu3 %v6964_v34  ;;  %v7092_v34 = vor.u32 %v9866_v29, %v7089_v30  ;;  %v7220_v45 = vor.u32 %v9898_v33, %v7217_v31  ;;  %v9974_v55 = vld [vmem:[%s15619_s1 + $0x86c] sm:$0xf]  ;;  %v7505_v24 = vld [vmem:[%s15619_s1 + $0x858] sm:$0xf0] }
 0x28f   :  { %5844 = vmatpush.bf16.msra.mxu0 %v7140_v50  ;;  %v7841_v50 = vld [vmem:[%s15619_s1 + $0xaf8] sm:$0xf0]  ;;  %v10018_v54 = vld [vmem:[%s15619_s1 + $0x9cc] sm:$0xf]  ;;  %v7524_v63 = vor.u32 %v9974_v55, %v7521_v56 }
 0x290   :  { %5857 = vmatpush.bf16.msra.mxu1 %v7268_v51  ;;  %v10086_v51 = vld [vmem:[%s15619_s1 + $0xbec] sm:$0xf]  ;;  %v7844_v57 = vor.u32 %v10054_v42, %v7841_v50  ;;  %v7937_v33 = vld [vmem:[%s15619_s1 + $0xbb8] sm:$0xf0] }
 0x291   :  { %5870 = vmatpush.bf16.msra.mxu2 %v7396_v52  ;;  %5835 = vmatmul.bf16.vlgmr.msrb.gmra.mxu3 %v10984_v0  ;;  %v7236_v0 = vor.u32 %v9902_v3, %v7233_v10  ;;  %v7969_v52 = vld [vmem:[%s15619_s1 + $0xbf8] sm:$0xf0]  ;;  %v10050_v61 = vld [vmem:[%s15619_s1 + $0xacc] sm:$0xf] }
 0x292   :  { %5879 = vmatpush.bf16.msra.mxu3 %v7588_v43  ;;  %v7716_v43 = vor.u32 %v10022_v36, %v7713_v41  ;;  %v7972_v58 = vor.u32 %v10086_v51, %v7969_v52  ;;  %v9970_v11 = vld [vmem:[%s15619_s1 + $0x84c] sm:$0xf]  ;;  %v7489_v37 = vld [vmem:[%s15619_s1 + $0x838] sm:$0xf0] }
 0x293   :  { %5845 = vmatpush.bf16.msra.mxu0 %v7124_v22  ;;  %v7825_v22 = vld [vmem:[%s15619_s1 + $0xad8] sm:$0xf0]  ;;  %v5615_v62 = vpop.f32.mrf.mxu2  ;;  %v10046_v29 = vld [vmem:[%s15619_s1 + $0xaac] sm:$0xf] }
 0x294   :  { %5858 = vmatpush.bf16.msra.mxu1 %v7252_v20  ;;  %v10082_v20 = vld [vmem:[%s15619_s1 + $0xbcc] sm:$0xf]  ;;  %v5616_v3 = vadd.f32 %v5615_v62, %v14614_v35  ;;  %v5628_v10 = vpop.f32.mrf.mxu3  ;;  %v7828_v25 = vor.u32 %v10050_v61, %v7825_v22  ;;  %v7681_v35 = vld [vmem:[%s15619_s1 + $0x9b8] sm:$0xf0] }
 0x295   :  { %5871 = vmatpush.bf16.msra.mxu2 %v7380_v26  ;;  %v7953_v26 = vld [vmem:[%s15619_s1 + $0xbd8] sm:$0xf0]  ;;  %v10042_v40 = vld [vmem:[%s15619_s1 + $0xa8c] sm:$0xf] }
 0x296   :  { %5880 = vmatpush.bf16.msra.mxu3 %v7572_v32  ;;  %v7700_v32 = vor.u32 %v10018_v54, %v7697_v59  ;;  %v7956_v27 = vor.u32 %v10082_v20, %v7953_v26  ;;  %v5629_v30 = vadd.f32 %v5628_v10, %v5616_v3  ;;  %v7665_v39 = vld [vmem:[%s15619_s1 + $0x998] sm:$0xf0]  ;;  %v10074_v42 = vld [vmem:[%s15619_s1 + $0xb8c] sm:$0xf] }
 0x297   :  { %5846 = vmatpush.bf16.msra.mxu0 %v7108_v28  ;;  %v10014_v28 = vld [vmem:[%s15619_s1 + $0x9ac] sm:$0xf]  ;;  %v7793_v41 = vld [vmem:[%s15619_s1 + $0xa98] sm:$0xf0] }
 0x298   :  { %5859 = vmatpush.bf16.msra.mxu1 %v7236_v0  ;;  %v7809_v0 = vld [vmem:[%s15619_s1 + $0xab8] sm:$0xf0]  ;;  %v7684_v31 = vor.u32 %v10014_v28, %v7681_v35  ;;  %v7796_v56 = vor.u32 %v10042_v40, %v7793_v41  ;;  %v10006_v54 = vld [vmem:[%s15619_s1 + $0x96c] sm:$0xf] }
 0x299   :  { %5872 = vmatpush.bf16.msra.mxu2 %v7364_v23  ;;  %v10078_v23 = vld [vmem:[%s15619_s1 + $0xbac] sm:$0xf]  ;;  %v7649_v59 = vld [vmem:[%s15619_s1 + $0x978] sm:$0xf0] }
 0x29a   :  { %5881 = vmatpush.bf16.msra.mxu3 %v7556_v44  ;;  %v7812_v44 = vor.u32 %v10046_v29, %v7809_v0  ;;  %v7940_v38 = vor.u32 %v10078_v23, %v7937_v33  ;;  %v10038_v61 = vld [vmem:[%s15619_s1 + $0xa6c] sm:$0xf]  ;;  %v7777_v22 = vld [vmem:[%s15619_s1 + $0xa78] sm:$0xf0] }
 0x29b   :  { %5847 = vmatpush.bf16.msra.mxu0 %v7092_v34  ;;  %v5641_v36 = vpop.f32.mrf.mxu0  ;;  %v7921_v34 = vld [vmem:[%s15619_s1 + $0xb98] sm:$0xf0]  ;;  %v5617_v52 = vpop.f32.mrf.mxu2  ;;  %v10070_v20 = vld [vmem:[%s15619_s1 + $0xb6c] sm:$0xf]  ;;  %v7780_v10 = vor.u32 %v10038_v61, %v7777_v22 }
 0x29c   :  { %5860 = vmatpush.bf16.msra.mxu1 %v7220_v45  ;;  %v5642_v50 = vadd.f32 %v5641_v36, %v5629_v30  ;;  %v5654_v51 = vpop.f32.mrf.mxu1  ;;  %v5630_v55 = vpop.f32.mrf.mxu3  ;;  %v7905_v26 = vld [vmem:[%s15619_s1 + $0xb78] sm:$0xf0]  ;;  %v10118_v62 = vld [vmem:[%s15619_s1 + $0xcec] sm:$0xf] }
 0x29d   :  { %5873 = vmatpush.bf16.msra.mxu2 %v7348_v53  ;;  %v7761_v35 = vld [vmem:[%s15619_s1 + $0xa58] sm:$0xf0]  ;;  %v10066_v29 = vld [vmem:[%s15619_s1 + $0xb4c] sm:$0xf] }
 0x29e   :  { %5882 = vmatpush.bf16.msra.mxu3 %v7540_v21  ;;  %5848 = vmatmul.bf16.vlgmr.msra.gmra.mxu0 %v10988_v2  ;;  %v9966_v2 = vld [vmem:[%s15619_s1 + $0x82c] sm:$0xf]  ;;  %v7889_v30 = vld [vmem:[%s15619_s1 + $0xb58] sm:$0xf0] }
 0x29f   :  { %5892 = vmatpush.bf16.msrb.mxu0 %v7716_v43  ;;  %5861 = vmatmul.bf16.vlgmr.msra.gmra.mxu1 %v10979_v60  ;;  %v10010_v60 = vld [vmem:[%s15619_s1 + $0x98c] sm:$0xf]  ;;  %v7492_v45 = vor.u32 %v9966_v2, %v7489_v37  ;;  %v7473_v43 = vld [vmem:[%s15619_s1 + $0x818] sm:$0xf0]  ;;  %v7892_v37 = vor.u32 %v10066_v29, %v7889_v30 }
 0x2a0   :  { %5905 = vmatpush.bf16.msrb.mxu1 %v7844_v57  ;;  %5874 = vmatmul.bf16.vlgmr.msra.gmra.mxu2 %v10986_v1  ;;  %v7508_v1 = vor.u32 %v9970_v11, %v7505_v24  ;;  %v7668_v53 = vor.u32 %v10010_v60, %v7665_v39  ;;  %v9962_v21 = vld [vmem:[%s15619_s1 + $0x80c] sm:$0xf]  ;;  %v7924_v57 = vor.u32 %v10074_v42, %v7921_v34  ;;  %v8081_v33 = vld [vmem:[%s15619_s1 + $0xcd8] sm:$0xf0] }
 0x2a1   :  { %5918 = vmatpush.bf16.msrb.mxu2 %v7972_v58  ;;  %v14813_v58 = vadd.f32 %v5654_v51, %v5642_v50  ;;  %v7476_v3 = vor.u32 %v9962_v21, %v7473_v43  ;;  %v7908_v11 = vor.u32 %v10070_v20, %v7905_v26  ;;  %v10002_v24 = vld [vmem:[%s15619_s1 + $0x94c] sm:$0xf]  ;;  %v7745_v40 = vld [vmem:[%s15619_s1 + $0xa38] sm:$0xf0] }
 0x2a2   :  { %5883 = vmatpush.bf16.msra.mxu3 %v7524_v63  ;;  %v8097_v63 = vld [vmem:[%s15619_s1 + $0xcf8] sm:$0xf0]  ;;  %v10114_v23 = vld [vmem:[%s15619_s1 + $0xccc] sm:$0xf] }
 0x2a3   :  { %5893 = vmatpush.bf16.msrb.mxu0 %v7700_v32  ;;  %v7652_v32 = vor.u32 %v10006_v54, %v7649_v59  ;;  %v8100_v28 = vor.u32 %v10118_v62, %v8097_v63  ;;  %v5643_v0 = vpop.f32.mrf.mxu0  ;;  %v10030_v60 = vld [vmem:[%s15619_s1 + $0xa2c] sm:$0xf]  ;;  %v8084_v39 = vor.u32 %v10114_v23, %v8081_v33  ;;  %v7873_v41 = vld [vmem:[%s15619_s1 + $0xb38] sm:$0xf0] }
 0x2a4   :  { %5906 = vmatpush.bf16.msrb.mxu1 %v7828_v25  ;;  %v7633_v25 = vld [vmem:[%s15619_s1 + $0x958] sm:$0xf0]  ;;  %v10062_v36 = vld [vmem:[%s15619_s1 + $0xb2c] sm:$0xf] }
 0x2a5   :  { %5919 = vmatpush.bf16.msrb.mxu2 %v7956_v27  ;;  %v10034_v27 = vld [vmem:[%s15619_s1 + $0xa4c] sm:$0xf]  ;;  %v8065_v34 = vld [vmem:[%s15619_s1 + $0xcb8] sm:$0xf0] }
 0x2a6   :  { %5884 = vmatpush.bf16.msra.mxu3 %v7508_v1  ;;  %v5656_v1 = vpop.f32.mrf.mxu1  ;;  %v7764_v2 = vor.u32 %v10034_v27, %v7761_v35  ;;  %v10110_v42 = vld [vmem:[%s15619_s1 + $0xcac] sm:$0xf]  ;;  %v7601_v52 = vld [vmem:[%s15619_s1 + $0x918] sm:$0xf0] }
 0x2a7   :  { %5894 = vmatpush.bf16.msrb.mxu0 %v7684_v31  ;;  %v7636_v31 = vor.u32 %v10002_v24, %v7633_v25  ;;  %v9994_v51 = vld [vmem:[%s15619_s1 + $0x90c] sm:$0xf]  ;;  %v7729_v21 = vld [vmem:[%s15619_s1 + $0xa18] sm:$0xf0]  ;;  %v8068_v55 = vor.u32 %v10110_v42, %v8065_v34 }
 0x2a8   :  { %5907 = vmatpush.bf16.msrb.mxu1 %v7812_v44  ;;  %v9998_v44 = vld [vmem:[%s15619_s1 + $0x92c] sm:$0xf]  ;;  %v8049_v54 = vld [vmem:[%s15619_s1 + $0xc98] sm:$0xf0]  ;;  %v7604_v20 = vor.u32 %v9994_v51, %v7601_v52 }
 0x2a9   :  { %5920 = vmatpush.bf16.msrb.mxu2 %v7940_v38  ;;  %v7617_v38 = vld [vmem:[%s15619_s1 + $0x938] sm:$0xf0]  ;;  %v10058_v43 = vld [vmem:[%s15619_s1 + $0xb0c] sm:$0xf] }
 0x2aa   :  { %5885 = vmatpush.bf16.msra.mxu3 %v7492_v45  ;;  %v7620_v50 = vor.u32 %v9998_v44, %v7617_v38  ;;  %v7876_v45 = vor.u32 %v10062_v36, %v7873_v41  ;;  %v10150_v59 = vld [vmem:[%s15619_s1 + $0xdec] sm:$0xf]  ;;  %v8225_v61 = vld [vmem:[%s15619_s1 + $0xdf8] sm:$0xf0] }
 0x2ab   :  { %5895 = vmatpush.bf16.msrb.mxu0 %v7668_v53  ;;  %v10026_v53 = vld [vmem:[%s15619_s1 + $0xa0c] sm:$0xf]  ;;  %v8353_v26 = vld [vmem:[%s15619_s1 + $0xef8] sm:$0xf0] }
 0x2ac   :  { %5908 = vmatpush.bf16.msrb.mxu1 %v7796_v56  ;;  %v7857_v56 = vld [vmem:[%s15619_s1 + $0xb18] sm:$0xf0]  ;;  %v10182_v22 = vld [vmem:[%s15619_s1 + $0xeec] sm:$0xf] }
 0x2ad   :  { %5921 = vmatpush.bf16.msrb.mxu2 %v7924_v57  ;;  %v10106_v57 = vld [vmem:[%s15619_s1 + $0xc8c] sm:$0xf]  ;;  %v8481_v63 = vld [vmem:[%s15619_s1 + $0xff8] sm:$0xf0]  ;;  %v8356_v27 = vor.u32 %v10182_v22, %v8353_v26 }
 0x2ae   :  { %5886 = vmatpush.bf16.msra.mxu3 %v7476_v3  ;;  %v10214_v62 = vld [vmem:[%s15619_s1 + $0xfec] sm:$0xf]  ;;  %v7732_v3 = vor.u32 %v10026_v53, %v7729_v21  ;;  %v8033_v25 = vld [vmem:[%s15619_s1 + $0xc78] sm:$0xf0] }
 0x2af   :  { %5896 = vmatpush.bf16.msrb.mxu0 %v7652_v32  ;;  %v7860_v32 = vor.u32 %v10058_v43, %v7857_v56  ;;  %v10102_v24 = vld [vmem:[%s15619_s1 + $0xc6c] sm:$0xf]  ;;  %v8209_v29 = vld [vmem:[%s15619_s1 + $0xdd8] sm:$0xf0] }
 0x2b0   :  { %5909 = vmatpush.bf16.msrb.mxu1 %v7780_v10  ;;  %v8052_v10 = vor.u32 %v10106_v57, %v8049_v54  ;;  %v10146_v35 = vld [vmem:[%s15619_s1 + $0xdcc] sm:$0xf]  ;;  %v8337_v0 = vld [vmem:[%s15619_s1 + $0xed8] sm:$0xf0] }
 0x2b1   :  { %5922 = vmatpush.bf16.msrb.mxu2 %v7908_v11  ;;  %5887 = vmatmul.bf16.vlgmr.msra.gmra.mxu3 %v11234_v12  ;;  %v7748_v12 = vor.u32 %v10030_v60, %v7745_v40  ;;  %v8228_v11 = vor.u32 %v10150_v59, %v8225_v61  ;;  %v10178_v30 = vld [vmem:[%s15619_s1 + $0xecc] sm:$0xf]  ;;  %v8465_v33 = vld [vmem:[%s15619_s1 + $0xfd8] sm:$0xf0] }
 0x2b2   :  { %5931 = vmatpush.bf16.msrb.mxu3 %v8100_v28  ;;  %v8484_v28 = vor.u32 %v10214_v62, %v8481_v63  ;;  %v10210_v23 = vld [vmem:[%s15619_s1 + $0xfcc] sm:$0xf]  ;;  %v8017_v60 = vld [vmem:[%s15619_s1 + $0xc58] sm:$0xf0] }
 0x2b3   :  { %5897 = vmatpush.bf16.msrb.mxu0 %v7636_v31  ;;  %v5667_v1 = vpop.f32.mrf.mxu2  ;;  %v8036_v31 = vor.u32 %v10102_v24, %v8033_v25  ;;  %v10098_v38 = vld [vmem:[%s15619_s1 + $0xc4c] sm:$0xf]  ;;  %v8468_v40 = vor.u32 %v10210_v23, %v8465_v33  ;;  %v8321_v34 = vld [vmem:[%s15619_s1 + $0xeb8] sm:$0xf0] }
 0x2b4   :  { %5910 = vmatpush.bf16.msrb.mxu1 %v7764_v2  ;;  %v5668_v2 = vadd.f32 %v5667_v1, %v14813_v58  ;;  %v5680_v44 = vpop.f32.mrf.mxu3  ;;  %v10142_v36 = vld [vmem:[%s15619_s1 + $0xdac] sm:$0xf]  ;;  %v8193_v58 = vld [vmem:[%s15619_s1 + $0xdb8] sm:$0xf0] }
 0x2b5   :  { %5923 = vmatpush.bf16.msrb.mxu2 %v7892_v37  ;;  %v8212_v37 = vor.u32 %v10146_v35, %v8209_v29  ;;  %v10174_v41 = vld [vmem:[%s15619_s1 + $0xeac] sm:$0xf]  ;;  %v8449_v51 = vld [vmem:[%s15619_s1 + $0xfb8] sm:$0xf0]  ;;  %v8196_v52 = vor.u32 %v10142_v36, %v8193_v58 }
 0x2b6   :  { %5932 = vmatpush.bf16.msrb.mxu3 %v8084_v39  ;;  %v8340_v39 = vor.u32 %v10178_v30, %v8337_v0  ;;  %v5681_v42 = vadd.f32 %v5680_v44, %v5668_v2  ;;  %v8177_v21 = vld [vmem:[%s15619_s1 + $0xd98] sm:$0xf0]  ;;  %v10170_v43 = vld [vmem:[%s15619_s1 + $0xe8c] sm:$0xf] }
 0x2b7   :  { %5898 = vmatpush.bf16.msrb.mxu0 %v7620_v50  ;;  %v10206_v50 = vld [vmem:[%s15619_s1 + $0xfac] sm:$0xf]  ;;  %v8305_v56 = vld [vmem:[%s15619_s1 + $0xe98] sm:$0xf0] }
 0x2b8   :  { %5911 = vmatpush.bf16.msrb.mxu1 %v7748_v12  ;;  %v8001_v12 = vld [vmem:[%s15619_s1 + $0xc38] sm:$0xf0]  ;;  %v8452_v53 = vor.u32 %v10206_v50, %v8449_v51  ;;  %v10202_v57 = vld [vmem:[%s15619_s1 + $0xf8c] sm:$0xf] }
 0x2b9   :  { %5924 = vmatpush.bf16.msrb.mxu2 %v7876_v45  ;;  %v8324_v45 = vor.u32 %v10174_v41, %v8321_v34  ;;  %v8433_v54 = vld [vmem:[%s15619_s1 + $0xf98] sm:$0xf0]  ;;  %v10090_v62 = vld [vmem:[%s15619_s1 + $0xc0c] sm:$0xf] }
 0x2ba   :  { %5933 = vmatpush.bf16.msrb.mxu3 %v8068_v55  ;;  %v7985_v63 = vld [vmem:[%s15619_s1 + $0xc18] sm:$0xf0]  ;;  %v10134_v24 = vld [vmem:[%s15619_s1 + $0xd6c] sm:$0xf] }
 0x2bb   :  { %5899 = vmatpush.bf16.msrb.mxu0 %v7604_v20  ;;  %v5693_v55 = vpop.f32.mrf.mxu0  ;;  %v5669_v22 = vpop.f32.mrf.mxu2  ;;  %v8161_v25 = vld [vmem:[%s15619_s1 + $0xd78] sm:$0xf0]  ;;  %v10198_v35 = vld [vmem:[%s15619_s1 + $0xf6c] sm:$0xf]  ;;  %v7988_v23 = vor.u32 %v10090_v62, %v7985_v63 }
 0x2bc   :  { %5912 = vmatpush.bf16.msrb.mxu1 %v7732_v3  ;;  %v5694_v59 = vadd.f32 %v5693_v55, %v5681_v42  ;;  %v5706_v61 = vpop.f32.mrf.mxu1  ;;  %v5682_v3 = vpop.f32.mrf.mxu3  ;;  %v8417_v29 = vld [vmem:[%s15619_s1 + $0xf78] sm:$0xf0]  ;;  %v10246_v30 = vld [vmem:[%s15619_s1 + $0x10ec] sm:$0xf]  ;;  %v8164_v33 = vor.u32 %v10134_v24, %v8161_v25 }
 0x2bd   :  { %5925 = vmatpush.bf16.msrb.mxu2 %v7860_v32  ;;  %v8308_v32 = vor.u32 %v10170_v43, %v8305_v56  ;;  %v8609_v0 = vld [vmem:[%s15619_s1 + $0x10f8] sm:$0xf0]  ;;  %v10130_v2 = vld [vmem:[%s15619_s1 + $0xd4c] sm:$0xf] }
 0x2be   :  { %5934 = vmatpush.bf16.msrb.mxu3 %v8052_v10  ;;  %5900 = vmatmul.bf16.vlgmr.msrb.gmra.mxu0 %v11244_v16  ;;  %v8020_v16 = vor.u32 %v10098_v38, %v8017_v60  ;;  %v8436_v10 = vor.u32 %v10202_v57, %v8433_v54  ;;  %v10162_v44 = vld [vmem:[%s15619_s1 + $0xe4c] sm:$0xf]  ;;  %v8612_v38 = vor.u32 %v10246_v30, %v8609_v0  ;;  %v8273_v60 = vld [vmem:[%s15619_s1 + $0xe58] sm:$0xf0] }
 0x2bf   :  { %5944 = vmatpush.bf16.msra.mxu0 %v8228_v11  ;;  %5913 = vmatmul.bf16.vlgmr.msrb.gmra.mxu1 %v11242_v15  ;;  %v10138_v15 = vld [vmem:[%s15619_s1 + $0xd8c] sm:$0xf]  ;;  %v15012_v11 = vadd.f32 %v5706_v61, %v5694_v59  ;;  %v8593_v41 = vld [vmem:[%s15619_s1 + $0x10d8] sm:$0xf0]  ;;  %v8276_v50 = vor.u32 %v10162_v44, %v8273_v60 }
 0x2c0   :  { %5957 = vmatpush.bf16.msra.mxu1 %v8356_v27  ;;  %5926 = vmatmul.bf16.vlgmr.msrb.gmra.mxu2 %v11246_v17  ;;  %v10094_v17 = vld [vmem:[%s15619_s1 + $0xc2c] sm:$0xf]  ;;  %v8180_v26 = vor.u32 %v10138_v15, %v8177_v21  ;;  %v8385_v15 = vld [vmem:[%s15619_s1 + $0xf38] sm:$0xf0] }
 0x2c1   :  { %5970 = vmatpush.bf16.msra.mxu2 %v8484_v28  ;;  %v8004_v20 = vor.u32 %v10094_v17, %v8001_v12  ;;  %v10166_v27 = vld [vmem:[%s15619_s1 + $0xe6c] sm:$0xf]  ;;  %v8289_v28 = vld [vmem:[%s15619_s1 + $0xe78] sm:$0xf0] }
 0x2c2   :  { %5935 = vmatpush.bf16.msrb.mxu3 %v8036_v31  ;;  %v8292_v1 = vor.u32 %v10166_v27, %v8289_v28  ;;  %v8420_v31 = vor.u32 %v10198_v35, %v8417_v29  ;;  %v10242_v58 = vld [vmem:[%s15619_s1 + $0x10cc] sm:$0xf]  ;;  %v8577_v43 = vld [vmem:[%s15619_s1 + $0x10b8] sm:$0xf0] }
 0x2c3   :  { %5945 = vmatpush.bf16.msra.mxu0 %v8212_v37  ;;  %v8145_v37 = vld [vmem:[%s15619_s1 + $0xd58] sm:$0xf0]  ;;  %v5695_v36 = vpop.f32.mrf.mxu0  ;;  %v10158_v17 = vld [vmem:[%s15619_s1 + $0xe2c] sm:$0xf]  ;;  %v8596_v12 = vor.u32 %v10242_v58, %v8593_v41 }
 0x2c4   :  { %5958 = vmatpush.bf16.msra.mxu1 %v8340_v39  ;;  %v10194_v39 = vld [vmem:[%s15619_s1 + $0xf4c] sm:$0xf]  ;;  %v5708_v42 = vpop.f32.mrf.mxu1  ;;  %v8148_v34 = vor.u32 %v10130_v2, %v8145_v37  ;;  %v8113_v57 = vld [vmem:[%s15619_s1 + $0xd18] sm:$0xf0] }
 0x2c5   :  { %5971 = vmatpush.bf16.msra.mxu2 %v8468_v40  ;;  %v8401_v40 = vld [vmem:[%s15619_s1 + $0xf58] sm:$0xf0]  ;;  %v10238_v21 = vld [vmem:[%s15619_s1 + $0x10ac] sm:$0xf] }
 0x2c6   :  { %5936 = vmatpush.bf16.msrb.mxu3 %v8020_v16  ;;  %v8404_v51 = vor.u32 %v10194_v39, %v8401_v40  ;;  %v10126_v16 = vld [vmem:[%s15619_s1 + $0xd2c] sm:$0xf]  ;;  %v8241_v61 = vld [vmem:[%s15619_s1 + $0xe18] sm:$0xf0] }
 0x2c7   :  { %5946 = vmatpush.bf16.msra.mxu0 %v8196_v52  ;;  %v8129_v52 = vld [vmem:[%s15619_s1 + $0xd38] sm:$0xf0]  ;;  %v10122_v56 = vld [vmem:[%s15619_s1 + $0xd0c] sm:$0xf] }
 0x2c8   :  { %5959 = vmatpush.bf16.msra.mxu1 %v8324_v45  ;;  %v8257_v45 = vld [vmem:[%s15619_s1 + $0xe38] sm:$0xf0]  ;;  %v8132_v55 = vor.u32 %v10126_v16, %v8129_v52  ;;  %v10154_v59 = vld [vmem:[%s15619_s1 + $0xe0c] sm:$0xf]  ;;  %v8116_v24 = vor.u32 %v10122_v56, %v8113_v57 }
 0x2c9   :  { %5972 = vmatpush.bf16.msra.mxu2 %v8452_v53  ;;  %v10190_v53 = vld [vmem:[%s15619_s1 + $0xf2c] sm:$0xf]  ;;  %v8561_v63 = vld [vmem:[%s15619_s1 + $0x1098] sm:$0xf0]  ;;  %v8244_v35 = vor.u32 %v10154_v59, %v8241_v61 }
 0x2ca   :  { %5937 = vmatpush.bf16.msrb.mxu3 %v8004_v20  ;;  %v8388_v54 = vor.u32 %v10190_v53, %v8385_v15  ;;  %v10186_v22 = vld [vmem:[%s15619_s1 + $0xf0c] sm:$0xf]  ;;  %v8580_v20 = vor.u32 %v10238_v21, %v8577_v43  ;;  %v8865_v25 = vld [vmem:[%s15619_s1 + $0x12f8] sm:$0xf0] }
 0x2cb   :  { %5947 = vmatpush.bf16.msra.mxu0 %v8180_v26  ;;  %v8369_v26 = vld [vmem:[%s15619_s1 + $0xf18] sm:$0xf0]  ;;  %v10234_v62 = vld [vmem:[%s15619_s1 + $0x108c] sm:$0xf] }
 0x2cc   :  { %5960 = vmatpush.bf16.msra.mxu1 %v8308_v32  ;;  %v10278_v3 = vld [vmem:[%s15619_s1 + $0x11ec] sm:$0xf]  ;;  %v8737_v32 = vld [vmem:[%s15619_s1 + $0x11f8] sm:$0xf0]  ;;  %v8372_v29 = vor.u32 %v10186_v22, %v8369_v26  ;;  %v8564_v30 = vor.u32 %v10234_v62, %v8561_v63 }
 0x2cd   :  { %5973 = vmatpush.bf16.msra.mxu2 %v8436_v10  ;;  %v10310_v10 = vld [vmem:[%s15619_s1 + $0x12ec] sm:$0xf]  ;;  %v8993_v28 = vld [vmem:[%s15619_s1 + $0x13f8] sm:$0xf0]  ;;  %v8740_v0 = vor.u32 %v10278_v3, %v8737_v32 }
 0x2ce   :  { %5938 = vmatpush.bf16.msrb.mxu3 %v7988_v23  ;;  %v10342_v27 = vld [vmem:[%s15619_s1 + $0x13ec] sm:$0xf]  ;;  %v8721_v37 = vld [vmem:[%s15619_s1 + $0x11d8] sm:$0xf0] }
 0x2cf   :  { %5948 = vmatpush.bf16.msra.mxu0 %v8164_v33  ;;  %v10230_v23 = vld [vmem:[%s15619_s1 + $0x106c] sm:$0xf]  ;;  %v8545_v33 = vld [vmem:[%s15619_s1 + $0x1078] sm:$0xf0] }
 0x2d0   :  { %5961 = vmatpush.bf16.msra.mxu1 %v8292_v1  ;;  %v8868_v1 = vor.u32 %v10310_v10, %v8865_v25  ;;  %v10274_v2 = vld [vmem:[%s15619_s1 + $0x11cc] sm:$0xf]  ;;  %v8977_v39 = vld [vmem:[%s15619_s1 + $0x13d8] sm:$0xf0]  ;;  %v8548_v36 = vor.u32 %v10230_v23, %v8545_v33 }
 0x2d1   :  { %5974 = vmatpush.bf16.msra.mxu2 %v8420_v31  ;;  %5939 = vmatmul.bf16.vlgmr.msrb.gmra.mxu3 %v11408_v46  ;;  %v8260_v46 = vor.u32 %v10158_v17, %v8257_v45  ;;  %v8996_v31 = vor.u32 %v10342_v27, %v8993_v28  ;;  %v10306_v44 = vld [vmem:[%s15619_s1 + $0x12cc] sm:$0xf]  ;;  %v8724_v41 = vor.u32 %v10274_v2, %v8721_v37  ;;  %v8833_v45 = vld [vmem:[%s15619_s1 + $0x12b8] sm:$0xf0] }
 0x2d2   :  { %5983 = vmatpush.bf16.msra.mxu3 %v8612_v38  ;;  %v8849_v38 = vld [vmem:[%s15619_s1 + $0x12d8] sm:$0xf0]  ;;  %v10338_v60 = vld [vmem:[%s15619_s1 + $0x13cc] sm:$0xf] }
 0x2d3   :  { %5949 = vmatpush.bf16.msra.mxu0 %v8148_v34  ;;  %v5719_v40 = vpop.f32.mrf.mxu2  ;;  %v10226_v34 = vld [vmem:[%s15619_s1 + $0x104c] sm:$0xf]  ;;  %v8980_v16 = vor.u32 %v10338_v60, %v8977_v39  ;;  %v8961_v15 = vld [vmem:[%s15619_s1 + $0x13b8] sm:$0xf0] }
 0x2d4   :  { %5962 = vmatpush.bf16.msra.mxu1 %v8276_v50  ;;  %v5720_v58 = vadd.f32 %v5719_v40, %v15012_v11  ;;  %v5732_v42 = vpop.f32.mrf.mxu3  ;;  %v8529_v50 = vld [vmem:[%s15619_s1 + $0x1058] sm:$0xf0]  ;;  %v10270_v52 = vld [vmem:[%s15619_s1 + $0x11ac] sm:$0xf] }
 0x2d5   :  { %5975 = vmatpush.bf16.msra.mxu2 %v8404_v51  ;;  %v8852_v51 = vor.u32 %v10306_v44, %v8849_v38  ;;  %v8705_v11 = vld [vmem:[%s15619_s1 + $0x11b8] sm:$0xf0]  ;;  %v10302_v17 = vld [vmem:[%s15619_s1 + $0x12ac] sm:$0xf] }
 0x2d6   :  { %5984 = vmatpush.bf16.msra.mxu3 %v8596_v12  ;;  %v5733_v12 = vadd.f32 %v5732_v42, %v5720_v58  ;;  %v10334_v53 = vld [vmem:[%s15619_s1 + $0x13ac] sm:$0xf]  ;;  %v8708_v21 = vor.u32 %v10270_v52, %v8705_v11  ;;  %v8513_v43 = vld [vmem:[%s15619_s1 + $0x1038] sm:$0xf0] }
 0x2d7   :  { %5950 = vmatpush.bf16.msra.mxu0 %v8132_v55  ;;  %v8836_v55 = vor.u32 %v10302_v17, %v8833_v45  ;;  %v8964_v56 = vor.u32 %v10334_v53, %v8961_v15  ;;  %v8689_v57 = vld [vmem:[%s15619_s1 + $0x1198] sm:$0xf0]  ;;  %v10330_v59 = vld [vmem:[%s15619_s1 + $0x138c] sm:$0xf] }
 0x2d8   :  { %5963 = vmatpush.bf16.msra.mxu1 %v8260_v46  ;;  %v10298_v46 = vld [vmem:[%s15619_s1 + $0x128c] sm:$0xf]  ;;  %v8945_v61 = vld [vmem:[%s15619_s1 + $0x1398] sm:$0xf0] }
 0x2d9   :  { %5976 = vmatpush.bf16.msra.mxu2 %v8388_v54  ;;  %v8817_v54 = vld [vmem:[%s15619_s1 + $0x1298] sm:$0xf0]  ;;  %v10218_v32 = vld [vmem:[%s15619_s1 + $0x100c] sm:$0xf]  ;;  %v8948_v27 = vor.u32 %v10330_v59, %v8945_v61 }
 0x2da   :  { %5985 = vmatpush.bf16.msra.mxu3 %v8580_v20  ;;  %v8497_v10 = vld [vmem:[%s15619_s1 + $0x1018] sm:$0xf0]  ;;  %v8820_v25 = vor.u32 %v10298_v46, %v8817_v54  ;;  %v10262_v28 = vld [vmem:[%s15619_s1 + $0x116c] sm:$0xf] }
 0x2db   :  { %5951 = vmatpush.bf16.msra.mxu0 %v8116_v24  ;;  %v5745_v22 = vpop.f32.mrf.mxu0  ;;  %v5721_v20 = vpop.f32.mrf.mxu2  ;;  %v10326_v23 = vld [vmem:[%s15619_s1 + $0x136c] sm:$0xf]  ;;  %v8929_v33 = vld [vmem:[%s15619_s1 + $0x1378] sm:$0xf0]  ;;  %v8500_v2 = vor.u32 %v10218_v32, %v8497_v10 }
 0x2dc   :  { %5964 = vmatpush.bf16.msra.mxu1 %v8244_v35  ;;  %v5746_v26 = vadd.f32 %v5745_v22, %v5733_v12  ;;  %v5758_v3 = vpop.f32.mrf.mxu1  ;;  %v5734_v24 = vpop.f32.mrf.mxu3  ;;  %v8673_v35 = vld [vmem:[%s15619_s1 + $0x1178] sm:$0xf0]  ;;  %v8932_v38 = vor.u32 %v10326_v23, %v8929_v33  ;;  %v10258_v60 = vld [vmem:[%s15619_s1 + $0x114c] sm:$0xf] }
 0x2dd   :  { %5977 = vmatpush.bf16.msra.mxu2 %v8372_v29  ;;  %v10294_v29 = vld [vmem:[%s15619_s1 + $0x126c] sm:$0xf]  ;;  %v8676_v37 = vor.u32 %v10262_v28, %v8673_v35  ;;  %v8657_v39 = vld [vmem:[%s15619_s1 + $0x1158] sm:$0xf0] }
 0x2de   :  { %5986 = vmatpush.bf16.msra.mxu3 %v8564_v30  ;;  %5952 = vmatmul.bf16.vlgmr.msra.gmra.mxu0 %v11412_v48  ;;  %v8532_v48 = vor.u32 %v10226_v34, %v8529_v50  ;;  %v5759_v30 = vadd.f32 %v5758_v3, %v5746_v26  ;;  %v10290_v40 = vld [vmem:[%s15619_s1 + $0x124c] sm:$0xf]  ;;  %v8785_v58 = vld [vmem:[%s15619_s1 + $0x1258] sm:$0xf0] }
 0x2df   :  { %5996 = vmatpush.bf16.msrb.mxu0 %v8740_v0  ;;  %5965 = vmatmul.bf16.vlgmr.msra.gmra.mxu1 %v11410_v47  ;;  %v10266_v47 = vld [vmem:[%s15619_s1 + $0x118c] sm:$0xf]  ;;  %v8801_v0 = vld [vmem:[%s15619_s1 + $0x1278] sm:$0xf0]  ;;  %v8788_v17 = vor.u32 %v10290_v40, %v8785_v58 }
 0x2e0   :  { %6009 = vmatpush.bf16.msrb.mxu1 %v8868_v1  ;;  %5978 = vmatmul.bf16.vlgmr.msra.gmra.mxu2 %v11414_v49  ;;  %v10222_v49 = vld [vmem:[%s15619_s1 + $0x102c] sm:$0xf]  ;;  %v8692_v63 = vor.u32 %v10266_v47, %v8689_v57  ;;  %v8804_v44 = vor.u32 %v10294_v29, %v8801_v0  ;;  %v8913_v42 = vld [vmem:[%s15619_s1 + $0x1358] sm:$0xf0] }
 0x2e1   :  { %6022 = vmatpush.bf16.msrb.mxu2 %v8996_v31  ;;  %v8516_v62 = vor.u32 %v10222_v49, %v8513_v43  ;;  %v10374_v1 = vld [vmem:[%s15619_s1 + $0x14ec] sm:$0xf]  ;;  %v9121_v31 = vld [vmem:[%s15619_s1 + $0x14f8] sm:$0xf0] }
 0x2e2   :  { %5987 = vmatpush.bf16.msra.mxu3 %v8548_v36  ;;  %v9124_v36 = vor.u32 %v10374_v1, %v9121_v31  ;;  %v10370_v34 = vld [vmem:[%s15619_s1 + $0x14cc] sm:$0xf]  ;;  %v9105_v50 = vld [vmem:[%s15619_s1 + $0x14d8] sm:$0xf0] }
 0x2e3   :  { %5997 = vmatpush.bf16.msrb.mxu0 %v8724_v41  ;;  %v10322_v41 = vld [vmem:[%s15619_s1 + $0x134c] sm:$0xf]  ;;  %v5771_v11 = vpop.f32.mrf.mxu2  ;;  %v8641_v53 = vld [vmem:[%s15619_s1 + $0x1138] sm:$0xf0] }
 0x2e4   :  { %6010 = vmatpush.bf16.msrb.mxu1 %v8852_v51  ;;  %v5747_v51 = vpop.f32.mrf.mxu0  ;;  %v5760_v52 = vpop.f32.mrf.mxu1  ;;  %v8916_v12 = vor.u32 %v10322_v41, %v8913_v42  ;;  %v10254_v45 = vld [vmem:[%s15619_s1 + $0x112c] sm:$0xf]  ;;  %v8769_v49 = vld [vmem:[%s15619_s1 + $0x1238] sm:$0xf0] }
 0x2e5   :  { %6023 = vmatpush.bf16.msrb.mxu2 %v8980_v16  ;;  %v8660_v16 = vor.u32 %v10258_v60, %v8657_v39  ;;  %v10286_v15 = vld [vmem:[%s15619_s1 + $0x122c] sm:$0xf]  ;;  %v9089_v47 = vld [vmem:[%s15619_s1 + $0x14b8] sm:$0xf0]  ;;  %v8644_v57 = vor.u32 %v10254_v45, %v8641_v53 }
 0x2e6   :  { %5988 = vmatpush.bf16.msra.mxu3 %v8532_v48  ;;  %v15268_v48 = vadd.f32 %v5771_v11, %v5759_v30  ;;  %v10318_v43 = vld [vmem:[%s15619_s1 + $0x132c] sm:$0xf]  ;;  %v8625_v54 = vld [vmem:[%s15619_s1 + $0x1118] sm:$0xf0] }
 0x2e7   :  { %5998 = vmatpush.bf16.msrb.mxu0 %v8708_v21  ;;  %v9108_v21 = vor.u32 %v10370_v34, %v9105_v50  ;;  %v10250_v46 = vld [vmem:[%s15619_s1 + $0x110c] sm:$0xf]  ;;  %v8753_v22 = vld [vmem:[%s15619_s1 + $0x1218] sm:$0xf0]  ;;  %v10527_v50 = vld [vmem:[%s15620_s2] sm:$0xf] }
 0x2e8   :  { %6011 = vmatpush.bf16.msrb.mxu1 %v8836_v55  ;;  %v8897_v55 = vld [vmem:[%s15619_s1 + $0x1338] sm:$0xf0]  ;;  %v10282_v61 = vld [vmem:[%s15619_s1 + $0x120c] sm:$0xf]  ;;  %v815_v51 = vperm.slane %v10527_v50, 3 }
 0x2e9   :  { %6024 = vmatpush.bf16.msrb.mxu2 %v8964_v56  ;;  %v10366_v56 = vld [vmem:[%s15619_s1 + $0x14ac] sm:$0xf]  ;;  %v8900_v59 = vor.u32 %v10318_v43, %v8897_v55  ;;  %v9073_v3 = vld [vmem:[%s15619_s1 + $0x1498] sm:$0xf0]  ;;  %v8756_v29 = vor.u32 %v10282_v61, %v8753_v22 }
 0x2ea   :  { %5989 = vmatpush.bf16.msra.mxu3 %v8516_v62  ;;  %v10314_v20 = vld [vmem:[%s15619_s1 + $0x130c] sm:$0xf]  ;;  %v9092_v26 = vor.u32 %v10366_v56, %v9089_v47  ;;  %v8881_v62 = vld [vmem:[%s15619_s1 + $0x1318] sm:$0xf0] }
 0x2eb   :  { %5999 = vmatpush.bf16.msrb.mxu0 %v8692_v63  ;;  %v10362_v63 = vld [vmem:[%s15619_s1 + $0x148c] sm:$0xf]  ;;  %v9249_v10 = vld [vmem:[%s15619_s1 + $0x15f8] sm:$0xf0]  ;;  %v8884_v30 = vor.u32 %v10314_v20, %v8881_v62  ;;  %v5773_v0 = vpop.f32.mrf.mxu2 }
 0x2ec   :  { %6012 = vmatpush.bf16.msrb.mxu1 %v8820_v25  ;;  %v10406_v32 = vld [vmem:[%s15619_s1 + $0x15ec] sm:$0xf]  ;;  %v8628_v25 = vor.u32 %v10250_v46, %v8625_v54  ;;  %v9505_v35 = vld [vmem:[%s15619_s1 + $0x17f8] sm:$0xf0]  ;;  %v9076_v23 = vor.u32 %v10362_v63, %v9073_v3 }
 0x2ed   :  { %6025 = vmatpush.bf16.msrb.mxu2 %v8948_v27  ;;  %v10438_v24 = vld [vmem:[%s15619_s1 + $0x16ec] sm:$0xf]  ;;  %v9377_v27 = vld [vmem:[%s15619_s1 + $0x16f8] sm:$0xf0]  ;;  %v9252_v33 = vor.u32 %v10406_v32, %v9249_v10 }
 0x2ee   :  { %5990 = vmatpush.bf16.msra.mxu3 %v8500_v2  ;;  %v10470_v28 = vld [vmem:[%s15619_s1 + $0x17ec] sm:$0xf]  ;;  %v9057_v31 = vld [vmem:[%s15619_s1 + $0x1478] sm:$0xf0]  ;;  %v9380_v2 = vor.u32 %v10438_v24, %v9377_v27 }
 0x2ef   :  { %6000 = vmatpush.bf16.msrb.mxu0 %v8676_v37  ;;  %v10358_v1 = vld [vmem:[%s15619_s1 + $0x146c] sm:$0xf]  ;;  %v9508_v37 = vor.u32 %v10470_v28, %v9505_v35  ;;  %v9361_v39 = vld [vmem:[%s15619_s1 + $0x16d8] sm:$0xf0] }
 0x2f0   :  { %6013 = vmatpush.bf16.msrb.mxu1 %v8804_v44  ;;  %v10402_v44 = vld [vmem:[%s15619_s1 + $0x15cc] sm:$0xf]  ;;  %v9060_v58 = vor.u32 %v10358_v1, %v9057_v31  ;;  %v9041_v34 = vld [vmem:[%s15619_s1 + $0x1458] sm:$0xf0] }
 0x2f1   :  { %6026 = vmatpush.bf16.msrb.mxu2 %v8932_v38  ;;  %5991 = vmatmul.bf16.vlgmr.msra.gmra.mxu3 %v11645_v9  ;;  %v8772_v9 = vor.u32 %v10286_v15, %v8769_v49  ;;  %v9233_v38 = vld [vmem:[%s15619_s1 + $0x15d8] sm:$0xf0]  ;;  %v10434_v60 = vld [vmem:[%s15619_s1 + $0x16cc] sm:$0xf] }
 0x2f2   :  { %6035 = vmatpush.bf16.msrb.mxu3 %v9124_v36  ;;  %v10466_v40 = vld [vmem:[%s15619_s1 + $0x17cc] sm:$0xf]  ;;  %v9489_v36 = vld [vmem:[%s15619_s1 + $0x17d8] sm:$0xf0]  ;;  %v9236_v41 = vor.u32 %v10402_v44, %v9233_v38  ;;  %v9364_v52 = vor.u32 %v10434_v60, %v9361_v39 }
 0x2f3   :  { %6001 = vmatpush.bf16.msrb.mxu0 %v8660_v16  ;;  %v10354_v42 = vld [vmem:[%s15619_s1 + $0x144c] sm:$0xf]  ;;  %v9492_v11 = vor.u32 %v10466_v40, %v9489_v36  ;;  %v9345_v53 = vld [vmem:[%s15619_s1 + $0x16b8] sm:$0xf0] }
 0x2f4   :  { %6014 = vmatpush.bf16.msrb.mxu1 %v8788_v17  ;;  %v5784_v16 = vpop.f32.mrf.mxu3  ;;  %v10398_v17 = vld [vmem:[%s15619_s1 + $0x15ac] sm:$0xf]  ;;  %v9044_v49 = vor.u32 %v10354_v42, %v9041_v34  ;;  %v9025_v43 = vld [vmem:[%s15619_s1 + $0x1438] sm:$0xf0] }
 0x2f5   :  { %6027 = vmatpush.bf16.msrb.mxu2 %v8916_v12  ;;  %v9217_v12 = vld [vmem:[%s15619_s1 + $0x15b8] sm:$0xf0]  ;;  %v10430_v45 = vld [vmem:[%s15619_s1 + $0x16ac] sm:$0xf]  ;;  %v5785_v55 = vadd.f32 %v5784_v16, %v815_v51 }
 0x2f6   :  { %6036 = vmatpush.bf16.msrb.mxu3 %v9108_v21  ;;  %v10462_v15 = vld [vmem:[%s15619_s1 + $0x17ac] sm:$0xf]  ;;  %v9473_v21 = vld [vmem:[%s15619_s1 + $0x17b8] sm:$0xf0]  ;;  %v9348_v56 = vor.u32 %v10430_v45, %v9345_v53 }
 0x2f7   :  { %6002 = vmatpush.bf16.msrb.mxu0 %v8644_v57  ;;  %v9476_v47 = vor.u32 %v10462_v15, %v9473_v21  ;;  %v9201_v57 = vld [vmem:[%s15619_s1 + $0x1598] sm:$0xf0]  ;;  %v10426_v46 = vld [vmem:[%s15619_s1 + $0x168c] sm:$0xf] }
 0x2f8   :  { %6015 = vmatpush.bf16.msrb.mxu1 %v8772_v9  ;;  %v9329_v54 = vld [vmem:[%s15619_s1 + $0x1698] sm:$0xf0]  ;;  %v10458_v9 = vld [vmem:[%s15619_s1 + $0x178c] sm:$0xf] }
 0x2f9   :  { %6028 = vmatpush.bf16.msrb.mxu2 %v8900_v59  ;;  %v9457_v59 = vld [vmem:[%s15619_s1 + $0x1798] sm:$0xf0]  ;;  %v9332_v10 = vor.u32 %v10426_v46, %v9329_v54  ;;  %v10422_v28 = vld [vmem:[%s15619_s1 + $0x166c] sm:$0xf] }
 0x2fa   :  { %6037 = vmatpush.bf16.msrb.mxu3 %v9092_v26  ;;  %v10346_v26 = vld [vmem:[%s15619_s1 + $0x140c] sm:$0xf]  ;;  %v9009_v62 = vld [vmem:[%s15619_s1 + $0x1418] sm:$0xf0]  ;;  %v9460_v24 = vor.u32 %v10458_v9, %v9457_v59 }
 0x2fb   :  { %6003 = vmatpush.bf16.msrb.mxu0 %v8628_v25  ;;  %v5797_v61 = vpop.f32.mrf.mxu0  ;;  %v10390_v25 = vld [vmem:[%s15619_s1 + $0x156c] sm:$0xf]  ;;  %v9185_v27 = vld [vmem:[%s15619_s1 + $0x1578] sm:$0xf0]  ;;  %v9012_v1 = vor.u32 %v10346_v26, %v9009_v62 }
 0x2fc   :  { %6016 = vmatpush.bf16.msrb.mxu1 %v8756_v29  ;;  %v5798_v63 = vadd.f32 %v5797_v61, %v5785_v55  ;;  %v5810_v3 = vpop.f32.mrf.mxu1  ;;  %v5786_v32 = vpop.f32.mrf.mxu3  ;;  %v9313_v35 = vld [vmem:[%s15619_s1 + $0x1678] sm:$0xf0]  ;;  %v10454_v29 = vld [vmem:[%s15619_s1 + $0x176c] sm:$0xf]  ;;  %v9188_v31 = vor.u32 %v10390_v25, %v9185_v27  ;;  %v10495_v25 = vld [vmem:[%s15621_s3 + $0x30] sm:$0xff] }
 0x2fd   :  { %6029 = vmatpush.bf16.msrb.mxu2 %v8884_v30  ;;  %v9441_v30 = vld [vmem:[%s15619_s1 + $0x1778] sm:$0xf0]  ;;  %v10386_v44 = vld [vmem:[%s15619_s1 + $0x154c] sm:$0xf]  ;;  %v10503_v27 = vld [vmem:[%s15621_s3 + $0x70] sm:$0xff] }
 0x2fe   :  { %6038 = vmatpush.bf16.msrb.mxu3 %v9076_v23  ;;  %6004 = vmatmul.bf16.vlgmr.msrb.gmra.mxu0 %v11655_v14  ;;  %v9220_v14 = vor.u32 %v10398_v17, %v9217_v12  ;;  %v5811_v0 = vadd.f32 %v5810_v3, %v5798_v63  ;;  %v10486_v23 = vld [vmem:[%s15619_s1 + $0x186c] sm:$0xf]  ;;  %v9169_v38 = vld [vmem:[%s15619_s1 + $0x1558] sm:$0xf0] }
 0x2ff   :  { %6048 = vmatpush.bf16.msra.mxu0 %v9252_v33  ;;  %6017 = vmatmul.bf16.vlgmr.msrb.gmra.mxu1 %v11653_v13  ;;  %v10394_v13 = vld [vmem:[%s15619_s1 + $0x158c] sm:$0xf]  ;;  %v9569_v33 = vld [vmem:[%s15619_s1 + $0x1878] sm:$0xf0]  ;;  %v9172_v16 = vor.u32 %v10386_v44, %v9169_v38 }
 0x300   :  { %6061 = vmatpush.bf16.msra.mxu1 %v9380_v2  ;;  %6030 = vmatmul.bf16.vlgmr.msrb.gmra.mxu2 %v11657_v18  ;;  %v10350_v18 = vld [vmem:[%s15619_s1 + $0x142c] sm:$0xf]  ;;  %v9204_v20 = vor.u32 %v10394_v13, %v9201_v57  ;;  %v9316_v2 = vor.u32 %v10422_v28, %v9313_v35  ;;  %v9572_v40 = vor.u32 %v10486_v23, %v9569_v33  ;;  %v9297_v36 = vld [vmem:[%s15619_s1 + $0x1658] sm:$0xf0]  ;;  %v10511_v35 = vld [vmem:[%s15621_s3 + $0xb0] sm:$0xff] }
 0x301   :  { %6074 = vmatpush.bf16.msra.mxu2 %v9508_v37  ;;  %v9028_v22 = vor.u32 %v10350_v18, %v9025_v43  ;;  %v9444_v37 = vor.u32 %v10454_v29, %v9441_v30  ;;  %v10418_v60 = vld [vmem:[%s15619_s1 + $0x164c] sm:$0xf]  ;;  %v9553_v50 = vld [vmem:[%s15619_s1 + $0x1858] sm:$0xf0]  ;;  %v10528_v23 = vld [vmem:[#allocation1] sm:$0xff] }
 0x302   :  { %6039 = vmatpush.bf16.msrb.mxu3 %v9060_v58  ;;  %v10450_v58 = vld [vmem:[%s15619_s1 + $0x174c] sm:$0xf]  ;;  %v9153_v45 = vld [vmem:[%s15619_s1 + $0x1538] sm:$0xf0]  ;;  %v10493_v33 = vld [vmem:[%s15621_s3 + $0x20] sm:$0xff] }
 0x303   :  { %6049 = vmatpush.bf16.msra.mxu0 %v9236_v41  ;;  %v5823_v39 = vpop.f32.mrf.mxu2  ;;  %v9425_v41 = vld [vmem:[%s15619_s1 + $0x1758] sm:$0xf0]  ;;  %v10482_v34 = vld [vmem:[%s15619_s1 + $0x184c] sm:$0xf]  ;;  %v5799_v51 = vpop.f32.mrf.mxu0 }
 0x304   :  { %6062 = vmatpush.bf16.msra.mxu1 %v9364_v52  ;;  %v5824_v42 = vadd.f32 %v5823_v39, %v5811_v0  ;;  %v5812_v52 = vpop.f32.mrf.mxu1  ;;  %v9428_v17 = vor.u32 %v10450_v58, %v9425_v41  ;;  %v10382_v12 = vld [vmem:[%s15619_s1 + $0x152c] sm:$0xf]  ;;  %v9556_v15 = vor.u32 %v10482_v34, %v9553_v50  ;;  %v9281_v21 = vld [vmem:[%s15619_s1 + $0x1638] sm:$0xf0]  ;;  %v10491_v41 = vld [vmem:[%s15621_s3 + $0x10] sm:$0xff] }
 0x305   :  { %6075 = vmatpush.bf16.msra.mxu2 %v9492_v11  ;;  %v9300_v11 = vor.u32 %v10418_v60, %v9297_v36  ;;  %v10414_v53 = vld [vmem:[%s15619_s1 + $0x162c] sm:$0xf]  ;;  %v9537_v43 = vld [vmem:[%s15619_s1 + $0x1838] sm:$0xf0]  ;;  %v9156_v55 = vor.u32 %v10382_v12, %v9153_v45  ;;  %v10507_v50 = vld [vmem:[%s15621_s3 + $0x90] sm:$0xff]  ;;  %v6100_v45 = vmax.f32 %v12835_v19, 0.0 }
 0x306   :  { %6040 = vmatpush.bf16.msrb.mxu3 %v9044_v49  ;;  %v10446_v49 = vld [vmem:[%s15619_s1 + $0x172c] sm:$0xf]  ;;  %v9265_v9 = vld [vmem:[%s15619_s1 + $0x1618] sm:$0xf0]  ;;  %v10497_v12 = vld [vmem:[%s15621_s3 + $0x40] sm:$0xff] }
 0x307   :  { %6050 = vmatpush.bf16.msra.mxu0 %v9220_v14  ;;  %v9409_v14 = vld [vmem:[%s15619_s1 + $0x1738] sm:$0xf0]  ;;  %v10478_v18 = vld [vmem:[%s15619_s1 + $0x182c] sm:$0xf] }
 0x308   :  { %6063 = vmatpush.bf16.msra.mxu1 %v9348_v56  ;;  %v9284_v56 = vor.u32 %v10414_v53, %v9281_v21  ;;  %v10378_v13 = vld [vmem:[%s15619_s1 + $0x150c] sm:$0xf]  ;;  %v9540_v54 = vor.u32 %v10478_v18, %v9537_v43  ;;  %v9393_v61 = vld [vmem:[%s15619_s1 + $0x1718] sm:$0xf0]  ;;  %v6101_v53 = vmax.f32 %v14038_v8, 0.0  ;;  %v6102_v21 = vmax.f32 %v15268_v48, 0.0 }
 0x309   :  { %6076 = vmatpush.bf16.msra.mxu2 %v9476_v47  ;;  %v9412_v47 = vor.u32 %v10446_v49, %v9409_v14  ;;  %v10410_v57 = vld [vmem:[%s15619_s1 + $0x160c] sm:$0xf]  ;;  %v9521_v26 = vld [vmem:[%s15619_s1 + $0x1818] sm:$0xf0]  ;;  %v6104_v49 = vpack.c.bf16 %v6100_v45, %v6100_v45 }
 0x30a   :  { %6041 = vmatpush.bf16.msrb.mxu3 %v9028_v22  ;;  %v10442_v59 = vld [vmem:[%s15619_s1 + $0x170c] sm:$0xf]  ;;  %v9268_v62 = vor.u32 %v10410_v57, %v9265_v9  ;;  %v10496_v3 = vld [vmem:[%s15621_s3 + $0x38] sm:$0xff]  ;;  %v6105_v14 = vpack.c.bf16 %v6101_v53, %v6101_v53  ;;  %v6106_v18 = vpack.c.bf16 %v6102_v21, %v6102_v21 }
 0x30b   :  { %6051 = vmatpush.bf16.msra.mxu0 %v9204_v20  ;;  %v5825_v46 = vpop.f32.mrf.mxu2  ;;  %v10474_v20 = vld [vmem:[%s15619_s1 + $0x180c] sm:$0xf]  ;;  %v9396_v63 = vor.u32 %v10442_v59, %v9393_v61  ;;  %v10504_v32 = vld [vmem:[%s15621_s3 + $0x78] sm:$0xff] }
 0x30c   :  { %6064 = vmatpush.bf16.msra.mxu1 %v9332_v10  ;;  %v10512_v10 = vld [vmem:[%s15621_s3 + $0xb8] sm:$0xff]  ;;  %v10494_v30 = vld [vmem:[%s15621_s3 + $0x28] sm:$0xff] }
 0x30d   :  { %6077 = vmatpush.bf16.msra.mxu2 %v9460_v24  ;;  %v9524_v24 = vor.u32 %v10474_v20, %v9521_v26  ;;  %v10502_v0 = vld [vmem:[%s15621_s3 + $0x68] sm:$0xff]  ;;  %v10492_v38 = vld [vmem:[%s15621_s3 + $0x18] sm:$0xff] }
 0x30e   :  { %6042 = vmatpush.bf16.msrb.mxu3 %v9012_v1  ;;  %v10501_v1 = vld [vmem:[%s15621_s3 + $0x60] sm:$0xff]  ;;  %v10500_v60 = vld [vmem:[%s15621_s3 + $0x58] sm:$0xff]  ;;  %v10490_v51 = vld [vmem:[%s15621_s3 + $0x8] sm:$0xff] }
 0x30f   :  { %6052 = vmatpush.bf16.msra.mxu0 %v9188_v31  ;;  %v10508_v39 = vld [vmem:[%s15621_s3 + $0x98] sm:$0xff]  ;;  %v10506_v52 = vld [vmem:[%s15621_s3 + $0x88] sm:$0xff] }
 0x310   :  { %6065 = vmatpush.bf16.msra.mxu1 %v9316_v2  ;;  %v10520_v20 = vld [vmem:[%s15621_s3 + $0xf8] sm:$0xff] }
 0x311   :  { %6078 = vmatpush.bf16.msra.mxu2 %v9444_v37  ;;  %6043 = vmatmul.bf16.vlgmr.msrb.gmra.mxu3 %v11738_v4  ;;  %v9137_v4 = vld [vmem:[%s15619_s1 + $0x1518] sm:$0xf0]  ;;  %v10509_v37 = vld [vmem:[%s15621_s3 + $0xa0] sm:$0xff] }
 0x312   :  { %6091 = vmatpush.bf16.msra.mxu3 %v9572_v40  ;;  %v9140_v22 = vor.u32 %v10378_v13, %v9137_v4 }
 0x313   :  { %6053 = vmatpush.bf16.msra.mxu0 %v9172_v16  ;;  %v10498_v16 = vld [vmem:[%s15621_s3 + $0x48] sm:$0xff] }
 0x314   :  { %6066 = vmatpush.bf16.msra.mxu1 %v9300_v11  ;;  %v5836_v28 = vpop.f32.mrf.mxu3 }
 0x315   :  { %6079 = vmatpush.bf16.msra.mxu2 %v9428_v17  ;;  %v5837_v29 = vadd.f32 %v5836_v28, %v5824_v42  ;;  %v10499_v42 = vld [vmem:[%s15621_s3 + $0x50] sm:$0xff]  ;;  %v10489_v17 = vld [vmem:[%s15621_s3] sm:$0xff] }
 0x316   :  { %6092 = vmatpush.bf16.msra.mxu3 %v9556_v15  ;;  %v10505_v15 = vld [vmem:[%s15621_s3 + $0x80] sm:$0xff] }
 0x317   :  { %6054 = vmatpush.bf16.msra.mxu0 %v9156_v55 }
 0x318   :  { %6067 = vmatpush.bf16.msra.mxu1 %v9284_v56 }
 0x319   :  { %6080 = vmatpush.bf16.msra.mxu2 %v9412_v47 }
 0x31a   :  { %6093 = vmatpush.bf16.msra.mxu3 %v9540_v54 }
 0x31b   :  { %6055 = vmatpush.bf16.msra.mxu0 %v9140_v22 }
 0x31c   :  { %6068 = vmatpush.bf16.msra.mxu1 %v9268_v62  ;;  %v5862_v31 = vpop.f32.mrf.mxu1  ;;  %v5838_v2 = vpop.f32.mrf.mxu3  ;;  %v10519_v62 = vld [vmem:[%s15621_s3 + $0xf0] sm:$0xff] }
 0x31d   :  { %6081 = vmatpush.bf16.msra.mxu2 %v9396_v63 }
 0x31e   :  { %6094 = vmatpush.bf16.msra.mxu3 %v9524_v24  ;;  %6056 = vmatmul.bf16.vlgmr.msra.gmra.mxu0 %v11742_v6  ;;  %v5849_v6 = vpop.f32.mrf.mxu0  ;;  %v10517_v24 = vld [vmem:[%s15621_s3 + $0xe0] sm:$0xff] }
 0x31f   :  { %6368 = vmatpush.bf16.msrb.mxu0 %v10496_v3  ;;  %6069 = vmatmul.bf16.vlgmr.msra.gmra.mxu1 %v11740_v5  ;;  %v10510_v5 = vld [vmem:[%s15621_s3 + $0xa8] sm:$0xff] }
 0x320   :  { %6381 = vmatpush.bf16.msrb.mxu1 %v10504_v32  ;;  %6082 = vmatmul.bf16.vlgmr.msra.gmra.mxu2 %v11744_v7  ;;  %v5850_v7 = vadd.f32 %v5849_v6, %v5837_v29 }
 0x321   :  { %6394 = vmatpush.bf16.msrb.mxu2 %v10512_v10  ;;  %9576 = vmatmul.msk.bf16.vlgmr.msra.gmra.mxu3 %vm4797_vm0, %v10528_v23  ;;  %v10518_v10 = vld [vmem:[%s15621_s3 + $0xe8] sm:$0xff] }
 0x322   :  { %v5863_v44 = vadd.f32 %v5862_v31, %v5850_v7  ;;  %6407 = vmatpush.bf16.msrb.mxu3 %v10520_v20  ;;  %v10514_v23 = vld [vmem:[%s15621_s3 + $0xc8] sm:$0xff] }
 0x323   :  { %6369 = vmatpush.bf16.msrb.mxu0 %v10495_v25  ;;  %v5875_v40 = vpop.f32.mrf.mxu2 }
 0x324   :  { %6382 = vmatpush.bf16.msrb.mxu1 %v10503_v27  ;;  %v5876_v36 = vadd.f32 %v5875_v40, %v5863_v44  ;;  %v5864_v34 = vpop.f32.mrf.mxu1  ;;  %v10516_v27 = vld [vmem:[%s15621_s3 + $0xd8] sm:$0xff] }
 0x325   :  { %6395 = vmatpush.bf16.msrb.mxu2 %v10511_v35 }
 0x326   :  { %v5851_v58 = vpop.f32.mrf.mxu0  ;;  %6408 = vmatpush.bf16.msrb.mxu3 %v10519_v62 }
 0x327   :  { %6370 = vmatpush.bf16.msrb.mxu0 %v10494_v30  ;;  %v10515_v30 = vld [vmem:[%s15621_s3 + $0xd0] sm:$0xff] }
 0x328   :  { %6383 = vmatpush.bf16.msrb.mxu1 %v10502_v0 }
 0x329   :  { %6396 = vmatpush.bf16.msrb.mxu2 %v10510_v5 }
 0x32a   :  { %6409 = vmatpush.bf16.msrb.mxu3 %v10518_v10 }
 0x32b   :  { %6371 = vmatpush.bf16.msrb.mxu0 %v10493_v33  ;;  %v5877_v11 = vpop.f32.mrf.mxu2  ;;  %v10513_v33 = vld [vmem:[%s15621_s3 + $0xc0] sm:$0xff] }
 0x32c   :  { %6384 = vmatpush.bf16.msrb.mxu1 %v10501_v1 }
 0x32d   :  { %6397 = vmatpush.bf16.msrb.mxu2 %v10509_v37 }
 0x32e   :  { %6410 = vmatpush.bf16.msrb.mxu3 %v10517_v24 }
 0x32f   :  { %6372 = vmatpush.bf16.msrb.mxu0 %v10492_v38 }
 0x330   :  { %6385 = vmatpush.bf16.msrb.mxu1 %v10500_v60 }
 0x331   :  { %6398 = vmatpush.bf16.msrb.mxu2 %v10508_v39 }
 0x332   :  { %6411 = vmatpush.bf16.msrb.mxu3 %v10516_v27 }
 0x333   :  { %6373 = vmatpush.bf16.msrb.mxu0 %v10491_v41 }
 0x334   :  { %6386 = vmatpush.bf16.msrb.mxu1 %v10499_v42  ;;  %v5888_v43 = vpop.f32.mrf.mxu3 }
 0x335   :  { %6399 = vmatpush.bf16.msrb.mxu2 %v10507_v50  ;;  %v5889_v55 = vadd.f32 %v5888_v43, %v5876_v36 }
 0x336   :  { %6412 = vmatpush.bf16.msrb.mxu3 %v10515_v30 }
 0x337   :  { %6374 = vmatpush.bf16.msrb.mxu0 %v10490_v51 }
 0x338   :  { %6387 = vmatpush.bf16.msrb.mxu1 %v10498_v16 }
 0x339   :  { %6400 = vmatpush.bf16.msrb.mxu2 %v10506_v52 }
 0x33a   :  { %6413 = vmatpush.bf16.msrb.mxu3 %v10514_v23 }
 0x33b   :  { %6375 = vmatpush.bf16.msrb.mxu0 %v10489_v17  ;;  %v5901_v19 = vpop.f32.mrf.mxu0 }
 0x33c   :  { %6388 = vmatpush.bf16.msrb.mxu1 %v10497_v12  ;;  %v5902_v8 = vadd.f32 %v5901_v19, %v5889_v55  ;;  %v5914_v56 = vpop.f32.mrf.mxu1  ;;  %v5890_v47 = vpop.f32.mrf.mxu3 }
 0x33d   :  { %6401 = vmatpush.bf16.msrb.mxu2 %v10505_v15 }
 0x33e   :  { %6376 = vmatmul.bf16.vlgmr.msrb.gmra.mxu0 %v6104_v49  ;;  %v5915_v13 = vadd.f32 %v5914_v56, %v5902_v8  ;;  %6414 = vmatpush.bf16.msrb.mxu3 %v10513_v33  ;;  %v10522_v49 = vld [vmem:[%s15622_s4] ss:$0 sm:$0xff] }
 0x33f   :  { %6389 = vmatmul.bf16.vlgmr.msrb.gmra.mxu1 %v6105_v14 }
 0x340   :  { %6402 = vmatmul.bf16.vlgmr.msrb.gmra.mxu2 %v6106_v18 }
 0x343   :  { %v5927_v4 = vpop.f32.mrf.mxu2  ;;  %v5903_v46 = vpop.f32.mrf.mxu0 }
 0x344   :  { %v5928_v57 = vadd.f32 %v5927_v4, %v5915_v13  ;;  %v5916_v48 = vpop.f32.mrf.mxu1 }
 0x34b   :  { %v5929_v54 = vpop.f32.mrf.mxu2 }
 0x354   :  { %v5940_v9 = vpop.f32.mrf.mxu3 }
 0x355   :  { %v5941_v7 = vadd.f32 %v5940_v9, %v5928_v57 }
 0x35b   :  { %v5953_v59 = vpop.f32.mrf.mxu0 }
 0x35c   :  { %v5966_v61 = vpop.f32.mrf.mxu1  ;;  %v5942_v22 = vpop.f32.mrf.mxu3  ;;  %v5954_v1 = vadd.f32 %v5953_v59, %v5941_v7 }
 0x35e   :  { %v5967_v2 = vadd.f32 %v5966_v61, %v5954_v1 }
 0x363   :  { %v5979_v26 = vpop.f32.mrf.mxu2  ;;  %v5955_v63 = vpop.f32.mrf.mxu0 }
 0x364   :  { %v5968_v3 = vpop.f32.mrf.mxu1  ;;  %v5980_v37 = vadd.f32 %v5979_v26, %v5967_v2 }
 0x36b   :  { %v5981_v32 = vpop.f32.mrf.mxu2 }
 0x374   :  { %v5992_v25 = vpop.f32.mrf.mxu3 }
 0x375   :  { %v5993_v44 = vadd.f32 %v5992_v25, %v5980_v37 }
 0x37b   :  { %v6005_v28 = vpop.f32.mrf.mxu0 }
 0x37c   :  { %v6018_v35 = vpop.f32.mrf.mxu1  ;;  %v5994_v29 = vpop.f32.mrf.mxu3  ;;  %v6006_v38 = vadd.f32 %v6005_v28, %v5993_v44 }
 0x37e   :  { %v6019_v39 = vadd.f32 %v6018_v35, %v6006_v38 }
 0x383   :  { %v6031_v0 = vpop.f32.mrf.mxu2  ;;  %v6007_v5 = vpop.f32.mrf.mxu0 }
 0x384   :  { %v6020_v6 = vpop.f32.mrf.mxu1  ;;  %v6032_v40 = vadd.f32 %v6031_v0, %v6019_v39 }
 0x38b   :  { %v6033_v31 = vpop.f32.mrf.mxu2 }
 0x394   :  { %v6044_v60 = vpop.f32.mrf.mxu3 }
 0x395   :  { %v6045_v36 = vadd.f32 %v6044_v60, %v6032_v40 }
 0x39b   :  { %v6057_v58 = vpop.f32.mrf.mxu0 }
 0x39c   :  { %v6070_v41 = vpop.f32.mrf.mxu1  ;;  %v6046_v42 = vpop.f32.mrf.mxu3  ;;  %v6058_v34 = vadd.f32 %v6057_v58, %v6045_v36 }
 0x39e   :  { %v6071_v50 = vadd.f32 %v6070_v41, %v6058_v34 }
 0x3a3   :  { %v6083_v51 = vpop.f32.mrf.mxu2  ;;  %v6059_v52 = vpop.f32.mrf.mxu0 }
 0x3a4   :  { %v6084_v16 = vadd.f32 %v6083_v51, %v6071_v50  ;;  %v6072_v11 = vpop.f32.mrf.mxu1  ;;  %v6096_v17 = vpop.f32.mrf.mxu3 }
 0x3a6   :  { %v6097_v12 = vadd.f32 %v6096_v17, %v6084_v16 }
 0x3a8   :  { %v6103_v45 = vmax.f32 %v6097_v12, 0.0 }
 0x3aa   :  { %v6107_v53 = vpack.c.bf16 %v6103_v45, %v6103_v45 }
 0x3ab   :  { %v6085_v15 = vpop.f32.mrf.mxu2 }
 0x3ac   :  { %6415 = vmatmul.bf16.vlgmr.msrb.gmra.mxu3 %v6107_v53  ;;  %v6098_v21 = vpop.f32.mrf.mxu3 }
 0x3bb   :  { %v6377_v14 = vpop.f32.mrf.mxu0 }
 0x3bc   :  { %v6390_v18 = vpop.f32.mrf.mxu1  ;;  %v6378_v43 = vadd.f32 %v10522_v49, %v6377_v14 }
 0x3be   :  { %v6391_v55 = vadd.f32 %v6390_v18, %v6378_v43 }
 0x3c3   :  { %v6403_v19 = vpop.f32.mrf.mxu2  ;;  %v6379_v56 = vpop.f32.mrf.mxu0 }
 0x3c4   :  { %v6404_v8 = vadd.f32 %v6403_v19, %v6391_v55  ;;  %v6392_v47 = vpop.f32.mrf.mxu1 }
 0x3cb   :  { %v6405_v13 = vpop.f32.mrf.mxu2 }
 0x42f   :  { %v6416_v4 = vpop.f32.mrf.mxu3 }
 0x430   :  { %v6417_v57 = vadd.f32 %v6416_v4, %v6404_v8 }
 0x432   :  { %6420 = vst [vmem:[#allocation2] sm:$0x3] %v6417_v57 }
 0x433   :  { %6431 = dma.vmem_to_hbm [thread:$0]  %s6427_s6, 32, %s6429_s9, [#allocation3]  }
 0x437   :  { %v6418_v46 = vpop.f32.mrf.mxu3 }
 0x438   :  { %10553 = dma.done.wait [#allocation3], 32  }
 0x439   :  { %10554 = vsyncadd [#allocation3], 4294967264 }
 0x43a   :  { %6436 = vsyncpa [#allocation3], 1 }

</bundles_post_ra>
